<compile_context>
chip_gen: v7x
topology: tpu7x:2x2x1
jax: 0.10.0
libtpu: 0.0.40
codegen_flags: <defaults>
</compile_context>

<pallas_src>
import functools

import jax
import jax.numpy as jnp
from jax import lax
from jax.experimental import pallas as pl
from jax.experimental.pallas import tpu as pltpu


def _mbox_kernel(tgt_ref, pc_ref, loc_ref, conf_ref,
                 loss_l_ref, loss_c_ref, npos_ref,
                 *, threshold, negpos_ratio, inv_var1, num_real_priors,
                 use_bf16_exp):
    tgt = tgt_ref[...]      # [Bblk, T, 6, 128]  (x1,y1,x2,y2,label,valid) * lanes
    pc = pc_ref[...]        # [11, Pb, 128]      prior-derived constants
    loc = loc_ref[...]      # [Bblk, 4, Pb, 128] predicted loc offsets
    conf = conf_ref[...]    # [Bblk, C, Pb, 128] class logits

    Bblk, T = tgt.shape[0], tgt.shape[1]
    C = conf.shape[1]
    Pb, L = pc.shape[1], pc.shape[2]

    px1, py1, px2, py2 = pc[0], pc[1], pc[2], pc[3]           # [Pb,128]
    area_p, cx, cy = pc[4], pc[5], pc[6]
    inv_v0w, inv_v0h, inv_w, inv_h = pc[7], pc[8], pc[9], pc[10]

    # flat prior index / validity mask on the dense tile grid
    pidx = (lax.broadcasted_iota(jnp.int32, (Pb, L), 0) * L
            + lax.broadcasted_iota(jnp.int32, (Pb, L), 1))    # [Pb,128]
    valid_p = pidx < num_real_priors
    BIGP = jnp.int32(Pb * L)

    def tfield(f, t):
        # [Bblk, 1, 128]: broadcast of targets[b, t, f] across the lane axis
        return tgt[:, t, f:f + 1, :]

    # ---- pass 1: best truth per prior (plain max) + best prior per truth ----
    bt_ov = jnp.full((Bblk, Pb, L), -1.0, jnp.float32)
    bt_idx = jnp.zeros((Bblk, Pb, L), jnp.int32)
    bp_idx_list = []
    valid_t_list = []
    for t in range(T):
        tx1, ty1 = tfield(0, t), tfield(1, t)
        tx2, ty2 = tfield(2, t), tfield(3, t)
        v_t = tfield(5, t) > 0.5                               # [Bblk,1,128]
        iw = jnp.maximum(jnp.minimum(tx2, px2) - jnp.maximum(tx1, px1), 0.0)
        ih = jnp.maximum(jnp.minimum(ty2, py2) - jnp.maximum(ty1, py1), 0.0)
        inter = iw * ih
        area_t = (tx2 - tx1) * (ty2 - ty1)
        ov = inter / (area_t + area_p - inter)                 # exact division
        ov = jnp.where(jnp.logical_and(v_t, valid_p), ov, -1.0)  # [Bblk,Pb,128]

        better = ov > bt_ov                  # strict > keeps first t on ties
        bt_ov = jnp.where(better, ov, bt_ov)
        bt_idx = jnp.where(better, t, bt_idx)

        bp_ov_t = jnp.max(jnp.max(ov, axis=2, keepdims=True),
                          axis=1, keepdims=True)               # [Bblk,1,1]
        cand = jnp.where(ov == bp_ov_t, pidx, BIGP)
        bp_idx_t = jnp.min(jnp.min(cand, axis=2, keepdims=True),
                           axis=1, keepdims=True)              # [Bblk,1,1]
        bp_idx_list.append(bp_idx_t)
        valid_t_list.append(v_t)

    # ---- pass 2: every valid truth keeps its best prior (last t wins) ----
    for t in range(T):
        eq = jnp.logical_and(pidx == bp_idx_list[t], valid_t_list[t])
        bt_ov = jnp.where(eq, 2.0, bt_ov)
        bt_idx = jnp.where(eq, t, bt_idx)

    # ---- pass 3: gather matched gt per prior (elementwise select over T) ----
    mx1 = jnp.zeros((Bblk, Pb, L), jnp.float32)
    my1 = jnp.zeros_like(mx1)
    mx2 = jnp.zeros_like(mx1)
    my2 = jnp.zeros_like(mx1)
    mlab = jnp.zeros_like(mx1)
    for t in range(T):
        sel = bt_idx == t
        mx1 = jnp.where(sel, tfield(0, t), mx1)
        my1 = jnp.where(sel, tfield(1, t), my1)
        mx2 = jnp.where(sel, tfield(2, t), mx2)
        my2 = jnp.where(sel, tfield(3, t), my2)
        mlab = jnp.where(sel, tfield(4, t), mlab)

    conf_tgt = jnp.where(bt_ov < threshold, 0,
                         (mlab + 1.0).astype(jnp.int32))       # [Bblk,Pb,128]
    pos = conf_tgt > 0
    posi = pos.astype(jnp.int32)
    num_pos = jnp.sum(jnp.sum(posi, axis=2, keepdims=True),
                      axis=1, keepdims=True)                   # [Bblk,1,1]

    # ---- localization loss: SSD encode (variances) + smooth-L1 ----
    g_cx = ((mx1 + mx2) * 0.5 - cx) * inv_v0w
    g_cy = ((my1 + my2) * 0.5 - cy) * inv_v0h
    g_w = jnp.log(jnp.maximum((mx2 - mx1) * inv_w, 1e-12)) * inv_var1
    g_h = jnp.log(jnp.maximum((my2 - my1) * inv_h, 1e-12)) * inv_var1

    def sl1(d):
        a = jnp.abs(d)
        return jnp.where(a < 1.0, 0.5 * a * a, a - 0.5)

    l_elem = (sl1(loc[:, 0] - g_cx) + sl1(loc[:, 1] - g_cy)
              + sl1(loc[:, 2] - g_w) + sl1(loc[:, 3] - g_h))
    loss_l = jnp.sum(jnp.where(pos, l_elem, 0.0))

    # ---- per-prior cross-entropy: logsumexp(x) - x[class] ----
    xmax = conf[:, 0]
    for c in range(1, C):
        xmax = jnp.maximum(xmax, conf[:, c])
    ssum = jnp.zeros_like(xmax)
    for c in range(C):
        d = conf[:, c] - xmax
        if use_bf16_exp:   # optional (v6e/v7x) -- changes loss at bf16 precision
            ssum = ssum + jnp.exp(d.astype(jnp.bfloat16)).astype(jnp.float32)
        else:
            ssum = ssum + jnp.exp(d)
    lse = jnp.log(ssum) + xmax
    gt_logit = conf[:, 0]
    for c in range(1, C):
        gt_logit = jnp.where(conf_tgt == c, conf[:, c], gt_logit)
    loss_c_all = lse - gt_logit                                # [Bblk,Pb,128] >= 0

    # ---- hard negative mining ----
    # Exact num_neg-th largest mining loss per image via a radix-4 descent over
    # the int32 bit patterns of the non-negative losses (order preserving):
    # 16 serial rounds / 46 compares, shared across all Bblk images.
    # TODO(synk): torch.sort's exact tie ordering is not reproduced -- all
    # priors tying with the k-th loss value are selected.
    mined = jnp.where(jnp.logical_or(pos, jnp.logical_not(valid_p)),
                      0.0, loss_c_all)
    mined = jnp.maximum(mined, 0.0)
    mined_bits = pltpu.bitcast(mined, jnp.int32)               # [Bblk,Pb,128]
    num_neg = jnp.minimum(negpos_ratio * num_pos, num_real_priors - 1)

    def count_ge(thr):                                         # thr: [Bblk,1,1]
        ge = (mined_bits >= thr).astype(jnp.int32)
        return jnp.sum(jnp.sum(ge, axis=2, keepdims=True),
                       axis=1, keepdims=True)                  # [Bblk,1,1]

    kth = jnp.zeros((Bblk, 1, 1), jnp.int32)
    groups = [(30, 1)] + [(s, 3) for s in range(28, -1, -2)]   # bits 30..0
    for shift, ncand in groups:
        dgt = jnp.zeros((Bblk, 1, 1), jnp.int32)
        for j in range(1, ncand + 1):      # candidates independent -> overlap
            cnt = count_ge(kth + (j << shift))
            dgt = dgt + (cnt >= num_neg).astype(jnp.int32)
        kth = kth + dgt * (1 << shift)

    neg = jnp.logical_and(mined_bits >= kth,
                          jnp.logical_and(num_neg > 0, valid_p))
    sel = jnp.logical_or(pos, neg)
    loss_c = jnp.sum(jnp.where(sel, loss_c_all, 0.0))

    loss_l_ref[0, 0] = loss_l
    loss_c_ref[0, 0] = loss_c
    npos_ref[0, 0] = jnp.sum(num_pos)


class MultiBoxLoss:
    """JAX/Pallas port of the SSD MultiBoxLoss forward pass."""

    def __init__(self, num_classes, overlap_thresh, prior_for_matching, bkg_label,
                 neg_mining, neg_pos, neg_overlap, encode_target,
                 images_per_step=4, use_bf16_exp=False):
        self.num_classes = num_classes
        self.threshold = overlap_thresh
        self.background_label = bkg_label
        self.encode_target = encode_target
        self.use_prior_for_matching = prior_for_matching
        self.do_neg_mining = neg_mining
        self.negpos_ratio = neg_pos
        self.neg_overlap = neg_overlap
        self.variance = (0.1, 0.2)
        self.images_per_step = int(images_per_step)
        self.use_bf16_exp = bool(use_bf16_exp)

    def __call__(self, predictions, priors, targets, num_objs=None):
        loc_data, conf_data = predictions          # [B,P,4], [B,P,C]
        B, P, _ = loc_data.shape
        C = self.num_classes
        T = targets.shape[1]
        var0, var1 = self.variance

        # prior axis padded to a multiple of 1024 -> dense (Pb, 128) tiles
        P_pad = ((P + 1023) // 1024) * 1024
        Pb = P_pad // 128

        # images per grid step: largest divisor of B not exceeding the request
        bblk = 1
        for d in range(1, min(self.images_per_step, B) + 1):
            if B % d == 0:
                bblk = d
        G = B // bblk

        # ---- layout glue ----
        loc_t = jnp.transpose(loc_data.astype(jnp.float32), (0, 2, 1))   # [B,4,P]
        conf_t = jnp.transpose(conf_data.astype(jnp.float32), (0, 2, 1)) # [B,C,P]
        if P_pad != P:
            pad = P_pad - P
            loc_t = jnp.pad(loc_t, ((0, 0), (0, 0), (0, pad)))
            conf_t = jnp.pad(conf_t, ((0, 0), (0, 0), (0, pad)))
        loc_t = loc_t.reshape(B, 4, Pb, 128)
        conf_t = conf_t.reshape(B, C, Pb, 128)

        # prior-derived constants, [11, Pb, 128], shared by every grid step
        pri = priors.astype(jnp.float32)
        cx, cy, w, h = pri[:, 0], pri[:, 1], pri[:, 2], pri[:, 3]
        if P_pad != P:
            pad = P_pad - P
            cx = jnp.concatenate([cx, jnp.full((pad,), 2.0, jnp.float32)])
            cy = jnp.concatenate([cy, jnp.full((pad,), 2.0, jnp.float32)])
            w = jnp.concatenate([w, jnp.ones((pad,), jnp.float32)])
            h = jnp.concatenate([h, jnp.ones((pad,), jnp.float32)])
        px1 = cx - 0.5 * w
        py1 = cy - 0.5 * h
        px2 = cx + 0.5 * w
        py2 = cy + 0.5 * h
        pconst = jnp.stack(
            [px1, py1, px2, py2, w * h, cx, cy,
             1.0 / (var0 * w), 1.0 / (var0 * h), 1.0 / w, 1.0 / h],
            axis=0).reshape(11, Pb, 128)

        # gt fields (+ validity flag) broadcast on the lane axis: [B, T, 6, 128]
        tgt = targets.astype(jnp.float32)
        if num_objs is None:
            num_objs = jnp.full((B,), T, dtype=jnp.int32)
        else:
            num_objs = jnp.asarray(num_objs, dtype=jnp.int32)
        t_ar = jnp.arange(T, dtype=jnp.int32)
        valid_t = (t_ar[None, :] < num_objs[:, None]).astype(jnp.float32)  # [B,T]
        fields = jnp.concatenate([tgt, valid_t[..., None]], axis=-1)       # [B,T,6]
        tgtb = jnp.broadcast_to(fields[..., None], (B, T, 6, 128))

        kernel = functools.partial(
            _mbox_kernel,
            threshold=float(self.threshold),
            negpos_ratio=int(self.negpos_ratio),
            inv_var1=float(1.0 / var1),
            num_real_priors=int(P),
            use_bf16_exp=self.use_bf16_exp,
        )

        grid_spec = pltpu.PrefetchScalarGridSpec(
            num_scalar_prefetch=0,
            grid=(G,),
            in_specs=[
                pl.BlockSpec((bblk, T, 6, 128), lambda g: (g, 0, 0, 0)),
                pl.BlockSpec((11, Pb, 128), lambda g: (0, 0, 0)),
                pl.BlockSpec((bblk, 4, Pb, 128), lambda g: (g, 0, 0, 0)),
                pl.BlockSpec((bblk, C, Pb, 128), lambda g: (g, 0, 0, 0)),
            ],
            out_specs=[
                pl.BlockSpec((1, 1), lambda g: (g, 0),
                             memory_space=pltpu.MemorySpace.SMEM),
                pl.BlockSpec((1, 1), lambda g: (g, 0),
                             memory_space=pltpu.MemorySpace.SMEM),
                pl.BlockSpec((1, 1), lambda g: (g, 0),
                             memory_space=pltpu.MemorySpace.SMEM),
            ],
        )

        # scoped-VMEM sizing (only raised when the blocks actually need it;
        # capped at 64 MiB so v7x's physical VMEM is never exceeded)
        blk_bytes = 4 * (bblk * T * 6 * 128 + 11 * Pb * 128
                         + bblk * 4 * Pb * 128 + bblk * C * Pb * 128)
        vmem_need = 2 * blk_bytes + 24 * bblk * Pb * 128 * 4 + (2 << 20)
        cp_kwargs = dict(dimension_semantics=("parallel",))
        if vmem_need > (32 << 20):
            cp_kwargs["vmem_limit_bytes"] = int(min(vmem_need, 64 << 20))

        loss_l_per, loss_c_per, npos_per = pl.pallas_call(
            kernel,
            out_shape=(
                jax.ShapeDtypeStruct((G, 1), jnp.float32),
                jax.ShapeDtypeStruct((G, 1), jnp.float32),
                jax.ShapeDtypeStruct((G, 1), jnp.int32),
            ),
            grid_spec=grid_spec,
            compiler_params=pltpu.CompilerParams(**cp_kwargs),
        )(tgtb, pconst, loc_t, conf_t)

        N = jnp.maximum(jnp.sum(npos_per).astype(jnp.float32), 1.0)
        loss_l = jnp.sum(loss_l_per) / N
        loss_c = jnp.sum(loss_c_per) / N
        return loss_l, loss_c


if __name__ == "__main__":
    key = jax.random.PRNGKey(0)
    B, P, C, T = 2, 128, 8, 4      # batch, num_priors, num_classes, num_objs

    k1, k2, k3, k4, k5 = jax.random.split(key, 5)

    # network predictions
    loc_data = 0.1 * jax.random.normal(k1, (B, P, 4), jnp.float32)
    conf_data = jax.random.normal(k2, (B, P, C), jnp.float32)

    # deterministic prior boxes: 16 x 8 grid of 0.25 x 0.25 boxes (cx, cy, w, h)
    idx = jnp.arange(P)
    priors = jnp.stack(
        [(idx % 16 + 0.5) / 16.0,
         (idx // 16 + 0.5) / 8.0,
         jnp.full((P,), 0.25),
         jnp.full((P,), 0.25)], axis=1).astype(jnp.float32)

    # ground-truth targets: [B, T, 5] = (x1, y1, x2, y2, label)
    cxy = jax.random.uniform(k3, (B, T, 2), minval=0.25, maxval=0.75)
    wh = jax.random.uniform(k4, (B, T, 2), minval=0.1, maxval=0.4)
    labels = jax.random.randint(k5, (B, T, 1), 0, C - 1).astype(jnp.float32)
    targets = jnp.concatenate([cxy - wh / 2, cxy + wh / 2, labels], axis=-1)

    criterion = MultiBoxLoss(num_classes=C, overlap_thresh=0.5,
                             prior_for_matching=True, bkg_label=0,
                             neg_mining=True, neg_pos=3, neg_overlap=0.5,
                             encode_target=False)

    loss_l, loss_c = criterion((loc_data, conf_data), priors, targets)
    jax.block_until_ready((loss_l, loss_c))
    assert bool(jnp.isfinite(loss_l)) and bool(jnp.isfinite(loss_c))
    print("KERNEL_OK")
</pallas_src>

<mosaic_0001>
module attributes {stable_mosaic.version = 11 : i64} {
  func.func @_mbox_kernel(%arg0: i32, %arg1: memref<2x4x6x128xf32, #tpu.memory_space<vmem>>, %arg2: memref<11x8x128xf32, #tpu.memory_space<vmem>>, %arg3: memref<2x4x8x128xf32, #tpu.memory_space<vmem>>, %arg4: memref<2x8x8x128xf32, #tpu.memory_space<vmem>>, %arg5: memref<1x1xf32, #tpu.memory_space<smem>>, %arg6: memref<1x1xf32, #tpu.memory_space<smem>>, %arg7: memref<1x1xi32, #tpu.memory_space<smem>>) attributes {dimension_semantics = [#tpu.dimension_semantics<parallel>], iteration_bounds = array<i64: 1>, scalar_prefetch = 0 : i64, scratch_operands = 0 : i64, tpu.core_type = #tpu.core_type<tc>, window_params = [{transform_indices = @transform_0, window_bounds = array<i64: 2, 4, 6, 128>}, {pipeline_mode = #tpu.pipeline_mode<synchronous>, transform_indices = @transform_1, window_bounds = array<i64: 11, 8, 128>}, {transform_indices = @transform_2, window_bounds = array<i64: 2, 4, 8, 128>}, {transform_indices = @transform_3, window_bounds = array<i64: 2, 8, 8, 128>}, {transform_indices = @transform_4, window_bounds = array<i64: 1, 1>}, {transform_indices = @transform_5, window_bounds = array<i64: 1, 1>}, {transform_indices = @transform_6, window_bounds = array<i64: 1, 1>}]} {
    %c0 = arith.constant 0 : index
    %c0_0 = arith.constant 0 : index
    %c0_1 = arith.constant 0 : index
    %c0_2 = arith.constant 0 : index
    %0 = vector.load %arg1[%c0, %c0_0, %c0_1, %c0_2] : memref<2x4x6x128xf32, #tpu.memory_space<vmem>>, vector<2x4x6x128xf32>
    %c0_3 = arith.constant 0 : index
    %c0_4 = arith.constant 0 : index
    %c0_5 = arith.constant 0 : index
    %1 = vector.load %arg2[%c0_3, %c0_4, %c0_5] : memref<11x8x128xf32, #tpu.memory_space<vmem>>, vector<11x8x128xf32>
    %c0_6 = arith.constant 0 : index
    %c0_7 = arith.constant 0 : index
    %c0_8 = arith.constant 0 : index
    %c0_9 = arith.constant 0 : index
    %2 = vector.load %arg3[%c0_6, %c0_7, %c0_8, %c0_9] : memref<2x4x8x128xf32, #tpu.memory_space<vmem>>, vector<2x4x8x128xf32>
    %c0_10 = arith.constant 0 : index
    %c0_11 = arith.constant 0 : index
    %c0_12 = arith.constant 0 : index
    %c0_13 = arith.constant 0 : index
    %3 = vector.load %arg4[%c0_10, %c0_11, %c0_12, %c0_13] : memref<2x8x8x128xf32, #tpu.memory_space<vmem>>, vector<2x8x8x128xf32>
    %4 = vector.extract_strided_slice %1 {offsets = [0, 0, 0], sizes = [1, 8, 128], strides = [1, 1, 1]} : vector<11x8x128xf32> to vector<1x8x128xf32>
    %5 = vector.shape_cast %4 : vector<1x8x128xf32> to vector<8x128xf32>
    %6 = vector.extract_strided_slice %1 {offsets = [1, 0, 0], sizes = [1, 8, 128], strides = [1, 1, 1]} : vector<11x8x128xf32> to vector<1x8x128xf32>
    %7 = vector.shape_cast %6 : vector<1x8x128xf32> to vector<8x128xf32>
    %8 = vector.extract_strided_slice %1 {offsets = [2, 0, 0], sizes = [1, 8, 128], strides = [1, 1, 1]} : vector<11x8x128xf32> to vector<1x8x128xf32>
    %9 = vector.shape_cast %8 : vector<1x8x128xf32> to vector<8x128xf32>
    %10 = vector.extract_strided_slice %1 {offsets = [3, 0, 0], sizes = [1, 8, 128], strides = [1, 1, 1]} : vector<11x8x128xf32> to vector<1x8x128xf32>
    %11 = vector.shape_cast %10 : vector<1x8x128xf32> to vector<8x128xf32>
    %12 = vector.extract_strided_slice %1 {offsets = [4, 0, 0], sizes = [1, 8, 128], strides = [1, 1, 1]} : vector<11x8x128xf32> to vector<1x8x128xf32>
    %13 = vector.shape_cast %12 : vector<1x8x128xf32> to vector<8x128xf32>
    %14 = vector.extract_strided_slice %1 {offsets = [5, 0, 0], sizes = [1, 8, 128], strides = [1, 1, 1]} : vector<11x8x128xf32> to vector<1x8x128xf32>
    %15 = vector.shape_cast %14 : vector<1x8x128xf32> to vector<8x128xf32>
    %16 = vector.extract_strided_slice %1 {offsets = [6, 0, 0], sizes = [1, 8, 128], strides = [1, 1, 1]} : vector<11x8x128xf32> to vector<1x8x128xf32>
    %17 = vector.shape_cast %16 : vector<1x8x128xf32> to vector<8x128xf32>
    %18 = vector.extract_strided_slice %1 {offsets = [7, 0, 0], sizes = [1, 8, 128], strides = [1, 1, 1]} : vector<11x8x128xf32> to vector<1x8x128xf32>
    %19 = vector.shape_cast %18 : vector<1x8x128xf32> to vector<8x128xf32>
    %20 = vector.extract_strided_slice %1 {offsets = [8, 0, 0], sizes = [1, 8, 128], strides = [1, 1, 1]} : vector<11x8x128xf32> to vector<1x8x128xf32>
    %21 = vector.shape_cast %20 : vector<1x8x128xf32> to vector<8x128xf32>
    %22 = vector.extract_strided_slice %1 {offsets = [9, 0, 0], sizes = [1, 8, 128], strides = [1, 1, 1]} : vector<11x8x128xf32> to vector<1x8x128xf32>
    %23 = vector.shape_cast %22 : vector<1x8x128xf32> to vector<8x128xf32>
    %24 = vector.extract_strided_slice %1 {offsets = [10, 0, 0], sizes = [1, 8, 128], strides = [1, 1, 1]} : vector<11x8x128xf32> to vector<1x8x128xf32>
    %25 = vector.shape_cast %24 : vector<1x8x128xf32> to vector<8x128xf32>
    %26 = tpu.iota {dimensions = array<i32: 0>} : vector<8x128xi32>
    %c128_i32 = arith.constant 128 : i32
    %27 = vector.broadcast %c128_i32 : i32 to vector<8x128xi32>
    %28 = arith.muli %26, %27 : vector<8x128xi32>
    %29 = tpu.iota {dimensions = array<i32: 1>} : vector<8x128xi32>
    %30 = arith.addi %28, %29 : vector<8x128xi32>
    %c128_i32_14 = arith.constant 128 : i32
    %31 = vector.broadcast %c128_i32_14 : i32 to vector<8x128xi32>
    %32 = arith.cmpi slt, %30, %31 : vector<8x128xi32>
    %cst = arith.constant -1.000000e+00 : f32
    %33 = vector.broadcast %cst : f32 to vector<2x8x128xf32>
    %c0_i32 = arith.constant 0 : i32
    %34 = vector.broadcast %c0_i32 : i32 to vector<2x8x128xi32>
    %35 = vector.extract_strided_slice %0 {offsets = [0, 0, 0, 0], sizes = [2, 1, 1, 128], strides = [1, 1, 1, 1]} : vector<2x4x6x128xf32> to vector<2x1x1x128xf32>
    %36 = vector.shape_cast %35 : vector<2x1x1x128xf32> to vector<2x1x128xf32>
    %37 = vector.extract_strided_slice %0 {offsets = [0, 0, 1, 0], sizes = [2, 1, 1, 128], strides = [1, 1, 1, 1]} : vector<2x4x6x128xf32> to vector<2x1x1x128xf32>
    %38 = vector.shape_cast %37 : vector<2x1x1x128xf32> to vector<2x1x128xf32>
    %39 = vector.extract_strided_slice %0 {offsets = [0, 0, 2, 0], sizes = [2, 1, 1, 128], strides = [1, 1, 1, 1]} : vector<2x4x6x128xf32> to vector<2x1x1x128xf32>
    %40 = vector.shape_cast %39 : vector<2x1x1x128xf32> to vector<2x1x128xf32>
    %41 = vector.extract_strided_slice %0 {offsets = [0, 0, 3, 0], sizes = [2, 1, 1, 128], strides = [1, 1, 1, 1]} : vector<2x4x6x128xf32> to vector<2x1x1x128xf32>
    %42 = vector.shape_cast %41 : vector<2x1x1x128xf32> to vector<2x1x128xf32>
    %43 = vector.extract_strided_slice %0 {offsets = [0, 0, 5, 0], sizes = [2, 1, 1, 128], strides = [1, 1, 1, 1]} : vector<2x4x6x128xf32> to vector<2x1x1x128xf32>
    %44 = vector.shape_cast %43 : vector<2x1x1x128xf32> to vector<2x1x128xf32>
    %cst_15 = arith.constant 5.000000e-01 : f32
    %45 = vector.broadcast %cst_15 : f32 to vector<2x1x128xf32>
    %46 = arith.cmpf ogt, %44, %45 : vector<2x1x128xf32>
    %47 = vector.shape_cast %9 : vector<8x128xf32> to vector<1x8x128xf32>
    %48 = vector.broadcast %40 : vector<2x1x128xf32> to vector<2x8x128xf32>
    %49 = vector.broadcast %47 : vector<1x8x128xf32> to vector<2x8x128xf32>
    %50 = arith.minimumf %48, %49 : vector<2x8x128xf32>
    %51 = vector.shape_cast %5 : vector<8x128xf32> to vector<1x8x128xf32>
    %52 = vector.broadcast %36 : vector<2x1x128xf32> to vector<2x8x128xf32>
    %53 = vector.broadcast %51 : vector<1x8x128xf32> to vector<2x8x128xf32>
    %54 = arith.maximumf %52, %53 : vector<2x8x128xf32>
    %55 = arith.subf %50, %54 : vector<2x8x128xf32>
    %cst_16 = arith.constant 0.000000e+00 : f32
    %56 = vector.broadcast %cst_16 : f32 to vector<2x8x128xf32>
    %57 = arith.maximumf %55, %56 : vector<2x8x128xf32>
    %58 = vector.shape_cast %11 : vector<8x128xf32> to vector<1x8x128xf32>
    %59 = vector.broadcast %42 : vector<2x1x128xf32> to vector<2x8x128xf32>
    %60 = vector.broadcast %58 : vector<1x8x128xf32> to vector<2x8x128xf32>
    %61 = arith.minimumf %59, %60 : vector<2x8x128xf32>
    %62 = vector.shape_cast %7 : vector<8x128xf32> to vector<1x8x128xf32>
    %63 = vector.broadcast %38 : vector<2x1x128xf32> to vector<2x8x128xf32>
    %64 = vector.broadcast %62 : vector<1x8x128xf32> to vector<2x8x128xf32>
    %65 = arith.maximumf %63, %64 : vector<2x8x128xf32>
    %66 = arith.subf %61, %65 : vector<2x8x128xf32>
    %cst_17 = arith.constant 0.000000e+00 : f32
    %67 = vector.broadcast %cst_17 : f32 to vector<2x8x128xf32>
    %68 = arith.maximumf %66, %67 : vector<2x8x128xf32>
    %69 = arith.mulf %57, %68 : vector<2x8x128xf32>
    %70 = arith.subf %40, %36 : vector<2x1x128xf32>
    %71 = arith.subf %42, %38 : vector<2x1x128xf32>
    %72 = arith.mulf %70, %71 : vector<2x1x128xf32>
    %73 = vector.shape_cast %13 : vector<8x128xf32> to vector<1x8x128xf32>
    %74 = vector.broadcast %72 : vector<2x1x128xf32> to vector<2x8x128xf32>
    %75 = vector.broadcast %73 : vector<1x8x128xf32> to vector<2x8x128xf32>
    %76 = arith.addf %74, %75 : vector<2x8x128xf32>
    %77 = arith.subf %76, %69 : vector<2x8x128xf32>
    %78 = arith.divf %69, %77 : vector<2x8x128xf32>
    %79 = vector.shape_cast %32 : vector<8x128xi1> to vector<1x8x128xi1>
    %80 = vector.broadcast %46 : vector<2x1x128xi1> to vector<2x8x128xi1>
    %81 = vector.broadcast %79 : vector<1x8x128xi1> to vector<2x8x128xi1>
    %82 = arith.andi %80, %81 : vector<2x8x128xi1>
    %cst_18 = arith.constant -1.000000e+00 : f32
    %83 = vector.broadcast %cst_18 : f32 to vector<2x8x128xf32>
    %84 = arith.select %82, %78, %83 : vector<2x8x128xi1>, vector<2x8x128xf32>
    %85 = arith.cmpf ogt, %84, %33 : vector<2x8x128xf32>
    %86 = arith.select %85, %84, %33 : vector<2x8x128xi1>, vector<2x8x128xf32>
    %c0_i32_19 = arith.constant 0 : i32
    %87 = vector.broadcast %c0_i32_19 : i32 to vector<2x8x128xi32>
    %88 = arith.select %85, %87, %34 : vector<2x8x128xi1>, vector<2x8x128xi32>
    %cst_20 = arith.constant dense<0xFF800000> : vector<2x8xf32>
    %89 = vector.multi_reduction <maximumf>, %84, %cst_20 [2] : vector<2x8x128xf32> to vector<2x8xf32>
    %90 = vector.shape_cast %89 : vector<2x8xf32> to vector<2x8x1xf32>
    %cst_21 = arith.constant dense<0xFF800000> : vector<2x1xf32>
    %91 = vector.multi_reduction <maximumf>, %90, %cst_21 [1] : vector<2x8x1xf32> to vector<2x1xf32>
    %92 = vector.shape_cast %91 : vector<2x1xf32> to vector<2x1x1xf32>
    %93 = vector.broadcast %92 : vector<2x1x1xf32> to vector<2x8x128xf32>
    %94 = arith.cmpf oeq, %84, %93 : vector<2x8x128xf32>
    %c1024_i32 = arith.constant 1024 : i32
    %95 = vector.shape_cast %30 : vector<8x128xi32> to vector<1x8x128xi32>
    %96 = vector.broadcast %95 : vector<1x8x128xi32> to vector<2x8x128xi32>
    %97 = vector.broadcast %c1024_i32 : i32 to vector<2x8x128xi32>
    %98 = arith.select %94, %96, %97 : vector<2x8x128xi1>, vector<2x8x128xi32>
    %cst_22 = arith.constant dense<2147483647> : vector<2x8xi32>
    %99 = vector.multi_reduction <minsi>, %98, %cst_22 [2] : vector<2x8x128xi32> to vector<2x8xi32>
    %100 = vector.shape_cast %99 : vector<2x8xi32> to vector<2x8x1xi32>
    %cst_23 = arith.constant dense<2147483647> : vector<2x1xi32>
    %101 = vector.multi_reduction <minsi>, %100, %cst_23 [1] : vector<2x8x1xi32> to vector<2x1xi32>
    %102 = vector.shape_cast %101 : vector<2x1xi32> to vector<2x1x1xi32>
    %103 = vector.extract_strided_slice %0 {offsets = [0, 1, 0, 0], sizes = [2, 1, 1, 128], strides = [1, 1, 1, 1]} : vector<2x4x6x128xf32> to vector<2x1x1x128xf32>
    %104 = vector.shape_cast %103 : vector<2x1x1x128xf32> to vector<2x1x128xf32>
    %105 = vector.extract_strided_slice %0 {offsets = [0, 1, 1, 0], sizes = [2, 1, 1, 128], strides = [1, 1, 1, 1]} : vector<2x4x6x128xf32> to vector<2x1x1x128xf32>
    %106 = vector.shape_cast %105 : vector<2x1x1x128xf32> to vector<2x1x128xf32>
    %107 = vector.extract_strided_slice %0 {offsets = [0, 1, 2, 0], sizes = [2, 1, 1, 128], strides = [1, 1, 1, 1]} : vector<2x4x6x128xf32> to vector<2x1x1x128xf32>
    %108 = vector.shape_cast %107 : vector<2x1x1x128xf32> to vector<2x1x128xf32>
    %109 = vector.extract_strided_slice %0 {offsets = [0, 1, 3, 0], sizes = [2, 1, 1, 128], strides = [1, 1, 1, 1]} : vector<2x4x6x128xf32> to vector<2x1x1x128xf32>
    %110 = vector.shape_cast %109 : vector<2x1x1x128xf32> to vector<2x1x128xf32>
    %111 = vector.extract_strided_slice %0 {offsets = [0, 1, 5, 0], sizes = [2, 1, 1, 128], strides = [1, 1, 1, 1]} : vector<2x4x6x128xf32> to vector<2x1x1x128xf32>
    %112 = vector.shape_cast %111 : vector<2x1x1x128xf32> to vector<2x1x128xf32>
    %cst_24 = arith.constant 5.000000e-01 : f32
    %113 = vector.broadcast %cst_24 : f32 to vector<2x1x128xf32>
    %114 = arith.cmpf ogt, %112, %113 : vector<2x1x128xf32>
    %115 = vector.shape_cast %9 : vector<8x128xf32> to vector<1x8x128xf32>
    %116 = vector.broadcast %108 : vector<2x1x128xf32> to vector<2x8x128xf32>
    %117 = vector.broadcast %115 : vector<1x8x128xf32> to vector<2x8x128xf32>
    %118 = arith.minimumf %116, %117 : vector<2x8x128xf32>
    %119 = vector.shape_cast %5 : vector<8x128xf32> to vector<1x8x128xf32>
    %120 = vector.broadcast %104 : vector<2x1x128xf32> to vector<2x8x128xf32>
    %121 = vector.broadcast %119 : vector<1x8x128xf32> to vector<2x8x128xf32>
    %122 = arith.maximumf %120, %121 : vector<2x8x128xf32>
    %123 = arith.subf %118, %122 : vector<2x8x128xf32>
    %cst_25 = arith.constant 0.000000e+00 : f32
    %124 = vector.broadcast %cst_25 : f32 to vector<2x8x128xf32>
    %125 = arith.maximumf %123, %124 : vector<2x8x128xf32>
    %126 = vector.shape_cast %11 : vector<8x128xf32> to vector<1x8x128xf32>
    %127 = vector.broadcast %110 : vector<2x1x128xf32> to vector<2x8x128xf32>
    %128 = vector.broadcast %126 : vector<1x8x128xf32> to vector<2x8x128xf32>
    %129 = arith.minimumf %127, %128 : vector<2x8x128xf32>
    %130 = vector.shape_cast %7 : vector<8x128xf32> to vector<1x8x128xf32>
    %131 = vector.broadcast %106 : vector<2x1x128xf32> to vector<2x8x128xf32>
    %132 = vector.broadcast %130 : vector<1x8x128xf32> to vector<2x8x128xf32>
    %133 = arith.maximumf %131, %132 : vector<2x8x128xf32>
    %134 = arith.subf %129, %133 : vector<2x8x128xf32>
    %cst_26 = arith.constant 0.000000e+00 : f32
    %135 = vector.broadcast %cst_26 : f32 to vector<2x8x128xf32>
    %136 = arith.maximumf %134, %135 : vector<2x8x128xf32>
    %137 = arith.mulf %125, %136 : vector<2x8x128xf32>
    %138 = arith.subf %108, %104 : vector<2x1x128xf32>
    %139 = arith.subf %110, %106 : vector<2x1x128xf32>
    %140 = arith.mulf %138, %139 : vector<2x1x128xf32>
    %141 = vector.shape_cast %13 : vector<8x128xf32> to vector<1x8x128xf32>
    %142 = vector.broadcast %140 : vector<2x1x128xf32> to vector<2x8x128xf32>
    %143 = vector.broadcast %141 : vector<1x8x128xf32> to vector<2x8x128xf32>
    %144 = arith.addf %142, %143 : vector<2x8x128xf32>
    %145 = arith.subf %144, %137 : vector<2x8x128xf32>
    %146 = arith.divf %137, %145 : vector<2x8x128xf32>
    %147 = vector.shape_cast %32 : vector<8x128xi1> to vector<1x8x128xi1>
    %148 = vector.broadcast %114 : vector<2x1x128xi1> to vector<2x8x128xi1>
    %149 = vector.broadcast %147 : vector<1x8x128xi1> to vector<2x8x128xi1>
    %150 = arith.andi %148, %149 : vector<2x8x128xi1>
    %cst_27 = arith.constant -1.000000e+00 : f32
    %151 = vector.broadcast %cst_27 : f32 to vector<2x8x128xf32>
    %152 = arith.select %150, %146, %151 : vector<2x8x128xi1>, vector<2x8x128xf32>
    %153 = arith.cmpf ogt, %152, %86 : vector<2x8x128xf32>
    %154 = arith.select %153, %152, %86 : vector<2x8x128xi1>, vector<2x8x128xf32>
    %c1_i32 = arith.constant 1 : i32
    %155 = vector.broadcast %c1_i32 : i32 to vector<2x8x128xi32>
    %156 = arith.select %153, %155, %88 : vector<2x8x128xi1>, vector<2x8x128xi32>
    %cst_28 = arith.constant dense<0xFF800000> : vector<2x8xf32>
    %157 = vector.multi_reduction <maximumf>, %152, %cst_28 [2] : vector<2x8x128xf32> to vector<2x8xf32>
    %158 = vector.shape_cast %157 : vector<2x8xf32> to vector<2x8x1xf32>
    %cst_29 = arith.constant dense<0xFF800000> : vector<2x1xf32>
    %159 = vector.multi_reduction <maximumf>, %158, %cst_29 [1] : vector<2x8x1xf32> to vector<2x1xf32>
    %160 = vector.shape_cast %159 : vector<2x1xf32> to vector<2x1x1xf32>
    %161 = vector.broadcast %160 : vector<2x1x1xf32> to vector<2x8x128xf32>
    %162 = arith.cmpf oeq, %152, %161 : vector<2x8x128xf32>
    %c1024_i32_30 = arith.constant 1024 : i32
    %163 = vector.shape_cast %30 : vector<8x128xi32> to vector<1x8x128xi32>
    %164 = vector.broadcast %163 : vector<1x8x128xi32> to vector<2x8x128xi32>
    %165 = vector.broadcast %c1024_i32_30 : i32 to vector<2x8x128xi32>
    %166 = arith.select %162, %164, %165 : vector<2x8x128xi1>, vector<2x8x128xi32>
    %cst_31 = arith.constant dense<2147483647> : vector<2x8xi32>
    %167 = vector.multi_reduction <minsi>, %166, %cst_31 [2] : vector<2x8x128xi32> to vector<2x8xi32>
    %168 = vector.shape_cast %167 : vector<2x8xi32> to vector<2x8x1xi32>
    %cst_32 = arith.constant dense<2147483647> : vector<2x1xi32>
    %169 = vector.multi_reduction <minsi>, %168, %cst_32 [1] : vector<2x8x1xi32> to vector<2x1xi32>
    %170 = vector.shape_cast %169 : vector<2x1xi32> to vector<2x1x1xi32>
    %171 = vector.extract_strided_slice %0 {offsets = [0, 2, 0, 0], sizes = [2, 1, 1, 128], strides = [1, 1, 1, 1]} : vector<2x4x6x128xf32> to vector<2x1x1x128xf32>
    %172 = vector.shape_cast %171 : vector<2x1x1x128xf32> to vector<2x1x128xf32>
    %173 = vector.extract_strided_slice %0 {offsets = [0, 2, 1, 0], sizes = [2, 1, 1, 128], strides = [1, 1, 1, 1]} : vector<2x4x6x128xf32> to vector<2x1x1x128xf32>
    %174 = vector.shape_cast %173 : vector<2x1x1x128xf32> to vector<2x1x128xf32>
    %175 = vector.extract_strided_slice %0 {offsets = [0, 2, 2, 0], sizes = [2, 1, 1, 128], strides = [1, 1, 1, 1]} : vector<2x4x6x128xf32> to vector<2x1x1x128xf32>
    %176 = vector.shape_cast %175 : vector<2x1x1x128xf32> to vector<2x1x128xf32>
    %177 = vector.extract_strided_slice %0 {offsets = [0, 2, 3, 0], sizes = [2, 1, 1, 128], strides = [1, 1, 1, 1]} : vector<2x4x6x128xf32> to vector<2x1x1x128xf32>
    %178 = vector.shape_cast %177 : vector<2x1x1x128xf32> to vector<2x1x128xf32>
    %179 = vector.extract_strided_slice %0 {offsets = [0, 2, 5, 0], sizes = [2, 1, 1, 128], strides = [1, 1, 1, 1]} : vector<2x4x6x128xf32> to vector<2x1x1x128xf32>
    %180 = vector.shape_cast %179 : vector<2x1x1x128xf32> to vector<2x1x128xf32>
    %cst_33 = arith.constant 5.000000e-01 : f32
    %181 = vector.broadcast %cst_33 : f32 to vector<2x1x128xf32>
    %182 = arith.cmpf ogt, %180, %181 : vector<2x1x128xf32>
    %183 = vector.shape_cast %9 : vector<8x128xf32> to vector<1x8x128xf32>
    %184 = vector.broadcast %176 : vector<2x1x128xf32> to vector<2x8x128xf32>
    %185 = vector.broadcast %183 : vector<1x8x128xf32> to vector<2x8x128xf32>
    %186 = arith.minimumf %184, %185 : vector<2x8x128xf32>
    %187 = vector.shape_cast %5 : vector<8x128xf32> to vector<1x8x128xf32>
    %188 = vector.broadcast %172 : vector<2x1x128xf32> to vector<2x8x128xf32>
    %189 = vector.broadcast %187 : vector<1x8x128xf32> to vector<2x8x128xf32>
    %190 = arith.maximumf %188, %189 : vector<2x8x128xf32>
    %191 = arith.subf %186, %190 : vector<2x8x128xf32>
    %cst_34 = arith.constant 0.000000e+00 : f32
    %192 = vector.broadcast %cst_34 : f32 to vector<2x8x128xf32>
    %193 = arith.maximumf %191, %192 : vector<2x8x128xf32>
    %194 = vector.shape_cast %11 : vector<8x128xf32> to vector<1x8x128xf32>
    %195 = vector.broadcast %178 : vector<2x1x128xf32> to vector<2x8x128xf32>
    %196 = vector.broadcast %194 : vector<1x8x128xf32> to vector<2x8x128xf32>
    %197 = arith.minimumf %195, %196 : vector<2x8x128xf32>
    %198 = vector.shape_cast %7 : vector<8x128xf32> to vector<1x8x128xf32>
    %199 = vector.broadcast %174 : vector<2x1x128xf32> to vector<2x8x128xf32>
    %200 = vector.broadcast %198 : vector<1x8x128xf32> to vector<2x8x128xf32>
    %201 = arith.maximumf %199, %200 : vector<2x8x128xf32>
    %202 = arith.subf %197, %201 : vector<2x8x128xf32>
    %cst_35 = arith.constant 0.000000e+00 : f32
    %203 = vector.broadcast %cst_35 : f32 to vector<2x8x128xf32>
    %204 = arith.maximumf %202, %203 : vector<2x8x128xf32>
    %205 = arith.mulf %193, %204 : vector<2x8x128xf32>
    %206 = arith.subf %176, %172 : vector<2x1x128xf32>
    %207 = arith.subf %178, %174 : vector<2x1x128xf32>
    %208 = arith.mulf %206, %207 : vector<2x1x128xf32>
    %209 = vector.shape_cast %13 : vector<8x128xf32> to vector<1x8x128xf32>
    %210 = vector.broadcast %208 : vector<2x1x128xf32> to vector<2x8x128xf32>
    %211 = vector.broadcast %209 : vector<1x8x128xf32> to vector<2x8x128xf32>
    %212 = arith.addf %210, %211 : vector<2x8x128xf32>
    %213 = arith.subf %212, %205 : vector<2x8x128xf32>
    %214 = arith.divf %205, %213 : vector<2x8x128xf32>
    %215 = vector.shape_cast %32 : vector<8x128xi1> to vector<1x8x128xi1>
    %216 = vector.broadcast %182 : vector<2x1x128xi1> to vector<2x8x128xi1>
    %217 = vector.broadcast %215 : vector<1x8x128xi1> to vector<2x8x128xi1>
    %218 = arith.andi %216, %217 : vector<2x8x128xi1>
    %cst_36 = arith.constant -1.000000e+00 : f32
    %219 = vector.broadcast %cst_36 : f32 to vector<2x8x128xf32>
    %220 = arith.select %218, %214, %219 : vector<2x8x128xi1>, vector<2x8x128xf32>
    %221 = arith.cmpf ogt, %220, %154 : vector<2x8x128xf32>
    %222 = arith.select %221, %220, %154 : vector<2x8x128xi1>, vector<2x8x128xf32>
    %c2_i32 = arith.constant 2 : i32
    %223 = vector.broadcast %c2_i32 : i32 to vector<2x8x128xi32>
    %224 = arith.select %221, %223, %156 : vector<2x8x128xi1>, vector<2x8x128xi32>
    %cst_37 = arith.constant dense<0xFF800000> : vector<2x8xf32>
    %225 = vector.multi_reduction <maximumf>, %220, %cst_37 [2] : vector<2x8x128xf32> to vector<2x8xf32>
    %226 = vector.shape_cast %225 : vector<2x8xf32> to vector<2x8x1xf32>
    %cst_38 = arith.constant dense<0xFF800000> : vector<2x1xf32>
    %227 = vector.multi_reduction <maximumf>, %226, %cst_38 [1] : vector<2x8x1xf32> to vector<2x1xf32>
    %228 = vector.shape_cast %227 : vector<2x1xf32> to vector<2x1x1xf32>
    %229 = vector.broadcast %228 : vector<2x1x1xf32> to vector<2x8x128xf32>
    %230 = arith.cmpf oeq, %220, %229 : vector<2x8x128xf32>
    %c1024_i32_39 = arith.constant 1024 : i32
    %231 = vector.shape_cast %30 : vector<8x128xi32> to vector<1x8x128xi32>
    %232 = vector.broadcast %231 : vector<1x8x128xi32> to vector<2x8x128xi32>
    %233 = vector.broadcast %c1024_i32_39 : i32 to vector<2x8x128xi32>
    %234 = arith.select %230, %232, %233 : vector<2x8x128xi1>, vector<2x8x128xi32>
    %cst_40 = arith.constant dense<2147483647> : vector<2x8xi32>
    %235 = vector.multi_reduction <minsi>, %234, %cst_40 [2] : vector<2x8x128xi32> to vector<2x8xi32>
    %236 = vector.shape_cast %235 : vector<2x8xi32> to vector<2x8x1xi32>
    %cst_41 = arith.constant dense<2147483647> : vector<2x1xi32>
    %237 = vector.multi_reduction <minsi>, %236, %cst_41 [1] : vector<2x8x1xi32> to vector<2x1xi32>
    %238 = vector.shape_cast %237 : vector<2x1xi32> to vector<2x1x1xi32>
    %239 = vector.extract_strided_slice %0 {offsets = [0, 3, 0, 0], sizes = [2, 1, 1, 128], strides = [1, 1, 1, 1]} : vector<2x4x6x128xf32> to vector<2x1x1x128xf32>
    %240 = vector.shape_cast %239 : vector<2x1x1x128xf32> to vector<2x1x128xf32>
    %241 = vector.extract_strided_slice %0 {offsets = [0, 3, 1, 0], sizes = [2, 1, 1, 128], strides = [1, 1, 1, 1]} : vector<2x4x6x128xf32> to vector<2x1x1x128xf32>
    %242 = vector.shape_cast %241 : vector<2x1x1x128xf32> to vector<2x1x128xf32>
    %243 = vector.extract_strided_slice %0 {offsets = [0, 3, 2, 0], sizes = [2, 1, 1, 128], strides = [1, 1, 1, 1]} : vector<2x4x6x128xf32> to vector<2x1x1x128xf32>
    %244 = vector.shape_cast %243 : vector<2x1x1x128xf32> to vector<2x1x128xf32>
    %245 = vector.extract_strided_slice %0 {offsets = [0, 3, 3, 0], sizes = [2, 1, 1, 128], strides = [1, 1, 1, 1]} : vector<2x4x6x128xf32> to vector<2x1x1x128xf32>
    %246 = vector.shape_cast %245 : vector<2x1x1x128xf32> to vector<2x1x128xf32>
    %247 = vector.extract_strided_slice %0 {offsets = [0, 3, 5, 0], sizes = [2, 1, 1, 128], strides = [1, 1, 1, 1]} : vector<2x4x6x128xf32> to vector<2x1x1x128xf32>
    %248 = vector.shape_cast %247 : vector<2x1x1x128xf32> to vector<2x1x128xf32>
    %cst_42 = arith.constant 5.000000e-01 : f32
    %249 = vector.broadcast %cst_42 : f32 to vector<2x1x128xf32>
    %250 = arith.cmpf ogt, %248, %249 : vector<2x1x128xf32>
    %251 = vector.shape_cast %9 : vector<8x128xf32> to vector<1x8x128xf32>
    %252 = vector.broadcast %244 : vector<2x1x128xf32> to vector<2x8x128xf32>
    %253 = vector.broadcast %251 : vector<1x8x128xf32> to vector<2x8x128xf32>
    %254 = arith.minimumf %252, %253 : vector<2x8x128xf32>
    %255 = vector.shape_cast %5 : vector<8x128xf32> to vector<1x8x128xf32>
    %256 = vector.broadcast %240 : vector<2x1x128xf32> to vector<2x8x128xf32>
    %257 = vector.broadcast %255 : vector<1x8x128xf32> to vector<2x8x128xf32>
    %258 = arith.maximumf %256, %257 : vector<2x8x128xf32>
    %259 = arith.subf %254, %258 : vector<2x8x128xf32>
    %cst_43 = arith.constant 0.000000e+00 : f32
    %260 = vector.broadcast %cst_43 : f32 to vector<2x8x128xf32>
    %261 = arith.maximumf %259, %260 : vector<2x8x128xf32>
    %262 = vector.shape_cast %11 : vector<8x128xf32> to vector<1x8x128xf32>
    %263 = vector.broadcast %246 : vector<2x1x128xf32> to vector<2x8x128xf32>
    %264 = vector.broadcast %262 : vector<1x8x128xf32> to vector<2x8x128xf32>
    %265 = arith.minimumf %263, %264 : vector<2x8x128xf32>
    %266 = vector.shape_cast %7 : vector<8x128xf32> to vector<1x8x128xf32>
    %267 = vector.broadcast %242 : vector<2x1x128xf32> to vector<2x8x128xf32>
    %268 = vector.broadcast %266 : vector<1x8x128xf32> to vector<2x8x128xf32>
    %269 = arith.maximumf %267, %268 : vector<2x8x128xf32>
    %270 = arith.subf %265, %269 : vector<2x8x128xf32>
    %cst_44 = arith.constant 0.000000e+00 : f32
    %271 = vector.broadcast %cst_44 : f32 to vector<2x8x128xf32>
    %272 = arith.maximumf %270, %271 : vector<2x8x128xf32>
    %273 = arith.mulf %261, %272 : vector<2x8x128xf32>
    %274 = arith.subf %244, %240 : vector<2x1x128xf32>
    %275 = arith.subf %246, %242 : vector<2x1x128xf32>
    %276 = arith.mulf %274, %275 : vector<2x1x128xf32>
    %277 = vector.shape_cast %13 : vector<8x128xf32> to vector<1x8x128xf32>
    %278 = vector.broadcast %276 : vector<2x1x128xf32> to vector<2x8x128xf32>
    %279 = vector.broadcast %277 : vector<1x8x128xf32> to vector<2x8x128xf32>
    %280 = arith.addf %278, %279 : vector<2x8x128xf32>
    %281 = arith.subf %280, %273 : vector<2x8x128xf32>
    %282 = arith.divf %273, %281 : vector<2x8x128xf32>
    %283 = vector.shape_cast %32 : vector<8x128xi1> to vector<1x8x128xi1>
    %284 = vector.broadcast %250 : vector<2x1x128xi1> to vector<2x8x128xi1>
    %285 = vector.broadcast %283 : vector<1x8x128xi1> to vector<2x8x128xi1>
    %286 = arith.andi %284, %285 : vector<2x8x128xi1>
    %cst_45 = arith.constant -1.000000e+00 : f32
    %287 = vector.broadcast %cst_45 : f32 to vector<2x8x128xf32>
    %288 = arith.select %286, %282, %287 : vector<2x8x128xi1>, vector<2x8x128xf32>
    %289 = arith.cmpf ogt, %288, %222 : vector<2x8x128xf32>
    %290 = arith.select %289, %288, %222 : vector<2x8x128xi1>, vector<2x8x128xf32>
    %c3_i32 = arith.constant 3 : i32
    %291 = vector.broadcast %c3_i32 : i32 to vector<2x8x128xi32>
    %292 = arith.select %289, %291, %224 : vector<2x8x128xi1>, vector<2x8x128xi32>
    %cst_46 = arith.constant dense<0xFF800000> : vector<2x8xf32>
    %293 = vector.multi_reduction <maximumf>, %288, %cst_46 [2] : vector<2x8x128xf32> to vector<2x8xf32>
    %294 = vector.shape_cast %293 : vector<2x8xf32> to vector<2x8x1xf32>
    %cst_47 = arith.constant dense<0xFF800000> : vector<2x1xf32>
    %295 = vector.multi_reduction <maximumf>, %294, %cst_47 [1] : vector<2x8x1xf32> to vector<2x1xf32>
    %296 = vector.shape_cast %295 : vector<2x1xf32> to vector<2x1x1xf32>
    %297 = vector.broadcast %296 : vector<2x1x1xf32> to vector<2x8x128xf32>
    %298 = arith.cmpf oeq, %288, %297 : vector<2x8x128xf32>
    %c1024_i32_48 = arith.constant 1024 : i32
    %299 = vector.shape_cast %30 : vector<8x128xi32> to vector<1x8x128xi32>
    %300 = vector.broadcast %299 : vector<1x8x128xi32> to vector<2x8x128xi32>
    %301 = vector.broadcast %c1024_i32_48 : i32 to vector<2x8x128xi32>
    %302 = arith.select %298, %300, %301 : vector<2x8x128xi1>, vector<2x8x128xi32>
    %cst_49 = arith.constant dense<2147483647> : vector<2x8xi32>
    %303 = vector.multi_reduction <minsi>, %302, %cst_49 [2] : vector<2x8x128xi32> to vector<2x8xi32>
    %304 = vector.shape_cast %303 : vector<2x8xi32> to vector<2x8x1xi32>
    %cst_50 = arith.constant dense<2147483647> : vector<2x1xi32>
    %305 = vector.multi_reduction <minsi>, %304, %cst_50 [1] : vector<2x8x1xi32> to vector<2x1xi32>
    %306 = vector.shape_cast %305 : vector<2x1xi32> to vector<2x1x1xi32>
    %307 = vector.shape_cast %30 : vector<8x128xi32> to vector<1x8x128xi32>
    %308 = vector.broadcast %307 : vector<1x8x128xi32> to vector<2x8x128xi32>
    %309 = vector.broadcast %102 : vector<2x1x1xi32> to vector<2x8x128xi32>
    %310 = arith.cmpi eq, %308, %309 : vector<2x8x128xi32>
    %311 = vector.broadcast %46 : vector<2x1x128xi1> to vector<2x8x128xi1>
    %312 = arith.andi %310, %311 : vector<2x8x128xi1>
    %cst_51 = arith.constant 2.000000e+00 : f32
    %313 = vector.broadcast %cst_51 : f32 to vector<2x8x128xf32>
    %314 = arith.select %312, %313, %290 : vector<2x8x128xi1>, vector<2x8x128xf32>
    %c0_i32_52 = arith.constant 0 : i32
    %315 = vector.broadcast %c0_i32_52 : i32 to vector<2x8x128xi32>
    %316 = arith.select %312, %315, %292 : vector<2x8x128xi1>, vector<2x8x128xi32>
    %317 = vector.shape_cast %30 : vector<8x128xi32> to vector<1x8x128xi32>
    %318 = vector.broadcast %317 : vector<1x8x128xi32> to vector<2x8x128xi32>
    %319 = vector.broadcast %170 : vector<2x1x1xi32> to vector<2x8x128xi32>
    %320 = arith.cmpi eq, %318, %319 : vector<2x8x128xi32>
    %321 = vector.broadcast %114 : vector<2x1x128xi1> to vector<2x8x128xi1>
    %322 = arith.andi %320, %321 : vector<2x8x128xi1>
    %cst_53 = arith.constant 2.000000e+00 : f32
    %323 = vector.broadcast %cst_53 : f32 to vector<2x8x128xf32>
    %324 = arith.select %322, %323, %314 : vector<2x8x128xi1>, vector<2x8x128xf32>
    %c1_i32_54 = arith.constant 1 : i32
    %325 = vector.broadcast %c1_i32_54 : i32 to vector<2x8x128xi32>
    %326 = arith.select %322, %325, %316 : vector<2x8x128xi1>, vector<2x8x128xi32>
    %327 = vector.shape_cast %30 : vector<8x128xi32> to vector<1x8x128xi32>
    %328 = vector.broadcast %327 : vector<1x8x128xi32> to vector<2x8x128xi32>
    %329 = vector.broadcast %238 : vector<2x1x1xi32> to vector<2x8x128xi32>
    %330 = arith.cmpi eq, %328, %329 : vector<2x8x128xi32>
    %331 = vector.broadcast %182 : vector<2x1x128xi1> to vector<2x8x128xi1>
    %332 = arith.andi %330, %331 : vector<2x8x128xi1>
    %cst_55 = arith.constant 2.000000e+00 : f32
    %333 = vector.broadcast %cst_55 : f32 to vector<2x8x128xf32>
    %334 = arith.select %332, %333, %324 : vector<2x8x128xi1>, vector<2x8x128xf32>
    %c2_i32_56 = arith.constant 2 : i32
    %335 = vector.broadcast %c2_i32_56 : i32 to vector<2x8x128xi32>
    %336 = arith.select %332, %335, %326 : vector<2x8x128xi1>, vector<2x8x128xi32>
    %337 = vector.shape_cast %30 : vector<8x128xi32> to vector<1x8x128xi32>
    %338 = vector.broadcast %337 : vector<1x8x128xi32> to vector<2x8x128xi32>
    %339 = vector.broadcast %306 : vector<2x1x1xi32> to vector<2x8x128xi32>
    %340 = arith.cmpi eq, %338, %339 : vector<2x8x128xi32>
    %341 = vector.broadcast %250 : vector<2x1x128xi1> to vector<2x8x128xi1>
    %342 = arith.andi %340, %341 : vector<2x8x128xi1>
    %cst_57 = arith.constant 2.000000e+00 : f32
    %343 = vector.broadcast %cst_57 : f32 to vector<2x8x128xf32>
    %344 = arith.select %342, %343, %334 : vector<2x8x128xi1>, vector<2x8x128xf32>
    %c3_i32_58 = arith.constant 3 : i32
    %345 = vector.broadcast %c3_i32_58 : i32 to vector<2x8x128xi32>
    %346 = arith.select %342, %345, %336 : vector<2x8x128xi1>, vector<2x8x128xi32>
    %cst_59 = arith.constant 0.000000e+00 : f32
    %347 = vector.broadcast %cst_59 : f32 to vector<2x8x128xf32>
    %cst_60 = arith.constant 0.000000e+00 : f32
    %348 = vector.broadcast %cst_60 : f32 to vector<2x8x128xf32>
    %cst_61 = arith.constant 0.000000e+00 : f32
    %349 = vector.broadcast %cst_61 : f32 to vector<2x8x128xf32>
    %cst_62 = arith.constant 0.000000e+00 : f32
    %350 = vector.broadcast %cst_62 : f32 to vector<2x8x128xf32>
    %cst_63 = arith.constant 0.000000e+00 : f32
    %351 = vector.broadcast %cst_63 : f32 to vector<2x8x128xf32>
    %c0_i32_64 = arith.constant 0 : i32
    %352 = vector.broadcast %c0_i32_64 : i32 to vector<2x8x128xi32>
    %353 = arith.cmpi eq, %346, %352 : vector<2x8x128xi32>
    %354 = vector.extract_strided_slice %0 {offsets = [0, 0, 0, 0], sizes = [2, 1, 1, 128], strides = [1, 1, 1, 1]} : vector<2x4x6x128xf32> to vector<2x1x1x128xf32>
    %355 = vector.shape_cast %354 : vector<2x1x1x128xf32> to vector<2x1x128xf32>
    %356 = vector.shape_cast %355 : vector<2x1x128xf32> to vector<2x1x128xf32>
    %357 = vector.broadcast %356 : vector<2x1x128xf32> to vector<2x8x128xf32>
    %358 = arith.select %353, %357, %347 : vector<2x8x128xi1>, vector<2x8x128xf32>
    %359 = vector.extract_strided_slice %0 {offsets = [0, 0, 1, 0], sizes = [2, 1, 1, 128], strides = [1, 1, 1, 1]} : vector<2x4x6x128xf32> to vector<2x1x1x128xf32>
    %360 = vector.shape_cast %359 : vector<2x1x1x128xf32> to vector<2x1x128xf32>
    %361 = vector.shape_cast %360 : vector<2x1x128xf32> to vector<2x1x128xf32>
    %362 = vector.broadcast %361 : vector<2x1x128xf32> to vector<2x8x128xf32>
    %363 = arith.select %353, %362, %348 : vector<2x8x128xi1>, vector<2x8x128xf32>
    %364 = vector.extract_strided_slice %0 {offsets = [0, 0, 2, 0], sizes = [2, 1, 1, 128], strides = [1, 1, 1, 1]} : vector<2x4x6x128xf32> to vector<2x1x1x128xf32>
    %365 = vector.shape_cast %364 : vector<2x1x1x128xf32> to vector<2x1x128xf32>
    %366 = vector.shape_cast %365 : vector<2x1x128xf32> to vector<2x1x128xf32>
    %367 = vector.broadcast %366 : vector<2x1x128xf32> to vector<2x8x128xf32>
    %368 = arith.select %353, %367, %349 : vector<2x8x128xi1>, vector<2x8x128xf32>
    %369 = vector.extract_strided_slice %0 {offsets = [0, 0, 3, 0], sizes = [2, 1, 1, 128], strides = [1, 1, 1, 1]} : vector<2x4x6x128xf32> to vector<2x1x1x128xf32>
    %370 = vector.shape_cast %369 : vector<2x1x1x128xf32> to vector<2x1x128xf32>
    %371 = vector.shape_cast %370 : vector<2x1x128xf32> to vector<2x1x128xf32>
    %372 = vector.broadcast %371 : vector<2x1x128xf32> to vector<2x8x128xf32>
    %373 = arith.select %353, %372, %350 : vector<2x8x128xi1>, vector<2x8x128xf32>
    %374 = vector.extract_strided_slice %0 {offsets = [0, 0, 4, 0], sizes = [2, 1, 1, 128], strides = [1, 1, 1, 1]} : vector<2x4x6x128xf32> to vector<2x1x1x128xf32>
    %375 = vector.shape_cast %374 : vector<2x1x1x128xf32> to vector<2x1x128xf32>
    %376 = vector.shape_cast %375 : vector<2x1x128xf32> to vector<2x1x128xf32>
    %377 = vector.broadcast %376 : vector<2x1x128xf32> to vector<2x8x128xf32>
    %378 = arith.select %353, %377, %351 : vector<2x8x128xi1>, vector<2x8x128xf32>
    %c1_i32_65 = arith.constant 1 : i32
    %379 = vector.broadcast %c1_i32_65 : i32 to vector<2x8x128xi32>
    %380 = arith.cmpi eq, %346, %379 : vector<2x8x128xi32>
    %381 = vector.extract_strided_slice %0 {offsets = [0, 1, 0, 0], sizes = [2, 1, 1, 128], strides = [1, 1, 1, 1]} : vector<2x4x6x128xf32> to vector<2x1x1x128xf32>
    %382 = vector.shape_cast %381 : vector<2x1x1x128xf32> to vector<2x1x128xf32>
    %383 = vector.shape_cast %382 : vector<2x1x128xf32> to vector<2x1x128xf32>
    %384 = vector.broadcast %383 : vector<2x1x128xf32> to vector<2x8x128xf32>
    %385 = arith.select %380, %384, %358 : vector<2x8x128xi1>, vector<2x8x128xf32>
    %386 = vector.extract_strided_slice %0 {offsets = [0, 1, 1, 0], sizes = [2, 1, 1, 128], strides = [1, 1, 1, 1]} : vector<2x4x6x128xf32> to vector<2x1x1x128xf32>
    %387 = vector.shape_cast %386 : vector<2x1x1x128xf32> to vector<2x1x128xf32>
    %388 = vector.shape_cast %387 : vector<2x1x128xf32> to vector<2x1x128xf32>
    %389 = vector.broadcast %388 : vector<2x1x128xf32> to vector<2x8x128xf32>
    %390 = arith.select %380, %389, %363 : vector<2x8x128xi1>, vector<2x8x128xf32>
    %391 = vector.extract_strided_slice %0 {offsets = [0, 1, 2, 0], sizes = [2, 1, 1, 128], strides = [1, 1, 1, 1]} : vector<2x4x6x128xf32> to vector<2x1x1x128xf32>
    %392 = vector.shape_cast %391 : vector<2x1x1x128xf32> to vector<2x1x128xf32>
    %393 = vector.shape_cast %392 : vector<2x1x128xf32> to vector<2x1x128xf32>
    %394 = vector.broadcast %393 : vector<2x1x128xf32> to vector<2x8x128xf32>
    %395 = arith.select %380, %394, %368 : vector<2x8x128xi1>, vector<2x8x128xf32>
    %396 = vector.extract_strided_slice %0 {offsets = [0, 1, 3, 0], sizes = [2, 1, 1, 128], strides = [1, 1, 1, 1]} : vector<2x4x6x128xf32> to vector<2x1x1x128xf32>
    %397 = vector.shape_cast %396 : vector<2x1x1x128xf32> to vector<2x1x128xf32>
    %398 = vector.shape_cast %397 : vector<2x1x128xf32> to vector<2x1x128xf32>
    %399 = vector.broadcast %398 : vector<2x1x128xf32> to vector<2x8x128xf32>
    %400 = arith.select %380, %399, %373 : vector<2x8x128xi1>, vector<2x8x128xf32>
    %401 = vector.extract_strided_slice %0 {offsets = [0, 1, 4, 0], sizes = [2, 1, 1, 128], strides = [1, 1, 1, 1]} : vector<2x4x6x128xf32> to vector<2x1x1x128xf32>
    %402 = vector.shape_cast %401 : vector<2x1x1x128xf32> to vector<2x1x128xf32>
    %403 = vector.shape_cast %402 : vector<2x1x128xf32> to vector<2x1x128xf32>
    %404 = vector.broadcast %403 : vector<2x1x128xf32> to vector<2x8x128xf32>
    %405 = arith.select %380, %404, %378 : vector<2x8x128xi1>, vector<2x8x128xf32>
    %c2_i32_66 = arith.constant 2 : i32
    %406 = vector.broadcast %c2_i32_66 : i32 to vector<2x8x128xi32>
    %407 = arith.cmpi eq, %346, %406 : vector<2x8x128xi32>
    %408 = vector.extract_strided_slice %0 {offsets = [0, 2, 0, 0], sizes = [2, 1, 1, 128], strides = [1, 1, 1, 1]} : vector<2x4x6x128xf32> to vector<2x1x1x128xf32>
    %409 = vector.shape_cast %408 : vector<2x1x1x128xf32> to vector<2x1x128xf32>
    %410 = vector.shape_cast %409 : vector<2x1x128xf32> to vector<2x1x128xf32>
    %411 = vector.broadcast %410 : vector<2x1x128xf32> to vector<2x8x128xf32>
    %412 = arith.select %407, %411, %385 : vector<2x8x128xi1>, vector<2x8x128xf32>
    %413 = vector.extract_strided_slice %0 {offsets = [0, 2, 1, 0], sizes = [2, 1, 1, 128], strides = [1, 1, 1, 1]} : vector<2x4x6x128xf32> to vector<2x1x1x128xf32>
    %414 = vector.shape_cast %413 : vector<2x1x1x128xf32> to vector<2x1x128xf32>
    %415 = vector.shape_cast %414 : vector<2x1x128xf32> to vector<2x1x128xf32>
    %416 = vector.broadcast %415 : vector<2x1x128xf32> to vector<2x8x128xf32>
    %417 = arith.select %407, %416, %390 : vector<2x8x128xi1>, vector<2x8x128xf32>
    %418 = vector.extract_strided_slice %0 {offsets = [0, 2, 2, 0], sizes = [2, 1, 1, 128], strides = [1, 1, 1, 1]} : vector<2x4x6x128xf32> to vector<2x1x1x128xf32>
    %419 = vector.shape_cast %418 : vector<2x1x1x128xf32> to vector<2x1x128xf32>
    %420 = vector.shape_cast %419 : vector<2x1x128xf32> to vector<2x1x128xf32>
    %421 = vector.broadcast %420 : vector<2x1x128xf32> to vector<2x8x128xf32>
    %422 = arith.select %407, %421, %395 : vector<2x8x128xi1>, vector<2x8x128xf32>
    %423 = vector.extract_strided_slice %0 {offsets = [0, 2, 3, 0], sizes = [2, 1, 1, 128], strides = [1, 1, 1, 1]} : vector<2x4x6x128xf32> to vector<2x1x1x128xf32>
    %424 = vector.shape_cast %423 : vector<2x1x1x128xf32> to vector<2x1x128xf32>
    %425 = vector.shape_cast %424 : vector<2x1x128xf32> to vector<2x1x128xf32>
    %426 = vector.broadcast %425 : vector<2x1x128xf32> to vector<2x8x128xf32>
    %427 = arith.select %407, %426, %400 : vector<2x8x128xi1>, vector<2x8x128xf32>
    %428 = vector.extract_strided_slice %0 {offsets = [0, 2, 4, 0], sizes = [2, 1, 1, 128], strides = [1, 1, 1, 1]} : vector<2x4x6x128xf32> to vector<2x1x1x128xf32>
    %429 = vector.shape_cast %428 : vector<2x1x1x128xf32> to vector<2x1x128xf32>
    %430 = vector.shape_cast %429 : vector<2x1x128xf32> to vector<2x1x128xf32>
    %431 = vector.broadcast %430 : vector<2x1x128xf32> to vector<2x8x128xf32>
    %432 = arith.select %407, %431, %405 : vector<2x8x128xi1>, vector<2x8x128xf32>
    %c3_i32_67 = arith.constant 3 : i32
    %433 = vector.broadcast %c3_i32_67 : i32 to vector<2x8x128xi32>
    %434 = arith.cmpi eq, %346, %433 : vector<2x8x128xi32>
    %435 = vector.extract_strided_slice %0 {offsets = [0, 3, 0, 0], sizes = [2, 1, 1, 128], strides = [1, 1, 1, 1]} : vector<2x4x6x128xf32> to vector<2x1x1x128xf32>
    %436 = vector.shape_cast %435 : vector<2x1x1x128xf32> to vector<2x1x128xf32>
    %437 = vector.shape_cast %436 : vector<2x1x128xf32> to vector<2x1x128xf32>
    %438 = vector.broadcast %437 : vector<2x1x128xf32> to vector<2x8x128xf32>
    %439 = arith.select %434, %438, %412 : vector<2x8x128xi1>, vector<2x8x128xf32>
    %440 = vector.extract_strided_slice %0 {offsets = [0, 3, 1, 0], sizes = [2, 1, 1, 128], strides = [1, 1, 1, 1]} : vector<2x4x6x128xf32> to vector<2x1x1x128xf32>
    %441 = vector.shape_cast %440 : vector<2x1x1x128xf32> to vector<2x1x128xf32>
    %442 = vector.shape_cast %441 : vector<2x1x128xf32> to vector<2x1x128xf32>
    %443 = vector.broadcast %442 : vector<2x1x128xf32> to vector<2x8x128xf32>
    %444 = arith.select %434, %443, %417 : vector<2x8x128xi1>, vector<2x8x128xf32>
    %445 = vector.extract_strided_slice %0 {offsets = [0, 3, 2, 0], sizes = [2, 1, 1, 128], strides = [1, 1, 1, 1]} : vector<2x4x6x128xf32> to vector<2x1x1x128xf32>
    %446 = vector.shape_cast %445 : vector<2x1x1x128xf32> to vector<2x1x128xf32>
    %447 = vector.shape_cast %446 : vector<2x1x128xf32> to vector<2x1x128xf32>
    %448 = vector.broadcast %447 : vector<2x1x128xf32> to vector<2x8x128xf32>
    %449 = arith.select %434, %448, %422 : vector<2x8x128xi1>, vector<2x8x128xf32>
    %450 = vector.extract_strided_slice %0 {offsets = [0, 3, 3, 0], sizes = [2, 1, 1, 128], strides = [1, 1, 1, 1]} : vector<2x4x6x128xf32> to vector<2x1x1x128xf32>
    %451 = vector.shape_cast %450 : vector<2x1x1x128xf32> to vector<2x1x128xf32>
    %452 = vector.shape_cast %451 : vector<2x1x128xf32> to vector<2x1x128xf32>
    %453 = vector.broadcast %452 : vector<2x1x128xf32> to vector<2x8x128xf32>
    %454 = arith.select %434, %453, %427 : vector<2x8x128xi1>, vector<2x8x128xf32>
    %455 = vector.extract_strided_slice %0 {offsets = [0, 3, 4, 0], sizes = [2, 1, 1, 128], strides = [1, 1, 1, 1]} : vector<2x4x6x128xf32> to vector<2x1x1x128xf32>
    %456 = vector.shape_cast %455 : vector<2x1x1x128xf32> to vector<2x1x128xf32>
    %457 = vector.shape_cast %456 : vector<2x1x128xf32> to vector<2x1x128xf32>
    %458 = vector.broadcast %457 : vector<2x1x128xf32> to vector<2x8x128xf32>
    %459 = arith.select %434, %458, %432 : vector<2x8x128xi1>, vector<2x8x128xf32>
    %cst_68 = arith.constant 5.000000e-01 : f32
    %460 = vector.broadcast %cst_68 : f32 to vector<2x8x128xf32>
    %461 = arith.cmpf olt, %344, %460 : vector<2x8x128xf32>
    %cst_69 = arith.constant 1.000000e+00 : f32
    %462 = vector.broadcast %cst_69 : f32 to vector<2x8x128xf32>
    %463 = arith.addf %459, %462 : vector<2x8x128xf32>
    %464 = arith.fptosi %463 : vector<2x8x128xf32> to vector<2x8x128xi32>
    %c0_i32_70 = arith.constant 0 : i32
    %465 = vector.broadcast %c0_i32_70 : i32 to vector<2x8x128xi32>
    %466 = arith.select %461, %465, %464 : vector<2x8x128xi1>, vector<2x8x128xi32>
    %c0_i32_71 = arith.constant 0 : i32
    %467 = vector.broadcast %c0_i32_71 : i32 to vector<2x8x128xi32>
    %468 = arith.cmpi sgt, %466, %467 : vector<2x8x128xi32>
    %469 = arith.extui %468 : vector<2x8x128xi1> to vector<2x8x128xi32>
    %cst_72 = arith.constant dense<0> : vector<2x8xi32>
    %470 = vector.multi_reduction <add>, %469, %cst_72 [2] : vector<2x8x128xi32> to vector<2x8xi32>
    %471 = vector.shape_cast %470 : vector<2x8xi32> to vector<2x8x1xi32>
    %cst_73 = arith.constant dense<0> : vector<2x1xi32>
    %472 = vector.multi_reduction <add>, %471, %cst_73 [1] : vector<2x8x1xi32> to vector<2x1xi32>
    %473 = vector.shape_cast %472 : vector<2x1xi32> to vector<2x1x1xi32>
    %474 = arith.addf %439, %449 : vector<2x8x128xf32>
    %cst_74 = arith.constant 5.000000e-01 : f32
    %475 = vector.broadcast %cst_74 : f32 to vector<2x8x128xf32>
    %476 = arith.mulf %474, %475 : vector<2x8x128xf32>
    %477 = vector.shape_cast %15 : vector<8x128xf32> to vector<1x8x128xf32>
    %478 = vector.broadcast %477 : vector<1x8x128xf32> to vector<2x8x128xf32>
    %479 = arith.subf %476, %478 : vector<2x8x128xf32>
    %480 = vector.shape_cast %19 : vector<8x128xf32> to vector<1x8x128xf32>
    %481 = vector.broadcast %480 : vector<1x8x128xf32> to vector<2x8x128xf32>
    %482 = arith.mulf %479, %481 : vector<2x8x128xf32>
    %483 = arith.addf %444, %454 : vector<2x8x128xf32>
    %cst_75 = arith.constant 5.000000e-01 : f32
    %484 = vector.broadcast %cst_75 : f32 to vector<2x8x128xf32>
    %485 = arith.mulf %483, %484 : vector<2x8x128xf32>
    %486 = vector.shape_cast %17 : vector<8x128xf32> to vector<1x8x128xf32>
    %487 = vector.broadcast %486 : vector<1x8x128xf32> to vector<2x8x128xf32>
    %488 = arith.subf %485, %487 : vector<2x8x128xf32>
    %489 = vector.shape_cast %21 : vector<8x128xf32> to vector<1x8x128xf32>
    %490 = vector.broadcast %489 : vector<1x8x128xf32> to vector<2x8x128xf32>
    %491 = arith.mulf %488, %490 : vector<2x8x128xf32>
    %492 = arith.subf %449, %439 : vector<2x8x128xf32>
    %493 = vector.shape_cast %23 : vector<8x128xf32> to vector<1x8x128xf32>
    %494 = vector.broadcast %493 : vector<1x8x128xf32> to vector<2x8x128xf32>
    %495 = arith.mulf %492, %494 : vector<2x8x128xf32>
    %cst_76 = arith.constant 9.99999996E-13 : f32
    %496 = vector.broadcast %cst_76 : f32 to vector<2x8x128xf32>
    %497 = arith.maximumf %495, %496 : vector<2x8x128xf32>
    %498 = math.log %497 : vector<2x8x128xf32>
    %cst_77 = arith.constant 5.000000e+00 : f32
    %499 = vector.broadcast %cst_77 : f32 to vector<2x8x128xf32>
    %500 = arith.mulf %498, %499 : vector<2x8x128xf32>
    %501 = arith.subf %454, %444 : vector<2x8x128xf32>
    %502 = vector.shape_cast %25 : vector<8x128xf32> to vector<1x8x128xf32>
    %503 = vector.broadcast %502 : vector<1x8x128xf32> to vector<2x8x128xf32>
    %504 = arith.mulf %501, %503 : vector<2x8x128xf32>
    %cst_78 = arith.constant 9.99999996E-13 : f32
    %505 = vector.broadcast %cst_78 : f32 to vector<2x8x128xf32>
    %506 = arith.maximumf %504, %505 : vector<2x8x128xf32>
    %507 = math.log %506 : vector<2x8x128xf32>
    %cst_79 = arith.constant 5.000000e+00 : f32
    %508 = vector.broadcast %cst_79 : f32 to vector<2x8x128xf32>
    %509 = arith.mulf %507, %508 : vector<2x8x128xf32>
    %510 = vector.extract_strided_slice %2 {offsets = [0, 0, 0, 0], sizes = [2, 1, 8, 128], strides = [1, 1, 1, 1]} : vector<2x4x8x128xf32> to vector<2x1x8x128xf32>
    %511 = vector.shape_cast %510 : vector<2x1x8x128xf32> to vector<2x8x128xf32>
    %512 = arith.subf %511, %482 : vector<2x8x128xf32>
    %513 = math.absf %512 : vector<2x8x128xf32>
    %cst_80 = arith.constant 1.000000e+00 : f32
    %514 = vector.broadcast %cst_80 : f32 to vector<2x8x128xf32>
    %515 = arith.cmpf olt, %513, %514 : vector<2x8x128xf32>
    %cst_81 = arith.constant 5.000000e-01 : f32
    %516 = vector.broadcast %cst_81 : f32 to vector<2x8x128xf32>
    %517 = arith.mulf %516, %513 : vector<2x8x128xf32>
    %518 = arith.mulf %517, %513 : vector<2x8x128xf32>
    %cst_82 = arith.constant 5.000000e-01 : f32
    %519 = vector.broadcast %cst_82 : f32 to vector<2x8x128xf32>
    %520 = arith.subf %513, %519 : vector<2x8x128xf32>
    %521 = arith.select %515, %518, %520 : vector<2x8x128xi1>, vector<2x8x128xf32>
    %522 = vector.extract_strided_slice %2 {offsets = [0, 1, 0, 0], sizes = [2, 1, 8, 128], strides = [1, 1, 1, 1]} : vector<2x4x8x128xf32> to vector<2x1x8x128xf32>
    %523 = vector.shape_cast %522 : vector<2x1x8x128xf32> to vector<2x8x128xf32>
    %524 = arith.subf %523, %491 : vector<2x8x128xf32>
    %525 = math.absf %524 : vector<2x8x128xf32>
    %cst_83 = arith.constant 1.000000e+00 : f32
    %526 = vector.broadcast %cst_83 : f32 to vector<2x8x128xf32>
    %527 = arith.cmpf olt, %525, %526 : vector<2x8x128xf32>
    %cst_84 = arith.constant 5.000000e-01 : f32
    %528 = vector.broadcast %cst_84 : f32 to vector<2x8x128xf32>
    %529 = arith.mulf %528, %525 : vector<2x8x128xf32>
    %530 = arith.mulf %529, %525 : vector<2x8x128xf32>
    %cst_85 = arith.constant 5.000000e-01 : f32
    %531 = vector.broadcast %cst_85 : f32 to vector<2x8x128xf32>
    %532 = arith.subf %525, %531 : vector<2x8x128xf32>
    %533 = arith.select %527, %530, %532 : vector<2x8x128xi1>, vector<2x8x128xf32>
    %534 = arith.addf %521, %533 : vector<2x8x128xf32>
    %535 = vector.extract_strided_slice %2 {offsets = [0, 2, 0, 0], sizes = [2, 1, 8, 128], strides = [1, 1, 1, 1]} : vector<2x4x8x128xf32> to vector<2x1x8x128xf32>
    %536 = vector.shape_cast %535 : vector<2x1x8x128xf32> to vector<2x8x128xf32>
    %537 = arith.subf %536, %500 : vector<2x8x128xf32>
    %538 = math.absf %537 : vector<2x8x128xf32>
    %cst_86 = arith.constant 1.000000e+00 : f32
    %539 = vector.broadcast %cst_86 : f32 to vector<2x8x128xf32>
    %540 = arith.cmpf olt, %538, %539 : vector<2x8x128xf32>
    %cst_87 = arith.constant 5.000000e-01 : f32
    %541 = vector.broadcast %cst_87 : f32 to vector<2x8x128xf32>
    %542 = arith.mulf %541, %538 : vector<2x8x128xf32>
    %543 = arith.mulf %542, %538 : vector<2x8x128xf32>
    %cst_88 = arith.constant 5.000000e-01 : f32
    %544 = vector.broadcast %cst_88 : f32 to vector<2x8x128xf32>
    %545 = arith.subf %538, %544 : vector<2x8x128xf32>
    %546 = arith.select %540, %543, %545 : vector<2x8x128xi1>, vector<2x8x128xf32>
    %547 = arith.addf %534, %546 : vector<2x8x128xf32>
    %548 = vector.extract_strided_slice %2 {offsets = [0, 3, 0, 0], sizes = [2, 1, 8, 128], strides = [1, 1, 1, 1]} : vector<2x4x8x128xf32> to vector<2x1x8x128xf32>
    %549 = vector.shape_cast %548 : vector<2x1x8x128xf32> to vector<2x8x128xf32>
    %550 = arith.subf %549, %509 : vector<2x8x128xf32>
    %551 = math.absf %550 : vector<2x8x128xf32>
    %cst_89 = arith.constant 1.000000e+00 : f32
    %552 = vector.broadcast %cst_89 : f32 to vector<2x8x128xf32>
    %553 = arith.cmpf olt, %551, %552 : vector<2x8x128xf32>
    %cst_90 = arith.constant 5.000000e-01 : f32
    %554 = vector.broadcast %cst_90 : f32 to vector<2x8x128xf32>
    %555 = arith.mulf %554, %551 : vector<2x8x128xf32>
    %556 = arith.mulf %555, %551 : vector<2x8x128xf32>
    %cst_91 = arith.constant 5.000000e-01 : f32
    %557 = vector.broadcast %cst_91 : f32 to vector<2x8x128xf32>
    %558 = arith.subf %551, %557 : vector<2x8x128xf32>
    %559 = arith.select %553, %556, %558 : vector<2x8x128xi1>, vector<2x8x128xf32>
    %560 = arith.addf %547, %559 : vector<2x8x128xf32>
    %cst_92 = arith.constant 0.000000e+00 : f32
    %561 = vector.broadcast %cst_92 : f32 to vector<2x8x128xf32>
    %562 = arith.select %468, %560, %561 : vector<2x8x128xi1>, vector<2x8x128xf32>
    %563 = vector.shape_cast %562 : vector<2x8x128xf32> to vector<1x2x8x128xf32>
    %cst_93 = arith.constant dense<0.000000e+00> : vector<1xf32>
    %564 = vector.multi_reduction <add>, %563, %cst_93 [1, 2, 3] : vector<1x2x8x128xf32> to vector<1xf32>
    %565 = vector.shape_cast %564 : vector<1xf32> to vector<1x1x1x1xf32>
    %566 = vector.extract %565[0, 0, 0, 0] : f32 from vector<1x1x1x1xf32>
    %567 = vector.extract_strided_slice %3 {offsets = [0, 0, 0, 0], sizes = [2, 1, 8, 128], strides = [1, 1, 1, 1]} : vector<2x8x8x128xf32> to vector<2x1x8x128xf32>
    %568 = vector.shape_cast %567 : vector<2x1x8x128xf32> to vector<2x8x128xf32>
    %569 = vector.extract_strided_slice %3 {offsets = [0, 1, 0, 0], sizes = [2, 1, 8, 128], strides = [1, 1, 1, 1]} : vector<2x8x8x128xf32> to vector<2x1x8x128xf32>
    %570 = vector.shape_cast %569 : vector<2x1x8x128xf32> to vector<2x8x128xf32>
    %571 = arith.maximumf %568, %570 : vector<2x8x128xf32>
    %572 = vector.extract_strided_slice %3 {offsets = [0, 2, 0, 0], sizes = [2, 1, 8, 128], strides = [1, 1, 1, 1]} : vector<2x8x8x128xf32> to vector<2x1x8x128xf32>
    %573 = vector.shape_cast %572 : vector<2x1x8x128xf32> to vector<2x8x128xf32>
    %574 = arith.maximumf %571, %573 : vector<2x8x128xf32>
    %575 = vector.extract_strided_slice %3 {offsets = [0, 3, 0, 0], sizes = [2, 1, 8, 128], strides = [1, 1, 1, 1]} : vector<2x8x8x128xf32> to vector<2x1x8x128xf32>
    %576 = vector.shape_cast %575 : vector<2x1x8x128xf32> to vector<2x8x128xf32>
    %577 = arith.maximumf %574, %576 : vector<2x8x128xf32>
    %578 = vector.extract_strided_slice %3 {offsets = [0, 4, 0, 0], sizes = [2, 1, 8, 128], strides = [1, 1, 1, 1]} : vector<2x8x8x128xf32> to vector<2x1x8x128xf32>
    %579 = vector.shape_cast %578 : vector<2x1x8x128xf32> to vector<2x8x128xf32>
    %580 = arith.maximumf %577, %579 : vector<2x8x128xf32>
    %581 = vector.extract_strided_slice %3 {offsets = [0, 5, 0, 0], sizes = [2, 1, 8, 128], strides = [1, 1, 1, 1]} : vector<2x8x8x128xf32> to vector<2x1x8x128xf32>
    %582 = vector.shape_cast %581 : vector<2x1x8x128xf32> to vector<2x8x128xf32>
    %583 = arith.maximumf %580, %582 : vector<2x8x128xf32>
    %584 = vector.extract_strided_slice %3 {offsets = [0, 6, 0, 0], sizes = [2, 1, 8, 128], strides = [1, 1, 1, 1]} : vector<2x8x8x128xf32> to vector<2x1x8x128xf32>
    %585 = vector.shape_cast %584 : vector<2x1x8x128xf32> to vector<2x8x128xf32>
    %586 = arith.maximumf %583, %585 : vector<2x8x128xf32>
    %587 = vector.extract_strided_slice %3 {offsets = [0, 7, 0, 0], sizes = [2, 1, 8, 128], strides = [1, 1, 1, 1]} : vector<2x8x8x128xf32> to vector<2x1x8x128xf32>
    %588 = vector.shape_cast %587 : vector<2x1x8x128xf32> to vector<2x8x128xf32>
    %589 = arith.maximumf %586, %588 : vector<2x8x128xf32>
    %cst_94 = arith.constant 0.000000e+00 : f32
    %590 = vector.broadcast %cst_94 : f32 to vector<2x8x128xf32>
    %591 = vector.extract_strided_slice %3 {offsets = [0, 0, 0, 0], sizes = [2, 1, 8, 128], strides = [1, 1, 1, 1]} : vector<2x8x8x128xf32> to vector<2x1x8x128xf32>
    %592 = vector.shape_cast %591 : vector<2x1x8x128xf32> to vector<2x8x128xf32>
    %593 = arith.subf %592, %589 : vector<2x8x128xf32>
    %594 = math.exp %593 : vector<2x8x128xf32>
    %595 = arith.addf %590, %594 : vector<2x8x128xf32>
    %596 = vector.extract_strided_slice %3 {offsets = [0, 1, 0, 0], sizes = [2, 1, 8, 128], strides = [1, 1, 1, 1]} : vector<2x8x8x128xf32> to vector<2x1x8x128xf32>
    %597 = vector.shape_cast %596 : vector<2x1x8x128xf32> to vector<2x8x128xf32>
    %598 = arith.subf %597, %589 : vector<2x8x128xf32>
    %599 = math.exp %598 : vector<2x8x128xf32>
    %600 = arith.addf %595, %599 : vector<2x8x128xf32>
    %601 = vector.extract_strided_slice %3 {offsets = [0, 2, 0, 0], sizes = [2, 1, 8, 128], strides = [1, 1, 1, 1]} : vector<2x8x8x128xf32> to vector<2x1x8x128xf32>
    %602 = vector.shape_cast %601 : vector<2x1x8x128xf32> to vector<2x8x128xf32>
    %603 = arith.subf %602, %589 : vector<2x8x128xf32>
    %604 = math.exp %603 : vector<2x8x128xf32>
    %605 = arith.addf %600, %604 : vector<2x8x128xf32>
    %606 = vector.extract_strided_slice %3 {offsets = [0, 3, 0, 0], sizes = [2, 1, 8, 128], strides = [1, 1, 1, 1]} : vector<2x8x8x128xf32> to vector<2x1x8x128xf32>
    %607 = vector.shape_cast %606 : vector<2x1x8x128xf32> to vector<2x8x128xf32>
    %608 = arith.subf %607, %589 : vector<2x8x128xf32>
    %609 = math.exp %608 : vector<2x8x128xf32>
    %610 = arith.addf %605, %609 : vector<2x8x128xf32>
    %611 = vector.extract_strided_slice %3 {offsets = [0, 4, 0, 0], sizes = [2, 1, 8, 128], strides = [1, 1, 1, 1]} : vector<2x8x8x128xf32> to vector<2x1x8x128xf32>
    %612 = vector.shape_cast %611 : vector<2x1x8x128xf32> to vector<2x8x128xf32>
    %613 = arith.subf %612, %589 : vector<2x8x128xf32>
    %614 = math.exp %613 : vector<2x8x128xf32>
    %615 = arith.addf %610, %614 : vector<2x8x128xf32>
    %616 = vector.extract_strided_slice %3 {offsets = [0, 5, 0, 0], sizes = [2, 1, 8, 128], strides = [1, 1, 1, 1]} : vector<2x8x8x128xf32> to vector<2x1x8x128xf32>
    %617 = vector.shape_cast %616 : vector<2x1x8x128xf32> to vector<2x8x128xf32>
    %618 = arith.subf %617, %589 : vector<2x8x128xf32>
    %619 = math.exp %618 : vector<2x8x128xf32>
    %620 = arith.addf %615, %619 : vector<2x8x128xf32>
    %621 = vector.extract_strided_slice %3 {offsets = [0, 6, 0, 0], sizes = [2, 1, 8, 128], strides = [1, 1, 1, 1]} : vector<2x8x8x128xf32> to vector<2x1x8x128xf32>
    %622 = vector.shape_cast %621 : vector<2x1x8x128xf32> to vector<2x8x128xf32>
    %623 = arith.subf %622, %589 : vector<2x8x128xf32>
    %624 = math.exp %623 : vector<2x8x128xf32>
    %625 = arith.addf %620, %624 : vector<2x8x128xf32>
    %626 = vector.extract_strided_slice %3 {offsets = [0, 7, 0, 0], sizes = [2, 1, 8, 128], strides = [1, 1, 1, 1]} : vector<2x8x8x128xf32> to vector<2x1x8x128xf32>
    %627 = vector.shape_cast %626 : vector<2x1x8x128xf32> to vector<2x8x128xf32>
    %628 = arith.subf %627, %589 : vector<2x8x128xf32>
    %629 = math.exp %628 : vector<2x8x128xf32>
    %630 = arith.addf %625, %629 : vector<2x8x128xf32>
    %631 = math.log %630 : vector<2x8x128xf32>
    %632 = arith.addf %631, %589 : vector<2x8x128xf32>
    %633 = vector.extract_strided_slice %3 {offsets = [0, 0, 0, 0], sizes = [2, 1, 8, 128], strides = [1, 1, 1, 1]} : vector<2x8x8x128xf32> to vector<2x1x8x128xf32>
    %634 = vector.shape_cast %633 : vector<2x1x8x128xf32> to vector<2x8x128xf32>
    %c1_i32_95 = arith.constant 1 : i32
    %635 = vector.broadcast %c1_i32_95 : i32 to vector<2x8x128xi32>
    %636 = arith.cmpi eq, %466, %635 : vector<2x8x128xi32>
    %637 = vector.extract_strided_slice %3 {offsets = [0, 1, 0, 0], sizes = [2, 1, 8, 128], strides = [1, 1, 1, 1]} : vector<2x8x8x128xf32> to vector<2x1x8x128xf32>
    %638 = vector.shape_cast %637 : vector<2x1x8x128xf32> to vector<2x8x128xf32>
    %639 = arith.select %636, %638, %634 : vector<2x8x128xi1>, vector<2x8x128xf32>
    %c2_i32_96 = arith.constant 2 : i32
    %640 = vector.broadcast %c2_i32_96 : i32 to vector<2x8x128xi32>
    %641 = arith.cmpi eq, %466, %640 : vector<2x8x128xi32>
    %642 = vector.extract_strided_slice %3 {offsets = [0, 2, 0, 0], sizes = [2, 1, 8, 128], strides = [1, 1, 1, 1]} : vector<2x8x8x128xf32> to vector<2x1x8x128xf32>
    %643 = vector.shape_cast %642 : vector<2x1x8x128xf32> to vector<2x8x128xf32>
    %644 = arith.select %641, %643, %639 : vector<2x8x128xi1>, vector<2x8x128xf32>
    %c3_i32_97 = arith.constant 3 : i32
    %645 = vector.broadcast %c3_i32_97 : i32 to vector<2x8x128xi32>
    %646 = arith.cmpi eq, %466, %645 : vector<2x8x128xi32>
    %647 = vector.extract_strided_slice %3 {offsets = [0, 3, 0, 0], sizes = [2, 1, 8, 128], strides = [1, 1, 1, 1]} : vector<2x8x8x128xf32> to vector<2x1x8x128xf32>
    %648 = vector.shape_cast %647 : vector<2x1x8x128xf32> to vector<2x8x128xf32>
    %649 = arith.select %646, %648, %644 : vector<2x8x128xi1>, vector<2x8x128xf32>
    %c4_i32 = arith.constant 4 : i32
    %650 = vector.broadcast %c4_i32 : i32 to vector<2x8x128xi32>
    %651 = arith.cmpi eq, %466, %650 : vector<2x8x128xi32>
    %652 = vector.extract_strided_slice %3 {offsets = [0, 4, 0, 0], sizes = [2, 1, 8, 128], strides = [1, 1, 1, 1]} : vector<2x8x8x128xf32> to vector<2x1x8x128xf32>
    %653 = vector.shape_cast %652 : vector<2x1x8x128xf32> to vector<2x8x128xf32>
    %654 = arith.select %651, %653, %649 : vector<2x8x128xi1>, vector<2x8x128xf32>
    %c5_i32 = arith.constant 5 : i32
    %655 = vector.broadcast %c5_i32 : i32 to vector<2x8x128xi32>
    %656 = arith.cmpi eq, %466, %655 : vector<2x8x128xi32>
    %657 = vector.extract_strided_slice %3 {offsets = [0, 5, 0, 0], sizes = [2, 1, 8, 128], strides = [1, 1, 1, 1]} : vector<2x8x8x128xf32> to vector<2x1x8x128xf32>
    %658 = vector.shape_cast %657 : vector<2x1x8x128xf32> to vector<2x8x128xf32>
    %659 = arith.select %656, %658, %654 : vector<2x8x128xi1>, vector<2x8x128xf32>
    %c6_i32 = arith.constant 6 : i32
    %660 = vector.broadcast %c6_i32 : i32 to vector<2x8x128xi32>
    %661 = arith.cmpi eq, %466, %660 : vector<2x8x128xi32>
    %662 = vector.extract_strided_slice %3 {offsets = [0, 6, 0, 0], sizes = [2, 1, 8, 128], strides = [1, 1, 1, 1]} : vector<2x8x8x128xf32> to vector<2x1x8x128xf32>
    %663 = vector.shape_cast %662 : vector<2x1x8x128xf32> to vector<2x8x128xf32>
    %664 = arith.select %661, %663, %659 : vector<2x8x128xi1>, vector<2x8x128xf32>
    %c7_i32 = arith.constant 7 : i32
    %665 = vector.broadcast %c7_i32 : i32 to vector<2x8x128xi32>
    %666 = arith.cmpi eq, %466, %665 : vector<2x8x128xi32>
    %667 = vector.extract_strided_slice %3 {offsets = [0, 7, 0, 0], sizes = [2, 1, 8, 128], strides = [1, 1, 1, 1]} : vector<2x8x8x128xf32> to vector<2x1x8x128xf32>
    %668 = vector.shape_cast %667 : vector<2x1x8x128xf32> to vector<2x8x128xf32>
    %669 = arith.select %666, %668, %664 : vector<2x8x128xi1>, vector<2x8x128xf32>
    %670 = arith.subf %632, %669 : vector<2x8x128xf32>
    %cst_98 = arith.constant dense<true> : vector<8x128xi1>
    %671 = arith.xori %32, %cst_98 : vector<8x128xi1>
    %672 = vector.shape_cast %671 : vector<8x128xi1> to vector<1x8x128xi1>
    %673 = vector.broadcast %672 : vector<1x8x128xi1> to vector<2x8x128xi1>
    %674 = arith.ori %468, %673 : vector<2x8x128xi1>
    %cst_99 = arith.constant 0.000000e+00 : f32
    %675 = vector.broadcast %cst_99 : f32 to vector<2x8x128xf32>
    %676 = arith.select %674, %675, %670 : vector<2x8x128xi1>, vector<2x8x128xf32>
    %cst_100 = arith.constant 0.000000e+00 : f32
    %677 = vector.broadcast %cst_100 : f32 to vector<2x8x128xf32>
    %678 = arith.maximumf %676, %677 : vector<2x8x128xf32>
    %679 = tpu.bitcast %678 : vector<2x8x128xf32> -> vector<2x8x128xi32>
    %c3_i32_101 = arith.constant 3 : i32
    %680 = vector.broadcast %c3_i32_101 : i32 to vector<2x1x1xi32>
    %681 = arith.muli %680, %473 : vector<2x1x1xi32>
    %c127_i32 = arith.constant 127 : i32
    %682 = vector.broadcast %c127_i32 : i32 to vector<2x1x1xi32>
    %683 = arith.minsi %681, %682 : vector<2x1x1xi32>
    %c0_i32_102 = arith.constant 0 : i32
    %684 = vector.broadcast %c0_i32_102 : i32 to vector<2x1x1xi32>
    %c0_i32_103 = arith.constant 0 : i32
    %685 = vector.broadcast %c0_i32_103 : i32 to vector<2x1x1xi32>
    %c1073741824_i32 = arith.constant 1073741824 : i32
    %686 = vector.broadcast %c1073741824_i32 : i32 to vector<2x1x1xi32>
    %687 = arith.addi %684, %686 : vector<2x1x1xi32>
    %688 = vector.broadcast %687 : vector<2x1x1xi32> to vector<2x8x128xi32>
    %689 = arith.cmpi sge, %679, %688 : vector<2x8x128xi32>
    %690 = arith.extui %689 : vector<2x8x128xi1> to vector<2x8x128xi32>
    %cst_104 = arith.constant dense<0> : vector<2x8xi32>
    %691 = vector.multi_reduction <add>, %690, %cst_104 [2] : vector<2x8x128xi32> to vector<2x8xi32>
    %692 = vector.shape_cast %691 : vector<2x8xi32> to vector<2x8x1xi32>
    %cst_105 = arith.constant dense<0> : vector<2x1xi32>
    %693 = vector.multi_reduction <add>, %692, %cst_105 [1] : vector<2x8x1xi32> to vector<2x1xi32>
    %694 = vector.shape_cast %693 : vector<2x1xi32> to vector<2x1x1xi32>
    %695 = arith.cmpi sge, %694, %683 : vector<2x1x1xi32>
    %696 = arith.extui %695 : vector<2x1x1xi1> to vector<2x1x1xi32>
    %697 = arith.addi %685, %696 : vector<2x1x1xi32>
    %c1073741824_i32_106 = arith.constant 1073741824 : i32
    %698 = vector.broadcast %c1073741824_i32_106 : i32 to vector<2x1x1xi32>
    %699 = arith.muli %697, %698 : vector<2x1x1xi32>
    %700 = arith.addi %684, %699 : vector<2x1x1xi32>
    %c0_i32_107 = arith.constant 0 : i32
    %701 = vector.broadcast %c0_i32_107 : i32 to vector<2x1x1xi32>
    %c268435456_i32 = arith.constant 268435456 : i32
    %702 = vector.broadcast %c268435456_i32 : i32 to vector<2x1x1xi32>
    %703 = arith.addi %700, %702 : vector<2x1x1xi32>
    %704 = vector.broadcast %703 : vector<2x1x1xi32> to vector<2x8x128xi32>
    %705 = arith.cmpi sge, %679, %704 : vector<2x8x128xi32>
    %706 = arith.extui %705 : vector<2x8x128xi1> to vector<2x8x128xi32>
    %cst_108 = arith.constant dense<0> : vector<2x8xi32>
    %707 = vector.multi_reduction <add>, %706, %cst_108 [2] : vector<2x8x128xi32> to vector<2x8xi32>
    %708 = vector.shape_cast %707 : vector<2x8xi32> to vector<2x8x1xi32>
    %cst_109 = arith.constant dense<0> : vector<2x1xi32>
    %709 = vector.multi_reduction <add>, %708, %cst_109 [1] : vector<2x8x1xi32> to vector<2x1xi32>
    %710 = vector.shape_cast %709 : vector<2x1xi32> to vector<2x1x1xi32>
    %711 = arith.cmpi sge, %710, %683 : vector<2x1x1xi32>
    %712 = arith.extui %711 : vector<2x1x1xi1> to vector<2x1x1xi32>
    %713 = arith.addi %701, %712 : vector<2x1x1xi32>
    %c536870912_i32 = arith.constant 536870912 : i32
    %714 = vector.broadcast %c536870912_i32 : i32 to vector<2x1x1xi32>
    %715 = arith.addi %700, %714 : vector<2x1x1xi32>
    %716 = vector.broadcast %715 : vector<2x1x1xi32> to vector<2x8x128xi32>
    %717 = arith.cmpi sge, %679, %716 : vector<2x8x128xi32>
    %718 = arith.extui %717 : vector<2x8x128xi1> to vector<2x8x128xi32>
    %cst_110 = arith.constant dense<0> : vector<2x8xi32>
    %719 = vector.multi_reduction <add>, %718, %cst_110 [2] : vector<2x8x128xi32> to vector<2x8xi32>
    %720 = vector.shape_cast %719 : vector<2x8xi32> to vector<2x8x1xi32>
    %cst_111 = arith.constant dense<0> : vector<2x1xi32>
    %721 = vector.multi_reduction <add>, %720, %cst_111 [1] : vector<2x8x1xi32> to vector<2x1xi32>
    %722 = vector.shape_cast %721 : vector<2x1xi32> to vector<2x1x1xi32>
    %723 = arith.cmpi sge, %722, %683 : vector<2x1x1xi32>
    %724 = arith.extui %723 : vector<2x1x1xi1> to vector<2x1x1xi32>
    %725 = arith.addi %713, %724 : vector<2x1x1xi32>
    %c805306368_i32 = arith.constant 805306368 : i32
    %726 = vector.broadcast %c805306368_i32 : i32 to vector<2x1x1xi32>
    %727 = arith.addi %700, %726 : vector<2x1x1xi32>
    %728 = vector.broadcast %727 : vector<2x1x1xi32> to vector<2x8x128xi32>
    %729 = arith.cmpi sge, %679, %728 : vector<2x8x128xi32>
    %730 = arith.extui %729 : vector<2x8x128xi1> to vector<2x8x128xi32>
    %cst_112 = arith.constant dense<0> : vector<2x8xi32>
    %731 = vector.multi_reduction <add>, %730, %cst_112 [2] : vector<2x8x128xi32> to vector<2x8xi32>
    %732 = vector.shape_cast %731 : vector<2x8xi32> to vector<2x8x1xi32>
    %cst_113 = arith.constant dense<0> : vector<2x1xi32>
    %733 = vector.multi_reduction <add>, %732, %cst_113 [1] : vector<2x8x1xi32> to vector<2x1xi32>
    %734 = vector.shape_cast %733 : vector<2x1xi32> to vector<2x1x1xi32>
    %735 = arith.cmpi sge, %734, %683 : vector<2x1x1xi32>
    %736 = arith.extui %735 : vector<2x1x1xi1> to vector<2x1x1xi32>
    %737 = arith.addi %725, %736 : vector<2x1x1xi32>
    %c268435456_i32_114 = arith.constant 268435456 : i32
    %738 = vector.broadcast %c268435456_i32_114 : i32 to vector<2x1x1xi32>
    %739 = arith.muli %737, %738 : vector<2x1x1xi32>
    %740 = arith.addi %700, %739 : vector<2x1x1xi32>
    %c0_i32_115 = arith.constant 0 : i32
    %741 = vector.broadcast %c0_i32_115 : i32 to vector<2x1x1xi32>
    %c67108864_i32 = arith.constant 67108864 : i32
    %742 = vector.broadcast %c67108864_i32 : i32 to vector<2x1x1xi32>
    %743 = arith.addi %740, %742 : vector<2x1x1xi32>
    %744 = vector.broadcast %743 : vector<2x1x1xi32> to vector<2x8x128xi32>
    %745 = arith.cmpi sge, %679, %744 : vector<2x8x128xi32>
    %746 = arith.extui %745 : vector<2x8x128xi1> to vector<2x8x128xi32>
    %cst_116 = arith.constant dense<0> : vector<2x8xi32>
    %747 = vector.multi_reduction <add>, %746, %cst_116 [2] : vector<2x8x128xi32> to vector<2x8xi32>
    %748 = vector.shape_cast %747 : vector<2x8xi32> to vector<2x8x1xi32>
    %cst_117 = arith.constant dense<0> : vector<2x1xi32>
    %749 = vector.multi_reduction <add>, %748, %cst_117 [1] : vector<2x8x1xi32> to vector<2x1xi32>
    %750 = vector.shape_cast %749 : vector<2x1xi32> to vector<2x1x1xi32>
    %751 = arith.cmpi sge, %750, %683 : vector<2x1x1xi32>
    %752 = arith.extui %751 : vector<2x1x1xi1> to vector<2x1x1xi32>
    %753 = arith.addi %741, %752 : vector<2x1x1xi32>
    %c134217728_i32 = arith.constant 134217728 : i32
    %754 = vector.broadcast %c134217728_i32 : i32 to vector<2x1x1xi32>
    %755 = arith.addi %740, %754 : vector<2x1x1xi32>
    %756 = vector.broadcast %755 : vector<2x1x1xi32> to vector<2x8x128xi32>
    %757 = arith.cmpi sge, %679, %756 : vector<2x8x128xi32>
    %758 = arith.extui %757 : vector<2x8x128xi1> to vector<2x8x128xi32>
    %cst_118 = arith.constant dense<0> : vector<2x8xi32>
    %759 = vector.multi_reduction <add>, %758, %cst_118 [2] : vector<2x8x128xi32> to vector<2x8xi32>
    %760 = vector.shape_cast %759 : vector<2x8xi32> to vector<2x8x1xi32>
    %cst_119 = arith.constant dense<0> : vector<2x1xi32>
    %761 = vector.multi_reduction <add>, %760, %cst_119 [1] : vector<2x8x1xi32> to vector<2x1xi32>
    %762 = vector.shape_cast %761 : vector<2x1xi32> to vector<2x1x1xi32>
    %763 = arith.cmpi sge, %762, %683 : vector<2x1x1xi32>
    %764 = arith.extui %763 : vector<2x1x1xi1> to vector<2x1x1xi32>
    %765 = arith.addi %753, %764 : vector<2x1x1xi32>
    %c201326592_i32 = arith.constant 201326592 : i32
    %766 = vector.broadcast %c201326592_i32 : i32 to vector<2x1x1xi32>
    %767 = arith.addi %740, %766 : vector<2x1x1xi32>
    %768 = vector.broadcast %767 : vector<2x1x1xi32> to vector<2x8x128xi32>
    %769 = arith.cmpi sge, %679, %768 : vector<2x8x128xi32>
    %770 = arith.extui %769 : vector<2x8x128xi1> to vector<2x8x128xi32>
    %cst_120 = arith.constant dense<0> : vector<2x8xi32>
    %771 = vector.multi_reduction <add>, %770, %cst_120 [2] : vector<2x8x128xi32> to vector<2x8xi32>
    %772 = vector.shape_cast %771 : vector<2x8xi32> to vector<2x8x1xi32>
    %cst_121 = arith.constant dense<0> : vector<2x1xi32>
    %773 = vector.multi_reduction <add>, %772, %cst_121 [1] : vector<2x8x1xi32> to vector<2x1xi32>
    %774 = vector.shape_cast %773 : vector<2x1xi32> to vector<2x1x1xi32>
    %775 = arith.cmpi sge, %774, %683 : vector<2x1x1xi32>
    %776 = arith.extui %775 : vector<2x1x1xi1> to vector<2x1x1xi32>
    %777 = arith.addi %765, %776 : vector<2x1x1xi32>
    %c67108864_i32_122 = arith.constant 67108864 : i32
    %778 = vector.broadcast %c67108864_i32_122 : i32 to vector<2x1x1xi32>
    %779 = arith.muli %777, %778 : vector<2x1x1xi32>
    %780 = arith.addi %740, %779 : vector<2x1x1xi32>
    %c0_i32_123 = arith.constant 0 : i32
    %781 = vector.broadcast %c0_i32_123 : i32 to vector<2x1x1xi32>
    %c16777216_i32 = arith.constant 16777216 : i32
    %782 = vector.broadcast %c16777216_i32 : i32 to vector<2x1x1xi32>
    %783 = arith.addi %780, %782 : vector<2x1x1xi32>
    %784 = vector.broadcast %783 : vector<2x1x1xi32> to vector<2x8x128xi32>
    %785 = arith.cmpi sge, %679, %784 : vector<2x8x128xi32>
    %786 = arith.extui %785 : vector<2x8x128xi1> to vector<2x8x128xi32>
    %cst_124 = arith.constant dense<0> : vector<2x8xi32>
    %787 = vector.multi_reduction <add>, %786, %cst_124 [2] : vector<2x8x128xi32> to vector<2x8xi32>
    %788 = vector.shape_cast %787 : vector<2x8xi32> to vector<2x8x1xi32>
    %cst_125 = arith.constant dense<0> : vector<2x1xi32>
    %789 = vector.multi_reduction <add>, %788, %cst_125 [1] : vector<2x8x1xi32> to vector<2x1xi32>
    %790 = vector.shape_cast %789 : vector<2x1xi32> to vector<2x1x1xi32>
    %791 = arith.cmpi sge, %790, %683 : vector<2x1x1xi32>
    %792 = arith.extui %791 : vector<2x1x1xi1> to vector<2x1x1xi32>
    %793 = arith.addi %781, %792 : vector<2x1x1xi32>
    %c33554432_i32 = arith.constant 33554432 : i32
    %794 = vector.broadcast %c33554432_i32 : i32 to vector<2x1x1xi32>
    %795 = arith.addi %780, %794 : vector<2x1x1xi32>
    %796 = vector.broadcast %795 : vector<2x1x1xi32> to vector<2x8x128xi32>
    %797 = arith.cmpi sge, %679, %796 : vector<2x8x128xi32>
    %798 = arith.extui %797 : vector<2x8x128xi1> to vector<2x8x128xi32>
    %cst_126 = arith.constant dense<0> : vector<2x8xi32>
    %799 = vector.multi_reduction <add>, %798, %cst_126 [2] : vector<2x8x128xi32> to vector<2x8xi32>
    %800 = vector.shape_cast %799 : vector<2x8xi32> to vector<2x8x1xi32>
    %cst_127 = arith.constant dense<0> : vector<2x1xi32>
    %801 = vector.multi_reduction <add>, %800, %cst_127 [1] : vector<2x8x1xi32> to vector<2x1xi32>
    %802 = vector.shape_cast %801 : vector<2x1xi32> to vector<2x1x1xi32>
    %803 = arith.cmpi sge, %802, %683 : vector<2x1x1xi32>
    %804 = arith.extui %803 : vector<2x1x1xi1> to vector<2x1x1xi32>
    %805 = arith.addi %793, %804 : vector<2x1x1xi32>
    %c50331648_i32 = arith.constant 50331648 : i32
    %806 = vector.broadcast %c50331648_i32 : i32 to vector<2x1x1xi32>
    %807 = arith.addi %780, %806 : vector<2x1x1xi32>
    %808 = vector.broadcast %807 : vector<2x1x1xi32> to vector<2x8x128xi32>
    %809 = arith.cmpi sge, %679, %808 : vector<2x8x128xi32>
    %810 = arith.extui %809 : vector<2x8x128xi1> to vector<2x8x128xi32>
    %cst_128 = arith.constant dense<0> : vector<2x8xi32>
    %811 = vector.multi_reduction <add>, %810, %cst_128 [2] : vector<2x8x128xi32> to vector<2x8xi32>
    %812 = vector.shape_cast %811 : vector<2x8xi32> to vector<2x8x1xi32>
    %cst_129 = arith.constant dense<0> : vector<2x1xi32>
    %813 = vector.multi_reduction <add>, %812, %cst_129 [1] : vector<2x8x1xi32> to vector<2x1xi32>
    %814 = vector.shape_cast %813 : vector<2x1xi32> to vector<2x1x1xi32>
    %815 = arith.cmpi sge, %814, %683 : vector<2x1x1xi32>
    %816 = arith.extui %815 : vector<2x1x1xi1> to vector<2x1x1xi32>
    %817 = arith.addi %805, %816 : vector<2x1x1xi32>
    %c16777216_i32_130 = arith.constant 16777216 : i32
    %818 = vector.broadcast %c16777216_i32_130 : i32 to vector<2x1x1xi32>
    %819 = arith.muli %817, %818 : vector<2x1x1xi32>
    %820 = arith.addi %780, %819 : vector<2x1x1xi32>
    %c0_i32_131 = arith.constant 0 : i32
    %821 = vector.broadcast %c0_i32_131 : i32 to vector<2x1x1xi32>
    %c4194304_i32 = arith.constant 4194304 : i32
    %822 = vector.broadcast %c4194304_i32 : i32 to vector<2x1x1xi32>
    %823 = arith.addi %820, %822 : vector<2x1x1xi32>
    %824 = vector.broadcast %823 : vector<2x1x1xi32> to vector<2x8x128xi32>
    %825 = arith.cmpi sge, %679, %824 : vector<2x8x128xi32>
    %826 = arith.extui %825 : vector<2x8x128xi1> to vector<2x8x128xi32>
    %cst_132 = arith.constant dense<0> : vector<2x8xi32>
    %827 = vector.multi_reduction <add>, %826, %cst_132 [2] : vector<2x8x128xi32> to vector<2x8xi32>
    %828 = vector.shape_cast %827 : vector<2x8xi32> to vector<2x8x1xi32>
    %cst_133 = arith.constant dense<0> : vector<2x1xi32>
    %829 = vector.multi_reduction <add>, %828, %cst_133 [1] : vector<2x8x1xi32> to vector<2x1xi32>
    %830 = vector.shape_cast %829 : vector<2x1xi32> to vector<2x1x1xi32>
    %831 = arith.cmpi sge, %830, %683 : vector<2x1x1xi32>
    %832 = arith.extui %831 : vector<2x1x1xi1> to vector<2x1x1xi32>
    %833 = arith.addi %821, %832 : vector<2x1x1xi32>
    %c8388608_i32 = arith.constant 8388608 : i32
    %834 = vector.broadcast %c8388608_i32 : i32 to vector<2x1x1xi32>
    %835 = arith.addi %820, %834 : vector<2x1x1xi32>
    %836 = vector.broadcast %835 : vector<2x1x1xi32> to vector<2x8x128xi32>
    %837 = arith.cmpi sge, %679, %836 : vector<2x8x128xi32>
    %838 = arith.extui %837 : vector<2x8x128xi1> to vector<2x8x128xi32>
    %cst_134 = arith.constant dense<0> : vector<2x8xi32>
    %839 = vector.multi_reduction <add>, %838, %cst_134 [2] : vector<2x8x128xi32> to vector<2x8xi32>
    %840 = vector.shape_cast %839 : vector<2x8xi32> to vector<2x8x1xi32>
    %cst_135 = arith.constant dense<0> : vector<2x1xi32>
    %841 = vector.multi_reduction <add>, %840, %cst_135 [1] : vector<2x8x1xi32> to vector<2x1xi32>
    %842 = vector.shape_cast %841 : vector<2x1xi32> to vector<2x1x1xi32>
    %843 = arith.cmpi sge, %842, %683 : vector<2x1x1xi32>
    %844 = arith.extui %843 : vector<2x1x1xi1> to vector<2x1x1xi32>
    %845 = arith.addi %833, %844 : vector<2x1x1xi32>
    %c12582912_i32 = arith.constant 12582912 : i32
    %846 = vector.broadcast %c12582912_i32 : i32 to vector<2x1x1xi32>
    %847 = arith.addi %820, %846 : vector<2x1x1xi32>
    %848 = vector.broadcast %847 : vector<2x1x1xi32> to vector<2x8x128xi32>
    %849 = arith.cmpi sge, %679, %848 : vector<2x8x128xi32>
    %850 = arith.extui %849 : vector<2x8x128xi1> to vector<2x8x128xi32>
    %cst_136 = arith.constant dense<0> : vector<2x8xi32>
    %851 = vector.multi_reduction <add>, %850, %cst_136 [2] : vector<2x8x128xi32> to vector<2x8xi32>
    %852 = vector.shape_cast %851 : vector<2x8xi32> to vector<2x8x1xi32>
    %cst_137 = arith.constant dense<0> : vector<2x1xi32>
    %853 = vector.multi_reduction <add>, %852, %cst_137 [1] : vector<2x8x1xi32> to vector<2x1xi32>
    %854 = vector.shape_cast %853 : vector<2x1xi32> to vector<2x1x1xi32>
    %855 = arith.cmpi sge, %854, %683 : vector<2x1x1xi32>
    %856 = arith.extui %855 : vector<2x1x1xi1> to vector<2x1x1xi32>
    %857 = arith.addi %845, %856 : vector<2x1x1xi32>
    %c4194304_i32_138 = arith.constant 4194304 : i32
    %858 = vector.broadcast %c4194304_i32_138 : i32 to vector<2x1x1xi32>
    %859 = arith.muli %857, %858 : vector<2x1x1xi32>
    %860 = arith.addi %820, %859 : vector<2x1x1xi32>
    %c0_i32_139 = arith.constant 0 : i32
    %861 = vector.broadcast %c0_i32_139 : i32 to vector<2x1x1xi32>
    %c1048576_i32 = arith.constant 1048576 : i32
    %862 = vector.broadcast %c1048576_i32 : i32 to vector<2x1x1xi32>
    %863 = arith.addi %860, %862 : vector<2x1x1xi32>
    %864 = vector.broadcast %863 : vector<2x1x1xi32> to vector<2x8x128xi32>
    %865 = arith.cmpi sge, %679, %864 : vector<2x8x128xi32>
    %866 = arith.extui %865 : vector<2x8x128xi1> to vector<2x8x128xi32>
    %cst_140 = arith.constant dense<0> : vector<2x8xi32>
    %867 = vector.multi_reduction <add>, %866, %cst_140 [2] : vector<2x8x128xi32> to vector<2x8xi32>
    %868 = vector.shape_cast %867 : vector<2x8xi32> to vector<2x8x1xi32>
    %cst_141 = arith.constant dense<0> : vector<2x1xi32>
    %869 = vector.multi_reduction <add>, %868, %cst_141 [1] : vector<2x8x1xi32> to vector<2x1xi32>
    %870 = vector.shape_cast %869 : vector<2x1xi32> to vector<2x1x1xi32>
    %871 = arith.cmpi sge, %870, %683 : vector<2x1x1xi32>
    %872 = arith.extui %871 : vector<2x1x1xi1> to vector<2x1x1xi32>
    %873 = arith.addi %861, %872 : vector<2x1x1xi32>
    %c2097152_i32 = arith.constant 2097152 : i32
    %874 = vector.broadcast %c2097152_i32 : i32 to vector<2x1x1xi32>
    %875 = arith.addi %860, %874 : vector<2x1x1xi32>
    %876 = vector.broadcast %875 : vector<2x1x1xi32> to vector<2x8x128xi32>
    %877 = arith.cmpi sge, %679, %876 : vector<2x8x128xi32>
    %878 = arith.extui %877 : vector<2x8x128xi1> to vector<2x8x128xi32>
    %cst_142 = arith.constant dense<0> : vector<2x8xi32>
    %879 = vector.multi_reduction <add>, %878, %cst_142 [2] : vector<2x8x128xi32> to vector<2x8xi32>
    %880 = vector.shape_cast %879 : vector<2x8xi32> to vector<2x8x1xi32>
    %cst_143 = arith.constant dense<0> : vector<2x1xi32>
    %881 = vector.multi_reduction <add>, %880, %cst_143 [1] : vector<2x8x1xi32> to vector<2x1xi32>
    %882 = vector.shape_cast %881 : vector<2x1xi32> to vector<2x1x1xi32>
    %883 = arith.cmpi sge, %882, %683 : vector<2x1x1xi32>
    %884 = arith.extui %883 : vector<2x1x1xi1> to vector<2x1x1xi32>
    %885 = arith.addi %873, %884 : vector<2x1x1xi32>
    %c3145728_i32 = arith.constant 3145728 : i32
    %886 = vector.broadcast %c3145728_i32 : i32 to vector<2x1x1xi32>
    %887 = arith.addi %860, %886 : vector<2x1x1xi32>
    %888 = vector.broadcast %887 : vector<2x1x1xi32> to vector<2x8x128xi32>
    %889 = arith.cmpi sge, %679, %888 : vector<2x8x128xi32>
    %890 = arith.extui %889 : vector<2x8x128xi1> to vector<2x8x128xi32>
    %cst_144 = arith.constant dense<0> : vector<2x8xi32>
    %891 = vector.multi_reduction <add>, %890, %cst_144 [2] : vector<2x8x128xi32> to vector<2x8xi32>
    %892 = vector.shape_cast %891 : vector<2x8xi32> to vector<2x8x1xi32>
    %cst_145 = arith.constant dense<0> : vector<2x1xi32>
    %893 = vector.multi_reduction <add>, %892, %cst_145 [1] : vector<2x8x1xi32> to vector<2x1xi32>
    %894 = vector.shape_cast %893 : vector<2x1xi32> to vector<2x1x1xi32>
    %895 = arith.cmpi sge, %894, %683 : vector<2x1x1xi32>
    %896 = arith.extui %895 : vector<2x1x1xi1> to vector<2x1x1xi32>
    %897 = arith.addi %885, %896 : vector<2x1x1xi32>
    %c1048576_i32_146 = arith.constant 1048576 : i32
    %898 = vector.broadcast %c1048576_i32_146 : i32 to vector<2x1x1xi32>
    %899 = arith.muli %897, %898 : vector<2x1x1xi32>
    %900 = arith.addi %860, %899 : vector<2x1x1xi32>
    %c0_i32_147 = arith.constant 0 : i32
    %901 = vector.broadcast %c0_i32_147 : i32 to vector<2x1x1xi32>
    %c262144_i32 = arith.constant 262144 : i32
    %902 = vector.broadcast %c262144_i32 : i32 to vector<2x1x1xi32>
    %903 = arith.addi %900, %902 : vector<2x1x1xi32>
    %904 = vector.broadcast %903 : vector<2x1x1xi32> to vector<2x8x128xi32>
    %905 = arith.cmpi sge, %679, %904 : vector<2x8x128xi32>
    %906 = arith.extui %905 : vector<2x8x128xi1> to vector<2x8x128xi32>
    %cst_148 = arith.constant dense<0> : vector<2x8xi32>
    %907 = vector.multi_reduction <add>, %906, %cst_148 [2] : vector<2x8x128xi32> to vector<2x8xi32>
    %908 = vector.shape_cast %907 : vector<2x8xi32> to vector<2x8x1xi32>
    %cst_149 = arith.constant dense<0> : vector<2x1xi32>
    %909 = vector.multi_reduction <add>, %908, %cst_149 [1] : vector<2x8x1xi32> to vector<2x1xi32>
    %910 = vector.shape_cast %909 : vector<2x1xi32> to vector<2x1x1xi32>
    %911 = arith.cmpi sge, %910, %683 : vector<2x1x1xi32>
    %912 = arith.extui %911 : vector<2x1x1xi1> to vector<2x1x1xi32>
    %913 = arith.addi %901, %912 : vector<2x1x1xi32>
    %c524288_i32 = arith.constant 524288 : i32
    %914 = vector.broadcast %c524288_i32 : i32 to vector<2x1x1xi32>
    %915 = arith.addi %900, %914 : vector<2x1x1xi32>
    %916 = vector.broadcast %915 : vector<2x1x1xi32> to vector<2x8x128xi32>
    %917 = arith.cmpi sge, %679, %916 : vector<2x8x128xi32>
    %918 = arith.extui %917 : vector<2x8x128xi1> to vector<2x8x128xi32>
    %cst_150 = arith.constant dense<0> : vector<2x8xi32>
    %919 = vector.multi_reduction <add>, %918, %cst_150 [2] : vector<2x8x128xi32> to vector<2x8xi32>
    %920 = vector.shape_cast %919 : vector<2x8xi32> to vector<2x8x1xi32>
    %cst_151 = arith.constant dense<0> : vector<2x1xi32>
    %921 = vector.multi_reduction <add>, %920, %cst_151 [1] : vector<2x8x1xi32> to vector<2x1xi32>
    %922 = vector.shape_cast %921 : vector<2x1xi32> to vector<2x1x1xi32>
    %923 = arith.cmpi sge, %922, %683 : vector<2x1x1xi32>
    %924 = arith.extui %923 : vector<2x1x1xi1> to vector<2x1x1xi32>
    %925 = arith.addi %913, %924 : vector<2x1x1xi32>
    %c786432_i32 = arith.constant 786432 : i32
    %926 = vector.broadcast %c786432_i32 : i32 to vector<2x1x1xi32>
    %927 = arith.addi %900, %926 : vector<2x1x1xi32>
    %928 = vector.broadcast %927 : vector<2x1x1xi32> to vector<2x8x128xi32>
    %929 = arith.cmpi sge, %679, %928 : vector<2x8x128xi32>
    %930 = arith.extui %929 : vector<2x8x128xi1> to vector<2x8x128xi32>
    %cst_152 = arith.constant dense<0> : vector<2x8xi32>
    %931 = vector.multi_reduction <add>, %930, %cst_152 [2] : vector<2x8x128xi32> to vector<2x8xi32>
    %932 = vector.shape_cast %931 : vector<2x8xi32> to vector<2x8x1xi32>
    %cst_153 = arith.constant dense<0> : vector<2x1xi32>
    %933 = vector.multi_reduction <add>, %932, %cst_153 [1] : vector<2x8x1xi32> to vector<2x1xi32>
    %934 = vector.shape_cast %933 : vector<2x1xi32> to vector<2x1x1xi32>
    %935 = arith.cmpi sge, %934, %683 : vector<2x1x1xi32>
    %936 = arith.extui %935 : vector<2x1x1xi1> to vector<2x1x1xi32>
    %937 = arith.addi %925, %936 : vector<2x1x1xi32>
    %c262144_i32_154 = arith.constant 262144 : i32
    %938 = vector.broadcast %c262144_i32_154 : i32 to vector<2x1x1xi32>
    %939 = arith.muli %937, %938 : vector<2x1x1xi32>
    %940 = arith.addi %900, %939 : vector<2x1x1xi32>
    %c0_i32_155 = arith.constant 0 : i32
    %941 = vector.broadcast %c0_i32_155 : i32 to vector<2x1x1xi32>
    %c65536_i32 = arith.constant 65536 : i32
    %942 = vector.broadcast %c65536_i32 : i32 to vector<2x1x1xi32>
    %943 = arith.addi %940, %942 : vector<2x1x1xi32>
    %944 = vector.broadcast %943 : vector<2x1x1xi32> to vector<2x8x128xi32>
    %945 = arith.cmpi sge, %679, %944 : vector<2x8x128xi32>
    %946 = arith.extui %945 : vector<2x8x128xi1> to vector<2x8x128xi32>
    %cst_156 = arith.constant dense<0> : vector<2x8xi32>
    %947 = vector.multi_reduction <add>, %946, %cst_156 [2] : vector<2x8x128xi32> to vector<2x8xi32>
    %948 = vector.shape_cast %947 : vector<2x8xi32> to vector<2x8x1xi32>
    %cst_157 = arith.constant dense<0> : vector<2x1xi32>
    %949 = vector.multi_reduction <add>, %948, %cst_157 [1] : vector<2x8x1xi32> to vector<2x1xi32>
    %950 = vector.shape_cast %949 : vector<2x1xi32> to vector<2x1x1xi32>
    %951 = arith.cmpi sge, %950, %683 : vector<2x1x1xi32>
    %952 = arith.extui %951 : vector<2x1x1xi1> to vector<2x1x1xi32>
    %953 = arith.addi %941, %952 : vector<2x1x1xi32>
    %c131072_i32 = arith.constant 131072 : i32
    %954 = vector.broadcast %c131072_i32 : i32 to vector<2x1x1xi32>
    %955 = arith.addi %940, %954 : vector<2x1x1xi32>
    %956 = vector.broadcast %955 : vector<2x1x1xi32> to vector<2x8x128xi32>
    %957 = arith.cmpi sge, %679, %956 : vector<2x8x128xi32>
    %958 = arith.extui %957 : vector<2x8x128xi1> to vector<2x8x128xi32>
    %cst_158 = arith.constant dense<0> : vector<2x8xi32>
    %959 = vector.multi_reduction <add>, %958, %cst_158 [2] : vector<2x8x128xi32> to vector<2x8xi32>
    %960 = vector.shape_cast %959 : vector<2x8xi32> to vector<2x8x1xi32>
    %cst_159 = arith.constant dense<0> : vector<2x1xi32>
    %961 = vector.multi_reduction <add>, %960, %cst_159 [1] : vector<2x8x1xi32> to vector<2x1xi32>
    %962 = vector.shape_cast %961 : vector<2x1xi32> to vector<2x1x1xi32>
    %963 = arith.cmpi sge, %962, %683 : vector<2x1x1xi32>
    %964 = arith.extui %963 : vector<2x1x1xi1> to vector<2x1x1xi32>
    %965 = arith.addi %953, %964 : vector<2x1x1xi32>
    %c196608_i32 = arith.constant 196608 : i32
    %966 = vector.broadcast %c196608_i32 : i32 to vector<2x1x1xi32>
    %967 = arith.addi %940, %966 : vector<2x1x1xi32>
    %968 = vector.broadcast %967 : vector<2x1x1xi32> to vector<2x8x128xi32>
    %969 = arith.cmpi sge, %679, %968 : vector<2x8x128xi32>
    %970 = arith.extui %969 : vector<2x8x128xi1> to vector<2x8x128xi32>
    %cst_160 = arith.constant dense<0> : vector<2x8xi32>
    %971 = vector.multi_reduction <add>, %970, %cst_160 [2] : vector<2x8x128xi32> to vector<2x8xi32>
    %972 = vector.shape_cast %971 : vector<2x8xi32> to vector<2x8x1xi32>
    %cst_161 = arith.constant dense<0> : vector<2x1xi32>
    %973 = vector.multi_reduction <add>, %972, %cst_161 [1] : vector<2x8x1xi32> to vector<2x1xi32>
    %974 = vector.shape_cast %973 : vector<2x1xi32> to vector<2x1x1xi32>
    %975 = arith.cmpi sge, %974, %683 : vector<2x1x1xi32>
    %976 = arith.extui %975 : vector<2x1x1xi1> to vector<2x1x1xi32>
    %977 = arith.addi %965, %976 : vector<2x1x1xi32>
    %c65536_i32_162 = arith.constant 65536 : i32
    %978 = vector.broadcast %c65536_i32_162 : i32 to vector<2x1x1xi32>
    %979 = arith.muli %977, %978 : vector<2x1x1xi32>
    %980 = arith.addi %940, %979 : vector<2x1x1xi32>
    %c0_i32_163 = arith.constant 0 : i32
    %981 = vector.broadcast %c0_i32_163 : i32 to vector<2x1x1xi32>
    %c16384_i32 = arith.constant 16384 : i32
    %982 = vector.broadcast %c16384_i32 : i32 to vector<2x1x1xi32>
    %983 = arith.addi %980, %982 : vector<2x1x1xi32>
    %984 = vector.broadcast %983 : vector<2x1x1xi32> to vector<2x8x128xi32>
    %985 = arith.cmpi sge, %679, %984 : vector<2x8x128xi32>
    %986 = arith.extui %985 : vector<2x8x128xi1> to vector<2x8x128xi32>
    %cst_164 = arith.constant dense<0> : vector<2x8xi32>
    %987 = vector.multi_reduction <add>, %986, %cst_164 [2] : vector<2x8x128xi32> to vector<2x8xi32>
    %988 = vector.shape_cast %987 : vector<2x8xi32> to vector<2x8x1xi32>
    %cst_165 = arith.constant dense<0> : vector<2x1xi32>
    %989 = vector.multi_reduction <add>, %988, %cst_165 [1] : vector<2x8x1xi32> to vector<2x1xi32>
    %990 = vector.shape_cast %989 : vector<2x1xi32> to vector<2x1x1xi32>
    %991 = arith.cmpi sge, %990, %683 : vector<2x1x1xi32>
    %992 = arith.extui %991 : vector<2x1x1xi1> to vector<2x1x1xi32>
    %993 = arith.addi %981, %992 : vector<2x1x1xi32>
    %c32768_i32 = arith.constant 32768 : i32
    %994 = vector.broadcast %c32768_i32 : i32 to vector<2x1x1xi32>
    %995 = arith.addi %980, %994 : vector<2x1x1xi32>
    %996 = vector.broadcast %995 : vector<2x1x1xi32> to vector<2x8x128xi32>
    %997 = arith.cmpi sge, %679, %996 : vector<2x8x128xi32>
    %998 = arith.extui %997 : vector<2x8x128xi1> to vector<2x8x128xi32>
    %cst_166 = arith.constant dense<0> : vector<2x8xi32>
    %999 = vector.multi_reduction <add>, %998, %cst_166 [2] : vector<2x8x128xi32> to vector<2x8xi32>
    %1000 = vector.shape_cast %999 : vector<2x8xi32> to vector<2x8x1xi32>
    %cst_167 = arith.constant dense<0> : vector<2x1xi32>
    %1001 = vector.multi_reduction <add>, %1000, %cst_167 [1] : vector<2x8x1xi32> to vector<2x1xi32>
    %1002 = vector.shape_cast %1001 : vector<2x1xi32> to vector<2x1x1xi32>
    %1003 = arith.cmpi sge, %1002, %683 : vector<2x1x1xi32>
    %1004 = arith.extui %1003 : vector<2x1x1xi1> to vector<2x1x1xi32>
    %1005 = arith.addi %993, %1004 : vector<2x1x1xi32>
    %c49152_i32 = arith.constant 49152 : i32
    %1006 = vector.broadcast %c49152_i32 : i32 to vector<2x1x1xi32>
    %1007 = arith.addi %980, %1006 : vector<2x1x1xi32>
    %1008 = vector.broadcast %1007 : vector<2x1x1xi32> to vector<2x8x128xi32>
    %1009 = arith.cmpi sge, %679, %1008 : vector<2x8x128xi32>
    %1010 = arith.extui %1009 : vector<2x8x128xi1> to vector<2x8x128xi32>
    %cst_168 = arith.constant dense<0> : vector<2x8xi32>
    %1011 = vector.multi_reduction <add>, %1010, %cst_168 [2] : vector<2x8x128xi32> to vector<2x8xi32>
    %1012 = vector.shape_cast %1011 : vector<2x8xi32> to vector<2x8x1xi32>
    %cst_169 = arith.constant dense<0> : vector<2x1xi32>
    %1013 = vector.multi_reduction <add>, %1012, %cst_169 [1] : vector<2x8x1xi32> to vector<2x1xi32>
    %1014 = vector.shape_cast %1013 : vector<2x1xi32> to vector<2x1x1xi32>
    %1015 = arith.cmpi sge, %1014, %683 : vector<2x1x1xi32>
    %1016 = arith.extui %1015 : vector<2x1x1xi1> to vector<2x1x1xi32>
    %1017 = arith.addi %1005, %1016 : vector<2x1x1xi32>
    %c16384_i32_170 = arith.constant 16384 : i32
    %1018 = vector.broadcast %c16384_i32_170 : i32 to vector<2x1x1xi32>
    %1019 = arith.muli %1017, %1018 : vector<2x1x1xi32>
    %1020 = arith.addi %980, %1019 : vector<2x1x1xi32>
    %c0_i32_171 = arith.constant 0 : i32
    %1021 = vector.broadcast %c0_i32_171 : i32 to vector<2x1x1xi32>
    %c4096_i32 = arith.constant 4096 : i32
    %1022 = vector.broadcast %c4096_i32 : i32 to vector<2x1x1xi32>
    %1023 = arith.addi %1020, %1022 : vector<2x1x1xi32>
    %1024 = vector.broadcast %1023 : vector<2x1x1xi32> to vector<2x8x128xi32>
    %1025 = arith.cmpi sge, %679, %1024 : vector<2x8x128xi32>
    %1026 = arith.extui %1025 : vector<2x8x128xi1> to vector<2x8x128xi32>
    %cst_172 = arith.constant dense<0> : vector<2x8xi32>
    %1027 = vector.multi_reduction <add>, %1026, %cst_172 [2] : vector<2x8x128xi32> to vector<2x8xi32>
    %1028 = vector.shape_cast %1027 : vector<2x8xi32> to vector<2x8x1xi32>
    %cst_173 = arith.constant dense<0> : vector<2x1xi32>
    %1029 = vector.multi_reduction <add>, %1028, %cst_173 [1] : vector<2x8x1xi32> to vector<2x1xi32>
    %1030 = vector.shape_cast %1029 : vector<2x1xi32> to vector<2x1x1xi32>
    %1031 = arith.cmpi sge, %1030, %683 : vector<2x1x1xi32>
    %1032 = arith.extui %1031 : vector<2x1x1xi1> to vector<2x1x1xi32>
    %1033 = arith.addi %1021, %1032 : vector<2x1x1xi32>
    %c8192_i32 = arith.constant 8192 : i32
    %1034 = vector.broadcast %c8192_i32 : i32 to vector<2x1x1xi32>
    %1035 = arith.addi %1020, %1034 : vector<2x1x1xi32>
    %1036 = vector.broadcast %1035 : vector<2x1x1xi32> to vector<2x8x128xi32>
    %1037 = arith.cmpi sge, %679, %1036 : vector<2x8x128xi32>
    %1038 = arith.extui %1037 : vector<2x8x128xi1> to vector<2x8x128xi32>
    %cst_174 = arith.constant dense<0> : vector<2x8xi32>
    %1039 = vector.multi_reduction <add>, %1038, %cst_174 [2] : vector<2x8x128xi32> to vector<2x8xi32>
    %1040 = vector.shape_cast %1039 : vector<2x8xi32> to vector<2x8x1xi32>
    %cst_175 = arith.constant dense<0> : vector<2x1xi32>
    %1041 = vector.multi_reduction <add>, %1040, %cst_175 [1] : vector<2x8x1xi32> to vector<2x1xi32>
    %1042 = vector.shape_cast %1041 : vector<2x1xi32> to vector<2x1x1xi32>
    %1043 = arith.cmpi sge, %1042, %683 : vector<2x1x1xi32>
    %1044 = arith.extui %1043 : vector<2x1x1xi1> to vector<2x1x1xi32>
    %1045 = arith.addi %1033, %1044 : vector<2x1x1xi32>
    %c12288_i32 = arith.constant 12288 : i32
    %1046 = vector.broadcast %c12288_i32 : i32 to vector<2x1x1xi32>
    %1047 = arith.addi %1020, %1046 : vector<2x1x1xi32>
    %1048 = vector.broadcast %1047 : vector<2x1x1xi32> to vector<2x8x128xi32>
    %1049 = arith.cmpi sge, %679, %1048 : vector<2x8x128xi32>
    %1050 = arith.extui %1049 : vector<2x8x128xi1> to vector<2x8x128xi32>
    %cst_176 = arith.constant dense<0> : vector<2x8xi32>
    %1051 = vector.multi_reduction <add>, %1050, %cst_176 [2] : vector<2x8x128xi32> to vector<2x8xi32>
    %1052 = vector.shape_cast %1051 : vector<2x8xi32> to vector<2x8x1xi32>
    %cst_177 = arith.constant dense<0> : vector<2x1xi32>
    %1053 = vector.multi_reduction <add>, %1052, %cst_177 [1] : vector<2x8x1xi32> to vector<2x1xi32>
    %1054 = vector.shape_cast %1053 : vector<2x1xi32> to vector<2x1x1xi32>
    %1055 = arith.cmpi sge, %1054, %683 : vector<2x1x1xi32>
    %1056 = arith.extui %1055 : vector<2x1x1xi1> to vector<2x1x1xi32>
    %1057 = arith.addi %1045, %1056 : vector<2x1x1xi32>
    %c4096_i32_178 = arith.constant 4096 : i32
    %1058 = vector.broadcast %c4096_i32_178 : i32 to vector<2x1x1xi32>
    %1059 = arith.muli %1057, %1058 : vector<2x1x1xi32>
    %1060 = arith.addi %1020, %1059 : vector<2x1x1xi32>
    %c0_i32_179 = arith.constant 0 : i32
    %1061 = vector.broadcast %c0_i32_179 : i32 to vector<2x1x1xi32>
    %c1024_i32_180 = arith.constant 1024 : i32
    %1062 = vector.broadcast %c1024_i32_180 : i32 to vector<2x1x1xi32>
    %1063 = arith.addi %1060, %1062 : vector<2x1x1xi32>
    %1064 = vector.broadcast %1063 : vector<2x1x1xi32> to vector<2x8x128xi32>
    %1065 = arith.cmpi sge, %679, %1064 : vector<2x8x128xi32>
    %1066 = arith.extui %1065 : vector<2x8x128xi1> to vector<2x8x128xi32>
    %cst_181 = arith.constant dense<0> : vector<2x8xi32>
    %1067 = vector.multi_reduction <add>, %1066, %cst_181 [2] : vector<2x8x128xi32> to vector<2x8xi32>
    %1068 = vector.shape_cast %1067 : vector<2x8xi32> to vector<2x8x1xi32>
    %cst_182 = arith.constant dense<0> : vector<2x1xi32>
    %1069 = vector.multi_reduction <add>, %1068, %cst_182 [1] : vector<2x8x1xi32> to vector<2x1xi32>
    %1070 = vector.shape_cast %1069 : vector<2x1xi32> to vector<2x1x1xi32>
    %1071 = arith.cmpi sge, %1070, %683 : vector<2x1x1xi32>
    %1072 = arith.extui %1071 : vector<2x1x1xi1> to vector<2x1x1xi32>
    %1073 = arith.addi %1061, %1072 : vector<2x1x1xi32>
    %c2048_i32 = arith.constant 2048 : i32
    %1074 = vector.broadcast %c2048_i32 : i32 to vector<2x1x1xi32>
    %1075 = arith.addi %1060, %1074 : vector<2x1x1xi32>
    %1076 = vector.broadcast %1075 : vector<2x1x1xi32> to vector<2x8x128xi32>
    %1077 = arith.cmpi sge, %679, %1076 : vector<2x8x128xi32>
    %1078 = arith.extui %1077 : vector<2x8x128xi1> to vector<2x8x128xi32>
    %cst_183 = arith.constant dense<0> : vector<2x8xi32>
    %1079 = vector.multi_reduction <add>, %1078, %cst_183 [2] : vector<2x8x128xi32> to vector<2x8xi32>
    %1080 = vector.shape_cast %1079 : vector<2x8xi32> to vector<2x8x1xi32>
    %cst_184 = arith.constant dense<0> : vector<2x1xi32>
    %1081 = vector.multi_reduction <add>, %1080, %cst_184 [1] : vector<2x8x1xi32> to vector<2x1xi32>
    %1082 = vector.shape_cast %1081 : vector<2x1xi32> to vector<2x1x1xi32>
    %1083 = arith.cmpi sge, %1082, %683 : vector<2x1x1xi32>
    %1084 = arith.extui %1083 : vector<2x1x1xi1> to vector<2x1x1xi32>
    %1085 = arith.addi %1073, %1084 : vector<2x1x1xi32>
    %c3072_i32 = arith.constant 3072 : i32
    %1086 = vector.broadcast %c3072_i32 : i32 to vector<2x1x1xi32>
    %1087 = arith.addi %1060, %1086 : vector<2x1x1xi32>
    %1088 = vector.broadcast %1087 : vector<2x1x1xi32> to vector<2x8x128xi32>
    %1089 = arith.cmpi sge, %679, %1088 : vector<2x8x128xi32>
    %1090 = arith.extui %1089 : vector<2x8x128xi1> to vector<2x8x128xi32>
    %cst_185 = arith.constant dense<0> : vector<2x8xi32>
    %1091 = vector.multi_reduction <add>, %1090, %cst_185 [2] : vector<2x8x128xi32> to vector<2x8xi32>
    %1092 = vector.shape_cast %1091 : vector<2x8xi32> to vector<2x8x1xi32>
    %cst_186 = arith.constant dense<0> : vector<2x1xi32>
    %1093 = vector.multi_reduction <add>, %1092, %cst_186 [1] : vector<2x8x1xi32> to vector<2x1xi32>
    %1094 = vector.shape_cast %1093 : vector<2x1xi32> to vector<2x1x1xi32>
    %1095 = arith.cmpi sge, %1094, %683 : vector<2x1x1xi32>
    %1096 = arith.extui %1095 : vector<2x1x1xi1> to vector<2x1x1xi32>
    %1097 = arith.addi %1085, %1096 : vector<2x1x1xi32>
    %c1024_i32_187 = arith.constant 1024 : i32
    %1098 = vector.broadcast %c1024_i32_187 : i32 to vector<2x1x1xi32>
    %1099 = arith.muli %1097, %1098 : vector<2x1x1xi32>
    %1100 = arith.addi %1060, %1099 : vector<2x1x1xi32>
    %c0_i32_188 = arith.constant 0 : i32
    %1101 = vector.broadcast %c0_i32_188 : i32 to vector<2x1x1xi32>
    %c256_i32 = arith.constant 256 : i32
    %1102 = vector.broadcast %c256_i32 : i32 to vector<2x1x1xi32>
    %1103 = arith.addi %1100, %1102 : vector<2x1x1xi32>
    %1104 = vector.broadcast %1103 : vector<2x1x1xi32> to vector<2x8x128xi32>
    %1105 = arith.cmpi sge, %679, %1104 : vector<2x8x128xi32>
    %1106 = arith.extui %1105 : vector<2x8x128xi1> to vector<2x8x128xi32>
    %cst_189 = arith.constant dense<0> : vector<2x8xi32>
    %1107 = vector.multi_reduction <add>, %1106, %cst_189 [2] : vector<2x8x128xi32> to vector<2x8xi32>
    %1108 = vector.shape_cast %1107 : vector<2x8xi32> to vector<2x8x1xi32>
    %cst_190 = arith.constant dense<0> : vector<2x1xi32>
    %1109 = vector.multi_reduction <add>, %1108, %cst_190 [1] : vector<2x8x1xi32> to vector<2x1xi32>
    %1110 = vector.shape_cast %1109 : vector<2x1xi32> to vector<2x1x1xi32>
    %1111 = arith.cmpi sge, %1110, %683 : vector<2x1x1xi32>
    %1112 = arith.extui %1111 : vector<2x1x1xi1> to vector<2x1x1xi32>
    %1113 = arith.addi %1101, %1112 : vector<2x1x1xi32>
    %c512_i32 = arith.constant 512 : i32
    %1114 = vector.broadcast %c512_i32 : i32 to vector<2x1x1xi32>
    %1115 = arith.addi %1100, %1114 : vector<2x1x1xi32>
    %1116 = vector.broadcast %1115 : vector<2x1x1xi32> to vector<2x8x128xi32>
    %1117 = arith.cmpi sge, %679, %1116 : vector<2x8x128xi32>
    %1118 = arith.extui %1117 : vector<2x8x128xi1> to vector<2x8x128xi32>
    %cst_191 = arith.constant dense<0> : vector<2x8xi32>
    %1119 = vector.multi_reduction <add>, %1118, %cst_191 [2] : vector<2x8x128xi32> to vector<2x8xi32>
    %1120 = vector.shape_cast %1119 : vector<2x8xi32> to vector<2x8x1xi32>
    %cst_192 = arith.constant dense<0> : vector<2x1xi32>
    %1121 = vector.multi_reduction <add>, %1120, %cst_192 [1] : vector<2x8x1xi32> to vector<2x1xi32>
    %1122 = vector.shape_cast %1121 : vector<2x1xi32> to vector<2x1x1xi32>
    %1123 = arith.cmpi sge, %1122, %683 : vector<2x1x1xi32>
    %1124 = arith.extui %1123 : vector<2x1x1xi1> to vector<2x1x1xi32>
    %1125 = arith.addi %1113, %1124 : vector<2x1x1xi32>
    %c768_i32 = arith.constant 768 : i32
    %1126 = vector.broadcast %c768_i32 : i32 to vector<2x1x1xi32>
    %1127 = arith.addi %1100, %1126 : vector<2x1x1xi32>
    %1128 = vector.broadcast %1127 : vector<2x1x1xi32> to vector<2x8x128xi32>
    %1129 = arith.cmpi sge, %679, %1128 : vector<2x8x128xi32>
    %1130 = arith.extui %1129 : vector<2x8x128xi1> to vector<2x8x128xi32>
    %cst_193 = arith.constant dense<0> : vector<2x8xi32>
    %1131 = vector.multi_reduction <add>, %1130, %cst_193 [2] : vector<2x8x128xi32> to vector<2x8xi32>
    %1132 = vector.shape_cast %1131 : vector<2x8xi32> to vector<2x8x1xi32>
    %cst_194 = arith.constant dense<0> : vector<2x1xi32>
    %1133 = vector.multi_reduction <add>, %1132, %cst_194 [1] : vector<2x8x1xi32> to vector<2x1xi32>
    %1134 = vector.shape_cast %1133 : vector<2x1xi32> to vector<2x1x1xi32>
    %1135 = arith.cmpi sge, %1134, %683 : vector<2x1x1xi32>
    %1136 = arith.extui %1135 : vector<2x1x1xi1> to vector<2x1x1xi32>
    %1137 = arith.addi %1125, %1136 : vector<2x1x1xi32>
    %c256_i32_195 = arith.constant 256 : i32
    %1138 = vector.broadcast %c256_i32_195 : i32 to vector<2x1x1xi32>
    %1139 = arith.muli %1137, %1138 : vector<2x1x1xi32>
    %1140 = arith.addi %1100, %1139 : vector<2x1x1xi32>
    %c0_i32_196 = arith.constant 0 : i32
    %1141 = vector.broadcast %c0_i32_196 : i32 to vector<2x1x1xi32>
    %c64_i32 = arith.constant 64 : i32
    %1142 = vector.broadcast %c64_i32 : i32 to vector<2x1x1xi32>
    %1143 = arith.addi %1140, %1142 : vector<2x1x1xi32>
    %1144 = vector.broadcast %1143 : vector<2x1x1xi32> to vector<2x8x128xi32>
    %1145 = arith.cmpi sge, %679, %1144 : vector<2x8x128xi32>
    %1146 = arith.extui %1145 : vector<2x8x128xi1> to vector<2x8x128xi32>
    %cst_197 = arith.constant dense<0> : vector<2x8xi32>
    %1147 = vector.multi_reduction <add>, %1146, %cst_197 [2] : vector<2x8x128xi32> to vector<2x8xi32>
    %1148 = vector.shape_cast %1147 : vector<2x8xi32> to vector<2x8x1xi32>
    %cst_198 = arith.constant dense<0> : vector<2x1xi32>
    %1149 = vector.multi_reduction <add>, %1148, %cst_198 [1] : vector<2x8x1xi32> to vector<2x1xi32>
    %1150 = vector.shape_cast %1149 : vector<2x1xi32> to vector<2x1x1xi32>
    %1151 = arith.cmpi sge, %1150, %683 : vector<2x1x1xi32>
    %1152 = arith.extui %1151 : vector<2x1x1xi1> to vector<2x1x1xi32>
    %1153 = arith.addi %1141, %1152 : vector<2x1x1xi32>
    %c128_i32_199 = arith.constant 128 : i32
    %1154 = vector.broadcast %c128_i32_199 : i32 to vector<2x1x1xi32>
    %1155 = arith.addi %1140, %1154 : vector<2x1x1xi32>
    %1156 = vector.broadcast %1155 : vector<2x1x1xi32> to vector<2x8x128xi32>
    %1157 = arith.cmpi sge, %679, %1156 : vector<2x8x128xi32>
    %1158 = arith.extui %1157 : vector<2x8x128xi1> to vector<2x8x128xi32>
    %cst_200 = arith.constant dense<0> : vector<2x8xi32>
    %1159 = vector.multi_reduction <add>, %1158, %cst_200 [2] : vector<2x8x128xi32> to vector<2x8xi32>
    %1160 = vector.shape_cast %1159 : vector<2x8xi32> to vector<2x8x1xi32>
    %cst_201 = arith.constant dense<0> : vector<2x1xi32>
    %1161 = vector.multi_reduction <add>, %1160, %cst_201 [1] : vector<2x8x1xi32> to vector<2x1xi32>
    %1162 = vector.shape_cast %1161 : vector<2x1xi32> to vector<2x1x1xi32>
    %1163 = arith.cmpi sge, %1162, %683 : vector<2x1x1xi32>
    %1164 = arith.extui %1163 : vector<2x1x1xi1> to vector<2x1x1xi32>
    %1165 = arith.addi %1153, %1164 : vector<2x1x1xi32>
    %c192_i32 = arith.constant 192 : i32
    %1166 = vector.broadcast %c192_i32 : i32 to vector<2x1x1xi32>
    %1167 = arith.addi %1140, %1166 : vector<2x1x1xi32>
    %1168 = vector.broadcast %1167 : vector<2x1x1xi32> to vector<2x8x128xi32>
    %1169 = arith.cmpi sge, %679, %1168 : vector<2x8x128xi32>
    %1170 = arith.extui %1169 : vector<2x8x128xi1> to vector<2x8x128xi32>
    %cst_202 = arith.constant dense<0> : vector<2x8xi32>
    %1171 = vector.multi_reduction <add>, %1170, %cst_202 [2] : vector<2x8x128xi32> to vector<2x8xi32>
    %1172 = vector.shape_cast %1171 : vector<2x8xi32> to vector<2x8x1xi32>
    %cst_203 = arith.constant dense<0> : vector<2x1xi32>
    %1173 = vector.multi_reduction <add>, %1172, %cst_203 [1] : vector<2x8x1xi32> to vector<2x1xi32>
    %1174 = vector.shape_cast %1173 : vector<2x1xi32> to vector<2x1x1xi32>
    %1175 = arith.cmpi sge, %1174, %683 : vector<2x1x1xi32>
    %1176 = arith.extui %1175 : vector<2x1x1xi1> to vector<2x1x1xi32>
    %1177 = arith.addi %1165, %1176 : vector<2x1x1xi32>
    %c64_i32_204 = arith.constant 64 : i32
    %1178 = vector.broadcast %c64_i32_204 : i32 to vector<2x1x1xi32>
    %1179 = arith.muli %1177, %1178 : vector<2x1x1xi32>
    %1180 = arith.addi %1140, %1179 : vector<2x1x1xi32>
    %c0_i32_205 = arith.constant 0 : i32
    %1181 = vector.broadcast %c0_i32_205 : i32 to vector<2x1x1xi32>
    %c16_i32 = arith.constant 16 : i32
    %1182 = vector.broadcast %c16_i32 : i32 to vector<2x1x1xi32>
    %1183 = arith.addi %1180, %1182 : vector<2x1x1xi32>
    %1184 = vector.broadcast %1183 : vector<2x1x1xi32> to vector<2x8x128xi32>
    %1185 = arith.cmpi sge, %679, %1184 : vector<2x8x128xi32>
    %1186 = arith.extui %1185 : vector<2x8x128xi1> to vector<2x8x128xi32>
    %cst_206 = arith.constant dense<0> : vector<2x8xi32>
    %1187 = vector.multi_reduction <add>, %1186, %cst_206 [2] : vector<2x8x128xi32> to vector<2x8xi32>
    %1188 = vector.shape_cast %1187 : vector<2x8xi32> to vector<2x8x1xi32>
    %cst_207 = arith.constant dense<0> : vector<2x1xi32>
    %1189 = vector.multi_reduction <add>, %1188, %cst_207 [1] : vector<2x8x1xi32> to vector<2x1xi32>
    %1190 = vector.shape_cast %1189 : vector<2x1xi32> to vector<2x1x1xi32>
    %1191 = arith.cmpi sge, %1190, %683 : vector<2x1x1xi32>
    %1192 = arith.extui %1191 : vector<2x1x1xi1> to vector<2x1x1xi32>
    %1193 = arith.addi %1181, %1192 : vector<2x1x1xi32>
    %c32_i32 = arith.constant 32 : i32
    %1194 = vector.broadcast %c32_i32 : i32 to vector<2x1x1xi32>
    %1195 = arith.addi %1180, %1194 : vector<2x1x1xi32>
    %1196 = vector.broadcast %1195 : vector<2x1x1xi32> to vector<2x8x128xi32>
    %1197 = arith.cmpi sge, %679, %1196 : vector<2x8x128xi32>
    %1198 = arith.extui %1197 : vector<2x8x128xi1> to vector<2x8x128xi32>
    %cst_208 = arith.constant dense<0> : vector<2x8xi32>
    %1199 = vector.multi_reduction <add>, %1198, %cst_208 [2] : vector<2x8x128xi32> to vector<2x8xi32>
    %1200 = vector.shape_cast %1199 : vector<2x8xi32> to vector<2x8x1xi32>
    %cst_209 = arith.constant dense<0> : vector<2x1xi32>
    %1201 = vector.multi_reduction <add>, %1200, %cst_209 [1] : vector<2x8x1xi32> to vector<2x1xi32>
    %1202 = vector.shape_cast %1201 : vector<2x1xi32> to vector<2x1x1xi32>
    %1203 = arith.cmpi sge, %1202, %683 : vector<2x1x1xi32>
    %1204 = arith.extui %1203 : vector<2x1x1xi1> to vector<2x1x1xi32>
    %1205 = arith.addi %1193, %1204 : vector<2x1x1xi32>
    %c48_i32 = arith.constant 48 : i32
    %1206 = vector.broadcast %c48_i32 : i32 to vector<2x1x1xi32>
    %1207 = arith.addi %1180, %1206 : vector<2x1x1xi32>
    %1208 = vector.broadcast %1207 : vector<2x1x1xi32> to vector<2x8x128xi32>
    %1209 = arith.cmpi sge, %679, %1208 : vector<2x8x128xi32>
    %1210 = arith.extui %1209 : vector<2x8x128xi1> to vector<2x8x128xi32>
    %cst_210 = arith.constant dense<0> : vector<2x8xi32>
    %1211 = vector.multi_reduction <add>, %1210, %cst_210 [2] : vector<2x8x128xi32> to vector<2x8xi32>
    %1212 = vector.shape_cast %1211 : vector<2x8xi32> to vector<2x8x1xi32>
    %cst_211 = arith.constant dense<0> : vector<2x1xi32>
    %1213 = vector.multi_reduction <add>, %1212, %cst_211 [1] : vector<2x8x1xi32> to vector<2x1xi32>
    %1214 = vector.shape_cast %1213 : vector<2x1xi32> to vector<2x1x1xi32>
    %1215 = arith.cmpi sge, %1214, %683 : vector<2x1x1xi32>
    %1216 = arith.extui %1215 : vector<2x1x1xi1> to vector<2x1x1xi32>
    %1217 = arith.addi %1205, %1216 : vector<2x1x1xi32>
    %c16_i32_212 = arith.constant 16 : i32
    %1218 = vector.broadcast %c16_i32_212 : i32 to vector<2x1x1xi32>
    %1219 = arith.muli %1217, %1218 : vector<2x1x1xi32>
    %1220 = arith.addi %1180, %1219 : vector<2x1x1xi32>
    %c0_i32_213 = arith.constant 0 : i32
    %1221 = vector.broadcast %c0_i32_213 : i32 to vector<2x1x1xi32>
    %c4_i32_214 = arith.constant 4 : i32
    %1222 = vector.broadcast %c4_i32_214 : i32 to vector<2x1x1xi32>
    %1223 = arith.addi %1220, %1222 : vector<2x1x1xi32>
    %1224 = vector.broadcast %1223 : vector<2x1x1xi32> to vector<2x8x128xi32>
    %1225 = arith.cmpi sge, %679, %1224 : vector<2x8x128xi32>
    %1226 = arith.extui %1225 : vector<2x8x128xi1> to vector<2x8x128xi32>
    %cst_215 = arith.constant dense<0> : vector<2x8xi32>
    %1227 = vector.multi_reduction <add>, %1226, %cst_215 [2] : vector<2x8x128xi32> to vector<2x8xi32>
    %1228 = vector.shape_cast %1227 : vector<2x8xi32> to vector<2x8x1xi32>
    %cst_216 = arith.constant dense<0> : vector<2x1xi32>
    %1229 = vector.multi_reduction <add>, %1228, %cst_216 [1] : vector<2x8x1xi32> to vector<2x1xi32>
    %1230 = vector.shape_cast %1229 : vector<2x1xi32> to vector<2x1x1xi32>
    %1231 = arith.cmpi sge, %1230, %683 : vector<2x1x1xi32>
    %1232 = arith.extui %1231 : vector<2x1x1xi1> to vector<2x1x1xi32>
    %1233 = arith.addi %1221, %1232 : vector<2x1x1xi32>
    %c8_i32 = arith.constant 8 : i32
    %1234 = vector.broadcast %c8_i32 : i32 to vector<2x1x1xi32>
    %1235 = arith.addi %1220, %1234 : vector<2x1x1xi32>
    %1236 = vector.broadcast %1235 : vector<2x1x1xi32> to vector<2x8x128xi32>
    %1237 = arith.cmpi sge, %679, %1236 : vector<2x8x128xi32>
    %1238 = arith.extui %1237 : vector<2x8x128xi1> to vector<2x8x128xi32>
    %cst_217 = arith.constant dense<0> : vector<2x8xi32>
    %1239 = vector.multi_reduction <add>, %1238, %cst_217 [2] : vector<2x8x128xi32> to vector<2x8xi32>
    %1240 = vector.shape_cast %1239 : vector<2x8xi32> to vector<2x8x1xi32>
    %cst_218 = arith.constant dense<0> : vector<2x1xi32>
    %1241 = vector.multi_reduction <add>, %1240, %cst_218 [1] : vector<2x8x1xi32> to vector<2x1xi32>
    %1242 = vector.shape_cast %1241 : vector<2x1xi32> to vector<2x1x1xi32>
    %1243 = arith.cmpi sge, %1242, %683 : vector<2x1x1xi32>
    %1244 = arith.extui %1243 : vector<2x1x1xi1> to vector<2x1x1xi32>
    %1245 = arith.addi %1233, %1244 : vector<2x1x1xi32>
    %c12_i32 = arith.constant 12 : i32
    %1246 = vector.broadcast %c12_i32 : i32 to vector<2x1x1xi32>
    %1247 = arith.addi %1220, %1246 : vector<2x1x1xi32>
    %1248 = vector.broadcast %1247 : vector<2x1x1xi32> to vector<2x8x128xi32>
    %1249 = arith.cmpi sge, %679, %1248 : vector<2x8x128xi32>
    %1250 = arith.extui %1249 : vector<2x8x128xi1> to vector<2x8x128xi32>
    %cst_219 = arith.constant dense<0> : vector<2x8xi32>
    %1251 = vector.multi_reduction <add>, %1250, %cst_219 [2] : vector<2x8x128xi32> to vector<2x8xi32>
    %1252 = vector.shape_cast %1251 : vector<2x8xi32> to vector<2x8x1xi32>
    %cst_220 = arith.constant dense<0> : vector<2x1xi32>
    %1253 = vector.multi_reduction <add>, %1252, %cst_220 [1] : vector<2x8x1xi32> to vector<2x1xi32>
    %1254 = vector.shape_cast %1253 : vector<2x1xi32> to vector<2x1x1xi32>
    %1255 = arith.cmpi sge, %1254, %683 : vector<2x1x1xi32>
    %1256 = arith.extui %1255 : vector<2x1x1xi1> to vector<2x1x1xi32>
    %1257 = arith.addi %1245, %1256 : vector<2x1x1xi32>
    %c4_i32_221 = arith.constant 4 : i32
    %1258 = vector.broadcast %c4_i32_221 : i32 to vector<2x1x1xi32>
    %1259 = arith.muli %1257, %1258 : vector<2x1x1xi32>
    %1260 = arith.addi %1220, %1259 : vector<2x1x1xi32>
    %c0_i32_222 = arith.constant 0 : i32
    %1261 = vector.broadcast %c0_i32_222 : i32 to vector<2x1x1xi32>
    %c1_i32_223 = arith.constant 1 : i32
    %1262 = vector.broadcast %c1_i32_223 : i32 to vector<2x1x1xi32>
    %1263 = arith.addi %1260, %1262 : vector<2x1x1xi32>
    %1264 = vector.broadcast %1263 : vector<2x1x1xi32> to vector<2x8x128xi32>
    %1265 = arith.cmpi sge, %679, %1264 : vector<2x8x128xi32>
    %1266 = arith.extui %1265 : vector<2x8x128xi1> to vector<2x8x128xi32>
    %cst_224 = arith.constant dense<0> : vector<2x8xi32>
    %1267 = vector.multi_reduction <add>, %1266, %cst_224 [2] : vector<2x8x128xi32> to vector<2x8xi32>
    %1268 = vector.shape_cast %1267 : vector<2x8xi32> to vector<2x8x1xi32>
    %cst_225 = arith.constant dense<0> : vector<2x1xi32>
    %1269 = vector.multi_reduction <add>, %1268, %cst_225 [1] : vector<2x8x1xi32> to vector<2x1xi32>
    %1270 = vector.shape_cast %1269 : vector<2x1xi32> to vector<2x1x1xi32>
    %1271 = arith.cmpi sge, %1270, %683 : vector<2x1x1xi32>
    %1272 = arith.extui %1271 : vector<2x1x1xi1> to vector<2x1x1xi32>
    %1273 = arith.addi %1261, %1272 : vector<2x1x1xi32>
    %c2_i32_226 = arith.constant 2 : i32
    %1274 = vector.broadcast %c2_i32_226 : i32 to vector<2x1x1xi32>
    %1275 = arith.addi %1260, %1274 : vector<2x1x1xi32>
    %1276 = vector.broadcast %1275 : vector<2x1x1xi32> to vector<2x8x128xi32>
    %1277 = arith.cmpi sge, %679, %1276 : vector<2x8x128xi32>
    %1278 = arith.extui %1277 : vector<2x8x128xi1> to vector<2x8x128xi32>
    %cst_227 = arith.constant dense<0> : vector<2x8xi32>
    %1279 = vector.multi_reduction <add>, %1278, %cst_227 [2] : vector<2x8x128xi32> to vector<2x8xi32>
    %1280 = vector.shape_cast %1279 : vector<2x8xi32> to vector<2x8x1xi32>
    %cst_228 = arith.constant dense<0> : vector<2x1xi32>
    %1281 = vector.multi_reduction <add>, %1280, %cst_228 [1] : vector<2x8x1xi32> to vector<2x1xi32>
    %1282 = vector.shape_cast %1281 : vector<2x1xi32> to vector<2x1x1xi32>
    %1283 = arith.cmpi sge, %1282, %683 : vector<2x1x1xi32>
    %1284 = arith.extui %1283 : vector<2x1x1xi1> to vector<2x1x1xi32>
    %1285 = arith.addi %1273, %1284 : vector<2x1x1xi32>
    %c3_i32_229 = arith.constant 3 : i32
    %1286 = vector.broadcast %c3_i32_229 : i32 to vector<2x1x1xi32>
    %1287 = arith.addi %1260, %1286 : vector<2x1x1xi32>
    %1288 = vector.broadcast %1287 : vector<2x1x1xi32> to vector<2x8x128xi32>
    %1289 = arith.cmpi sge, %679, %1288 : vector<2x8x128xi32>
    %1290 = arith.extui %1289 : vector<2x8x128xi1> to vector<2x8x128xi32>
    %cst_230 = arith.constant dense<0> : vector<2x8xi32>
    %1291 = vector.multi_reduction <add>, %1290, %cst_230 [2] : vector<2x8x128xi32> to vector<2x8xi32>
    %1292 = vector.shape_cast %1291 : vector<2x8xi32> to vector<2x8x1xi32>
    %cst_231 = arith.constant dense<0> : vector<2x1xi32>
    %1293 = vector.multi_reduction <add>, %1292, %cst_231 [1] : vector<2x8x1xi32> to vector<2x1xi32>
    %1294 = vector.shape_cast %1293 : vector<2x1xi32> to vector<2x1x1xi32>
    %1295 = arith.cmpi sge, %1294, %683 : vector<2x1x1xi32>
    %1296 = arith.extui %1295 : vector<2x1x1xi1> to vector<2x1x1xi32>
    %1297 = arith.addi %1285, %1296 : vector<2x1x1xi32>
    %c1_i32_232 = arith.constant 1 : i32
    %1298 = vector.broadcast %c1_i32_232 : i32 to vector<2x1x1xi32>
    %1299 = arith.muli %1297, %1298 : vector<2x1x1xi32>
    %1300 = arith.addi %1260, %1299 : vector<2x1x1xi32>
    %1301 = vector.broadcast %1300 : vector<2x1x1xi32> to vector<2x8x128xi32>
    %1302 = arith.cmpi sge, %679, %1301 : vector<2x8x128xi32>
    %c0_i32_233 = arith.constant 0 : i32
    %1303 = vector.broadcast %c0_i32_233 : i32 to vector<2x1x1xi32>
    %1304 = arith.cmpi sgt, %683, %1303 : vector<2x1x1xi32>
    %1305 = vector.shape_cast %32 : vector<8x128xi1> to vector<1x8x128xi1>
    %1306 = vector.broadcast %1304 : vector<2x1x1xi1> to vector<2x8x128xi1>
    %1307 = vector.broadcast %1305 : vector<1x8x128xi1> to vector<2x8x128xi1>
    %1308 = arith.andi %1306, %1307 : vector<2x8x128xi1>
    %1309 = arith.andi %1302, %1308 : vector<2x8x128xi1>
    %1310 = arith.ori %468, %1309 : vector<2x8x128xi1>
    %cst_234 = arith.constant 0.000000e+00 : f32
    %1311 = vector.broadcast %cst_234 : f32 to vector<2x8x128xf32>
    %1312 = arith.select %1310, %670, %1311 : vector<2x8x128xi1>, vector<2x8x128xf32>
    %1313 = vector.shape_cast %1312 : vector<2x8x128xf32> to vector<1x2x8x128xf32>
    %cst_235 = arith.constant dense<0.000000e+00> : vector<1xf32>
    %1314 = vector.multi_reduction <add>, %1313, %cst_235 [1, 2, 3] : vector<1x2x8x128xf32> to vector<1xf32>
    %1315 = vector.shape_cast %1314 : vector<1xf32> to vector<1x1x1x1xf32>
    %1316 = vector.extract %1315[0, 0, 0, 0] : f32 from vector<1x1x1x1xf32>
    %c0_236 = arith.constant 0 : index
    %c0_237 = arith.constant 0 : index
    %1317 = memref.load %arg5[%c0_236, %c0_237] : memref<1x1xf32, #tpu.memory_space<smem>>
    memref.store %566, %arg5[%c0_236, %c0_237] : memref<1x1xf32, #tpu.memory_space<smem>>
    %c0_238 = arith.constant 0 : index
    %c0_239 = arith.constant 0 : index
    %1318 = memref.load %arg6[%c0_238, %c0_239] : memref<1x1xf32, #tpu.memory_space<smem>>
    memref.store %1316, %arg6[%c0_238, %c0_239] : memref<1x1xf32, #tpu.memory_space<smem>>
    %1319 = vector.shape_cast %473 : vector<2x1x1xi32> to vector<1x2x1x1xi32>
    %cst_240 = arith.constant dense<0> : vector<1xi32>
    %1320 = vector.multi_reduction <add>, %1319, %cst_240 [1, 2, 3] : vector<1x2x1x1xi32> to vector<1xi32>
    %1321 = vector.shape_cast %1320 : vector<1xi32> to vector<1x1x1x1xi32>
    %1322 = vector.extract %1321[0, 0, 0, 0] : i32 from vector<1x1x1x1xi32>
    %c0_241 = arith.constant 0 : index
    %c0_242 = arith.constant 0 : index
    %1323 = memref.load %arg7[%c0_241, %c0_242] : memref<1x1xi32, #tpu.memory_space<smem>>
    memref.store %1322, %arg7[%c0_241, %c0_242] : memref<1x1xi32, #tpu.memory_space<smem>>
    return
  }
  func.func @transform_0(%arg0: i32) -> (i32, i32, i32, i32) {
    %c0_i32 = arith.constant 0 : i32
    %c0_i32_0 = arith.constant 0 : i32
    %c0_i32_1 = arith.constant 0 : i32
    %c0_i32_2 = arith.constant 0 : i32
    return %arg0, %c0_i32, %c0_i32_0, %c0_i32_1 : i32, i32, i32, i32
  }
  func.func @transform_1(%arg0: i32) -> (i32, i32, i32) {
    %c0_i32 = arith.constant 0 : i32
    %c0_i32_0 = arith.constant 0 : i32
    %c0_i32_1 = arith.constant 0 : i32
    %c0_i32_2 = arith.constant 0 : i32
    return %c0_i32, %c0_i32_0, %c0_i32_1 : i32, i32, i32
  }
  func.func @transform_2(%arg0: i32) -> (i32, i32, i32, i32) {
    %c0_i32 = arith.constant 0 : i32
    %c0_i32_0 = arith.constant 0 : i32
    %c0_i32_1 = arith.constant 0 : i32
    %c0_i32_2 = arith.constant 0 : i32
    return %arg0, %c0_i32, %c0_i32_0, %c0_i32_1 : i32, i32, i32, i32
  }
  func.func @transform_3(%arg0: i32) -> (i32, i32, i32, i32) {
    %c0_i32 = arith.constant 0 : i32
    %c0_i32_0 = arith.constant 0 : i32
    %c0_i32_1 = arith.constant 0 : i32
    %c0_i32_2 = arith.constant 0 : i32
    return %arg0, %c0_i32, %c0_i32_0, %c0_i32_1 : i32, i32, i32, i32
  }
  func.func @transform_4(%arg0: i32) -> (i32, i32) {
    %c0_i32 = arith.constant 0 : i32
    %c0_i32_0 = arith.constant 0 : i32
    return %arg0, %c0_i32 : i32, i32
  }
  func.func @transform_5(%arg0: i32) -> (i32, i32) {
    %c0_i32 = arith.constant 0 : i32
    %c0_i32_0 = arith.constant 0 : i32
    return %arg0, %c0_i32 : i32, i32
  }
  func.func @transform_6(%arg0: i32) -> (i32, i32) {
    %c0_i32 = arith.constant 0 : i32
    %c0_i32_0 = arith.constant 0 : i32
    return %arg0, %c0_i32 : i32, i32
  }
}

</mosaic_0001>

<bundles_post_ra>
// kernel: tpu_custom_call.1
= control target key start
LH: loop header
LB: loop body
LE: loop exit
PB: predicated region body
PF: predicated region fallthrough
CT: control target
= control target key end

     0   :  { %12 = vsyncpa [#allocation3], 0  ;;  %s5314_s0 = inlined_call_operand.vmem [shape: f32[2,4,6,128], index: 0, kind: input, shape index: {}]   ;;  %s5315_s1 = inlined_call_operand.vmem [shape: f32[11,8,128], index: 1, kind: input, shape index: {}]   ;;  %s5316_s2 = inlined_call_operand.hbm [shape: f32[2,4,8,128], index: 2, kind: input, shape index: {}]   ;;  %s5317_s3 = inlined_call_operand.hbm [shape: f32[2,8,8,128], index: 3, kind: input, shape index: {}]   ;;  %s5318_s4 = inlined_call_operand.hbm [shape: f32[1,1], index: 4, kind: output, shape index: {0}]   ;;  %s5319_s5 = inlined_call_operand.hbm [shape: f32[1,1], index: 5, kind: output, shape index: {1}]   ;;  %s5320_s6 = inlined_call_operand.hbm [shape: s32[1,1], index: 6, kind: output, shape index: {2}]  }
   0x1   :  { %13 = vsyncpa [#allocation6], 0 }
   0x2   :  { %14 = vsyncpa [#allocation4], 0 }
   0x3   :  { %15 = vsyncpa [#allocation9], 0  ;;  %s3674_s21 = smov [#allocation2]   ;;  %s3592_s25 = scalar_lea.hbm %s5316_s2, 1024 }
   0x4   :  { %s25_s22 = sshll.u32 %s3674_s21, 4  ;;  %p3593_p0 = scmp.ne.s32.totalorder %s5316_s2, %s3592_s25  ;;  %s26_s22 = int_to_ptr.vmem [resolvable:$true] %s25_s22 }
   0x5   :  { %p3596_p1 = scmp.lt.u32.totalorder %s3592_s25, %s5316_s2 }
   0x7   :  { %p3598_p2 = pnand %p3596_p1, %p3593_p0 }
   0x9   :  { %3601 = shalt.err (!%p3598_p2)
}
   0xa   :  { %s3602_s30 = scalar_lea.vmem %s26_s22, 1024  ;;  %p3607_p4 = scmp.lt.s32.totalorder %s26_s22, %s26_s22 }
   0xb   :  { %p3603_p3 = scmp.ne.s32.totalorder %s26_s22, %s3602_s30  ;;  %p3608_p5 = scmp.lt.s32.totalorder %s3602_s30, %s3602_s30 }
   0xd   :  { %p3609_p6 = por %p3608_p5, %p3607_p4 }
   0xf   :  { %p3610_p7 = pnand %p3609_p6, %p3603_p3 }
  0x11   :  { %3613 = shalt.err (!%p3610_p7)
}
  0x12   :  { %s3675_s7 = smov 128   ;;  %s3676_s8 = smov 8  }
  0x13   :  { %31 = dma.hbm_to_vmem [thread:$0]  %s5316_s2, 1024, %s26_s22, [#allocation3], %s3675_s7, %s3675_s7, %s3676_s8  }
  0x14   :  { %s3677_s11 = smov [#allocation5]   ;;  %s3614_s15 = scalar_lea.hbm %s5317_s3, 2048 }
  0x15   :  { %s37_s12 = sshll.u32 %s3677_s11, 4  ;;  %p3615_p8 = scmp.ne.s32.totalorder %s5317_s3, %s3614_s15  ;;  %s38_s12 = int_to_ptr.vmem [resolvable:$true] %s37_s12 }
  0x16   :  { %p3618_p9 = scmp.lt.u32.totalorder %s3614_s15, %s5317_s3 }
  0x18   :  { %p3620_p10 = pnand %p3618_p9, %p3615_p8 }
  0x1a   :  { %3623 = shalt.err (!%p3620_p10)
}
  0x1b   :  { %s3624_s20 = scalar_lea.vmem %s38_s12, 2048  ;;  %p3629_p12 = scmp.lt.s32.totalorder %s38_s12, %s38_s12 }
  0x1c   :  { %p3625_p11 = scmp.ne.s32.totalorder %s38_s12, %s3624_s20  ;;  %p3630_p13 = scmp.lt.s32.totalorder %s3624_s20, %s3624_s20 }
  0x1e   :  { %p3631_p0 = por %p3630_p13, %p3629_p12 }
  0x20   :  { %p3632_p1 = pnand %p3631_p0, %p3625_p11 }
  0x22   :  { %3635 = shalt.err (!%p3632_p1)
}
  0x23   :  { %43 = dma.hbm_to_vmem [thread:$0]  %s5317_s3, 2048, %s38_s12, [#allocation6], %s3675_s7, %s3675_s7, %s3676_s8  }
  0x24   :  { %3666 = dma.done.wait [#allocation3], 1024  }
  0x25   :  { %3667 = vsyncadd [#allocation3], 4294966272 }
  0x26   :  { %3668 = dma.done.wait [#allocation6], 2048  }
  0x27   :  { %3669 = vsyncadd [#allocation6], 4294965248  ;;  %v93_v0 = vlaneseq  ;;  %v51_v6 = vld [vmem:[%s5314_s0 + $0x8] sm:$0x3f]  ;;  %v3762_v7 = vld [vmem:[%s5315_s1] sm:$0xff]  ;;  %v5321_v27 = vmov 0  }
  0x28   :  { %v3767_v8 = vld [vmem:[%s5315_s1 + $0x8] sm:$0xff]  ;;  %v3772_v9 = vld [vmem:[%s5315_s1 + $0x10] sm:$0xff]  ;;  %v3777_v10 = vld [vmem:[%s5315_s1 + $0x18] sm:$0xff]  ;;  %vm272_vm0 = vcmp.gt.f32.partialorder %v51_v6, 0.5  ;;  %v326_v16 = vrot.slane %v51_v6, 6  ;;  %s3636_s21 = scalar_lea.hbm %s5318_s4, 16 }
  0x29   :  { %v3742_v1 = vshrl.u32 %v93_v0, 7  ;;  %v97_v11 = vand.u32 127, %v93_v0  ;;  %v50_v21 = vld [vmem:[%s5314_s0] sm:$0x3f]  ;;  %v356_v28 = vsel %vm272_vm0, 1, %v5321_v27  ;;  %p3637_p2 = scmp.ne.s32.totalorder %s5318_s4, %s3636_s21  ;;  %p3640_p3 = scmp.lt.u32.totalorder %s3636_s21, %s5318_s4 }
  0x2a   :  { %v330_v24 = vsub.f32 %v51_v6, %v326_v16  ;;  %v154_v38 = vrot.slane %v50_v21, 6  ;;  %v3830_v42 = vld [vmem:[%s5315_s1 + $0x20] sm:$0xff]  ;;  %v55_v47 = vld [vmem:[%s5314_s0 + $0x28] sm:$0x3f]  ;;  %vm100_vm1 = vcmp.gt.f32.partialorder %v50_v21, 0.5 }
  0x2b   :  { %v3745_v2 = vsub.s32 2, %v3742_v1  ;;  %v3748_v3 = vsub.s32 0, %v3742_v1  ;;  %v3751_v4 = vsub.s32 3, %v3742_v1  ;;  %v3754_v5 = vsub.s32 1, %v3742_v1  ;;  %p3642_p4 = pnand %p3640_p3, %p3637_p2 }
  0x2c   :  { %v95_v17 = vmul.u32 128, %v3742_v1  ;;  %v3793_v18 = vsub.s32 5, %v3742_v1  ;;  %v334_v32 = vrot.slane %v330_v24, 1  ;;  %v158_v46 = vsub.f32 %v50_v21, %v154_v38 }
  0x2d   :  { %v3780_v12 = vrot.slane %v51_v6, %v3745_v2  ;;  %v3783_v13 = vrot.slane %v51_v6, %v3748_v3  ;;  %v3786_v14 = vrot.slane %v51_v6, %v3751_v4  ;;  %v3789_v15 = vrot.slane %v51_v6, %v3754_v5 }
  0x2e   :  { %v3807_v25 = vrot.slane %v50_v21, %v3745_v2  ;;  %v3811_v29 = vrot.slane %v50_v21, %v3748_v3  ;;  %v3814_v30 = vrot.slane %v50_v21, %v3751_v4  ;;  %v3819_v34 = vrot.slane %v50_v21, %v3754_v5 }
  0x2f   :  { %5364 = vst [vmem:[#allocation15_spill] sm:$0xff] %v3780_v12  ;;  %5365 = vst [vmem:[#allocation16_spill] sm:$0xff] %v3783_v13  ;;  %v282_v19 = vmin.f32 %v3780_v12, %v3772_v9  ;;  %v292_v20 = vmax.f32 %v3783_v13, %v3762_v7  ;;  %v306_v22 = vmin.f32 %v3786_v14, %v3777_v10  ;;  %v162_v53 = vrot.slane %v158_v46, 1 }
  0x30   :  { %5366 = vst [vmem:[#allocation17_spill] sm:$0xff] %v3786_v14  ;;  %5367 = vst [vmem:[#allocation18_spill] sm:$0xff] %v3789_v15  ;;  %v316_v23 = vmax.f32 %v3789_v15, %v3767_v8  ;;  %v110_v33 = vmin.f32 %v3807_v25, %v3772_v9  ;;  %v120_v36 = vmax.f32 %v3811_v29, %v3762_v7  ;;  %v327_v62 = vrot.slane %v55_v47, 6 }
  0x31   :  { %5368 = vst [vmem:[#allocation19_spill] sm:$0xff] %v3807_v25  ;;  %v294_v26 = vsub.f32 %v282_v19, %v292_v20  ;;  %5369 = vst [vmem:[#allocation20_spill] sm:$0xff] %v3811_v29  ;;  %v134_v37 = vmin.f32 %v3814_v30, %v3777_v10  ;;  %v338_v40 = vmul.f32 %v334_v32, %v330_v24  ;;  %vm273_vm2 = vcmp.gt.f32.partialorder %v55_v47, 0.5  ;;  %v54_v20 = vld [vmem:[%s5314_s0 + $0x20] sm:$0x3f] }
  0x32   :  { %5370 = vst [vmem:[#allocation21_spill] sm:$0xff] %v3814_v30  ;;  %v318_v31 = vsub.f32 %v306_v22, %v316_v23  ;;  %5371 = vst [vmem:[#allocation22_spill] sm:$0xff] %v3819_v34  ;;  %v144_v41 = vmax.f32 %v3819_v34, %v3767_v8  ;;  %v3832_v43 = vadd.s32 %v97_v11, %v95_v17  ;;  %v184_v23 = vsel %vm100_vm1, 1, %v5321_v27 }
  0x33   :  { %v296_v35 = vmax.f32 %v294_v26, 0.0  ;;  %v361_v44 = vrot.slane %v356_v28, %v3793_v18  ;;  %v122_v45 = vsub.f32 %v110_v33, %v120_v36  ;;  %v343_v49 = vrot.slane %v338_v40, %v3745_v2 }
  0x34   :  { %v320_v39 = vmax.f32 %v318_v31, 0.0  ;;  %v146_v50 = vsub.f32 %v134_v37, %v144_v41  ;;  %v3842_v51 = vrot.slane %v55_v47, %v3745_v2  ;;  %v3845_v54 = vrot.slane %v55_v47, %v3748_v3 }
  0x35   :  { %v124_v52 = vmax.f32 %v122_v45, 0.0  ;;  %v348_v55 = vadd.f32 %v343_v49, %v3830_v42  ;;  %v3851_v58 = vrot.slane %v55_v47, %v3751_v4  ;;  %v166_v59 = vmul.f32 %v162_v53, %v158_v46 }
  0x36   :  { %v3838_v48 = vmul.f32 %v320_v39, %v296_v35  ;;  %v148_v56 = vmax.f32 %v146_v50, 0.0  ;;  %v283_v57 = vmin.f32 %v3842_v51, %v3772_v9  ;;  %v293_v60 = vmax.f32 %v3845_v54, %v3762_v7 }
  0x37   :  { %v3856_v61 = vrot.slane %v55_v47, %v3754_v5  ;;  %v307_v6 = vmin.f32 %v3851_v58, %v3777_v10  ;;  %vm5362_vm3 = vcmp.lt.s32.totalorder %v3832_v43, 128  ;;  %v171_v11 = vrot.slane %v166_v59, %v3745_v2 }
  0x38   :  { %v350_v63 = vsub.f32 %v348_v55, %v3838_v48  ;;  %v3859_v0 = vmul.f32 %v148_v56, %v124_v52  ;;  %v295_v16 = vsub.f32 %v283_v57, %v293_v60  ;;  %v331_v19 = vsub.f32 %v55_v47, %v327_v62  ;;  %v3908_v56 = vld [vmem:[%s5314_s0 + $0x30] sm:$0x3f] }
  0x39   :  { %v317_v17 = vmax.f32 %v3856_v61, %v3767_v8  ;;  %vm3870_vm4 = vcmp.eq.s32.totalorder %v361_v44, 1  ;;  %v3877_v24 = vrot.slane %v54_v20, %v3745_v2  ;;  %v176_v26 = vadd.f32 %v171_v11, %v3830_v42 }
  0x3a   :  { %3526 = vrcp.f32 %v350_v63  ;;  %v297_v28 = vmax.f32 %v295_v16, 0.0  ;;  %v335_v32 = vrot.slane %v331_v19, 1  ;;  %v357_v33 = vsel %vm273_vm2, 1, %v5321_v27  ;;  %vm368_vm6 = vmand %vm3870_vm4, %vm5362_vm3 }
  0x3b   :  { %v319_v31 = vsub.f32 %v307_v6, %v317_v17  ;;  %v111_v35 = vmin.f32 %v3877_v24, %v3772_v9  ;;  %v3885_v36 = vrot.slane %v54_v20, %v3748_v3  ;;  %v3888_v21 = vrot.slane %v54_v20, %v3751_v4 }
  0x3c   :  { %v178_v37 = vsub.f32 %v176_v26, %v3859_v0  ;;  %v339_v39 = vmul.f32 %v335_v32, %v331_v19  ;;  %v3892_v40 = vrot.slane %v54_v20, %v3754_v5  ;;  %vm101_vm5 = vcmp.gt.f32.partialorder %v54_v20, 0.5 }
  0x3d   :  { %v321_v38 = vmax.f32 %v319_v31, 0.0  ;;  %v121_v41 = vmax.f32 %v3885_v36, %v3762_v7  ;;  %v135_v44 = vmin.f32 %v3888_v21, %v3777_v10  ;;  %v155_v45 = vrot.slane %v54_v20, 6 }
  0x3e   :  { %3528 = vrcp.f32 %v178_v37  ;;  %v347_v47 = vrot.slane %v339_v39, %v3745_v2  ;;  %v145_v49 = vmax.f32 %v3892_v40, %v3767_v8  ;;  %v189_v50 = vrot.slane %v184_v23, %v3793_v18 }
  0x3f   :  { %v3898_v46 = vmul.f32 %v321_v38, %v297_v28  ;;  %v365_v52 = vrot.slane %v357_v33, %v3793_v18  ;;  %v123_v53 = vsub.f32 %v111_v35, %v121_v41  ;;  %v159_v55 = vsub.f32 %v54_v20, %v155_v45 }
  0x40   :  { %v349_v57 = vadd.f32 %v347_v47, %v3830_v42  ;;  %v147_v59 = vsub.f32 %v135_v44, %v145_v49  ;;  %v3913_v60 = vrot.slane %v3908_v56, %v3745_v2  ;;  %v3917_v62 = vrot.slane %v3908_v56, %v3748_v3 }
  0x41   :  { %v125_v63 = vmax.f32 %v123_v53, 0.0  ;;  %v163_v6 = vrot.slane %v159_v55, 1  ;;  %v185_v11 = vsel %vm101_vm5, 1, %v5321_v27  ;;  %v3923_v16 = vrot.slane %v3908_v56, %v3751_v4  ;;  %v3962_v53 = vld [vmem:[%s5314_s0 + $0x10] sm:$0x3f] }
  0x42   :  { %5374 = vst [vmem:[#allocation23_spill] sm:$0xff] %v3913_v60  ;;  %5375 = vst [vmem:[#allocation24_spill] sm:$0xff] %v3917_v62  ;;  %v351_v17 = vsub.f32 %v349_v57, %v3898_v46  ;;  %v149_v19 = vmax.f32 %v147_v59, 0.0  ;;  %v455_v23 = vmin.f32 %v3913_v60, %v3772_v9  ;;  %v465_v26 = vmax.f32 %v3917_v62, %v3762_v7 }
  0x43   :  { %5376 = vst [vmem:[#allocation25_spill] sm:$0xff] %v3923_v16  ;;  %v167_v20 = vmul.f32 %v163_v6, %v159_v55  ;;  %v479_v31 = vmin.f32 %v3923_v16, %v3777_v10  ;;  %v3938_v32 = vrot.slane %v3908_v56, %v3754_v5  ;;  %v499_v33 = vrot.slane %v3908_v56, 6 }
  0x44   :  { %v3527_v28 = vpop.eup %3526  ;;  %vm3942_vm7 = vcmp.eq.s32.totalorder %v189_v50, 1  ;;  %3530 = vrcp.f32 %v351_v17  ;;  %v467_v38 = vsub.f32 %v455_v23, %v465_v26  ;;  %v3946_v39 = vmul.f32 %v149_v19, %v125_v63 }
  0x45   :  { %5377 = vst [vmem:[#allocation26_spill] sm:$0xff] %v3938_v32  ;;  %v353_v35 = vmul.f32 %v3527_v28, %v3838_v48  ;;  %v175_v41 = vrot.slane %v167_v20, %v3745_v2  ;;  %v489_v44 = vmax.f32 %v3938_v32, %v3767_v8  ;;  %v503_v45 = vsub.f32 %v3908_v56, %v499_v33  ;;  %vm198_vm9 = vmand %vm3942_vm7, %vm5362_vm3 }
  0x46   :  { %vm3954_vm8 = vcmp.eq.s32.totalorder %v365_v52, 1  ;;  %v193_v48 = vrot.slane %v185_v11, %v3793_v18  ;;  %v469_v50 = vmax.f32 %v467_v38, 0.0  ;;  %v3968_v52 = vrot.slane %v3962_v53, %v3745_v2 }
  0x47   :  { %v3952_v47 = vsel %vm368_vm6, %v353_v35, -1.0  ;;  %v177_v55 = vadd.f32 %v175_v41, %v3830_v42  ;;  %v491_v57 = vsub.f32 %v479_v31, %v489_v44  ;;  %v507_v59 = vrot.slane %v503_v45, 1  ;;  %vm369_vm11 = vmand %vm3954_vm8, %vm5362_vm3 }
  0x48   :  { %378 = vmax.xlane.f32.xlu1 %v3952_v47  ;;  %5382 = vst [vmem:[#allocation27_spill] sm:$0xff] %v3968_v52  ;;  %v3529_v63 = vpop.eup %3528  ;;  %vm445_vm10 = vcmp.gt.f32.partialorder %v3908_v56, 0.5  ;;  %v3977_v6 = vrot.slane %v3962_v53, %v3748_v3  ;;  %v3981_v11 = vrot.slane %v3962_v53, %v3751_v4  ;;  %v3985_v17 = vrot.slane %v3962_v53, %v3754_v5 }
  0x49   :  { %v181_v19 = vmul.f32 %v3529_v63, %v3859_v0  ;;  %v179_v23 = vsub.f32 %v177_v55, %v3946_v39  ;;  %v493_v26 = vmax.f32 %v491_v57, 0.0  ;;  %v511_v28 = vmul.f32 %v507_v59, %v503_v45 }
  0x4a   :  { %5383 = vst [vmem:[#allocation28_spill] sm:$0xff] %v3977_v6  ;;  %5384 = vst [vmem:[#allocation29_spill] sm:$0xff] %v3981_v11  ;;  %v454_v20 = vmin.f32 %v3968_v52, %v3772_v9  ;;  %v464_v31 = vmax.f32 %v3977_v6, %v3762_v7  ;;  %v478_v33 = vmin.f32 %v3981_v11, %v3777_v10  ;;  %v498_v55 = vrot.slane %v3962_v53, 6 }
  0x4b   :  { %5385 = vst [vmem:[#allocation30_spill] sm:$0xff] %v3985_v17  ;;  %v488_v35 = vmax.f32 %v3985_v17, %v3767_v8  ;;  %v3997_v38 = vsel %vm198_vm9, %v181_v19, -1.0  ;;  %3532 = vrcp.f32 %v179_v23  ;;  %v3999_v0 = vmul.f32 %v493_v26, %v469_v50 }
  0x4c   :  { %v519_v41 = vrot.slane %v511_v28, %v3745_v2  ;;  %206 = vmax.xlane.f32.xlu0 %v3997_v38  ;;  %v466_v44 = vsub.f32 %v454_v20, %v464_v31  ;;  %v529_v50 = vsel %vm445_vm10, 1, %v5321_v27  ;;  %v502_v63 = vsub.f32 %v3962_v53, %v498_v55  ;;  %v4022_v28 = vld [vmem:[%s5314_s0 + $0x38] sm:$0x3f] }
  0x4d   :  { %v490_v45 = vsub.f32 %v478_v33, %v488_v35  ;;  %vm4014_vm12 = vcmp.eq.s32.totalorder %v193_v48, 1  ;;  %v4026_v56 = vrot.slane %v4022_v28, %v3745_v2  ;;  %v4033_v48 = vrot.slane %v4022_v28, %v3748_v3 }
  0x4e   :  { %v521_v57 = vadd.f32 %v519_v41, %v3830_v42  ;;  %v3531_v59 = vpop.eup %3530  ;;  %v468_v20 = vmax.f32 %v466_v44, 0.0  ;;  %v506_v33 = vrot.slane %v502_v63, 1  ;;  %v4044_v55 = vrot.slane %v4022_v28, %v3754_v5  ;;  %vm199_vm14 = vmand %vm4014_vm12, %vm5362_vm3 }
  0x4f   :  { %v355_v19 = vmul.f32 %v3531_v59, %v3898_v46  ;;  %v492_v31 = vmax.f32 %v490_v45, 0.0  ;;  %5388 = vst [vmem:[#allocation31_spill] sm:$0xff] %v4026_v56  ;;  %v537_v46 = vrot.slane %v529_v50, %v3793_v18  ;;  %5389 = vst [vmem:[#allocation32_spill] sm:$0xff] %v4033_v48  ;;  %v627_v44 = vmin.f32 %v4026_v56, %v3772_v9  ;;  %v4265_v56 = vld [vmem:[#allocation5 + $0x70] sm:$0xff] }
  0x50   :  { %v523_v26 = vsub.f32 %v521_v57, %v3999_v0  ;;  %v510_v41 = vmul.f32 %v506_v33, %v502_v63  ;;  %v4040_v45 = vrot.slane %v4022_v28, %v3751_v4  ;;  %5391 = vst [vmem:[#allocation34_spill] sm:$0xff] %v4044_v55  ;;  %vm444_vm13 = vcmp.gt.f32.partialorder %v3962_v53, 0.5  ;;  %v4058_v33 = vld [vmem:[%s5314_s0 + $0x18] sm:$0x3f]  ;;  %5419 = vst [vmem:[#allocation53_spill] sm:$0xff] %v4265_v56 }
  0x51   :  { %v4028_v35 = vsel %vm369_vm11, %v355_v19, -1.0  ;;  %v637_v57 = vmax.f32 %v4033_v48, %v3762_v7  ;;  %v671_v59 = vrot.slane %v4022_v28, 6  ;;  %v494_v50 = vmul.f32 %v492_v31, %v468_v20  ;;  %v4271_v48 = vld [vmem:[#allocation5 + $0x78] sm:$0xff] }
  0x52   :  { %3534 = vrcp.f32 %v523_v26  ;;  %380 = vmax.xlane.f32.xlu1 %v4028_v35  ;;  %5390 = vst [vmem:[#allocation33_spill] sm:$0xff] %v4040_v45  ;;  %v515_v63 = vrot.slane %v510_v41, %v3745_v2  ;;  %v651_v19 = vmin.f32 %v4040_v45, %v3777_v10  ;;  %v661_v26 = vmax.f32 %v4044_v55, %v3767_v8  ;;  %v4268_v55 = vld [vmem:[#allocation5 + $0x38] sm:$0xff] }
  0x53   :  { %v639_v20 = vsub.f32 %v627_v44, %v637_v57  ;;  %v675_v31 = vsub.f32 %v4022_v28, %v671_v59  ;;  %v4067_v41 = vrot.slane %v4058_v33, %v3745_v2  ;;  %v4071_v11 = vrot.slane %v4058_v33, %v3748_v3 }
  0x54   :  { %vm4074_vm15 = vcmp.eq.s32.totalorder %v537_v46, 1  ;;  %v520_v6 = vadd.f32 %v515_v63, %v3830_v42  ;;  %v663_v14 = vsub.f32 %v651_v19, %v661_v26  ;;  %v4092_v46 = vrot.slane %v4058_v33, %v3754_v5 }
  0x55   :  { %v3533_v27 = vpop.eup %3532  ;;  %5392 = vst [vmem:[#allocation35_spill] sm:$0xff] %v4067_v41  ;;  %5393 = vst [vmem:[#allocation36_spill] sm:$0xff] %v4071_v11  ;;  %v641_v44 = vmax.f32 %v639_v20, 0.0  ;;  %v679_v57 = vrot.slane %v675_v31, 1  ;;  %v626_v59 = vmin.f32 %v4067_v41, %v3772_v9  ;;  %v636_v12 = vmax.f32 %v4071_v11, %v3762_v7 }
  0x56   :  { %v183_v52 = vmul.f32 %v3533_v27, %v3946_v39  ;;  %v522_v3 = vsub.f32 %v520_v6, %v494_v50  ;;  %v665_v13 = vmax.f32 %v663_v14, 0.0  ;;  %v4087_v27 = vrot.slane %v4058_v33, %v3751_v4  ;;  %5397 = vst [vmem:[#allocation38_spill] sm:$0xff] %v4092_v46  ;;  %vm541_vm0 = vmand %vm4074_vm15, %vm5362_vm3 }
  0x57   :  { %v683_v39 = vmul.f32 %v679_v57, %v675_v31  ;;  %v5398_v9 = vmov 0   ;;  %v660_v5 = vmax.f32 %v4092_v46, %v3767_v8  ;;  %v638_v19 = vsub.f32 %v626_v59, %v636_v12 }
  0x58   :  { %v4083_v15 = vsel %vm199_vm14, %v183_v52, -1.0  ;;  %5396 = vst [vmem:[#allocation37_spill] sm:$0xff] %v4087_v27  ;;  %3536 = vrcp.f32 %v522_v3  ;;  %v528_v7 = vsel %vm444_vm13, 1, %v5398_v9  ;;  %v650_v52 = vmin.f32 %v4087_v27, %v3777_v10 }
  0x59   :  { %208 = vmax.xlane.f32.xlu0 %v4083_v15  ;;  %v667_v4 = vmul.f32 %v665_v13, %v641_v44  ;;  %v691_v6 = vrot.slane %v683_v39, %v3745_v2  ;;  %v670_v53 = vrot.slane %v4058_v33, 6  ;;  %v533_v26 = vrot.slane %v528_v7, %v3793_v18 }
  0x5a   :  { %v662_v20 = vsub.f32 %v650_v52, %v660_v5  ;;  %vm617_vm1 = vcmp.gt.f32.partialorder %v4022_v28, 0.5  ;;  %v640_v8 = vmax.f32 %v638_v19, 0.0  ;;  %vm616_vm6 = vcmp.gt.f32.partialorder %v4058_v33, 0.5 }
  0x5b   :  { %v693_v10 = vadd.f32 %v691_v6, %v3830_v42  ;;  %v674_v13 = vsub.f32 %v4058_v33, %v670_v53  ;;  %vm4115_vm2 = vcmp.eq.s32.totalorder %v533_v26, 1  ;;  %v701_v59 = vsel %vm617_vm1, 1, %v5398_v9 }
  0x5c   :  { %v3535_v14 = vpop.eup %3534  ;;  %v664_v57 = vmax.f32 %v662_v20, 0.0  ;;  %vm540_vm5 = vmand %vm4115_vm2, %vm5362_vm3  ;;  %v709_v7 = vrot.slane %v701_v59, %v3793_v18  ;;  %v700_v26 = vsel %vm616_vm6, 1, %v5398_v9  ;;  %v5403_v20 = vmov 0 }
  0x5d   :  { %v527_v63 = vmul.f32 %v3535_v14, %v3999_v0  ;;  %v695_v44 = vsub.f32 %v693_v10, %v667_v4  ;;  %v678_v0 = vrot.slane %v674_v13, 1 }
  0x5e   :  { %v666_v52 = vmul.f32 %v664_v57, %v640_v8  ;;  %vm4131_vm9 = vcmp.eq.s32.totalorder %v709_v7, 1 }
  0x5f   :  { %v4110_v31 = vsel %vm541_vm0, %v527_v63, -1.0  ;;  %3538 = vrcp.f32 %v695_v44  ;;  %v682_v3 = vmul.f32 %v678_v0, %v674_v13  ;;  %vm713_vm10 = vmand %vm4131_vm9, %vm5362_vm3 }
  0x60   :  { %552 = vmax.xlane.f32.xlu1 %v4110_v31 }
  0x61   :  { %v687_v14 = vrot.slane %v682_v3, %v3745_v2 }
  0x62   :  { %v3537_v39 = vpop.eup %3536 }
  0x63   :  { %v525_v6 = vmul.f32 %v3537_v39, %v494_v50  ;;  %v692_v5 = vadd.f32 %v687_v14, %v3830_v42  ;;  %v705_v42 = vrot.slane %v700_v26, %v3793_v18 }
  0x65   :  { %v4127_v63 = vsel %vm540_vm5, %v525_v6, -1.0  ;;  %v694_v53 = vsub.f32 %v692_v5, %v666_v52  ;;  %vm4144_vm11 = vcmp.eq.s32.totalorder %v705_v42, 1 }
  0x66   :  { %550 = vmax.xlane.f32.xlu0 %v4127_v63  ;;  %v5404_v20 = vsel %vm4144_vm11, 4294967295, %v5403_v20  ;;  %vm712_vm13 = vmand %vm4144_vm11, %vm5362_vm3 }
  0x67   :  { %3540 = vrcp.f32 %v694_v53  ;;  %5405 = vst [vmem:[#allocation39_spill] sm:$0xff] %v5404_v20 }
  0x69   :  { %v3539_v10 = vpop.eup %3538 }
  0x6a   :  { %v699_v2 = vmul.f32 %v3539_v10, %v667_v4 }
  0x6c   :  { %v4141_v50 = vsel %vm713_vm10, %v699_v2, -1.0 }
  0x6d   :  { %724 = vmax.xlane.f32.xlu1 %v4141_v50 }
  0x71   :  { %v3541_v13 = vpop.eup %3540 }
  0x72   :  { %v697_v44 = vmul.f32 %v3541_v13, %v666_v52 }
  0x74   :  { %v4152_v8 = vsel %vm712_vm13, %v697_v44, -1.0 }
  0x75   :  { %722 = vmax.xlane.f32.xlu0 %v4152_v8 }
  0xd5   :  { %v379_v18 = vpop.xlane.xlu1 %378 }
  0xd6   :  { %v382_v4 = vrot.slane %v379_v18, 4 }
  0xd8   :  { %v383_v57 = vmax.f32 %v379_v18, %v382_v4 }
  0xd9   :  { %v207_v59 = vpop.xlane.xlu0 %206 }
  0xda   :  { %v384_v0 = vrot.slane %v383_v57, 2  ;;  %v210_v3 = vrot.slane %v207_v59, 4 }
  0xdc   :  { %v385_v39 = vmax.f32 %v383_v57, %v384_v0  ;;  %v211_v7 = vmax.f32 %v207_v59, %v210_v3 }
  0xde   :  { %v386_v14 = vrot.slane %v385_v39, 1  ;;  %v212_v6 = vrot.slane %v211_v7, 2 }
  0xdf   :  { %v381_v5 = vpop.xlane.xlu1 %380 }
  0xe0   :  { %v213_v53 = vmax.f32 %v211_v7, %v212_v6  ;;  %v388_v26 = vrot.slane %v381_v5, 4  ;;  %v387_v10 = vmax.f32 %v385_v39, %v386_v14 }
  0xe2   :  { %v214_v2 = vrot.slane %v213_v53, 1  ;;  %v389_v52 = vmax.f32 %v381_v5, %v388_v26  ;;  %vm394_vm14 = vcmp.eq.f32.partialorder %v3952_v47, %v387_v10 }
  0xe3   :  { %v4161_v57 = vsel %vm394_vm14, %v3832_v43, 1024 }
  0xe4   :  { %v390_v42 = vrot.slane %v389_v52, 2  ;;  %v215_v13 = vmax.f32 %v213_v53, %v214_v2  ;;  %v399_v7 = vshra.s32 %v4161_v57, 16 }
  0xe6   :  { %v391_v44 = vmax.f32 %v389_v52, %v390_v42  ;;  %v209_v27 = vpop.xlane.xlu0 %208  ;;  %vm222_vm0 = vcmp.eq.f32.partialorder %v3997_v38, %v215_v13  ;;  %v4168_v10 = vcvt.s32.f32 %v399_v7 }
  0xe7   :  { %v216_v18 = vrot.slane %v209_v27, 4  ;;  %v4158_v4 = vsel %vm222_vm0, %v3832_v43, 1024 }
  0xe8   :  { %v227_v0 = vshra.s32 %v4158_v4, 16  ;;  %v392_v59 = vrot.slane %v391_v44, 1 }
  0xe9   :  { %v217_v3 = vmax.f32 %v209_v27, %v216_v18 }
  0xea   :  { %v4164_v39 = vcvt.s32.f32 %v227_v0  ;;  %v393_v26 = vmax.f32 %v391_v44, %v392_v59 }
  0xeb   :  { %v218_v14 = vrot.slane %v217_v3, 2 }
  0xec   :  { %230 = vmin.xlane.f32.xlu0 %v4164_v39  ;;  %vm395_vm1 = vcmp.eq.f32.partialorder %v4028_v35, %v393_v26 }
  0xed   :  { %v553_v6 = vpop.xlane.xlu1 %552  ;;  %v219_v5 = vmax.f32 %v217_v3, %v218_v14  ;;  %v4177_v0 = vsel %vm395_vm1, %v3832_v43, 1024 }
  0xee   :  { %v560_v53 = vrot.slane %v553_v6, 4 }
  0xef   :  { %v220_v2 = vrot.slane %v219_v5, 1 }
  0xf0   :  { %v561_v52 = vmax.f32 %v553_v6, %v560_v53  ;;  %402 = vmin.xlane.f32.xlu0 %v4168_v10  ;;  %v413_v6 = vshra.s32 %v4177_v0, 16 }
  0xf1   :  { %v221_v13 = vmax.f32 %v219_v5, %v220_v2 }
  0xf2   :  { %v562_v42 = vrot.slane %v561_v52, 2 }
  0xf3   :  { %vm223_vm5 = vcmp.eq.f32.partialorder %v4083_v15, %v221_v13  ;;  %v551_v59 = vpop.xlane.xlu0 %550 }
  0xf4   :  { %v563_v27 = vmax.f32 %v561_v52, %v562_v42  ;;  %v4174_v18 = vsel %vm223_vm5, %v3832_v43, 1024  ;;  %v554_v7 = vrot.slane %v551_v59, 4  ;;  %v415_v52 = vcvt.s32.f32 %v413_v6 }
  0xf5   :  { %v241_v3 = vshra.s32 %v4174_v18, 16 }
  0xf6   :  { %v564_v44 = vrot.slane %v563_v27, 1  ;;  %v555_v53 = vmax.f32 %v551_v59, %v554_v7 }
  0xf7   :  { %v4180_v14 = vcvt.s32.f32 %v241_v3 }
  0xf8   :  { %v565_v5 = vmax.f32 %v563_v27, %v564_v44  ;;  %v556_v26 = vrot.slane %v555_v53, 2 }
  0xf9   :  { %244 = vmin.xlane.f32.xlu1 %v4180_v14 }
  0xfa   :  { %vm567_vm6 = vcmp.eq.f32.partialorder %v4110_v31, %v565_v5  ;;  %v557_v13 = vmax.f32 %v555_v53, %v556_v26  ;;  %v725_v41 = vpop.xlane.xlu1 %724 }
  0xfb   :  { %v4186_v2 = vsel %vm567_vm6, %v3832_v43, 1024  ;;  %v732_v46 = vrot.slane %v725_v41, 4 }
  0xfc   :  { %v585_v42 = vshra.s32 %v4186_v2, 16  ;;  %v558_v3 = vrot.slane %v557_v13, 1 }
  0xfd   :  { %416 = vmin.xlane.f32.xlu1 %v415_v52  ;;  %v733_v11 = vmax.f32 %v725_v41, %v732_v46 }
  0xfe   :  { %v587_v30 = vcvt.s32.f32 %v585_v42  ;;  %v559_v27 = vmax.f32 %v557_v13, %v558_v3 }
  0xff   :  { %v734_v44 = vrot.slane %v733_v11, 2 }
 0x100   :  { %vm566_vm10 = vcmp.eq.f32.partialorder %v4127_v63, %v559_v27 }
 0x101   :  { %588 = vmin.xlane.f32.xlu1 %v587_v30  ;;  %v735_v59 = vmax.f32 %v733_v11, %v734_v44  ;;  %v568_v7 = vsel %vm566_vm10, %v3832_v43, 1024 }
 0x102   :  { %v571_v5 = vshra.s32 %v568_v7, 16  ;;  %v723_v6 = vpop.xlane.xlu0 %722 }
 0x103   :  { %v736_v25 = vrot.slane %v735_v59, 1  ;;  %v726_v34 = vrot.slane %v723_v6, 4 }
 0x104   :  { %v573_v29 = vcvt.s32.f32 %v571_v5 }
 0x105   :  { %v737_v53 = vmax.f32 %v735_v59, %v736_v25  ;;  %v727_v26 = vmax.f32 %v723_v6, %v726_v34  ;;  %v226_v25 = vand.u32 65535, %v4158_v4  ;;  %v398_v6 = vand.u32 65535, %v4161_v57 }
 0x106   :  { %574 = vmin.xlane.f32.xlu0 %v573_v29  ;;  %v240_v4 = vand.u32 65535, %v4174_v18  ;;  %v412_v57 = vand.u32 65535, %v4177_v0 }
 0x107   :  { %vm739_vm13 = vcmp.eq.f32.partialorder %v4141_v50, %v737_v53  ;;  %v728_v41 = vrot.slane %v727_v26, 2  ;;  %v228_v59 = vcvt.s32.f32 %v226_v25  ;;  %v584_v25 = vand.u32 65535, %v4186_v2 }
 0x108   :  { %v741_v46 = vsel %vm739_vm13, %v3832_v43, 1024 }
 0x109   :  { %v757_v42 = vshra.s32 %v741_v46, 16  ;;  %v729_v13 = vmax.f32 %v727_v26, %v728_v41  ;;  %v400_v41 = vcvt.s32.f32 %v398_v6  ;;  %v570_v6 = vand.u32 65535, %v568_v7 }
 0x10a   :  { %v756_v2 = vand.u32 65535, %v741_v46  ;;  %v4231_v46 = vld [vmem:[#allocation5 + $0x40] sm:$0xff] }
 0x10b   :  { %v759_v3 = vcvt.s32.f32 %v757_v42  ;;  %v730_v27 = vrot.slane %v729_v13, 1  ;;  %5408 = vst [vmem:[#allocation42_spill] sm:$0xff] %v4231_v46 }
 0x10d   :  { %760 = vmin.xlane.f32.xlu1 %v759_v3  ;;  %v731_v11 = vmax.f32 %v729_v13, %v730_v27  ;;  %v242_v13 = vcvt.s32.f32 %v240_v4 }
 0x10f   :  { %vm738_vm14 = vcmp.eq.f32.partialorder %v4152_v8, %v731_v11  ;;  %v414_v11 = vcvt.s32.f32 %v412_v57 }
 0x110   :  { %v740_v44 = vsel %vm738_vm14, %v3832_v43, 1024 }
 0x111   :  { %v743_v45 = vshra.s32 %v740_v44, 16 }
 0x113   :  { %v745_v5 = vcvt.s32.f32 %v743_v45 }
 0x115   :  { %746 = vmin.xlane.f32.xlu0 %v745_v5 }
 0x179   :  { %v4196_v34 = vpop.xlane.xlu0 %230 }
 0x17a   :  { %vm232_vm0 = vcmp.eq.f32.partialorder %v4164_v39, %v4196_v34 }
 0x17b   :  { %v233_v53 = vsel %vm232_vm0, %v228_v59, inf  ;;  %v586_v59 = vcvt.s32.f32 %v584_v25  ;;  %v4237_v25 = vld [vmem:[#allocation5 + $0x10] sm:$0xff] }
 0x17c   :  { %234 = vmin.xlane.f32.xlu0 %v233_v53  ;;  %v572_v53 = vcvt.s32.f32 %v570_v6  ;;  %5410 = vst [vmem:[#allocation44_spill] sm:$0xff] %v4237_v25  ;;  %v4247_v6 = vld [vmem:[#allocation5 + $0x58] sm:$0xff] }
 0x17d   :  { %v4201_v26 = vpop.xlane.xlu0 %402  ;;  %5413 = vst [vmem:[#allocation47_spill] sm:$0xff] %v4247_v6 }
 0x17e   :  { %vm404_vm1 = vcmp.eq.f32.partialorder %v4168_v10, %v4201_v26 }
 0x17f   :  { %v405_v45 = vsel %vm404_vm1, %v400_v41, inf  ;;  %vm202_vm1 = vcmp.gt.f32.partialorder %v3997_v38, -1.0 }
 0x180   :  { %406 = vmin.xlane.f32.xlu0 %v405_v45 }
 0x186   :  { %v4206_v42 = vpop.xlane.xlu1 %244 }
 0x187   :  { %vm246_vm5 = vcmp.eq.f32.partialorder %v4180_v14, %v4206_v42 }
 0x188   :  { %v247_v39 = vsel %vm246_vm5, %v242_v13, inf  ;;  %v742_v13 = vand.u32 65535, %v740_v44  ;;  %vm203_vm5 = vcmp.gt.f32.partialorder %v4083_v15, -1.0 }
 0x189   :  { %248 = vmin.xlane.f32.xlu1 %v247_v39  ;;  %v4227_v39 = vld [vmem:[#allocation5] sm:$0xff] }
 0x18a   :  { %v4211_v27 = vpop.xlane.xlu1 %416  ;;  %v744_v7 = vcvt.s32.f32 %v742_v13  ;;  %5406 = vst [vmem:[#allocation40_spill] sm:$0xff] %v4227_v39  ;;  %v4256_v13 = vld [vmem:[#allocation5 + $0x28] sm:$0xff] }
 0x18b   :  { %vm418_vm6 = vcmp.eq.f32.partialorder %v415_v52, %v4211_v27  ;;  %v758_v52 = vcvt.s32.f32 %v756_v2  ;;  %5416 = vst [vmem:[#allocation50_spill] sm:$0xff] %v4256_v13 }
 0x18c   :  { %v419_v10 = vsel %vm418_vm6, %v414_v11, inf  ;;  %v4233_v11 = vld [vmem:[#allocation5 + $0x48] sm:$0xff] }
 0x18d   :  { %420 = vmin.xlane.f32.xlu1 %v419_v10  ;;  %5409 = vst [vmem:[#allocation43_spill] sm:$0xff] %v4233_v11  ;;  %v1063_v44 = vmax.f32 %v4231_v46, %v4233_v11  ;;  %v4241_v10 = vld [vmem:[#allocation5 + $0x50] sm:$0xff] }
 0x18e   :  { %v4215_v18 = vpop.xlane.xlu1 %588  ;;  %5411 = vst [vmem:[#allocation45_spill] sm:$0xff] %v4241_v10 }
 0x18f   :  { %vm590_vm10 = vcmp.eq.f32.partialorder %v587_v30, %v4215_v18 }
 0x190   :  { %v591_v0 = vsel %vm590_vm10, %v586_v59, inf  ;;  %v4244_v59 = vld [vmem:[#allocation5 + $0x18] sm:$0xff] }
 0x191   :  { %592 = vmin.xlane.f32.xlu1 %v591_v0  ;;  %5412 = vst [vmem:[#allocation46_spill] sm:$0xff] %v4244_v59  ;;  %v1065_v0 = vmax.f32 %v1063_v44, %v4241_v10  ;;  %v4262_v44 = vld [vmem:[#allocation5 + $0x30] sm:$0xff] }
 0x192   :  { %5418 = vst [vmem:[#allocation52_spill] sm:$0xff] %v4262_v44 }
 0x193   :  { %v4218_v14 = vpop.xlane.xlu0 %574  ;;  %v1067_v2 = vmax.f32 %v1065_v0, %v4247_v6 }
 0x194   :  { %vm576_vm13 = vcmp.eq.f32.partialorder %v573_v29, %v4218_v14  ;;  %v4229_v29 = vld [vmem:[#allocation5 + $0x8] sm:$0xff] }
 0x195   :  { %v577_v41 = vsel %vm576_vm13, %v572_v53, inf  ;;  %5407 = vst [vmem:[#allocation41_spill] sm:$0xff] %v4229_v29 }
 0x196   :  { %578 = vmin.xlane.f32.xlu0 %v577_v41  ;;  %v4250_v41 = vld [vmem:[#allocation5 + $0x20] sm:$0xff] }
 0x197   :  { %5414 = vst [vmem:[#allocation48_spill] sm:$0xff] %v4250_v41 }
 0x19a   :  { %v4221_v45 = vpop.xlane.xlu1 %760 }
 0x19b   :  { %vm762_vm14 = vcmp.eq.f32.partialorder %v759_v3, %v4221_v45  ;;  %v1062_v3 = vmax.f32 %v4227_v39, %v4229_v29 }
 0x19c   :  { %v763_v4 = vsel %vm762_vm14, %v758_v52, inf  ;;  %v4253_v52 = vld [vmem:[#allocation5 + $0x60] sm:$0xff] }
 0x19d   :  { %764 = vmin.xlane.f32.xlu1 %v763_v4  ;;  %5415 = vst [vmem:[#allocation49_spill] sm:$0xff] %v4253_v52 }
 0x1a2   :  { %v4224_v30 = vpop.xlane.xlu0 %746 }
 0x1a3   :  { %vm748_vm0 = vcmp.eq.f32.partialorder %v745_v5, %v4224_v30  ;;  %v1064_v5 = vmax.f32 %v1062_v3, %v4237_v25 }
 0x1a4   :  { %v749_v57 = vsel %vm748_vm0, %v744_v7, inf  ;;  %v1069_v7 = vmax.f32 %v1067_v2, %v4253_v52 }
 0x1a5   :  { %750 = vmin.xlane.f32.xlu0 %v749_v57  ;;  %v1066_v53 = vmax.f32 %v1064_v5, %v4244_v59  ;;  %v4259_v57 = vld [vmem:[#allocation5 + $0x68] sm:$0xff] }
 0x1a6   :  { %5417 = vst [vmem:[#allocation51_spill] sm:$0xff] %v4259_v57  ;;  %v1071_v5 = vmax.f32 %v1069_v7, %v4259_v57 }
 0x1a7   :  { %v1068_v4 = vmax.f32 %v1066_v53, %v4250_v41 }
 0x1a8   :  { %v1073_v53 = vmax.f32 %v1071_v5, %v4265_v56 }
 0x1a9   :  { %v1070_v3 = vmax.f32 %v1068_v4, %v4256_v13 }
 0x1aa   :  { %v4277_v20 = vmax.f32 %v1073_v53, %v4271_v48 }
 0x1ab   :  { %v1072_v0 = vmax.f32 %v1070_v3, %v4262_v44 }
 0x1ac   :  { %v1077_v3 = vsub.f32 %v4231_v46, %v4277_v20  ;;  %v1085_v5 = vsub.f32 %v4233_v11, %v4277_v20  ;;  %v1093_v62 = vsub.f32 %v4241_v10, %v4277_v20  ;;  %v409_v11 = vcvt.f32.s32 %v4201_v26 }
 0x1ad   :  { %v4274_v2 = vmax.f32 %v1072_v0, %v4268_v55 }
 0x1ae   :  { %v1080_v32 = vmul.f32 1.442695, %v1077_v3  ;;  %v1088_v53 = vmul.f32 1.442695, %v1085_v5  ;;  %v1096_v46 = vmul.f32 1.442695, %v1093_v62 }
 0x1af   :  { %v1076_v4 = vsub.f32 %v4227_v39, %v4274_v2  ;;  %v1084_v7 = vsub.f32 %v4229_v29, %v4274_v2  ;;  %v1092_v0 = vsub.f32 %v4237_v25, %v4274_v2  ;;  %v1100_v29 = vsub.f32 %v4244_v59, %v4274_v2 }
 0x1b0   :  { %v1108_v3 = vsub.f32 %v4250_v41, %v4274_v2 }
 0x1b1   :  { %v1078_v16 = vmul.f32 1.442695, %v1076_v4  ;;  %v1086_v60 = vmul.f32 1.442695, %v1084_v7  ;;  %v1094_v39 = vmul.f32 1.442695, %v1092_v0  ;;  %v1101_v4 = vsub.f32 %v4247_v6, %v4277_v20 }
 0x1b2   :  { %v1102_v7 = vmul.f32 1.442695, %v1100_v29  ;;  %v1110_v0 = vmul.f32 1.442695, %v1108_v3 }
 0x1b3   :  { %3542 = vpow2.f32 %v1078_v16  ;;  %v1104_v5 = vmul.f32 1.442695, %v1101_v4 }
 0x1b4   :  { %3544 = vpow2.f32 %v1086_v60  ;;  %v1109_v60 = vsub.f32 %v4253_v52, %v4277_v20 }
 0x1b5   :  { %3546 = vpow2.f32 %v1080_v32  ;;  %v1116_v32 = vsub.f32 %v4256_v13, %v4274_v2 }
 0x1b6   :  { %3548 = vpow2.f32 %v1088_v53  ;;  %v1112_v6 = vmul.f32 1.442695, %v1109_v60 }
 0x1b7   :  { %3550 = vpow2.f32 %v1094_v39  ;;  %v1117_v39 = vsub.f32 %v4259_v57, %v4277_v20  ;;  %v1118_v4 = vmul.f32 1.442695, %v1116_v32  ;;  %v1132_v32 = vsub.f32 %v4268_v55, %v4274_v2 }
 0x1b8   :  { %3552 = vpow2.f32 %v1096_v46  ;;  %v237_v46 = vcvt.f32.s32 %v4196_v34 }
 0x1b9   :  { %3554 = vpow2.f32 %v1102_v7  ;;  %v1124_v7 = vsub.f32 %v4262_v44, %v4274_v2  ;;  %v1120_v13 = vmul.f32 1.442695, %v1117_v39  ;;  %v410_v39 = vshll.u32 %v409_v11, 16 }
 0x1ba   :  { %3556 = vpow2.f32 %v1104_v5  ;;  %v1125_v5 = vsub.f32 %v4265_v56, %v4277_v20  ;;  %v238_v59 = vshll.u32 %v237_v46, 16  ;;  %v1134_v46 = vmul.f32 1.442695, %v1132_v32 }
 0x1bb   :  { %3558 = vpow2.f32 %v1110_v0  ;;  %v1126_v0 = vmul.f32 1.442695, %v1124_v7 }
 0x1bc   :  { %3560 = vpow2.f32 %v1112_v6  ;;  %v1128_v6 = vmul.f32 1.442695, %v1125_v5 }
 0x1bd   :  { %v3543_v16 = vpop.eup %3542  ;;  %3562 = vpow2.f32 %v1118_v4 }
 0x1be   :  { %v3545_v62 = vpop.eup %3544  ;;  %3564 = vpow2.f32 %v1120_v13 }
 0x1bf   :  { %v3547_v29 = vpop.eup %3546  ;;  %v1090_v52 = vadd.f32 %v3545_v62, %v3543_v16  ;;  %v1133_v16 = vsub.f32 %v4271_v48, %v4277_v20  ;;  %3566 = vpow2.f32 %v1126_v0  ;;  %v205_v0 = vsel %vm203_vm5, %v4083_v15, -1.0 }
 0x1c0   :  { %v3549_v10 = vpop.eup %3548  ;;  %3568 = vpow2.f32 %v1128_v6  ;;  %vm373_vm14 = vcmp.gt.f32.partialorder %v4028_v35, %v205_v0 }
 0x1c1   :  { %v3551_v60 = vpop.eup %3550  ;;  %v1091_v57 = vadd.f32 %v3549_v10, %v3547_v29  ;;  %v251_v10 = vcvt.f32.s32 %v4206_v42  ;;  %v1136_v7 = vmul.f32 1.442695, %v1133_v16  ;;  %3570 = vpow2.f32 %v1134_v46 }
 0x1c2   :  { %v3553_v41 = vpop.eup %3552  ;;  %v1098_v44 = vadd.f32 %v3551_v60, %v1090_v52  ;;  %v423_v52 = vcvt.f32.s32 %v4211_v27  ;;  %v595_v16 = vcvt.f32.s32 %v4215_v18 }
 0x1c3   :  { %v3555_v62 = vpop.eup %3554  ;;  %v1099_v56 = vadd.f32 %v3553_v41, %v1091_v57  ;;  %v252_v11 = vshll.u32 %v251_v10, 16  ;;  %3572 = vpow2.f32 %v1136_v7 }
 0x1c4   :  { %v3557_v26 = vpop.eup %3556  ;;  %v1106_v4 = vadd.f32 %v3555_v62, %v1098_v44  ;;  %v424_v32 = vshll.u32 %v423_v52, 16 }
 0x1c5   :  { %v1107_v5 = vadd.f32 %v3557_v26, %v1099_v56 }
 0x209   :  { %v235_v53 = vpop.xlane.xlu0 %234 }
 0x20a   :  { %v236_v25 = vcvt.f32.s32 %v235_v53 }
 0x20c   :  { %v239_v29 = vadd.s32 %v238_v59, %v236_v25  ;;  %v204_v59 = vsel %vm202_vm1, %v3997_v38, -1.0 }
 0x20d   :  { %v407_v3 = vpop.xlane.xlu0 %406  ;;  %vm372_vm10 = vcmp.gt.f32.partialorder %v3952_v47, %v204_v59 }
 0x20e   :  { %v408_v34 = vcvt.f32.s32 %v407_v3  ;;  %v3559_v3 = vpop.eup %3558  ;;  %v254_v41 = vrot.slane %v239_v29, 4 }
 0x20f   :  { %v3561_v60 = vpop.eup %3560  ;;  %v1114_v44 = vadd.f32 %v3559_v3, %v1106_v4  ;;  %v596_v3 = vshll.u32 %v595_v16, 16 }
 0x210   :  { %v411_v53 = vadd.s32 %v410_v39, %v408_v34  ;;  %v3563_v34 = vpop.eup %3562  ;;  %v1115_v6 = vadd.f32 %v3561_v60, %v1107_v5  ;;  %vm255_vm6 = vcmp.lt.s32.totalorder %v239_v29, %v254_v41  ;;  %v375_v5 = vsel %vm373_vm14, %v4028_v35, %v205_v0 }
 0x211   :  { %v3565_v56 = vpop.eup %3564  ;;  %v1122_v26 = vadd.f32 %v3563_v34, %v1114_v44  ;;  %v256_v46 = vsel %vm255_vm6, %v239_v29, %v254_v41  ;;  %v374_v60 = vsel %vm372_vm10, %v3952_v47, %v204_v59  ;;  %vm545_vm5 = vcmp.gt.f32.partialorder %v4110_v31, %v375_v5 }
 0x212   :  { %v426_v25 = vrot.slane %v411_v53, 4  ;;  %v3567_v10 = vpop.eup %3566  ;;  %v1123_v4 = vadd.f32 %v3565_v56, %v1115_v6  ;;  %v257_v44 = vrot.slane %v256_v46, 2  ;;  %v767_v35 = vcvt.f32.s32 %v4221_v45 }
 0x213   :  { %v3569_v7 = vpop.eup %3568  ;;  %v1130_v41 = vadd.f32 %v3567_v10, %v1122_v26 }
 0x214   :  { %vm427_vm13 = vcmp.lt.s32.totalorder %v411_v53, %v426_v25  ;;  %v3571_v34 = vpop.eup %3570 }
 0x215   :  { %v428_v52 = vsel %vm427_vm13, %v411_v53, %v426_v25  ;;  %v1131_v25 = vadd.f32 %v3569_v7, %v1123_v4  ;;  %vm258_vm13 = vcmp.lt.s32.totalorder %v256_v46, %v257_v44  ;;  %v547_v7 = vsel %vm545_vm5, %v4110_v31, %v375_v5 }
 0x216   :  { %v249_v13 = vpop.xlane.xlu1 %248 }
 0x217   :  { %v250_v42 = vcvt.f32.s32 %v249_v13 }
 0x219   :  { %v253_v57 = vadd.s32 %v252_v11, %v250_v42  ;;  %v581_v11 = vcvt.f32.s32 %v4218_v14 }
 0x21a   :  { %v421_v27 = vpop.xlane.xlu1 %420 }
 0x21b   :  { %v263_v62 = vrot.slane %v253_v57, 4  ;;  %v422_v39 = vcvt.f32.s32 %v421_v27  ;;  %v3573_v27 = vpop.eup %3572 }
 0x21c   :  { %v1139_v10 = vadd.f32 %v3573_v27, %v1131_v25 }
 0x21d   :  { %vm264_vm0 = vcmp.lt.s32.totalorder %v253_v57, %v263_v62  ;;  %v425_v38 = vadd.s32 %v424_v32, %v422_v39  ;;  %v429_v32 = vrot.slane %v428_v52, 2  ;;  %v582_v39 = vshll.u32 %v581_v11, 16 }
 0x21e   :  { %v593_v15 = vpop.xlane.xlu1 %592  ;;  %v265_v42 = vsel %vm264_vm0, %v253_v57, %v263_v62  ;;  %v1138_v57 = vadd.f32 %v3571_v34, %v1130_v41 }
 0x21f   :  { %v435_v13 = vrot.slane %v425_v38, 4  ;;  %v594_v18 = vcvt.f32.s32 %v593_v15  ;;  %v266_v6 = vrot.slane %v265_v42, 2  ;;  %vm430_vm3 = vcmp.lt.s32.totalorder %v428_v52, %v429_v32 }
 0x220   :  { %v376_v15 = vsel %vm372_vm10, 1, %v5398_v9  ;;  %v431_v11 = vsel %vm430_vm3, %v428_v52, %v429_v32  ;;  %3574 = vlog2.f32 %v1138_v57  ;;  %vm717_vm10 = vcmp.gt.f32.partialorder %v4141_v50, %v547_v7 }
 0x221   :  { %vm436_vm1 = vcmp.lt.s32.totalorder %v425_v38, %v435_v13  ;;  %v597_v29 = vadd.s32 %v596_v3, %v594_v18  ;;  %v259_v3 = vsel %vm258_vm13, %v256_v46, %v257_v44  ;;  %3576 = vlog2.f32 %v1139_v10 }
 0x222   :  { %v437_v53 = vsel %vm436_vm1, %v425_v38, %v435_v13  ;;  %v377_v38 = vsel %vm373_vm14, 1, %v5398_v9  ;;  %vm267_vm1 = vcmp.lt.s32.totalorder %v265_v42, %v266_v6  ;;  %v432_v46 = vrot.slane %v431_v11, 1 }
 0x223   :  { %v607_v56 = vrot.slane %v597_v29, 4  ;;  %v438_v16 = vrot.slane %v437_v53, 2  ;;  %v579_v14 = vpop.xlane.xlu0 %578  ;;  %v268_v47 = vsel %vm267_vm1, %v265_v42, %v266_v6  ;;  %v549_v0 = vsel %vm545_vm5, 2, %v377_v38 }
 0x224   :  { %v580_v62 = vcvt.f32.s32 %v579_v14  ;;  %v269_v45 = vrot.slane %v268_v47, 1  ;;  %v768_v32 = vshll.u32 %v767_v35, 16  ;;  %v4353_v5 = vsel %vm717_vm10, %v4141_v50, %v547_v7  ;;  %v4383_v7 = vld [vmem:[%s5314_s0 + $0x8] sm:$0x3f] }
 0x225   :  { %vm608_vm0 = vcmp.lt.s32.totalorder %v597_v29, %v607_v56  ;;  %vm439_vm6 = vcmp.lt.s32.totalorder %v437_v53, %v438_v16  ;;  %vm433_vm5 = vcmp.lt.s32.totalorder %v431_v11, %v432_v46 }
 0x226   :  { %v609_v26 = vsel %vm608_vm0, %v597_v29, %v607_v56  ;;  %v583_v13 = vadd.s32 %v582_v39, %v580_v62  ;;  %vm5420_vm0 = vcmp.gt.f32.partialorder %v4127_v63, %v374_v60  ;;  %v260_v29 = vrot.slane %v259_v3, 1 }
 0x227   :  { %v610_v4 = vrot.slane %v609_v26, 2  ;;  %v546_v18 = vsel %vm5420_vm0, %v4127_v63, %v374_v60  ;;  %v440_v41 = vsel %vm439_vm6, %v437_v53, %v438_v16  ;;  %vm5421_vm3 = vmmov %vm5420_vm0  ;;  %v753_v53 = vcvt.f32.s32 %v4224_v30 }
 0x228   :  { %v598_v59 = vrot.slane %v583_v13, 4  ;;  %v548_v52 = vsel %vm5421_vm3, 2, %v376_v15  ;;  %vm716_vm13 = vcmp.gt.f32.partialorder %v4152_v8, %v546_v18  ;;  %v441_v25 = vrot.slane %v440_v41, 1  ;;  %v4375_v15 = vld [vmem:[%s5314_s0] sm:$0x3f] }
 0x229   :  { %vm611_vm11 = vcmp.lt.s32.totalorder %v609_v26, %v610_v4  ;;  %v4357_v63 = vsub.s32 4, %v3742_v1  ;;  %v4361_v56 = vsel %vm717_vm10, 3, %v549_v0  ;;  %v4366_v16 = vsel %vm716_vm13, %v4152_v8, %v546_v18 }
 0x22a   :  { %vm599_vm14 = vcmp.lt.s32.totalorder %v583_v13, %v598_v59  ;;  %v612_v44 = vsel %vm611_vm11, %v609_v26, %v610_v4  ;;  %v765_v34 = vpop.xlane.xlu1 %764  ;;  %vm261_vm11 = vcmp.lt.s32.totalorder %v259_v3, %v260_v29  ;;  %vm270_vm1 = vcmp.lt.s32.totalorder %v268_v47, %v269_v45  ;;  %v3575_v62 = vpop.eup %3574 }
 0x22b   :  { %v600_v42 = vsel %vm599_vm14, %v583_v13, %v598_v59  ;;  %v766_v31 = vcvt.f32.s32 %v765_v34  ;;  %v613_v6 = vrot.slane %v612_v44, 1  ;;  %v262_v30 = vsel %vm261_vm11, %v259_v3, %v260_v29  ;;  %v3577_v10 = vpop.eup %3576 }
 0x22c   :  { %v601_v27 = vrot.slane %v600_v42, 2  ;;  %vm442_vm0 = vcmp.lt.s32.totalorder %v440_v41, %v441_v25  ;;  %v4370_v1 = vsel %vm716_vm13, 3, %v548_v52  ;;  %v754_v26 = vshll.u32 %v753_v53, 16 }
 0x22d   :  { %v769_v60 = vadd.s32 %v768_v32, %v766_v31  ;;  %v434_v50 = vsel %vm433_vm5, %v431_v11, %v432_v46  ;;  %vm614_vm10 = vcmp.lt.s32.totalorder %v612_v44, %v613_v6  ;;  %v271_v38 = vsel %vm270_vm1, %v268_v47, %v269_v45  ;;  %v4399_v46 = vld [vmem:[%s5314_s0 + $0x10] sm:$0x3f]  ;;  %v3589_v45 = vld [vmem:[%s5314_s0 + $0x20] sm:$0x3f] }
 0x22e   :  { %vm602_vm6 = vcmp.lt.s32.totalorder %v600_v42, %v601_v27  ;;  %v833_v4 = vrot.slane %v4375_v15, %v4357_v63  ;;  %vm788_vm11 = vcmp.eq.s32.totalorder %v3832_v43, %v262_v30  ;;  %v443_v8 = vsel %vm442_vm0, %v440_v41, %v441_v25  ;;  %v5456_v15 = vld [vmem:[#allocation27_spill] sm:$0xff] }
 0x22f   :  { %v603_v39 = vsel %vm602_vm6, %v600_v42, %v601_v27  ;;  %v779_v57 = vrot.slane %v769_v60, 4  ;;  %v853_v3 = vrot.slane %v4383_v7, %v4357_v63  ;;  %vm796_vm13 = vcmp.eq.s32.totalorder %v3832_v43, %v434_v50  ;;  %vm4391_vm6 = vmand %vm788_vm11, %vm3942_vm7  ;;  %v3590_v27 = vld [vmem:[%s5314_s0 + $0x28] sm:$0x3f] }
 0x230   :  { %v604_v14 = vrot.slane %v603_v39, 1  ;;  %v615_v11 = vsel %vm614_vm10, %v612_v44, %v613_v6  ;;  %vm789_vm5 = vcmp.eq.s32.totalorder %v3832_v43, %v271_v38  ;;  %v1141_v0 = vmul.f32 0.6931472, %v3575_v62  ;;  %vm4405_vm10 = vmand %vm796_vm13, %vm3870_vm4  ;;  %v3591_v6 = vld [vmem:[%s5314_s0 + $0x30] sm:$0x3f] }
 0x231   :  { %vm780_vm3 = vcmp.lt.s32.totalorder %v769_v60, %v779_v57  ;;  %v1143_v29 = vmul.f32 0.6931472, %v3577_v10  ;;  %vm797_vm1 = vcmp.eq.s32.totalorder %v3832_v43, %v443_v8  ;;  %v873_v44 = vrot.slane %v4399_v46, %v4357_v63  ;;  %vm4420_vm4 = vmand %vm789_vm5, %vm4014_vm12 }
 0x232   :  { %vm605_vm14 = vcmp.lt.s32.totalorder %v603_v39, %v604_v14  ;;  %v751_v13 = vpop.xlane.xlu0 %750  ;;  %v781_v18 = vsel %vm780_vm3, %v769_v60, %v779_v57  ;;  %vm805_vm7 = vcmp.eq.s32.totalorder %v3832_v43, %v615_v11  ;;  %v893_v52 = vrot.slane %v4058_v33, %v4357_v63  ;;  %vm4433_vm3 = vmand %vm797_vm1, %vm3954_vm8  ;;  %v4584_v33 = vld [vmem:[%s5315_s1 + $0x28] sm:$0xff] }
 0x233   :  { %v752_v35 = vcvt.f32.s32 %v751_v13  ;;  %v782_v47 = vrot.slane %v781_v18, 2  ;;  %v606_v59 = vsel %vm605_vm14, %v603_v39, %v604_v14  ;;  %v837_v42 = vrot.slane %v3589_v45, %v4357_v63  ;;  %vm4459_vm8 = vmand %vm805_vm7, %vm4074_vm15 }
 0x234   :  { %vm804_vm14 = vcmp.eq.s32.totalorder %v3832_v43, %v606_v59  ;;  %v857_v31 = vrot.slane %v3590_v27, %v4357_v63  ;;  %v877_v60 = vrot.slane %v3591_v6, %v4357_v63  ;;  %v897_v39 = vrot.slane %v4022_v28, %v4357_v63  ;;  %v5438_v27 = vld [vmem:[#allocation23_spill] sm:$0xff]  ;;  %v4589_v63 = vld [vmem:[%s5315_s1 + $0x30] sm:$0xff] }
 0x235   :  { %v755_v34 = vadd.s32 %v754_v26, %v752_v35  ;;  %vm783_vm0 = vcmp.lt.s32.totalorder %v781_v18, %v782_v47  ;;  %v4444_v30 = vadd.f32 %v1141_v0, %v4274_v2  ;;  %v4447_v49 = vadd.f32 %v1143_v29, %v4277_v20  ;;  %vm4473_vm13 = vmand %vm804_vm14, %vm4115_vm2  ;;  %v5444_v6 = vld [vmem:[#allocation31_spill] sm:$0xff] }
 0x236   :  { %v784_v32 = vsel %vm783_vm0, %v781_v18, %v782_v47  ;;  %v792_v14 = vsel %vm4391_vm6, 2.0, %v4366_v16  ;;  %v794_v57 = vsel %vm4391_vm6, 0, %v4370_v1  ;;  %v793_v20 = vsel %vm4420_vm4, 2.0, %v4353_v5 }
 0x237   :  { %v770_v25 = vrot.slane %v755_v34, 4  ;;  %v785_v53 = vrot.slane %v784_v32, 1  ;;  %v795_v2 = vsel %vm4420_vm4, 0, %v4361_v56  ;;  %v801_v1 = vsel %vm4433_vm3, 2.0, %v793_v20 }
 0x238   :  { %v803_v5 = vsel %vm4433_vm3, 1, %v795_v2  ;;  %v800_v12 = vsel %vm4405_vm10, 2.0, %v792_v14  ;;  %v802_v56 = vsel %vm4405_vm10, 1, %v794_v57  ;;  %v809_v50 = vsel %vm4459_vm8, 2.0, %v801_v1  ;;  %v5445_v57 = vld [vmem:[#allocation33_spill] sm:$0xff]  ;;  %v5447_v1 = vld [vmem:[#allocation22_spill] sm:$0xff] }
 0x239   :  { %vm771_vm12 = vcmp.lt.s32.totalorder %v755_v34, %v770_v25  ;;  %vm786_vm11 = vcmp.lt.s32.totalorder %v784_v32, %v785_v53  ;;  %v811_v10 = vsel %vm4459_vm8, 2, %v803_v5  ;;  %v808_v8 = vsel %vm4473_vm13, 2.0, %v800_v12 }
 0x23a   :  { %v772_v16 = vsel %vm771_vm12, %v755_v34, %v770_v25  ;;  %v787_v62 = vsel %vm786_vm11, %v784_v32, %v785_v53  ;;  %v810_v13 = vsel %vm4473_vm13, 2, %v802_v56  ;;  %v5436_v25 = vld [vmem:[#allocation24_spill] sm:$0xff]  ;;  %v5443_v53 = vld [vmem:[#allocation34_spill] sm:$0xff]  ;;  %v5449_v56 = vld [vmem:[#allocation21_spill] sm:$0xff] }
 0x23b   :  { %v773_v26 = vrot.slane %v772_v16, 2  ;;  %vm813_vm15 = vcmp.eq.s32.totalorder %v3832_v43, %v787_v62 }
 0x23c   :  { %vm4492_vm2 = vmand %vm813_vm15, %vm4131_vm9 }
 0x23d   :  { %vm774_vm5 = vcmp.lt.s32.totalorder %v772_v16, %v773_v26  ;;  %v819_v18 = vsel %vm4492_vm2, 3, %v811_v10  ;;  %v817_v17 = vsel %vm4492_vm2, 2.0, %v809_v50  ;;  %v5451_v50 = vld [vmem:[#allocation18_spill] sm:$0xff] }
 0x23e   :  { %v775_v11 = vsel %vm774_vm5, %v772_v16, %v773_v26  ;;  %vm821_vm6 = vcmp.eq.s32.totalorder %v819_v18, 0  ;;  %vm841_vm1 = vcmp.eq.s32.totalorder %v819_v18, 1  ;;  %vm861_vm0 = vcmp.eq.s32.totalorder %v819_v18, 2  ;;  %v5446_v16 = vld [vmem:[#allocation20_spill] sm:$0xff]  ;;  %v5448_v26 = vld [vmem:[#allocation19_spill] sm:$0xff] }
 0x23f   :  { %v776_v35 = vrot.slane %v775_v11, 1  ;;  %v823_v19 = vsel %vm821_vm6, %v3885_v36, 0.0  ;;  %v825_v47 = vsel %vm821_vm6, %v3892_v40, 0.0  ;;  %v827_v59 = vsel %vm821_vm6, %v3877_v24, 0.0  ;;  %v5437_v40 = vld [vmem:[#allocation26_spill] sm:$0xff] }
 0x240   :  { %v829_v0 = vsel %vm821_vm6, %v3888_v21, 0.0  ;;  %v839_v29 = vsel %vm821_vm6, %v837_v42, 0.0  ;;  %v843_v41 = vsel %vm841_vm1, %v3845_v54, %v823_v19  ;;  %v845_v34 = vsel %vm841_vm1, %v3856_v61, %v825_v47  ;;  %v5439_v54 = vld [vmem:[#allocation25_spill] sm:$0xff]  ;;  %v5442_v42 = vld [vmem:[#allocation32_spill] sm:$0xff] }
 0x241   :  { %vm777_vm9 = vcmp.lt.s32.totalorder %v775_v11, %v776_v35  ;;  %v847_v37 = vsel %vm841_vm1, %v3842_v51, %v827_v59  ;;  %v849_v45 = vsel %vm841_vm1, %v3851_v58, %v829_v0  ;;  %v859_v32 = vsel %vm841_vm1, %v857_v31, %v839_v29  ;;  %v5440_v58 = vld [vmem:[#allocation39_spill] sm:$0xff]  ;;  %v5454_v59 = vld [vmem:[#allocation28_spill] sm:$0xff]  ;;  %v5455_v29 = vld [vmem:[#allocation30_spill] sm:$0xff] }
 0x242   :  { %v778_v22 = vsel %vm777_vm9, %v775_v11, %v776_v35  ;;  %v863_v36 = vsel %vm861_vm0, %v5436_v25, %v843_v41  ;;  %v865_v24 = vsel %vm861_vm0, %v5437_v40, %v845_v34  ;;  %v867_v21 = vsel %vm861_vm0, %v5438_v27, %v847_v37  ;;  %v5453_v35 = vld [vmem:[#allocation17_spill] sm:$0xff]  ;;  %v5460_v25 = vld [vmem:[#allocation35_spill] sm:$0xff] }
 0x243   :  { %vm812_vm10 = vcmp.eq.s32.totalorder %v3832_v43, %v778_v22  ;;  %v869_v61 = vsel %vm861_vm0, %v5439_v54, %v849_v45  ;;  %v879_v51 = vsel %vm861_vm0, %v877_v60, %v859_v32  ;;  %vm881_vm7 = vcmp.eq.s32.totalorder %v819_v18, 3  ;;  %v5452_v18 = vld [vmem:[#allocation15_spill] sm:$0xff]  ;;  %v5457_v34 = vld [vmem:[#allocation29_spill] sm:$0xff]  ;;  %v5458_v32 = vld [vmem:[#allocation36_spill] sm:$0xff] }
 0x244   :  { %vm5441_vm4 = vnez %v5440_v58  ;;  %v883_v31 = vsel %vm881_vm7, %v5442_v42, %v863_v36  ;;  %v4524_v23 = vsel %vm881_vm7, %v5443_v53, %v865_v24  ;;  %v887_v14 = vsel %vm881_vm7, %v5444_v6, %v867_v21  ;;  %v5461_v40 = vld [vmem:[#allocation37_spill] sm:$0xff] }
 0x245   :  { %vm814_vm14 = vmand %vm812_vm10, %vm5441_vm4  ;;  %v4528_v28 = vsel %vm881_vm7, %v5445_v57, %v869_v61  ;;  %v899_v60 = vsel %vm881_vm7, %v897_v39, %v879_v51  ;;  %vm901_vm13 = vcmp.lt.f32.partialorder %v817_v17, 0.5  ;;  %v67_v54 = vld [vmem:[%s5315_s1 + $0x48] sm:$0xff]  ;;  %v949_v58 = vadd.f32 %v887_v14, %v883_v31 }
 0x246   :  { %v816_v20 = vsel %vm814_vm14, 2.0, %v808_v8  ;;  %v818_v2 = vsel %vm814_vm14, 3, %v810_v13  ;;  %v5450_v13 = vld [vmem:[#allocation16_spill] sm:$0xff]  ;;  %v903_v51 = vadd.f32 1.0, %v899_v60  ;;  %v957_v42 = vadd.f32 %v4528_v28, %v4524_v23 }
 0x247   :  { %vm820_vm3 = vcmp.eq.s32.totalorder %v818_v2, 0  ;;  %vm840_vm8 = vcmp.eq.s32.totalorder %v818_v2, 1  ;;  %vm860_vm12 = vcmp.eq.s32.totalorder %v818_v2, 2  ;;  %vm880_vm11 = vcmp.eq.s32.totalorder %v818_v2, 3 }
 0x248   :  { %v822_v62 = vsel %vm820_vm3, %v5446_v16, 0.0  ;;  %v824_v5 = vsel %vm820_vm3, %v5447_v1, 0.0  ;;  %v826_v12 = vsel %vm820_vm3, %v5448_v26, 0.0  ;;  %v828_v10 = vsel %vm820_vm3, %v5449_v56, 0.0  ;;  %v4601_v1 = vld [vmem:[%s5315_s1 + $0x40] sm:$0xff] }
 0x249   :  { %v838_v8 = vsel %vm820_vm3, %v833_v4, 0.0  ;;  %v842_v38 = vsel %vm840_vm8, %v5450_v13, %v822_v62  ;;  %v844_v39 = vsel %vm840_vm8, %v5451_v50, %v824_v5  ;;  %v846_v11 = vsel %vm840_vm8, %v5452_v18, %v826_v12  ;;  %v65_v62 = vld [vmem:[%s5315_s1 + $0x38] sm:$0xff] }
 0x24a   :  { %v848_v19 = vsel %vm840_vm8, %v5453_v35, %v828_v10  ;;  %v858_v47 = vsel %vm840_vm8, %v853_v3, %v838_v8  ;;  %v862_v0 = vsel %vm860_vm12, %v5454_v59, %v842_v38  ;;  %v864_v41 = vsel %vm860_vm12, %v5455_v29, %v844_v39  ;;  %v5459_v3 = vld [vmem:[#allocation38_spill] sm:$0xff]  ;;  %v5463_v35 = vld [vmem:[#allocation41_spill] sm:$0xff]  ;;  %v5464_v59 = vld [vmem:[#allocation44_spill] sm:$0xff] }
 0x24b   :  { %v866_v4 = vsel %vm860_vm12, %v5456_v15, %v846_v11  ;;  %v868_v37 = vsel %vm860_vm12, %v5457_v34, %v848_v19  ;;  %v878_v45 = vsel %vm860_vm12, %v873_v44, %v858_v47  ;;  %v882_v7 = vsel %vm880_vm11, %v5458_v32, %v862_v0  ;;  %v5462_v11 = vld [vmem:[#allocation40_spill] sm:$0xff]  ;;  %v5465_v29 = vld [vmem:[#allocation46_spill] sm:$0xff]  ;;  %v5468_v32 = vld [vmem:[#allocation43_spill] sm:$0xff] }
 0x24c   :  { %v4562_v22 = vsel %vm880_vm11, %v5459_v3, %v864_v41  ;;  %v886_v36 = vsel %vm880_vm11, %v5460_v25, %v866_v4  ;;  %v4568_v24 = vsel %vm880_vm11, %v5461_v40, %v868_v37  ;;  %v898_v46 = vsel %vm880_vm11, %v893_v52, %v878_v45  ;;  %v5466_v4 = vld [vmem:[#allocation48_spill] sm:$0xff]  ;;  %v5467_v45 = vld [vmem:[#allocation42_spill] sm:$0xff] }
 0x24d   :  { %v902_v44 = vadd.f32 1.0, %v898_v46  ;;  %v948_v27 = vadd.f32 %v886_v36, %v882_v7  ;;  %v956_v21 = vadd.f32 %v4568_v24, %v4562_v22  ;;  %v964_v61 = vsub.f32 %v886_v36, %v882_v7  ;;  %v5469_v3 = vld [vmem:[#allocation50_spill] sm:$0xff]  ;;  %v5470_v40 = vld [vmem:[#allocation52_spill] sm:$0xff] }
 0x24e   :  { %v965_v57 = vsub.f32 %v887_v14, %v883_v31  ;;  %v3509_v2 = vtrunc.f32 %v903_v51  ;;  %v4591_v60 = vmul.f32 0.5, %v949_v58  ;;  %v4593_v16 = vmul.f32 0.5, %v957_v42  ;;  %v5475_v51 = vld [vmem:[#allocation47_spill] sm:$0xff] }
 0x24f   :  { %v3507_v52 = vtrunc.f32 %v902_v44  ;;  %v950_v53 = vmul.f32 0.5, %v948_v27  ;;  %v958_v6 = vmul.f32 0.5, %v956_v21  ;;  %v4603_v5 = vmul.f32 %v964_v61, %v67_v54  ;;  %v5474_v27 = vld [vmem:[#allocation45_spill] sm:$0xff] }
 0x250   :  { %v4607_v14 = vmul.f32 %v965_v57, %v67_v54  ;;  %vm900_vm15 = vcmp.lt.f32.partialorder %v816_v20, 0.5  ;;  %v3510_v56 = vcvt.f32.s32 %v3509_v2  ;;  %v953_v10 = vsub.f32 %v4591_v60, %v4584_v33  ;;  %v69_v2 = vld [vmem:[#allocation2] sm:$0xff] }
 0x251   :  { %v3508_v26 = vcvt.f32.s32 %v3507_v52  ;;  %v952_v12 = vsub.f32 %v950_v53, %v4584_v33  ;;  %v960_v31 = vsub.f32 %v958_v6, %v4589_v63  ;;  %v961_v8 = vsub.f32 %v4593_v16, %v4589_v63  ;;  %v5476_v33 = vld [vmem:[#allocation49_spill] sm:$0xff]  ;;  %v5477_v6 = vld [vmem:[#allocation51_spill] sm:$0xff] }
 0x252   :  { %v968_v39 = vmax.f32 %v4603_v5, 1e-12  ;;  %v4622_v18 = vsel %vm901_vm13, 0, %v3510_v56  ;;  %v969_v47 = vmax.f32 %v4607_v14, 1e-12  ;;  %vm3679_vm8 = vmmov 1  }
 0x253   :  { %v4613_v13 = vsel %vm900_vm15, 0, %v3508_v26  ;;  %v4615_v38 = vmul.f32 %v952_v12, %v65_v62  ;;  %v4618_v50 = vmul.f32 %v960_v31, %v4601_v1  ;;  %vm909_vm7 = vcmp.gt.s32.totalorder %v4622_v18, 0  ;;  %v5478_v5 = vld [vmem:[#allocation53_spill] sm:$0xff]  ;;  %v73_v31 = vld [vmem:[#allocation2 + $0x20] sm:$0xff] }
 0x254   :  { %vm908_vm2 = vcmp.gt.s32.totalorder %v4613_v13, 0  ;;  %vm1146_vm5 = vcmp.eq.s32.totalorder %v4613_v13, 1  ;;  %vm1150_vm6 = vcmp.eq.s32.totalorder %v4613_v13, 2  ;;  %vm1154_vm1 = vcmp.eq.s32.totalorder %v4613_v13, 3 }
 0x255   :  { %v910_v20 = vsel %vm908_vm2, 1, %v5398_v9  ;;  %v1148_v19 = vsel %vm1146_vm5, %v5463_v35, %v5462_v11  ;;  %vm1158_vm0 = vcmp.eq.s32.totalorder %v4613_v13, 4  ;;  %vm1162_vm9 = vcmp.eq.s32.totalorder %v4613_v13, 5  ;;  %v68_v11 = vld [vmem:[%s5315_s1 + $0x50] sm:$0xff] }
 0x256   :  { %v913_v17 = vshrl.u32 %v910_v20, 16  ;;  %v1152_v0 = vsel %vm1150_vm6, %v5464_v59, %v1148_v19  ;;  %vm1166_vm10 = vcmp.eq.s32.totalorder %v4613_v13, 6  ;;  %vm1147_vm4 = vcmp.eq.s32.totalorder %v4622_v18, 1 }
 0x257   :  { %v1156_v41 = vsel %vm1154_vm1, %v5465_v29, %v1152_v0  ;;  %v911_v37 = vsel %vm909_vm7, 1, %v5398_v9  ;;  %v1149_v7 = vsel %vm1147_vm4, %v5468_v32, %v5467_v45  ;;  %vm1170_vm14 = vcmp.eq.s32.totalorder %v4613_v13, 7 }
 0x258   :  { %v915_v15 = vcvt.s32.f32 %v913_v17  ;;  %v1160_v34 = vsel %vm1158_vm0, %v5466_v4, %v1156_v41  ;;  %v925_v36 = vshrl.u32 %v911_v37, 16  ;;  %vm1151_vm3 = vcmp.eq.s32.totalorder %v4622_v18, 2  ;;  %v74_v17 = vld [vmem:[#allocation2 + $0x28] sm:$0xff] }
 0x259   :  { %v1164_v25 = vsel %vm1162_vm9, %v5469_v3, %v1160_v34  ;;  %vm5471_vm12 = vcmp.lt.s32.totalorder %v3832_v43, 128  ;;  %v1153_v21 = vsel %vm1151_vm3, %v5474_v27, %v1149_v7  ;;  %vm1155_vm13 = vcmp.eq.s32.totalorder %v4622_v18, 3 }
 0x25a   :  { %v1168_v46 = vsel %vm1166_vm10, %v5470_v40, %v1164_v25  ;;  %vm4653_vm11 = vmxor %vm5471_vm12, %vm3679_vm8  ;;  %918 = vadd.xlane.f32.xlu0 %v915_v15  ;;  %vm1159_vm15 = vcmp.eq.s32.totalorder %v4622_v18, 4  ;;  %v927_v61 = vcvt.s32.f32 %v925_v36  ;;  %v1157_v58 = vsel %vm1155_vm13, %v5475_v51, %v1153_v21 }
 0x25b   :  { %v1172_v54 = vsel %vm1170_vm14, %v4268_v55, %v1168_v46  ;;  %vm1163_vm5 = vcmp.eq.s32.totalorder %v4622_v18, 5  ;;  %v1161_v52 = vsel %vm1159_vm15, %v5476_v33, %v1157_v58  ;;  %vm1167_vm6 = vcmp.eq.s32.totalorder %v4622_v18, 6  ;;  %vm1179_vm1 = vmor %vm908_vm2, %vm4653_vm11  ;;  %v71_v46 = vld [vmem:[#allocation2 + $0x10] sm:$0xff] }
 0x25c   :  { %v4664_v42 = vsub.f32 %v4444_v30, %v1172_v54  ;;  %v912_v53 = vand.u32 65535, %v910_v20  ;;  %v1165_v55 = vsel %vm1163_vm5, %v5477_v6, %v1161_v52  ;;  %vm1171_vm0 = vcmp.eq.s32.totalorder %v4622_v18, 7  ;;  %930 = vadd.xlane.f32.xlu1 %v927_v61  ;;  %vm1180_vm9 = vmor %vm909_vm7, %vm4653_vm11  ;;  %v75_v61 = vld [vmem:[#allocation2 + $0x30] sm:$0xff] }
 0x25d   :  { %v924_v57 = vand.u32 65535, %v911_v37  ;;  %v955_v60 = vmul.f32 %v953_v10, %v65_v62  ;;  %v1169_v26 = vsel %vm1167_vm6, %v5478_v5, %v1165_v55  ;;  %3578 = vlog2.f32 %v968_v39 }
 0x25e   :  { %v1181_v30 = vsel %vm1179_vm1, 0.0, %v4664_v42  ;;  %v914_v12 = vcvt.s32.f32 %v912_v53  ;;  %v1173_v56 = vsel %vm1171_vm0, %v4271_v48, %v1169_v26  ;;  %3580 = vlog2.f32 %v969_v47  ;;  %v70_v48 = vld [vmem:[#allocation2 + $0x8] sm:$0xff] }
 0x25f   :  { %v4676_v14 = vmax.f32 %v1181_v30, 0.0  ;;  %v926_v20 = vcvt.s32.f32 %v924_v57  ;;  %v4683_v35 = vsub.f32 %v4447_v49, %v1173_v56  ;;  %v976_v62 = vsub.f32 %v4568_v24, %v4562_v22 }
 0x260   :  { %916 = vadd.xlane.f32.xlu0 %v914_v12  ;;  %v977_v10 = vsub.f32 %v4528_v28, %v4524_v23  ;;  %v988_v39 = vsub.f32 %v69_v2, %v4615_v38  ;;  %v963_v49 = vmul.f32 %v961_v8, %v4601_v1  ;;  %v989_v22 = vsub.f32 %v73_v31, %v955_v60 }
 0x261   :  { %928 = vadd.xlane.f32.xlu1 %v926_v20  ;;  %vm1193_vm10 = vcmp.ge.s32.totalorder %v4676_v14, 1073741824  ;;  %v1182_v24 = vsel %vm1180_vm9, 0.0, %v4683_v35  ;;  %v978_v28 = vmul.f32 %v976_v62, %v68_v11  ;;  %v1002_v15 = vsub.f32 %v70_v48, %v4618_v50 }
 0x262   :  { %v1195_v23 = vsel %vm1193_vm10, 1, %v5398_v9  ;;  %v979_v38 = vmul.f32 %v977_v10, %v68_v11  ;;  %v4701_v19 = vmax.f32 %v1182_v24, 0.0  ;;  %v990_v59 = vand.u32 2147483647, %v988_v39  ;;  %v72_v24 = vld [vmem:[#allocation2 + $0x18] sm:$0xff] }
 0x263   :  { %v1198_v47 = vshrl.u32 %v1195_v23, 16  ;;  %v980_v0 = vmax.f32 %v978_v28, 1e-12  ;;  %v991_v41 = vand.u32 2147483647, %v989_v22  ;;  %v1197_v63 = vand.u32 65535, %v1195_v23 }
 0x264   :  { %v981_v29 = vmax.f32 %v979_v38, 1e-12  ;;  %vm1194_vm4 = vcmp.ge.s32.totalorder %v4701_v19, 1073741824  ;;  %v994_v1 = vmul.f32 0.5, %v990_v59  ;;  %v1003_v8 = vsub.f32 %v74_v17, %v963_v49  ;;  %v76_v38 = vld [vmem:[#allocation2 + $0x38] sm:$0xff] }
 0x265   :  { %v1200_v4 = vcvt.s32.f32 %v1198_v47  ;;  %v1196_v16 = vsel %vm1194_vm4, 1, %v5398_v9  ;;  %3582 = vlog2.f32 %v980_v0  ;;  %v995_v37 = vmul.f32 0.5, %v991_v41 }
 0x266   :  { %v1210_v34 = vshrl.u32 %v1196_v16, 16  ;;  %3584 = vlog2.f32 %v981_v29  ;;  %v1209_v32 = vand.u32 65535, %v1196_v16  ;;  %v996_v7 = vmul.f32 %v994_v1, %v990_v59 }
 0x267   :  { %1203 = vadd.xlane.f32.xlu0 %v1200_v4  ;;  %v3579_v45 = vpop.eup %3578  ;;  %v1004_v3 = vand.u32 2147483647, %v1002_v15  ;;  %v1199_v50 = vcvt.s32.f32 %v1197_v63  ;;  %vm992_vm14 = vcmp.lt.f32.partialorder %v990_v59, 1.0  ;;  %v997_v27 = vmul.f32 %v995_v37, %v991_v41 }
 0x268   :  { %v3581_v25 = vpop.eup %3580  ;;  %v1212_v36 = vcvt.s32.f32 %v1210_v34  ;;  %v971_v40 = vmul.f32 0.6931472, %v3579_v45  ;;  %v3499_v21 = vadd.f32 -0.5, %v990_v59  ;;  %v1005_v54 = vand.u32 2147483647, %v1003_v8 }
 0x269   :  { %v973_v44 = vmul.f32 0.6931472, %v3581_v25  ;;  %vm993_vm3 = vcmp.lt.f32.partialorder %v991_v41, 1.0  ;;  %v3500_v58 = vadd.f32 -0.5, %v991_v41  ;;  %v1008_v33 = vmul.f32 0.5, %v1004_v3 }
 0x26a   :  { %1215 = vadd.xlane.f32.xlu1 %v1212_v36  ;;  %v974_v51 = vmul.f32 5.0, %v971_v40  ;;  %v1211_v52 = vcvt.s32.f32 %v1209_v32  ;;  %v1000_v6 = vsel %vm992_vm14, %v996_v7, %v3499_v21  ;;  %v1009_v55 = vmul.f32 0.5, %v1005_v54 }
 0x26b   :  { %1201 = vadd.xlane.f32.xlu0 %v1199_v50  ;;  %v975_v53 = vmul.f32 5.0, %v973_v44  ;;  %vm1006_vm8 = vcmp.lt.f32.partialorder %v1004_v3, 1.0  ;;  %v1010_v57 = vmul.f32 %v1008_v33, %v1004_v3  ;;  %v3501_v2 = vadd.f32 -0.5, %v1004_v3 }
 0x26c   :  { %v1018_v60 = vsub.f32 %v71_v46, %v974_v51  ;;  %v1001_v30 = vsel %vm993_vm3, %v997_v27, %v3500_v58  ;;  %v1011_v5 = vmul.f32 %v1009_v55, %v1005_v54  ;;  %v3502_v26 = vadd.f32 -0.5, %v1005_v54 }
 0x26d   :  { %v1019_v12 = vsub.f32 %v75_v61, %v975_v53  ;;  %vm1007_vm12 = vcmp.lt.f32.partialorder %v1005_v54, 1.0  ;;  %v1014_v31 = vsel %vm1006_vm8, %v1010_v57, %v3501_v2 }
 0x26e   :  { %1213 = vadd.xlane.f32.xlu1 %v1211_v52  ;;  %v1020_v56 = vand.u32 2147483647, %v1018_v60  ;;  %v1015_v11 = vsel %vm1007_vm12, %v1011_v5, %v3502_v26  ;;  %v1016_v62 = vadd.f32 %v1014_v31, %v1000_v6 }
 0x26f   :  { %v3583_v20 = vpop.eup %3582  ;;  %v1021_v10 = vand.u32 2147483647, %v1019_v12  ;;  %v1017_v49 = vadd.f32 %v1015_v11, %v1001_v30 }
 0x270   :  { %v3585_v39 = vpop.eup %3584  ;;  %v983_v48 = vmul.f32 0.6931472, %v3583_v20  ;;  %v1024_v22 = vmul.f32 0.5, %v1020_v56  ;;  %v3503_v59 = vadd.f32 -0.5, %v1020_v56  ;;  %vm1022_vm11 = vcmp.lt.f32.partialorder %v1020_v56, 1.0 }
 0x271   :  { %v985_v23 = vmul.f32 0.6931472, %v3585_v39  ;;  %v1025_v28 = vmul.f32 0.5, %v1021_v10  ;;  %v3504_v41 = vadd.f32 -0.5, %v1021_v10  ;;  %vm1023_vm13 = vcmp.lt.f32.partialorder %v1021_v10, 1.0 }
 0x272   :  { %v986_v47 = vmul.f32 5.0, %v983_v48  ;;  %v1026_v17 = vmul.f32 %v1024_v22, %v1020_v56 }
 0x273   :  { %v987_v0 = vmul.f32 5.0, %v985_v23  ;;  %v1027_v29 = vmul.f32 %v1025_v28, %v1021_v10 }
 0x274   :  { %v1030_v15 = vsel %vm1022_vm11, %v1026_v17, %v3503_v59  ;;  %v1034_v4 = vsub.f32 %v72_v24, %v986_v47 }
 0x275   :  { %v1031_v63 = vsel %vm1023_vm13, %v1027_v29, %v3504_v41  ;;  %v1032_v16 = vadd.f32 %v1030_v15, %v1016_v62  ;;  %v1035_v1 = vsub.f32 %v76_v38, %v987_v0 }
 0x276   :  { %v1033_v8 = vadd.f32 %v1031_v63, %v1017_v49  ;;  %v1036_v34 = vand.u32 2147483647, %v1034_v4 }
 0x277   :  { %v1037_v37 = vand.u32 2147483647, %v1035_v1 }
 0x278   :  { %v1040_v45 = vmul.f32 0.5, %v1036_v34  ;;  %v3505_v3 = vadd.f32 -0.5, %v1036_v34  ;;  %vm1038_vm15 = vcmp.lt.f32.partialorder %v1036_v34, 1.0 }
 0x279   :  { %v1041_v32 = vmul.f32 0.5, %v1037_v37  ;;  %v3506_v36 = vadd.f32 -0.5, %v1037_v37  ;;  %vm1039_vm5 = vcmp.lt.f32.partialorder %v1037_v37, 1.0 }
 0x27a   :  { %v1042_v7 = vmul.f32 %v1040_v45, %v1036_v34 }
 0x27b   :  { %v1043_v25 = vmul.f32 %v1041_v32, %v1037_v37 }
 0x27c   :  { %v1046_v50 = vsel %vm1038_vm15, %v1042_v7, %v3505_v3 }
 0x27d   :  { %v1047_v40 = vsel %vm1039_vm5, %v1043_v25, %v3506_v36  ;;  %v1048_v46 = vadd.f32 %v1046_v50, %v1032_v16 }
 0x27e   :  { %v1049_v44 = vadd.f32 %v1047_v40, %v1033_v8 }
 0x27f   :  { %v1050_v27 = vsel %vm908_vm2, %v1048_v46, 0.0 }
 0x280   :  { %v1051_v21 = vsel %vm909_vm7, %v1049_v44, 0.0 }
 0x281   :  { %v4710_v54 = vadd.f32 %v1051_v21, %v1050_v27 }
 0x2e7   :  { %v919_v61 = vpop.xlane.xlu0 %918 }
 0x2e8   :  { %v921_v51 = vcvt.f32.s32 %v919_v61 }
 0x2e9   :  { %v931_v58 = vpop.xlane.xlu1 %930 }
 0x2ea   :  { %v933_v33 = vcvt.f32.s32 %v931_v58  ;;  %v922_v53 = vshll.u32 %v921_v51, 16 }
 0x2ec   :  { %v934_v57 = vshll.u32 %v933_v33, 16 }
 0x2ed   :  { %v917_v52 = vpop.xlane.xlu0 %916 }
 0x2ee   :  { %v920_v6 = vcvt.f32.s32 %v917_v52  ;;  %v929_v55 = vpop.xlane.xlu1 %928 }
 0x2ef   :  { %v932_v2 = vcvt.f32.s32 %v929_v55 }
 0x2f0   :  { %v923_v60 = vadd.s32 %v922_v53, %v920_v6 }
 0x2f1   :  { %v935_v30 = vadd.s32 %v934_v57, %v932_v2 }
 0x2f2   :  { %v936_v5 = vrot.slane %v923_v60, 4 }
 0x2f3   :  { %v942_v26 = vrot.slane %v935_v30, 4 }
 0x2f4   :  { %v937_v12 = vadd.s32 %v936_v5, %v923_v60  ;;  %v1204_v31 = vpop.xlane.xlu0 %1203 }
 0x2f5   :  { %v943_v56 = vadd.s32 %v942_v26, %v935_v30  ;;  %v1206_v20 = vcvt.f32.s32 %v1204_v31 }
 0x2f6   :  { %v938_v11 = vrot.slane %v937_v12, 2 }
 0x2f7   :  { %v944_v62 = vrot.slane %v943_v56, 2  ;;  %v1216_v39 = vpop.xlane.xlu1 %1215  ;;  %v1207_v22 = vshll.u32 %v1206_v20, 16 }
 0x2f8   :  { %v939_v10 = vadd.s32 %v938_v11, %v937_v12  ;;  %v1202_v48 = vpop.xlane.xlu0 %1201  ;;  %v1218_v24 = vcvt.f32.s32 %v1216_v39 }
 0x2f9   :  { %v945_v49 = vadd.s32 %v944_v62, %v943_v56  ;;  %v1205_v23 = vcvt.f32.s32 %v1202_v48 }
 0x2fa   :  { %v940_v28 = vrot.slane %v939_v10, 1  ;;  %v1219_v17 = vshll.u32 %v1218_v24, 16 }
 0x2fb   :  { %v946_v38 = vrot.slane %v945_v49, 1  ;;  %v1208_v47 = vadd.s32 %v1207_v22, %v1205_v23  ;;  %v1214_v59 = vpop.xlane.xlu1 %1213 }
 0x2fc   :  { %v941_v0 = vadd.s32 %v940_v28, %v939_v10  ;;  %v1217_v15 = vcvt.f32.s32 %v1214_v59 }
 0x2fd   :  { %v947_v29 = vadd.s32 %v946_v38, %v945_v49  ;;  %v1221_v41 = vrot.slane %v1208_v47, 4 }
 0x2fe   :  { %v1220_v63 = vadd.s32 %v1219_v17, %v1217_v15  ;;  %v1187_v1 = vmul.u32 3, %v941_v0 }
 0x2ff   :  { %v1222_v4 = vadd.s32 %v1221_v41, %v1208_v47  ;;  %v4712_v16 = vadd.s32 %v947_v29, %v941_v0  ;;  %v1188_v32 = vmul.u32 3, %v947_v29 }
 0x300   :  { %v1227_v34 = vrot.slane %v1220_v63, 4  ;;  %vm1189_vm6 = vcmp.lt.s32.totalorder %v1187_v1, 127 }
 0x301   :  { %v1223_v8 = vrot.slane %v1222_v4, 2  ;;  %v4714_v50 = vsel %vm1189_vm6, %v1187_v1, 127  ;;  %vm1191_vm1 = vcmp.lt.s32.totalorder %v1188_v32, 127 }
 0x302   :  { %v1228_v45 = vadd.s32 %v1227_v34, %v1220_v63  ;;  %v4720_v21 = vsel %vm1191_vm1, %v1188_v32, 127 }
 0x303   :  { %v1224_v37 = vadd.s32 %v1223_v8, %v1222_v4 }
 0x304   :  { %v1229_v3 = vrot.slane %v1228_v45, 2 }
 0x305   :  { %v1225_v7 = vrot.slane %v1224_v37, 1 }
 0x306   :  { %v1230_v36 = vadd.s32 %v1229_v3, %v1228_v45 }
 0x307   :  { %v1226_v25 = vadd.s32 %v1225_v7, %v1224_v37 }
 0x308   :  { %v1231_v40 = vrot.slane %v1230_v36, 1 }
 0x309   :  { %vm1233_vm0 = vcmp.ge.s32.totalorder %v1226_v25, %v4714_v50 }
 0x30a   :  { %v1235_v46 = vsel %vm1233_vm0, 1, %v5398_v9  ;;  %v1232_v27 = vadd.s32 %v1231_v40, %v1230_v36 }
 0x30b   :  { %v4718_v44 = vmul.u32 1073741824, %v1235_v46 }
 0x30c   :  { %vm1234_vm9 = vcmp.ge.s32.totalorder %v1232_v27, %v4720_v21 }
 0x30d   :  { %v1239_v61 = vadd.s32 268435456, %v4718_v44  ;;  %v1285_v51 = vadd.s32 536870912, %v4718_v44  ;;  %v1236_v58 = vsel %vm1234_vm9, 1, %v5398_v9  ;;  %v1333_v12 = vadd.s32 805306368, %v4718_v44 }
 0x30e   :  { %v4726_v33 = vmul.u32 1073741824, %v1236_v58 }
 0x30f   :  { %vm1241_vm10 = vcmp.ge.s32.totalorder %v4676_v14, %v1239_v61  ;;  %vm1287_vm4 = vcmp.ge.s32.totalorder %v4676_v14, %v1285_v51  ;;  %vm1335_vm8 = vcmp.ge.s32.totalorder %v4676_v14, %v1333_v12 }
 0x310   :  { %v1243_v52 = vsel %vm1241_vm10, 1, %v5398_v9  ;;  %v1289_v53 = vsel %vm1287_vm4, 1, %v5398_v9  ;;  %v1240_v55 = vadd.s32 268435456, %v4726_v33  ;;  %v1286_v57 = vadd.s32 536870912, %v4726_v33 }
 0x311   :  { %v1246_v6 = vshrl.u32 %v1243_v52, 16  ;;  %v1292_v60 = vshrl.u32 %v1289_v53, 16  ;;  %v1245_v11 = vand.u32 65535, %v1243_v52  ;;  %v1334_v62 = vadd.s32 805306368, %v4726_v33 }
 0x312   :  { %vm1242_vm14 = vcmp.ge.s32.totalorder %v4701_v19, %v1240_v55  ;;  %vm1288_vm3 = vcmp.ge.s32.totalorder %v4701_v19, %v1286_v57  ;;  %v1291_v49 = vand.u32 65535, %v1289_v53  ;;  %v1337_v22 = vsel %vm1335_vm8, 1, %v5398_v9 }
 0x313   :  { %v1248_v2 = vcvt.s32.f32 %v1246_v6  ;;  %v1244_v30 = vsel %vm1242_vm14, 1, %v5398_v9  ;;  %v1290_v5 = vsel %vm1288_vm3, 1, %v5398_v9  ;;  %v1294_v56 = vcvt.s32.f32 %v1292_v60 }
 0x314   :  { %v1258_v26 = vshrl.u32 %v1244_v30, 16  ;;  %v1304_v20 = vshrl.u32 %v1290_v5, 16  ;;  %v1247_v39 = vcvt.s32.f32 %v1245_v11  ;;  %v1257_v48 = vand.u32 65535, %v1244_v30 }
 0x315   :  { %1251 = vadd.xlane.f32.xlu0 %v1248_v2  ;;  %vm1336_vm12 = vcmp.ge.s32.totalorder %v4701_v19, %v1334_v62  ;;  %v1293_v23 = vcvt.s32.f32 %v1291_v49  ;;  %v1303_v28 = vand.u32 65535, %v1290_v5  ;;  %v1340_v38 = vshrl.u32 %v1337_v22, 16 }
 0x316   :  { %v1260_v31 = vcvt.s32.f32 %v1258_v26  ;;  %v1306_v10 = vcvt.s32.f32 %v1304_v20  ;;  %v1259_v24 = vcvt.s32.f32 %v1257_v48  ;;  %v1338_v47 = vsel %vm1336_vm12, 1, %v5398_v9 }
 0x317   :  { %v1305_v17 = vcvt.s32.f32 %v1303_v28  ;;  %v1342_v59 = vcvt.s32.f32 %v1340_v38  ;;  %v1352_v0 = vshrl.u32 %v1338_v47, 16  ;;  %v1339_v29 = vand.u32 65535, %v1337_v22 }
 0x318   :  { %1263 = vadd.xlane.f32.xlu1 %v1260_v31  ;;  %v1351_v4 = vand.u32 65535, %v1338_v47 }
 0x319   :  { %1297 = vadd.xlane.f32.xlu0 %v1294_v56  ;;  %v1354_v41 = vcvt.s32.f32 %v1352_v0  ;;  %v1341_v15 = vcvt.s32.f32 %v1339_v29 }
 0x31a   :  { %v1353_v63 = vcvt.s32.f32 %v1351_v4 }
 0x31c   :  { %1309 = vadd.xlane.f32.xlu1 %v1306_v10 }
 0x31d   :  { %1249 = vadd.xlane.f32.xlu0 %v1247_v39 }
 0x320   :  { %1261 = vadd.xlane.f32.xlu1 %v1259_v24 }
 0x321   :  { %1295 = vadd.xlane.f32.xlu0 %v1293_v23 }
 0x324   :  { %1307 = vadd.xlane.f32.xlu1 %v1305_v17 }
 0x325   :  { %1345 = vadd.xlane.f32.xlu0 %v1342_v59 }
 0x328   :  { %1357 = vadd.xlane.f32.xlu1 %v1354_v41 }
 0x329   :  { %1343 = vadd.xlane.f32.xlu0 %v1341_v15 }
 0x32c   :  { %1355 = vadd.xlane.f32.xlu1 %v1353_v63 }
 0x3a2   :  { %v1252_v1 = vpop.xlane.xlu0 %1251 }
 0x3a3   :  { %v1254_v37 = vcvt.f32.s32 %v1252_v1 }
 0x3a5   :  { %v1264_v8 = vpop.xlane.xlu1 %1263  ;;  %v1255_v3 = vshll.u32 %v1254_v37, 16 }
 0x3a6   :  { %v1298_v34 = vpop.xlane.xlu0 %1297  ;;  %v1266_v45 = vcvt.f32.s32 %v1264_v8 }
 0x3a7   :  { %v1300_v25 = vcvt.f32.s32 %v1298_v34 }
 0x3a8   :  { %v1267_v46 = vshll.u32 %v1266_v45, 16 }
 0x3a9   :  { %v1310_v32 = vpop.xlane.xlu1 %1309  ;;  %v1301_v58 = vshll.u32 %v1300_v25, 16 }
 0x3aa   :  { %v1250_v7 = vpop.xlane.xlu0 %1249  ;;  %v1312_v27 = vcvt.f32.s32 %v1310_v32 }
 0x3ab   :  { %v1253_v36 = vcvt.f32.s32 %v1250_v7 }
 0x3ac   :  { %v1313_v60 = vshll.u32 %v1312_v27, 16 }
 0x3ad   :  { %v1256_v40 = vadd.s32 %v1255_v3, %v1253_v36  ;;  %v1262_v61 = vpop.xlane.xlu1 %1261 }
 0x3ae   :  { %v1296_v51 = vpop.xlane.xlu0 %1295  ;;  %v1265_v53 = vcvt.f32.s32 %v1262_v61 }
 0x3af   :  { %v1269_v52 = vrot.slane %v1256_v40, 4  ;;  %v1299_v6 = vcvt.f32.s32 %v1296_v51 }
 0x3b0   :  { %v1268_v57 = vadd.s32 %v1267_v46, %v1265_v53 }
 0x3b1   :  { %v1270_v55 = vadd.s32 %v1269_v52, %v1256_v40  ;;  %v1302_v2 = vadd.s32 %v1301_v58, %v1299_v6  ;;  %v1308_v30 = vpop.xlane.xlu1 %1307 }
 0x3b2   :  { %v1346_v5 = vpop.xlane.xlu0 %1345  ;;  %v1275_v12 = vrot.slane %v1268_v57, 4  ;;  %v1311_v56 = vcvt.f32.s32 %v1308_v30 }
 0x3b3   :  { %v1271_v26 = vrot.slane %v1270_v55, 2  ;;  %v1315_v31 = vrot.slane %v1302_v2, 4  ;;  %v1348_v20 = vcvt.f32.s32 %v1346_v5 }
 0x3b4   :  { %v1276_v11 = vadd.s32 %v1275_v12, %v1268_v57  ;;  %v1314_v10 = vadd.s32 %v1313_v60, %v1311_v56 }
 0x3b5   :  { %v1316_v62 = vadd.s32 %v1315_v31, %v1302_v2  ;;  %v1358_v39 = vpop.xlane.xlu1 %1357  ;;  %v1272_v49 = vadd.s32 %v1271_v26, %v1270_v55  ;;  %v1349_v28 = vshll.u32 %v1348_v20, 16 }
 0x3b6   :  { %v1344_v48 = vpop.xlane.xlu0 %1343  ;;  %v1321_v24 = vrot.slane %v1314_v10, 4  ;;  %v1277_v23 = vrot.slane %v1276_v11, 2  ;;  %v1360_v38 = vcvt.f32.s32 %v1358_v39 }
 0x3b7   :  { %v1317_v22 = vrot.slane %v1316_v62, 2  ;;  %v1347_v47 = vcvt.f32.s32 %v1344_v48  ;;  %v1273_v41 = vrot.slane %v1272_v49, 1 }
 0x3b8   :  { %v1322_v59 = vadd.s32 %v1321_v24, %v1314_v10  ;;  %v1278_v63 = vadd.s32 %v1277_v23, %v1276_v11  ;;  %v1361_v1 = vshll.u32 %v1360_v38, 16 }
 0x3b9   :  { %v1318_v17 = vadd.s32 %v1317_v22, %v1316_v62  ;;  %v1350_v0 = vadd.s32 %v1349_v28, %v1347_v47  ;;  %v1356_v29 = vpop.xlane.xlu1 %1355  ;;  %v1274_v25 = vadd.s32 %v1273_v41, %v1272_v49 }
 0x3ba   :  { %v1323_v4 = vrot.slane %v1322_v59, 2  ;;  %v1359_v34 = vcvt.f32.s32 %v1356_v29  ;;  %v1279_v36 = vrot.slane %v1278_v63, 1 }
 0x3bb   :  { %v1319_v15 = vrot.slane %v1318_v17, 1  ;;  %v1363_v8 = vrot.slane %v1350_v0, 4  ;;  %vm1281_vm13 = vcmp.ge.s32.totalorder %v1274_v25, %v4714_v50 }
 0x3bc   :  { %v1324_v37 = vadd.s32 %v1323_v4, %v1322_v59  ;;  %v1362_v7 = vadd.s32 %v1361_v1, %v1359_v34  ;;  %v1280_v58 = vadd.s32 %v1279_v36, %v1278_v63  ;;  %v1283_v2 = vsel %vm1281_vm13, 1, %v5398_v9 }
 0x3bd   :  { %v1320_v45 = vadd.s32 %v1319_v15, %v1318_v17  ;;  %v1364_v32 = vadd.s32 %v1363_v8, %v1350_v0 }
 0x3be   :  { %v1325_v3 = vrot.slane %v1324_v37, 1  ;;  %v1369_v46 = vrot.slane %v1362_v7, 4  ;;  %vm1282_vm5 = vcmp.ge.s32.totalorder %v1280_v58, %v4720_v21 }
 0x3bf   :  { %v1365_v40 = vrot.slane %v1364_v32, 2  ;;  %vm1327_vm11 = vcmp.ge.s32.totalorder %v1320_v45, %v4714_v50  ;;  %v1284_v56 = vsel %vm1282_vm5, 1, %v5398_v9 }
 0x3c0   :  { %v1326_v27 = vadd.s32 %v1325_v3, %v1324_v37  ;;  %v1370_v51 = vadd.s32 %v1369_v46, %v1362_v7  ;;  %v1329_v6 = vsel %vm1327_vm11, 1, %v5398_v9 }
 0x3c1   :  { %v1366_v61 = vadd.s32 %v1365_v40, %v1364_v32  ;;  %v1331_v60 = vadd.s32 %v1329_v6, %v1283_v2 }
 0x3c2   :  { %v1371_v53 = vrot.slane %v1370_v51, 2  ;;  %vm1328_vm15 = vcmp.ge.s32.totalorder %v1326_v27, %v4720_v21 }
 0x3c3   :  { %v1367_v52 = vrot.slane %v1366_v61, 1  ;;  %v1330_v5 = vsel %vm1328_vm15, 1, %v5398_v9 }
 0x3c4   :  { %v1372_v57 = vadd.s32 %v1371_v53, %v1370_v51  ;;  %v1332_v20 = vadd.s32 %v1330_v5, %v1284_v56 }
 0x3c5   :  { %v1368_v55 = vadd.s32 %v1367_v52, %v1366_v61 }
 0x3c6   :  { %v1373_v30 = vrot.slane %v1372_v57, 1 }
 0x3c7   :  { %vm1375_vm6 = vcmp.ge.s32.totalorder %v1368_v55, %v4714_v50 }
 0x3c8   :  { %v1377_v26 = vsel %vm1375_vm6, 1, %v5398_v9  ;;  %v1374_v31 = vadd.s32 %v1373_v30, %v1372_v57 }
 0x3c9   :  { %v1379_v12 = vadd.s32 %v1377_v26, %v1331_v60 }
 0x3ca   :  { %vm1376_vm1 = vcmp.ge.s32.totalorder %v1374_v31, %v4720_v21 }
 0x3cb   :  { %v1381_v11 = vmul.u32 268435456, %v1379_v12  ;;  %v1378_v62 = vsel %vm1376_vm1, 1, %v5398_v9 }
 0x3cc   :  { %v1380_v10 = vadd.s32 %v1378_v62, %v1332_v20 }
 0x3cd   :  { %v4757_v39 = vadd.s32 %v1381_v11, %v4718_v44 }
 0x3ce   :  { %v1382_v48 = vmul.u32 268435456, %v1380_v10 }
 0x3cf   :  { %v1385_v49 = vadd.s32 67108864, %v4757_v39  ;;  %v1431_v22 = vadd.s32 134217728, %v4757_v39  ;;  %v1479_v41 = vadd.s32 201326592, %v4757_v39 }
 0x3d0   :  { %v4763_v24 = vadd.s32 %v1382_v48, %v4726_v33 }
 0x3d1   :  { %vm1387_vm0 = vcmp.ge.s32.totalorder %v4676_v14, %v1385_v49  ;;  %vm1433_vm9 = vcmp.ge.s32.totalorder %v4676_v14, %v1431_v22  ;;  %vm1481_vm14 = vcmp.ge.s32.totalorder %v4676_v14, %v1479_v41 }
 0x3d2   :  { %v1389_v23 = vsel %vm1387_vm0, 1, %v5398_v9  ;;  %v1435_v28 = vsel %vm1433_vm9, 1, %v5398_v9  ;;  %v1386_v44 = vadd.s32 67108864, %v4763_v24  ;;  %v1432_v47 = vadd.s32 134217728, %v4763_v24 }
 0x3d3   :  { %v1392_v38 = vshrl.u32 %v1389_v23, 16  ;;  %v1438_v59 = vshrl.u32 %v1435_v28, 16  ;;  %v1391_v1 = vand.u32 65535, %v1389_v23  ;;  %v1480_v8 = vadd.s32 201326592, %v4763_v24 }
 0x3d4   :  { %vm1388_vm10 = vcmp.ge.s32.totalorder %v4701_v19, %v1386_v44  ;;  %vm1434_vm4 = vcmp.ge.s32.totalorder %v4701_v19, %v1432_v47  ;;  %v1437_v32 = vand.u32 65535, %v1435_v28  ;;  %v1483_v7 = vsel %vm1481_vm14, 1, %v5398_v9 }
 0x3d5   :  { %v1394_v17 = vcvt.s32.f32 %v1392_v38  ;;  %v1390_v33 = vsel %vm1388_vm10, 1, %v5398_v9  ;;  %v1436_v0 = vsel %vm1434_vm4, 1, %v5398_v9  ;;  %v1440_v4 = vcvt.s32.f32 %v1438_v59 }
 0x3d6   :  { %v1404_v29 = vshrl.u32 %v1390_v33, 16  ;;  %v1450_v63 = vshrl.u32 %v1436_v0, 16  ;;  %v1393_v37 = vcvt.s32.f32 %v1391_v1  ;;  %v1403_v45 = vand.u32 65535, %v1390_v33 }
 0x3d7   :  { %1397 = vadd.xlane.f32.xlu0 %v1394_v17  ;;  %vm1482_vm3 = vcmp.ge.s32.totalorder %v4701_v19, %v1480_v8  ;;  %v1439_v25 = vcvt.s32.f32 %v1437_v32  ;;  %v1449_v36 = vand.u32 65535, %v1436_v0  ;;  %v1486_v40 = vshrl.u32 %v1483_v7, 16 }
 0x3d8   :  { %v1406_v15 = vcvt.s32.f32 %v1404_v29  ;;  %v1452_v34 = vcvt.s32.f32 %v1450_v63  ;;  %v1405_v3 = vcvt.s32.f32 %v1403_v45  ;;  %v1484_v46 = vsel %vm1482_vm3, 1, %v5398_v9 }
 0x3d9   :  { %v1451_v27 = vcvt.s32.f32 %v1449_v36  ;;  %v1488_v61 = vcvt.s32.f32 %v1486_v40  ;;  %v1498_v51 = vshrl.u32 %v1484_v46, 16  ;;  %v1485_v58 = vand.u32 65535, %v1483_v7 }
 0x3da   :  { %1409 = vadd.xlane.f32.xlu1 %v1406_v15  ;;  %v1497_v6 = vand.u32 65535, %v1484_v46 }
 0x3db   :  { %1443 = vadd.xlane.f32.xlu0 %v1440_v4  ;;  %v1500_v52 = vcvt.s32.f32 %v1498_v51  ;;  %v1487_v53 = vcvt.s32.f32 %v1485_v58 }
 0x3dc   :  { %v1499_v55 = vcvt.s32.f32 %v1497_v6 }
 0x3de   :  { %1455 = vadd.xlane.f32.xlu1 %v1452_v34 }
 0x3df   :  { %1395 = vadd.xlane.f32.xlu0 %v1393_v37 }
 0x3e2   :  { %1407 = vadd.xlane.f32.xlu1 %v1405_v3 }
 0x3e3   :  { %1441 = vadd.xlane.f32.xlu0 %v1439_v25 }
 0x3e6   :  { %1453 = vadd.xlane.f32.xlu1 %v1451_v27 }
 0x3e7   :  { %1491 = vadd.xlane.f32.xlu0 %v1488_v61 }
 0x3ea   :  { %1503 = vadd.xlane.f32.xlu1 %v1500_v52 }
 0x3eb   :  { %1489 = vadd.xlane.f32.xlu0 %v1487_v53 }
 0x3ee   :  { %1501 = vadd.xlane.f32.xlu1 %v1499_v55 }
 0x464   :  { %v1398_v57 = vpop.xlane.xlu0 %1397 }
 0x465   :  { %v1400_v30 = vcvt.f32.s32 %v1398_v57 }
 0x467   :  { %v1410_v2 = vpop.xlane.xlu1 %1409  ;;  %v1401_v31 = vshll.u32 %v1400_v30, 16 }
 0x468   :  { %v1444_v60 = vpop.xlane.xlu0 %1443  ;;  %v1412_v5 = vcvt.f32.s32 %v1410_v2 }
 0x469   :  { %v1446_v56 = vcvt.f32.s32 %v1444_v60 }
 0x46a   :  { %v1413_v62 = vshll.u32 %v1412_v5, 16 }
 0x46b   :  { %v1456_v26 = vpop.xlane.xlu1 %1455  ;;  %v1447_v22 = vshll.u32 %v1446_v56, 16 }
 0x46c   :  { %v1396_v12 = vpop.xlane.xlu0 %1395  ;;  %v1458_v10 = vcvt.f32.s32 %v1456_v26 }
 0x46d   :  { %v1399_v20 = vcvt.f32.s32 %v1396_v12 }
 0x46e   :  { %v1459_v59 = vshll.u32 %v1458_v10, 16 }
 0x46f   :  { %v1402_v11 = vadd.s32 %v1401_v31, %v1399_v20  ;;  %v1408_v48 = vpop.xlane.xlu1 %1407 }
 0x470   :  { %v1442_v49 = vpop.xlane.xlu0 %1441  ;;  %v1411_v28 = vcvt.f32.s32 %v1408_v48 }
 0x471   :  { %v1415_v23 = vrot.slane %v1402_v11, 4  ;;  %v1445_v38 = vcvt.f32.s32 %v1442_v49 }
 0x472   :  { %v1414_v47 = vadd.s32 %v1413_v62, %v1411_v28 }
 0x473   :  { %v1416_v44 = vadd.s32 %v1415_v23, %v1402_v11  ;;  %v1448_v17 = vadd.s32 %v1447_v22, %v1445_v38  ;;  %v1454_v33 = vpop.xlane.xlu1 %1453 }
 0x474   :  { %v1492_v0 = vpop.xlane.xlu0 %1491  ;;  %v1421_v41 = vrot.slane %v1414_v47, 4  ;;  %v1457_v4 = vcvt.f32.s32 %v1454_v33 }
 0x475   :  { %v1417_v29 = vrot.slane %v1416_v44, 2  ;;  %v1461_v15 = vrot.slane %v1448_v17, 4  ;;  %v1494_v63 = vcvt.f32.s32 %v1492_v0 }
 0x476   :  { %v1422_v1 = vadd.s32 %v1421_v41, %v1414_v47  ;;  %v1460_v34 = vadd.s32 %v1459_v59, %v1457_v4 }
 0x477   :  { %v1462_v8 = vadd.s32 %v1461_v15, %v1448_v17  ;;  %v1504_v37 = vpop.xlane.xlu1 %1503  ;;  %v1418_v32 = vadd.s32 %v1417_v29, %v1416_v44  ;;  %v1495_v36 = vshll.u32 %v1494_v63, 16 }
 0x478   :  { %v1490_v45 = vpop.xlane.xlu0 %1489  ;;  %v1467_v3 = vrot.slane %v1460_v34, 4  ;;  %v1423_v25 = vrot.slane %v1422_v1, 2  ;;  %v1506_v40 = vcvt.f32.s32 %v1504_v37 }
 0x479   :  { %v1463_v7 = vrot.slane %v1462_v8, 2  ;;  %v1493_v46 = vcvt.f32.s32 %v1490_v45  ;;  %v1419_v52 = vrot.slane %v1418_v32, 1 }
 0x47a   :  { %v1468_v61 = vadd.s32 %v1467_v3, %v1460_v34  ;;  %v1424_v55 = vadd.s32 %v1423_v25, %v1422_v1  ;;  %v1507_v57 = vshll.u32 %v1506_v40, 16 }
 0x47b   :  { %v1464_v27 = vadd.s32 %v1463_v7, %v1462_v8  ;;  %v1496_v51 = vadd.s32 %v1495_v36, %v1493_v46  ;;  %v1502_v58 = vpop.xlane.xlu1 %1501  ;;  %v1420_v56 = vadd.s32 %v1419_v52, %v1418_v32 }
 0x47c   :  { %v1469_v6 = vrot.slane %v1468_v61, 2  ;;  %v1505_v60 = vcvt.f32.s32 %v1502_v58  ;;  %v1425_v20 = vrot.slane %v1424_v55, 1 }
 0x47d   :  { %v1465_v53 = vrot.slane %v1464_v27, 1  ;;  %v1509_v2 = vrot.slane %v1496_v51, 4  ;;  %vm1427_vm12 = vcmp.ge.s32.totalorder %v1420_v56, %v4714_v50 }
 0x47e   :  { %v1470_v30 = vadd.s32 %v1469_v6, %v1468_v61  ;;  %v1508_v12 = vadd.s32 %v1507_v57, %v1505_v60  ;;  %v1426_v22 = vadd.s32 %v1425_v20, %v1424_v55  ;;  %v1429_v17 = vsel %vm1427_vm12, 1, %v5398_v9 }
 0x47f   :  { %v1466_v5 = vadd.s32 %v1465_v53, %v1464_v27  ;;  %v1510_v26 = vadd.s32 %v1509_v2, %v1496_v51 }
 0x480   :  { %v1471_v31 = vrot.slane %v1470_v30, 1  ;;  %v1515_v62 = vrot.slane %v1508_v12, 4  ;;  %vm1428_vm13 = vcmp.ge.s32.totalorder %v1426_v22, %v4720_v21 }
 0x481   :  { %v1511_v11 = vrot.slane %v1510_v26, 2  ;;  %vm1473_vm8 = vcmp.ge.s32.totalorder %v1466_v5, %v4714_v50  ;;  %v1430_v4 = vsel %vm1428_vm13, 1, %v5398_v9 }
 0x482   :  { %v1472_v10 = vadd.s32 %v1471_v31, %v1470_v30  ;;  %v1516_v49 = vadd.s32 %v1515_v62, %v1508_v12  ;;  %v1475_v38 = vsel %vm1473_vm8, 1, %v5398_v9 }
 0x483   :  { %v1512_v48 = vadd.s32 %v1511_v11, %v1510_v26  ;;  %v1477_v59 = vadd.s32 %v1475_v38, %v1429_v17 }
 0x484   :  { %v1517_v28 = vrot.slane %v1516_v49, 2  ;;  %vm1474_vm11 = vcmp.ge.s32.totalorder %v1472_v10, %v4720_v21 }
 0x485   :  { %v1513_v23 = vrot.slane %v1512_v48, 1  ;;  %v1476_v0 = vsel %vm1474_vm11, 1, %v5398_v9 }
 0x486   :  { %v1518_v47 = vadd.s32 %v1517_v28, %v1516_v49  ;;  %v1478_v63 = vadd.s32 %v1476_v0, %v1430_v4 }
 0x487   :  { %v1514_v44 = vadd.s32 %v1513_v23, %v1512_v48 }
 0x488   :  { %v1519_v33 = vrot.slane %v1518_v47, 1 }
 0x489   :  { %vm1521_vm15 = vcmp.ge.s32.totalorder %v1514_v44, %v4714_v50 }
 0x48a   :  { %v1523_v29 = vsel %vm1521_vm15, 1, %v5398_v9  ;;  %v1520_v15 = vadd.s32 %v1519_v33, %v1518_v47 }
 0x48b   :  { %v1525_v41 = vadd.s32 %v1523_v29, %v1477_v59 }
 0x48c   :  { %vm1522_vm5 = vcmp.ge.s32.totalorder %v1520_v15, %v4720_v21 }
 0x48d   :  { %v1527_v1 = vmul.u32 67108864, %v1525_v41  ;;  %v1524_v8 = vsel %vm1522_vm5, 1, %v5398_v9 }
 0x48e   :  { %v1526_v34 = vadd.s32 %v1524_v8, %v1478_v63 }
 0x48f   :  { %v4793_v37 = vadd.s32 %v1527_v1, %v4757_v39 }
 0x490   :  { %v1528_v45 = vmul.u32 67108864, %v1526_v34 }
 0x491   :  { %v1531_v32 = vadd.s32 16777216, %v4793_v37  ;;  %v1577_v7 = vadd.s32 33554432, %v4793_v37  ;;  %v1625_v52 = vadd.s32 50331648, %v4793_v37 }
 0x492   :  { %v4799_v3 = vadd.s32 %v1528_v45, %v4763_v24 }
 0x493   :  { %vm1533_vm6 = vcmp.ge.s32.totalorder %v4676_v14, %v1531_v32  ;;  %vm1579_vm1 = vcmp.ge.s32.totalorder %v4676_v14, %v1577_v7  ;;  %vm1627_vm10 = vcmp.ge.s32.totalorder %v4676_v14, %v1625_v52 }
 0x494   :  { %v1535_v25 = vsel %vm1533_vm6, 1, %v5398_v9  ;;  %v1581_v36 = vsel %vm1579_vm1, 1, %v5398_v9  ;;  %v1532_v39 = vadd.s32 16777216, %v4799_v3  ;;  %v1578_v46 = vadd.s32 33554432, %v4799_v3 }
 0x495   :  { %v1538_v40 = vshrl.u32 %v1535_v25, 16  ;;  %v1584_v61 = vshrl.u32 %v1581_v36, 16  ;;  %v1537_v57 = vand.u32 65535, %v1535_v25  ;;  %v1626_v2 = vadd.s32 50331648, %v4799_v3 }
 0x496   :  { %vm1534_vm0 = vcmp.ge.s32.totalorder %v4701_v19, %v1532_v39  ;;  %vm1580_vm9 = vcmp.ge.s32.totalorder %v4701_v19, %v1578_v46  ;;  %v1583_v26 = vand.u32 65535, %v1581_v36  ;;  %v1629_v12 = vsel %vm1627_vm10, 1, %v5398_v9 }
 0x497   :  { %v1540_v27 = vcvt.s32.f32 %v1538_v40  ;;  %v1536_v24 = vsel %vm1534_vm0, 1, %v5398_v9  ;;  %v1582_v51 = vsel %vm1580_vm9, 1, %v5398_v9  ;;  %v1586_v6 = vcvt.s32.f32 %v1584_v61 }
 0x498   :  { %v1550_v58 = vshrl.u32 %v1536_v24, 16  ;;  %v1596_v55 = vshrl.u32 %v1582_v51, 16  ;;  %v1539_v30 = vcvt.s32.f32 %v1537_v57  ;;  %v1549_v5 = vand.u32 65535, %v1536_v24 }
 0x499   :  { %1543 = vadd.xlane.f32.xlu0 %v1540_v27  ;;  %vm1628_vm4 = vcmp.ge.s32.totalorder %v4701_v19, %v1626_v2  ;;  %v1585_v56 = vcvt.s32.f32 %v1583_v26  ;;  %v1595_v20 = vand.u32 65535, %v1582_v51  ;;  %v1632_v11 = vshrl.u32 %v1629_v12, 16 }
 0x49a   :  { %v1552_v53 = vcvt.s32.f32 %v1550_v58  ;;  %v1598_v60 = vcvt.s32.f32 %v1596_v55  ;;  %v1551_v31 = vcvt.s32.f32 %v1549_v5  ;;  %v1630_v62 = vsel %vm1628_vm4, 1, %v5398_v9 }
 0x49b   :  { %v1597_v10 = vcvt.s32.f32 %v1595_v20  ;;  %v1634_v48 = vcvt.s32.f32 %v1632_v11  ;;  %v1644_v49 = vshrl.u32 %v1630_v62, 16  ;;  %v1631_v22 = vand.u32 65535, %v1629_v12 }
 0x49c   :  { %1555 = vadd.xlane.f32.xlu1 %v1552_v53  ;;  %v1643_v38 = vand.u32 65535, %v1630_v62 }
 0x49d   :  { %1589 = vadd.xlane.f32.xlu0 %v1586_v6  ;;  %v1646_v23 = vcvt.s32.f32 %v1644_v49  ;;  %v1633_v28 = vcvt.s32.f32 %v1631_v22 }
 0x49e   :  { %v1645_v44 = vcvt.s32.f32 %v1643_v38 }
 0x4a0   :  { %1601 = vadd.xlane.f32.xlu1 %v1598_v60 }
 0x4a1   :  { %1541 = vadd.xlane.f32.xlu0 %v1539_v30 }
 0x4a4   :  { %1553 = vadd.xlane.f32.xlu1 %v1551_v31 }
 0x4a5   :  { %1587 = vadd.xlane.f32.xlu0 %v1585_v56 }
 0x4a8   :  { %1599 = vadd.xlane.f32.xlu1 %v1597_v10 }
 0x4a9   :  { %1637 = vadd.xlane.f32.xlu0 %v1634_v48 }
 0x4ac   :  { %1649 = vadd.xlane.f32.xlu1 %v1646_v23 }
 0x4ad   :  { %1635 = vadd.xlane.f32.xlu0 %v1633_v28 }
 0x4b0   :  { %1647 = vadd.xlane.f32.xlu1 %v1645_v44 }
 0x526   :  { %v1544_v47 = vpop.xlane.xlu0 %1543 }
 0x527   :  { %v1546_v33 = vcvt.f32.s32 %v1544_v47 }
 0x529   :  { %v1556_v17 = vpop.xlane.xlu1 %1555  ;;  %v1547_v15 = vshll.u32 %v1546_v33, 16 }
 0x52a   :  { %v1590_v59 = vpop.xlane.xlu0 %1589  ;;  %v1558_v0 = vcvt.f32.s32 %v1556_v17 }
 0x52b   :  { %v1592_v4 = vcvt.f32.s32 %v1590_v59 }
 0x52c   :  { %v1559_v8 = vshll.u32 %v1558_v0, 16 }
 0x52d   :  { %v1602_v29 = vpop.xlane.xlu1 %1601  ;;  %v1593_v7 = vshll.u32 %v1592_v4, 16 }
 0x52e   :  { %v1542_v41 = vpop.xlane.xlu0 %1541  ;;  %v1604_v34 = vcvt.f32.s32 %v1602_v29 }
 0x52f   :  { %v1545_v63 = vcvt.f32.s32 %v1542_v41 }
 0x530   :  { %v1605_v61 = vshll.u32 %v1604_v34, 16 }
 0x531   :  { %v1548_v1 = vadd.s32 %v1547_v15, %v1545_v63  ;;  %v1554_v45 = vpop.xlane.xlu1 %1553 }
 0x532   :  { %v1588_v32 = vpop.xlane.xlu0 %1587  ;;  %v1557_v36 = vcvt.f32.s32 %v1554_v45 }
 0x533   :  { %v1561_v25 = vrot.slane %v1548_v1, 4  ;;  %v1591_v40 = vcvt.f32.s32 %v1588_v32 }
 0x534   :  { %v1560_v46 = vadd.s32 %v1559_v8, %v1557_v36 }
 0x535   :  { %v1562_v39 = vadd.s32 %v1561_v25, %v1548_v1  ;;  %v1594_v27 = vadd.s32 %v1593_v7, %v1591_v40  ;;  %v1600_v24 = vpop.xlane.xlu1 %1599 }
 0x536   :  { %v1638_v51 = vpop.xlane.xlu0 %1637  ;;  %v1567_v52 = vrot.slane %v1560_v46, 4  ;;  %v1603_v6 = vcvt.f32.s32 %v1600_v24 }
 0x537   :  { %v1563_v58 = vrot.slane %v1562_v39, 2  ;;  %v1607_v53 = vrot.slane %v1594_v27, 4  ;;  %v1640_v55 = vcvt.f32.s32 %v1638_v51 }
 0x538   :  { %v1568_v57 = vadd.s32 %v1567_v52, %v1560_v46  ;;  %v1606_v60 = vadd.s32 %v1605_v61, %v1603_v6 }
 0x539   :  { %v1608_v2 = vadd.s32 %v1607_v53, %v1594_v27  ;;  %v1650_v30 = vpop.xlane.xlu1 %1649  ;;  %v1564_v26 = vadd.s32 %v1563_v58, %v1562_v39  ;;  %v1641_v20 = vshll.u32 %v1640_v55, 16 }
 0x53a   :  { %v1636_v5 = vpop.xlane.xlu0 %1635  ;;  %v1613_v31 = vrot.slane %v1606_v60, 4  ;;  %v1569_v56 = vrot.slane %v1568_v57, 2  ;;  %v1652_v11 = vcvt.f32.s32 %v1650_v30 }
 0x53b   :  { %v1609_v12 = vrot.slane %v1608_v2, 2  ;;  %v1639_v62 = vcvt.f32.s32 %v1636_v5  ;;  %v1565_v23 = vrot.slane %v1564_v26, 1 }
 0x53c   :  { %v1614_v48 = vadd.s32 %v1613_v31, %v1606_v60  ;;  %v1570_v44 = vadd.s32 %v1569_v56, %v1568_v57  ;;  %v1653_v47 = vshll.u32 %v1652_v11, 16 }
 0x53d   :  { %v1610_v10 = vadd.s32 %v1609_v12, %v1608_v2  ;;  %v1642_v49 = vadd.s32 %v1641_v20, %v1639_v62  ;;  %v1648_v22 = vpop.xlane.xlu1 %1647  ;;  %v1566_v4 = vadd.s32 %v1565_v23, %v1564_v26 }
 0x53e   :  { %v1615_v38 = vrot.slane %v1614_v48, 2  ;;  %v1651_v59 = vcvt.f32.s32 %v1648_v22  ;;  %v1571_v63 = vrot.slane %v1570_v44, 1 }
 0x53f   :  { %v1611_v28 = vrot.slane %v1610_v10, 1  ;;  %v1655_v17 = vrot.slane %v1642_v49, 4  ;;  %vm1573_vm3 = vcmp.ge.s32.totalorder %v1566_v4, %v4714_v50 }
 0x540   :  { %v1616_v33 = vadd.s32 %v1615_v38, %v1614_v48  ;;  %v1654_v41 = vadd.s32 %v1653_v47, %v1651_v59  ;;  %v1572_v7 = vadd.s32 %v1571_v63, %v1570_v44  ;;  %v1575_v27 = vsel %vm1573_vm3, 1, %v5398_v9 }
 0x541   :  { %v1612_v0 = vadd.s32 %v1611_v28, %v1610_v10  ;;  %v1656_v29 = vadd.s32 %v1655_v17, %v1642_v49 }
 0x542   :  { %v1617_v15 = vrot.slane %v1616_v33, 1  ;;  %v1661_v8 = vrot.slane %v1654_v41, 4  ;;  %vm1574_vm12 = vcmp.ge.s32.totalorder %v1572_v7, %v4720_v21 }
 0x543   :  { %v1657_v1 = vrot.slane %v1656_v29, 2  ;;  %vm1619_vm14 = vcmp.ge.s32.totalorder %v1612_v0, %v4714_v50  ;;  %v1576_v6 = vsel %vm1574_vm12, 1, %v5398_v9 }
 0x544   :  { %v1618_v34 = vadd.s32 %v1617_v15, %v1616_v33  ;;  %v1662_v32 = vadd.s32 %v1661_v8, %v1654_v41  ;;  %v1621_v40 = vsel %vm1619_vm14, 1, %v5398_v9 }
 0x545   :  { %v1658_v45 = vadd.s32 %v1657_v1, %v1656_v29  ;;  %v1623_v61 = vadd.s32 %v1621_v40, %v1575_v27 }
 0x546   :  { %v1663_v36 = vrot.slane %v1662_v32, 2  ;;  %vm1620_vm8 = vcmp.ge.s32.totalorder %v1618_v34, %v4720_v21 }
 0x547   :  { %v1659_v25 = vrot.slane %v1658_v45, 1  ;;  %v1622_v51 = vsel %vm1620_vm8, 1, %v5398_v9 }
 0x548   :  { %v1664_v46 = vadd.s32 %v1663_v36, %v1662_v32  ;;  %v1624_v55 = vadd.s32 %v1622_v51, %v1576_v6 }
 0x549   :  { %v1660_v39 = vadd.s32 %v1659_v25, %v1658_v45 }
 0x54a   :  { %v1665_v24 = vrot.slane %v1664_v46, 1 }
 0x54b   :  { %vm1667_vm11 = vcmp.ge.s32.totalorder %v1660_v39, %v4714_v50 }
 0x54c   :  { %v1669_v58 = vsel %vm1667_vm11, 1, %v5398_v9  ;;  %v1666_v53 = vadd.s32 %v1665_v24, %v1664_v46 }
 0x54d   :  { %v1671_v52 = vadd.s32 %v1669_v58, %v1623_v61 }
 0x54e   :  { %vm1668_vm13 = vcmp.ge.s32.totalorder %v1666_v53, %v4720_v21 }
 0x54f   :  { %v1673_v57 = vmul.u32 16777216, %v1671_v52  ;;  %v1670_v2 = vsel %vm1668_vm13, 1, %v5398_v9 }
 0x550   :  { %v1672_v60 = vadd.s32 %v1670_v2, %v1624_v55 }
 0x551   :  { %v4829_v30 = vadd.s32 %v1673_v57, %v4793_v37 }
 0x552   :  { %v1674_v5 = vmul.u32 16777216, %v1672_v60 }
 0x553   :  { %v1677_v26 = vadd.s32 4194304, %v4829_v30  ;;  %v1723_v12 = vadd.s32 8388608, %v4829_v30  ;;  %v1771_v23 = vadd.s32 12582912, %v4829_v30 }
 0x554   :  { %v4835_v31 = vadd.s32 %v1674_v5, %v4799_v3 }
 0x555   :  { %vm1679_vm15 = vcmp.ge.s32.totalorder %v4676_v14, %v1677_v26  ;;  %vm1725_vm5 = vcmp.ge.s32.totalorder %v4676_v14, %v1723_v12  ;;  %vm1773_vm0 = vcmp.ge.s32.totalorder %v4676_v14, %v1771_v23 }
 0x556   :  { %v1681_v56 = vsel %vm1679_vm15, 1, %v5398_v9  ;;  %v1727_v20 = vsel %vm1725_vm5, 1, %v5398_v9  ;;  %v1678_v37 = vadd.s32 4194304, %v4835_v31  ;;  %v1724_v62 = vadd.s32 8388608, %v4835_v31 }
 0x557   :  { %v1684_v11 = vshrl.u32 %v1681_v56, 16  ;;  %v1730_v48 = vshrl.u32 %v1727_v20, 16  ;;  %v1683_v47 = vand.u32 65535, %v1681_v56  ;;  %v1772_v17 = vadd.s32 12582912, %v4835_v31 }
 0x558   :  { %vm1680_vm6 = vcmp.ge.s32.totalorder %v4701_v19, %v1678_v37  ;;  %vm1726_vm1 = vcmp.ge.s32.totalorder %v4701_v19, %v1724_v62  ;;  %v1729_v29 = vand.u32 65535, %v1727_v20  ;;  %v1775_v41 = vsel %vm1773_vm0, 1, %v5398_v9 }
 0x559   :  { %v1686_v10 = vcvt.s32.f32 %v1684_v11  ;;  %v1682_v3 = vsel %vm1680_vm6, 1, %v5398_v9  ;;  %v1728_v49 = vsel %vm1726_vm1, 1, %v5398_v9  ;;  %v1732_v38 = vcvt.s32.f32 %v1730_v48 }
 0x55a   :  { %v1696_v22 = vshrl.u32 %v1682_v3, 16  ;;  %v1742_v44 = vshrl.u32 %v1728_v49, 16  ;;  %v1685_v33 = vcvt.s32.f32 %v1683_v47  ;;  %v1695_v0 = vand.u32 65535, %v1682_v3 }
 0x55b   :  { %1689 = vadd.xlane.f32.xlu0 %v1686_v10  ;;  %vm1774_vm9 = vcmp.ge.s32.totalorder %v4701_v19, %v1772_v17  ;;  %v1731_v4 = vcvt.s32.f32 %v1729_v29  ;;  %v1741_v63 = vand.u32 65535, %v1728_v49  ;;  %v1778_v1 = vshrl.u32 %v1775_v41, 16 }
 0x55c   :  { %v1698_v28 = vcvt.s32.f32 %v1696_v22  ;;  %v1744_v59 = vcvt.s32.f32 %v1742_v44  ;;  %v1697_v15 = vcvt.s32.f32 %v1695_v0  ;;  %v1776_v8 = vsel %vm1774_vm9, 1, %v5398_v9 }
 0x55d   :  { %v1743_v34 = vcvt.s32.f32 %v1741_v63  ;;  %v1780_v45 = vcvt.s32.f32 %v1778_v1  ;;  %v1790_v32 = vshrl.u32 %v1776_v8, 16  ;;  %v1777_v7 = vand.u32 65535, %v1775_v41 }
 0x55e   :  { %1701 = vadd.xlane.f32.xlu1 %v1698_v28  ;;  %v1789_v40 = vand.u32 65535, %v1776_v8 }
 0x55f   :  { %1735 = vadd.xlane.f32.xlu0 %v1732_v38  ;;  %v1792_v25 = vcvt.s32.f32 %v1790_v32  ;;  %v1779_v36 = vcvt.s32.f32 %v1777_v7 }
 0x560   :  { %v1791_v39 = vcvt.s32.f32 %v1789_v40 }
 0x562   :  { %1747 = vadd.xlane.f32.xlu1 %v1744_v59 }
 0x563   :  { %1687 = vadd.xlane.f32.xlu0 %v1685_v33 }
 0x566   :  { %1699 = vadd.xlane.f32.xlu1 %v1697_v15 }
 0x567   :  { %1733 = vadd.xlane.f32.xlu0 %v1731_v4 }
 0x56a   :  { %1745 = vadd.xlane.f32.xlu1 %v1743_v34 }
 0x56b   :  { %1783 = vadd.xlane.f32.xlu0 %v1780_v45 }
 0x56e   :  { %1795 = vadd.xlane.f32.xlu1 %v1792_v25 }
 0x56f   :  { %1781 = vadd.xlane.f32.xlu0 %v1779_v36 }
 0x572   :  { %1793 = vadd.xlane.f32.xlu1 %v1791_v39 }
 0x5e8   :  { %v1690_v46 = vpop.xlane.xlu0 %1689 }
 0x5e9   :  { %v1692_v24 = vcvt.f32.s32 %v1690_v46 }
 0x5eb   :  { %v1702_v27 = vpop.xlane.xlu1 %1701  ;;  %v1693_v53 = vshll.u32 %v1692_v24, 16 }
 0x5ec   :  { %v1736_v61 = vpop.xlane.xlu0 %1735  ;;  %v1704_v51 = vcvt.f32.s32 %v1702_v27 }
 0x5ed   :  { %v1738_v6 = vcvt.f32.s32 %v1736_v61 }
 0x5ee   :  { %v1705_v2 = vshll.u32 %v1704_v51, 16 }
 0x5ef   :  { %v1748_v58 = vpop.xlane.xlu1 %1747  ;;  %v1739_v12 = vshll.u32 %v1738_v6, 16 }
 0x5f0   :  { %v1688_v52 = vpop.xlane.xlu0 %1687  ;;  %v1750_v60 = vcvt.f32.s32 %v1748_v58 }
 0x5f1   :  { %v1691_v55 = vcvt.f32.s32 %v1688_v52 }
 0x5f2   :  { %v1751_v48 = vshll.u32 %v1750_v60, 16 }
 0x5f3   :  { %v1694_v57 = vadd.s32 %v1693_v53, %v1691_v55  ;;  %v1700_v5 = vpop.xlane.xlu1 %1699 }
 0x5f4   :  { %v1734_v26 = vpop.xlane.xlu0 %1733  ;;  %v1703_v20 = vcvt.f32.s32 %v1700_v5 }
 0x5f5   :  { %v1707_v56 = vrot.slane %v1694_v57, 4  ;;  %v1737_v11 = vcvt.f32.s32 %v1734_v26 }
 0x5f6   :  { %v1706_v62 = vadd.s32 %v1705_v2, %v1703_v20 }
 0x5f7   :  { %v1708_v37 = vadd.s32 %v1707_v56, %v1694_v57  ;;  %v1740_v10 = vadd.s32 %v1739_v12, %v1737_v11  ;;  %v1746_v3 = vpop.xlane.xlu1 %1745 }
 0x5f8   :  { %v1784_v49 = vpop.xlane.xlu0 %1783  ;;  %v1713_v23 = vrot.slane %v1706_v62, 4  ;;  %v1749_v38 = vcvt.f32.s32 %v1746_v3 }
 0x5f9   :  { %v1709_v22 = vrot.slane %v1708_v37, 2  ;;  %v1753_v28 = vrot.slane %v1740_v10, 4  ;;  %v1786_v44 = vcvt.f32.s32 %v1784_v49 }
 0x5fa   :  { %v1714_v47 = vadd.s32 %v1713_v23, %v1706_v62  ;;  %v1752_v59 = vadd.s32 %v1751_v48, %v1749_v38 }
 0x5fb   :  { %v1754_v17 = vadd.s32 %v1753_v28, %v1740_v10  ;;  %v1796_v33 = vpop.xlane.xlu1 %1795  ;;  %v1710_v29 = vadd.s32 %v1709_v22, %v1708_v37  ;;  %v1787_v63 = vshll.u32 %v1786_v44, 16 }
 0x5fc   :  { %v1782_v0 = vpop.xlane.xlu0 %1781  ;;  %v1759_v15 = vrot.slane %v1752_v59, 4  ;;  %v1715_v4 = vrot.slane %v1714_v47, 2  ;;  %v1798_v1 = vcvt.f32.s32 %v1796_v33 }
 0x5fd   :  { %v1755_v41 = vrot.slane %v1754_v17, 2  ;;  %v1785_v8 = vcvt.f32.s32 %v1782_v0  ;;  %v1711_v25 = vrot.slane %v1710_v29, 1 }
 0x5fe   :  { %v1760_v45 = vadd.s32 %v1759_v15, %v1752_v59  ;;  %v1716_v39 = vadd.s32 %v1715_v4, %v1714_v47  ;;  %v1799_v46 = vshll.u32 %v1798_v1, 16 }
 0x5ff   :  { %v1756_v34 = vadd.s32 %v1755_v41, %v1754_v17  ;;  %v1788_v32 = vadd.s32 %v1787_v63, %v1785_v8  ;;  %v1794_v7 = vpop.xlane.xlu1 %1793  ;;  %v1712_v6 = vadd.s32 %v1711_v25, %v1710_v29 }
 0x600   :  { %v1761_v40 = vrot.slane %v1760_v45, 2  ;;  %v1797_v61 = vcvt.f32.s32 %v1794_v7  ;;  %v1717_v55 = vrot.slane %v1716_v39, 1 }
 0x601   :  { %v1757_v36 = vrot.slane %v1756_v34, 1  ;;  %v1801_v27 = vrot.slane %v1788_v32, 4  ;;  %vm1719_vm4 = vcmp.ge.s32.totalorder %v1712_v6, %v4714_v50 }
 0x602   :  { %v1762_v24 = vadd.s32 %v1761_v40, %v1760_v45  ;;  %v1800_v52 = vadd.s32 %v1799_v46, %v1797_v61  ;;  %v1718_v12 = vadd.s32 %v1717_v55, %v1716_v39  ;;  %v1721_v10 = vsel %vm1719_vm4, 1, %v5398_v9 }
 0x603   :  { %v1758_v51 = vadd.s32 %v1757_v36, %v1756_v34  ;;  %v1802_v58 = vadd.s32 %v1801_v27, %v1788_v32 }
 0x604   :  { %v1763_v53 = vrot.slane %v1762_v24, 1  ;;  %v1807_v2 = vrot.slane %v1800_v52, 4  ;;  %vm1720_vm3 = vcmp.ge.s32.totalorder %v1718_v12, %v4720_v21 }
 0x605   :  { %v1803_v57 = vrot.slane %v1802_v58, 2  ;;  %vm1765_vm10 = vcmp.ge.s32.totalorder %v1758_v51, %v4714_v50  ;;  %v1722_v38 = vsel %vm1720_vm3, 1, %v5398_v9 }
 0x606   :  { %v1764_v60 = vadd.s32 %v1763_v53, %v1762_v24  ;;  %v1808_v26 = vadd.s32 %v1807_v2, %v1800_v52  ;;  %v1767_v11 = vsel %vm1765_vm10, 1, %v5398_v9 }
 0x607   :  { %v1804_v5 = vadd.s32 %v1803_v57, %v1802_v58  ;;  %v1769_v48 = vadd.s32 %v1767_v11, %v1721_v10 }
 0x608   :  { %v1809_v20 = vrot.slane %v1808_v26, 2  ;;  %vm1766_vm14 = vcmp.ge.s32.totalorder %v1764_v60, %v4720_v21 }
 0x609   :  { %v1805_v56 = vrot.slane %v1804_v5, 1  ;;  %v1768_v49 = vsel %vm1766_vm14, 1, %v5398_v9 }
 0x60a   :  { %v1810_v62 = vadd.s32 %v1809_v20, %v1808_v26  ;;  %v1770_v44 = vadd.s32 %v1768_v49, %v1722_v38 }
 0x60b   :  { %v1806_v37 = vadd.s32 %v1805_v56, %v1804_v5 }
 0x60c   :  { %v1811_v3 = vrot.slane %v1810_v62, 1 }
 0x60d   :  { %vm1813_vm8 = vcmp.ge.s32.totalorder %v1806_v37, %v4714_v50 }
 0x60e   :  { %v1815_v22 = vsel %vm1813_vm8, 1, %v5398_v9  ;;  %v1812_v28 = vadd.s32 %v1811_v3, %v1810_v62 }
 0x60f   :  { %v1817_v23 = vadd.s32 %v1815_v22, %v1769_v48 }
 0x610   :  { %vm1814_vm12 = vcmp.ge.s32.totalorder %v1812_v28, %v4720_v21 }
 0x611   :  { %v1819_v47 = vmul.u32 4194304, %v1817_v23  ;;  %v1816_v17 = vsel %vm1814_vm12, 1, %v5398_v9 }
 0x612   :  { %v1818_v59 = vadd.s32 %v1816_v17, %v1770_v44 }
 0x613   :  { %v4865_v33 = vadd.s32 %v1819_v47, %v4829_v30 }
 0x614   :  { %v1820_v0 = vmul.u32 4194304, %v1818_v59 }
 0x615   :  { %v1823_v29 = vadd.s32 1048576, %v4865_v33  ;;  %v1869_v41 = vadd.s32 2097152, %v4865_v33  ;;  %v1917_v25 = vadd.s32 3145728, %v4865_v33 }
 0x616   :  { %v4871_v15 = vadd.s32 %v1820_v0, %v4835_v31 }
 0x617   :  { %vm1825_vm11 = vcmp.ge.s32.totalorder %v4676_v14, %v1823_v29  ;;  %vm1871_vm13 = vcmp.ge.s32.totalorder %v4676_v14, %v1869_v41  ;;  %vm1919_vm6 = vcmp.ge.s32.totalorder %v4676_v14, %v1917_v25 }
 0x618   :  { %v1827_v4 = vsel %vm1825_vm11, 1, %v5398_v9  ;;  %v1873_v63 = vsel %vm1871_vm13, 1, %v5398_v9  ;;  %v1824_v30 = vadd.s32 1048576, %v4871_v15  ;;  %v1870_v8 = vadd.s32 2097152, %v4871_v15 }
 0x619   :  { %v1830_v1 = vshrl.u32 %v1827_v4, 16  ;;  %v1876_v45 = vshrl.u32 %v1873_v63, 16  ;;  %v1829_v46 = vand.u32 65535, %v1827_v4  ;;  %v1918_v27 = vadd.s32 3145728, %v4871_v15 }
 0x61a   :  { %vm1826_vm15 = vcmp.ge.s32.totalorder %v4701_v19, %v1824_v30  ;;  %vm1872_vm5 = vcmp.ge.s32.totalorder %v4701_v19, %v1870_v8  ;;  %v1875_v58 = vand.u32 65535, %v1873_v63  ;;  %v1921_v52 = vsel %vm1919_vm6, 1, %v5398_v9 }
 0x61b   :  { %v1832_v34 = vcvt.s32.f32 %v1830_v1  ;;  %v1828_v31 = vsel %vm1826_vm15, 1, %v5398_v9  ;;  %v1874_v32 = vsel %vm1872_vm5, 1, %v5398_v9  ;;  %v1878_v40 = vcvt.s32.f32 %v1876_v45 }
 0x61c   :  { %v1842_v7 = vshrl.u32 %v1828_v31, 16  ;;  %v1888_v39 = vshrl.u32 %v1874_v32, 16  ;;  %v1831_v24 = vcvt.s32.f32 %v1829_v46  ;;  %v1841_v51 = vand.u32 65535, %v1828_v31 }
 0x61d   :  { %1835 = vadd.xlane.f32.xlu0 %v1832_v34  ;;  %vm1920_vm1 = vcmp.ge.s32.totalorder %v4701_v19, %v1918_v27  ;;  %v1877_v6 = vcvt.s32.f32 %v1875_v58  ;;  %v1887_v55 = vand.u32 65535, %v1874_v32  ;;  %v1924_v57 = vshrl.u32 %v1921_v52, 16 }
 0x61e   :  { %v1844_v36 = vcvt.s32.f32 %v1842_v7  ;;  %v1890_v61 = vcvt.s32.f32 %v1888_v39  ;;  %v1843_v53 = vcvt.s32.f32 %v1841_v51  ;;  %v1922_v2 = vsel %vm1920_vm1, 1, %v5398_v9 }
 0x61f   :  { %v1889_v60 = vcvt.s32.f32 %v1887_v55  ;;  %v1926_v5 = vcvt.s32.f32 %v1924_v57  ;;  %v1936_v26 = vshrl.u32 %v1922_v2, 16  ;;  %v1923_v12 = vand.u32 65535, %v1921_v52 }
 0x620   :  { %1847 = vadd.xlane.f32.xlu1 %v1844_v36  ;;  %v1935_v11 = vand.u32 65535, %v1922_v2 }
 0x621   :  { %1881 = vadd.xlane.f32.xlu0 %v1878_v40  ;;  %v1938_v56 = vcvt.s32.f32 %v1936_v26  ;;  %v1925_v20 = vcvt.s32.f32 %v1923_v12 }
 0x622   :  { %v1937_v37 = vcvt.s32.f32 %v1935_v11 }
 0x624   :  { %1893 = vadd.xlane.f32.xlu1 %v1890_v61 }
 0x625   :  { %1833 = vadd.xlane.f32.xlu0 %v1831_v24 }
 0x628   :  { %1845 = vadd.xlane.f32.xlu1 %v1843_v53 }
 0x629   :  { %1879 = vadd.xlane.f32.xlu0 %v1877_v6 }
 0x62c   :  { %1891 = vadd.xlane.f32.xlu1 %v1889_v60 }
 0x62d   :  { %1929 = vadd.xlane.f32.xlu0 %v1926_v5 }
 0x630   :  { %1941 = vadd.xlane.f32.xlu1 %v1938_v56 }
 0x631   :  { %1927 = vadd.xlane.f32.xlu0 %v1925_v20 }
 0x634   :  { %1939 = vadd.xlane.f32.xlu1 %v1937_v37 }
 0x6aa   :  { %v1836_v62 = vpop.xlane.xlu0 %1835 }
 0x6ab   :  { %v1838_v3 = vcvt.f32.s32 %v1836_v62 }
 0x6ad   :  { %v1848_v10 = vpop.xlane.xlu1 %1847  ;;  %v1839_v28 = vshll.u32 %v1838_v3, 16 }
 0x6ae   :  { %v1882_v48 = vpop.xlane.xlu0 %1881  ;;  %v1850_v49 = vcvt.f32.s32 %v1848_v10 }
 0x6af   :  { %v1884_v38 = vcvt.f32.s32 %v1882_v48 }
 0x6b0   :  { %v1851_v17 = vshll.u32 %v1850_v49, 16 }
 0x6b1   :  { %v1894_v22 = vpop.xlane.xlu1 %1893  ;;  %v1885_v41 = vshll.u32 %v1884_v38, 16 }
 0x6b2   :  { %v1834_v23 = vpop.xlane.xlu0 %1833  ;;  %v1896_v59 = vcvt.f32.s32 %v1894_v22 }
 0x6b3   :  { %v1837_v44 = vcvt.f32.s32 %v1834_v23 }
 0x6b4   :  { %v1897_v45 = vshll.u32 %v1896_v59, 16 }
 0x6b5   :  { %v1840_v47 = vadd.s32 %v1839_v28, %v1837_v44  ;;  %v1846_v0 = vpop.xlane.xlu1 %1845 }
 0x6b6   :  { %v1880_v29 = vpop.xlane.xlu0 %1879  ;;  %v1849_v63 = vcvt.f32.s32 %v1846_v0 }
 0x6b7   :  { %v1853_v4 = vrot.slane %v1840_v47, 4  ;;  %v1883_v1 = vcvt.f32.s32 %v1880_v29 }
 0x6b8   :  { %v1852_v8 = vadd.s32 %v1851_v17, %v1849_v63 }
 0x6b9   :  { %v1854_v30 = vadd.s32 %v1853_v4, %v1840_v47  ;;  %v1886_v34 = vadd.s32 %v1885_v41, %v1883_v1  ;;  %v1892_v31 = vpop.xlane.xlu1 %1891 }
 0x6ba   :  { %v1930_v32 = vpop.xlane.xlu0 %1929  ;;  %v1859_v25 = vrot.slane %v1852_v8, 4  ;;  %v1895_v40 = vcvt.f32.s32 %v1892_v31 }
 0x6bb   :  { %v1855_v7 = vrot.slane %v1854_v30, 2  ;;  %v1899_v36 = vrot.slane %v1886_v34, 4  ;;  %v1932_v39 = vcvt.f32.s32 %v1930_v32 }
 0x6bc   :  { %v1860_v46 = vadd.s32 %v1859_v25, %v1852_v8  ;;  %v1898_v61 = vadd.s32 %v1897_v45, %v1895_v40 }
 0x6bd   :  { %v1900_v27 = vadd.s32 %v1899_v36, %v1886_v34  ;;  %v1942_v24 = vpop.xlane.xlu1 %1941  ;;  %v1856_v58 = vadd.s32 %v1855_v7, %v1854_v30  ;;  %v1933_v55 = vshll.u32 %v1932_v39, 16 }
 0x6be   :  { %v1928_v51 = vpop.xlane.xlu0 %1927  ;;  %v1905_v53 = vrot.slane %v1898_v61, 4  ;;  %v1861_v6 = vrot.slane %v1860_v46, 2  ;;  %v1944_v57 = vcvt.f32.s32 %v1942_v24 }
 0x6bf   :  { %v1901_v52 = vrot.slane %v1900_v27, 2  ;;  %v1931_v2 = vcvt.f32.s32 %v1928_v51  ;;  %v1857_v56 = vrot.slane %v1856_v58, 1 }
 0x6c0   :  { %v1906_v5 = vadd.s32 %v1905_v53, %v1898_v61  ;;  %v1862_v37 = vadd.s32 %v1861_v6, %v1860_v46  ;;  %v1945_v62 = vshll.u32 %v1944_v57, 16 }
 0x6c1   :  { %v1902_v60 = vadd.s32 %v1901_v52, %v1900_v27  ;;  %v1934_v26 = vadd.s32 %v1933_v55, %v1931_v2  ;;  %v1940_v12 = vpop.xlane.xlu1 %1939  ;;  %v1858_v38 = vadd.s32 %v1857_v56, %v1856_v58 }
 0x6c2   :  { %v1907_v11 = vrot.slane %v1906_v5, 2  ;;  %v1943_v48 = vcvt.f32.s32 %v1940_v12  ;;  %v1863_v44 = vrot.slane %v1862_v37, 1 }
 0x6c3   :  { %v1903_v20 = vrot.slane %v1902_v60, 1  ;;  %v1947_v10 = vrot.slane %v1934_v26, 4  ;;  %vm1865_vm9 = vcmp.ge.s32.totalorder %v1858_v38, %v4714_v50 }
 0x6c4   :  { %v1908_v3 = vadd.s32 %v1907_v11, %v1906_v5  ;;  %v1946_v23 = vadd.s32 %v1945_v62, %v1943_v48  ;;  %v1864_v41 = vadd.s32 %v1863_v44, %v1862_v37  ;;  %v1867_v34 = vsel %vm1865_vm9, 1, %v5398_v9 }
 0x6c5   :  { %v1904_v49 = vadd.s32 %v1903_v20, %v1902_v60  ;;  %v1948_v22 = vadd.s32 %v1947_v10, %v1934_v26 }
 0x6c6   :  { %v1909_v28 = vrot.slane %v1908_v3, 1  ;;  %v1953_v17 = vrot.slane %v1946_v23, 4  ;;  %vm1866_vm4 = vcmp.ge.s32.totalorder %v1864_v41, %v4720_v21 }
 0x6c7   :  { %v1949_v47 = vrot.slane %v1948_v22, 2  ;;  %vm1911_vm0 = vcmp.ge.s32.totalorder %v1904_v49, %v4714_v50  ;;  %v1868_v40 = vsel %vm1866_vm4, 1, %v5398_v9 }
 0x6c8   :  { %v1910_v59 = vadd.s32 %v1909_v28, %v1908_v3  ;;  %v1954_v29 = vadd.s32 %v1953_v17, %v1946_v23  ;;  %v1913_v1 = vsel %vm1911_vm0, 1, %v5398_v9 }
 0x6c9   :  { %v1950_v0 = vadd.s32 %v1949_v47, %v1948_v22  ;;  %v1915_v45 = vadd.s32 %v1913_v1, %v1867_v34 }
 0x6ca   :  { %v1955_v63 = vrot.slane %v1954_v29, 2  ;;  %vm1912_vm10 = vcmp.ge.s32.totalorder %v1910_v59, %v4720_v21 }
 0x6cb   :  { %v1951_v4 = vrot.slane %v1950_v0, 1  ;;  %v1914_v32 = vsel %vm1912_vm10, 1, %v5398_v9 }
 0x6cc   :  { %v1956_v8 = vadd.s32 %v1955_v63, %v1954_v29  ;;  %v1916_v39 = vadd.s32 %v1914_v32, %v1868_v40 }
 0x6cd   :  { %v1952_v30 = vadd.s32 %v1951_v4, %v1950_v0 }
 0x6ce   :  { %v1957_v31 = vrot.slane %v1956_v8, 1 }
 0x6cf   :  { %vm1959_vm14 = vcmp.ge.s32.totalorder %v1952_v30, %v4714_v50 }
 0x6d0   :  { %v1961_v7 = vsel %vm1959_vm14, 1, %v5398_v9  ;;  %v1958_v36 = vadd.s32 %v1957_v31, %v1956_v8 }
 0x6d1   :  { %v1963_v25 = vadd.s32 %v1961_v7, %v1915_v45 }
 0x6d2   :  { %vm1960_vm3 = vcmp.ge.s32.totalorder %v1958_v36, %v4720_v21 }
 0x6d3   :  { %v1965_v46 = vmul.u32 1048576, %v1963_v25  ;;  %v1962_v27 = vsel %vm1960_vm3, 1, %v5398_v9 }
 0x6d4   :  { %v1964_v61 = vadd.s32 %v1962_v27, %v1916_v39 }
 0x6d5   :  { %v4901_v24 = vadd.s32 %v1965_v46, %v4865_v33 }
 0x6d6   :  { %v1966_v51 = vmul.u32 1048576, %v1964_v61 }
 0x6d7   :  { %v1969_v58 = vadd.s32 262144, %v4901_v24  ;;  %v2015_v52 = vadd.s32 524288, %v4901_v24  ;;  %v2063_v56 = vadd.s32 786432, %v4901_v24 }
 0x6d8   :  { %v4907_v53 = vadd.s32 %v1966_v51, %v4871_v15 }
 0x6d9   :  { %vm1971_vm8 = vcmp.ge.s32.totalorder %v4676_v14, %v1969_v58  ;;  %vm2017_vm12 = vcmp.ge.s32.totalorder %v4676_v14, %v2015_v52  ;;  %vm2065_vm15 = vcmp.ge.s32.totalorder %v4676_v14, %v2063_v56 }
 0x6da   :  { %v1973_v6 = vsel %vm1971_vm8, 1, %v5398_v9  ;;  %v2019_v55 = vsel %vm2017_vm12, 1, %v5398_v9  ;;  %v1970_v33 = vadd.s32 262144, %v4907_v53  ;;  %v2016_v2 = vadd.s32 524288, %v4907_v53 }
 0x6db   :  { %v1976_v57 = vshrl.u32 %v1973_v6, 16  ;;  %v2022_v5 = vshrl.u32 %v2019_v55, 16  ;;  %v1975_v62 = vand.u32 65535, %v1973_v6  ;;  %v2064_v10 = vadd.s32 786432, %v4907_v53 }
 0x6dc   :  { %vm1972_vm11 = vcmp.ge.s32.totalorder %v4701_v19, %v1970_v33  ;;  %vm2018_vm13 = vcmp.ge.s32.totalorder %v4701_v19, %v2016_v2  ;;  %v2021_v48 = vand.u32 65535, %v2019_v55  ;;  %v2067_v23 = vsel %vm2065_vm15, 1, %v5398_v9 }
 0x6dd   :  { %v1978_v60 = vcvt.s32.f32 %v1976_v57  ;;  %v1974_v26 = vsel %vm1972_vm11, 1, %v5398_v9  ;;  %v2020_v12 = vsel %vm2018_vm13, 1, %v5398_v9  ;;  %v2024_v11 = vcvt.s32.f32 %v2022_v5 }
 0x6de   :  { %v1988_v15 = vshrl.u32 %v1974_v26, 16  ;;  %v2034_v37 = vshrl.u32 %v2020_v12, 16  ;;  %v1977_v49 = vcvt.s32.f32 %v1975_v62  ;;  %v1987_v22 = vand.u32 65535, %v1974_v26 }
 0x6df   :  { %1981 = vadd.xlane.f32.xlu0 %v1978_v60  ;;  %vm2066_vm5 = vcmp.ge.s32.totalorder %v4701_v19, %v2064_v10  ;;  %v2033_v28 = vand.u32 65535, %v2020_v12  ;;  %v2023_v44 = vcvt.s32.f32 %v2021_v48  ;;  %v2070_v47 = vshrl.u32 %v2067_v23, 16 }
 0x6e0   :  { %v1990_v20 = vcvt.s32.f32 %v1988_v15  ;;  %v2036_v3 = vcvt.s32.f32 %v2034_v37  ;;  %v1989_v38 = vcvt.s32.f32 %v1987_v22  ;;  %v2068_v17 = vsel %vm2066_vm5, 1, %v5398_v9 }
 0x6e1   :  { %v2035_v59 = vcvt.s32.f32 %v2033_v28  ;;  %v2072_v0 = vcvt.s32.f32 %v2070_v47  ;;  %v2082_v29 = vshrl.u32 %v2068_v17, 16  ;;  %v2069_v41 = vand.u32 65535, %v2067_v23 }
 0x6e2   :  { %1993 = vadd.xlane.f32.xlu1 %v1990_v20  ;;  %v2081_v1 = vand.u32 65535, %v2068_v17 }
 0x6e3   :  { %2027 = vadd.xlane.f32.xlu0 %v2024_v11  ;;  %v2084_v4 = vcvt.s32.f32 %v2082_v29  ;;  %v2071_v63 = vcvt.s32.f32 %v2069_v41 }
 0x6e4   :  { %v2083_v30 = vcvt.s32.f32 %v2081_v1 }
 0x6e6   :  { %2039 = vadd.xlane.f32.xlu1 %v2036_v3 }
 0x6e7   :  { %1979 = vadd.xlane.f32.xlu0 %v1977_v49 }
 0x6ea   :  { %1991 = vadd.xlane.f32.xlu1 %v1989_v38 }
 0x6eb   :  { %2025 = vadd.xlane.f32.xlu0 %v2023_v44 }
 0x6ee   :  { %2037 = vadd.xlane.f32.xlu1 %v2035_v59 }
 0x6ef   :  { %2075 = vadd.xlane.f32.xlu0 %v2072_v0 }
 0x6f2   :  { %2087 = vadd.xlane.f32.xlu1 %v2084_v4 }
 0x6f3   :  { %2073 = vadd.xlane.f32.xlu0 %v2071_v63 }
 0x6f6   :  { %2085 = vadd.xlane.f32.xlu1 %v2083_v30 }
 0x76c   :  { %v1982_v8 = vpop.xlane.xlu0 %1981 }
 0x76d   :  { %v1984_v31 = vcvt.f32.s32 %v1982_v8 }
 0x76f   :  { %v1994_v34 = vpop.xlane.xlu1 %1993  ;;  %v1985_v36 = vshll.u32 %v1984_v31, 16 }
 0x770   :  { %v2028_v45 = vpop.xlane.xlu0 %2027  ;;  %v1996_v32 = vcvt.f32.s32 %v1994_v34 }
 0x771   :  { %v2030_v40 = vcvt.f32.s32 %v2028_v45 }
 0x772   :  { %v1997_v27 = vshll.u32 %v1996_v32, 16 }
 0x773   :  { %v2040_v7 = vpop.xlane.xlu1 %2039  ;;  %v2031_v52 = vshll.u32 %v2030_v40, 16 }
 0x774   :  { %v1980_v25 = vpop.xlane.xlu0 %1979  ;;  %v2042_v61 = vcvt.f32.s32 %v2040_v7 }
 0x775   :  { %v1983_v39 = vcvt.f32.s32 %v1980_v25 }
 0x776   :  { %v2043_v5 = vshll.u32 %v2042_v61, 16 }
 0x777   :  { %v1986_v46 = vadd.s32 %v1985_v36, %v1983_v39  ;;  %v1992_v51 = vpop.xlane.xlu1 %1991 }
 0x778   :  { %v2026_v58 = vpop.xlane.xlu0 %2025  ;;  %v1995_v55 = vcvt.f32.s32 %v1992_v51 }
 0x779   :  { %v1999_v6 = vrot.slane %v1986_v46, 4  ;;  %v2029_v57 = vcvt.f32.s32 %v2026_v58 }
 0x77a   :  { %v1998_v2 = vadd.s32 %v1997_v27, %v1995_v55 }
 0x77b   :  { %v2000_v33 = vadd.s32 %v1999_v6, %v1986_v46  ;;  %v2032_v60 = vadd.s32 %v2031_v52, %v2029_v57  ;;  %v2038_v26 = vpop.xlane.xlu1 %2037 }
 0x77c   :  { %v2076_v15 = vpop.xlane.xlu0 %2075  ;;  %v2005_v56 = vrot.slane %v1998_v2, 4  ;;  %v2041_v11 = vcvt.f32.s32 %v2038_v26 }
 0x77d   :  { %v2001_v12 = vrot.slane %v2000_v33, 2  ;;  %v2045_v20 = vrot.slane %v2032_v60, 4  ;;  %v2078_v37 = vcvt.f32.s32 %v2076_v15 }
 0x77e   :  { %v2006_v62 = vadd.s32 %v2005_v56, %v1998_v2  ;;  %v2044_v48 = vadd.s32 %v2043_v5, %v2041_v11 }
 0x77f   :  { %v2046_v10 = vadd.s32 %v2045_v20, %v2032_v60  ;;  %v2088_v3 = vpop.xlane.xlu1 %2087  ;;  %v2002_v22 = vadd.s32 %v2001_v12, %v2000_v33  ;;  %v2079_v44 = vshll.u32 %v2078_v37, 16 }
 0x780   :  { %v2074_v49 = vpop.xlane.xlu0 %2073  ;;  %v2051_v28 = vrot.slane %v2044_v48, 4  ;;  %v2007_v38 = vrot.slane %v2006_v62, 2  ;;  %v2090_v47 = vcvt.f32.s32 %v2088_v3 }
 0x781   :  { %v2047_v23 = vrot.slane %v2046_v10, 2  ;;  %v2077_v17 = vcvt.f32.s32 %v2074_v49  ;;  %v2003_v4 = vrot.slane %v2002_v22, 1 }
 0x782   :  { %v2052_v0 = vadd.s32 %v2051_v28, %v2044_v48  ;;  %v2008_v30 = vadd.s32 %v2007_v38, %v2006_v62  ;;  %v2091_v8 = vshll.u32 %v2090_v47, 16 }
 0x783   :  { %v2048_v59 = vadd.s32 %v2047_v23, %v2046_v10  ;;  %v2080_v29 = vadd.s32 %v2079_v44, %v2077_v17  ;;  %v2086_v41 = vpop.xlane.xlu1 %2085  ;;  %v2004_v40 = vadd.s32 %v2003_v4, %v2002_v22 }
 0x784   :  { %v2053_v1 = vrot.slane %v2052_v0, 2  ;;  %v2089_v45 = vcvt.f32.s32 %v2086_v41  ;;  %v2009_v39 = vrot.slane %v2008_v30, 1 }
 0x785   :  { %v2049_v63 = vrot.slane %v2048_v59, 1  ;;  %v2093_v34 = vrot.slane %v2080_v29, 4  ;;  %vm2011_vm1 = vcmp.ge.s32.totalorder %v2004_v40, %v4714_v50 }
 0x786   :  { %v2054_v31 = vadd.s32 %v2053_v1, %v2052_v0  ;;  %v2092_v25 = vadd.s32 %v2091_v8, %v2089_v45  ;;  %v2010_v52 = vadd.s32 %v2009_v39, %v2008_v30  ;;  %v2013_v60 = vsel %vm2011_vm1, 1, %v5398_v9 }
 0x787   :  { %v2050_v32 = vadd.s32 %v2049_v63, %v2048_v59  ;;  %v2094_v7 = vadd.s32 %v2093_v34, %v2080_v29 }
 0x788   :  { %v2055_v36 = vrot.slane %v2054_v31, 1  ;;  %v2099_v27 = vrot.slane %v2092_v25, 4  ;;  %vm2012_vm9 = vcmp.ge.s32.totalorder %v2010_v52, %v4720_v21 }
 0x789   :  { %v2095_v46 = vrot.slane %v2094_v7, 2  ;;  %vm2057_vm6 = vcmp.ge.s32.totalorder %v2050_v32, %v4714_v50  ;;  %v2014_v11 = vsel %vm2012_vm9, 1, %v5398_v9 }
 0x78a   :  { %v2056_v61 = vadd.s32 %v2055_v36, %v2054_v31  ;;  %v2100_v58 = vadd.s32 %v2099_v27, %v2092_v25  ;;  %v2059_v57 = vsel %vm2057_vm6, 1, %v5398_v9 }
 0x78b   :  { %v2096_v51 = vadd.s32 %v2095_v46, %v2094_v7  ;;  %v2061_v5 = vadd.s32 %v2059_v57, %v2013_v60 }
 0x78c   :  { %v2101_v55 = vrot.slane %v2100_v58, 2  ;;  %vm2058_vm0 = vcmp.ge.s32.totalorder %v2056_v61, %v4720_v21 }
 0x78d   :  { %v2097_v6 = vrot.slane %v2096_v51, 1  ;;  %v2060_v15 = vsel %vm2058_vm0, 1, %v5398_v9 }
 0x78e   :  { %v2102_v2 = vadd.s32 %v2101_v55, %v2100_v58  ;;  %v2062_v37 = vadd.s32 %v2060_v15, %v2014_v11 }
 0x78f   :  { %v2098_v33 = vadd.s32 %v2097_v6, %v2096_v51 }
 0x790   :  { %v2103_v26 = vrot.slane %v2102_v2, 1 }
 0x791   :  { %vm2105_vm10 = vcmp.ge.s32.totalorder %v2098_v33, %v4714_v50 }
 0x792   :  { %v2107_v12 = vsel %vm2105_vm10, 1, %v5398_v9  ;;  %v2104_v20 = vadd.s32 %v2103_v26, %v2102_v2 }
 0x793   :  { %v2109_v56 = vadd.s32 %v2107_v12, %v2061_v5 }
 0x794   :  { %vm2106_vm4 = vcmp.ge.s32.totalorder %v2104_v20, %v4720_v21 }
 0x795   :  { %v2111_v62 = vmul.u32 262144, %v2109_v56  ;;  %v2108_v10 = vsel %vm2106_vm4, 1, %v5398_v9 }
 0x796   :  { %v2110_v3 = vadd.s32 %v2108_v10, %v2062_v37 }
 0x797   :  { %v4937_v48 = vadd.s32 %v2111_v62, %v4901_v24 }
 0x798   :  { %v2112_v49 = vmul.u32 262144, %v2110_v3 }
 0x799   :  { %v2115_v22 = vadd.s32 65536, %v4937_v48  ;;  %v2161_v23 = vadd.s32 131072, %v4937_v48  ;;  %v2209_v4 = vadd.s32 196608, %v4937_v48 }
 0x79a   :  { %v4942_v28 = vadd.s32 %v2112_v49, %v4907_v53 }
 0x79b   :  { %vm2117_vm14 = vcmp.ge.s32.totalorder %v4676_v14, %v2115_v22  ;;  %vm2163_vm3 = vcmp.ge.s32.totalorder %v4676_v14, %v2161_v23  ;;  %vm2211_vm11 = vcmp.ge.s32.totalorder %v4676_v14, %v2209_v4 }
 0x79c   :  { %v2119_v38 = vsel %vm2117_vm14, 1, %v5398_v9  ;;  %v2165_v44 = vsel %vm2163_vm3, 1, %v5398_v9  ;;  %v2116_v24 = vadd.s32 65536, %v4942_v28  ;;  %v2162_v17 = vadd.s32 131072, %v4942_v28 }
 0x79d   :  { %v2122_v47 = vshrl.u32 %v2119_v38, 16  ;;  %v2168_v0 = vshrl.u32 %v2165_v44, 16  ;;  %v2121_v8 = vand.u32 65535, %v2119_v38  ;;  %v2210_v34 = vadd.s32 196608, %v4942_v28 }
 0x79e   :  { %vm2118_vm8 = vcmp.ge.s32.totalorder %v4701_v19, %v2116_v24  ;;  %vm2164_vm12 = vcmp.ge.s32.totalorder %v4701_v19, %v2162_v17  ;;  %v2167_v7 = vand.u32 65535, %v2165_v44  ;;  %v2213_v25 = vsel %vm2211_vm11, 1, %v5398_v9 }
 0x79f   :  { %v2124_v59 = vcvt.s32.f32 %v2122_v47  ;;  %v2120_v53 = vsel %vm2118_vm8, 1, %v5398_v9  ;;  %v2166_v29 = vsel %vm2164_vm12, 1, %v5398_v9  ;;  %v2170_v1 = vcvt.s32.f32 %v2168_v0 }
 0x7a0   :  { %v2134_v41 = vshrl.u32 %v2120_v53, 16  ;;  %v2180_v30 = vshrl.u32 %v2166_v29, 16  ;;  %v2123_v31 = vcvt.s32.f32 %v2121_v8  ;;  %v2133_v32 = vand.u32 65535, %v2120_v53 }
 0x7a1   :  { %2127 = vadd.xlane.f32.xlu0 %v2124_v59  ;;  %vm2212_vm13 = vcmp.ge.s32.totalorder %v4701_v19, %v2210_v34  ;;  %v2169_v40 = vcvt.s32.f32 %v2167_v7  ;;  %v2179_v39 = vand.u32 65535, %v2166_v29  ;;  %v2216_v46 = vshrl.u32 %v2213_v25, 16 }
 0x7a2   :  { %v2136_v63 = vcvt.s32.f32 %v2134_v41  ;;  %v2182_v45 = vcvt.s32.f32 %v2180_v30  ;;  %v2135_v36 = vcvt.s32.f32 %v2133_v32  ;;  %v2214_v27 = vsel %vm2212_vm13, 1, %v5398_v9 }
 0x7a3   :  { %v2181_v61 = vcvt.s32.f32 %v2179_v39  ;;  %v2218_v51 = vcvt.s32.f32 %v2216_v46  ;;  %v2228_v58 = vshrl.u32 %v2214_v27, 16  ;;  %v2215_v52 = vand.u32 65535, %v2213_v25 }
 0x7a4   :  { %2139 = vadd.xlane.f32.xlu1 %v2136_v63  ;;  %v2227_v57 = vand.u32 65535, %v2214_v27 }
 0x7a5   :  { %2173 = vadd.xlane.f32.xlu0 %v2170_v1  ;;  %v2230_v6 = vcvt.s32.f32 %v2228_v58  ;;  %v2217_v55 = vcvt.s32.f32 %v2215_v52 }
 0x7a6   :  { %v2229_v33 = vcvt.s32.f32 %v2227_v57 }
 0x7a8   :  { %2185 = vadd.xlane.f32.xlu1 %v2182_v45 }
 0x7a9   :  { %2125 = vadd.xlane.f32.xlu0 %v2123_v31 }
 0x7ac   :  { %2137 = vadd.xlane.f32.xlu1 %v2135_v36 }
 0x7ad   :  { %2171 = vadd.xlane.f32.xlu0 %v2169_v40 }
 0x7b0   :  { %2183 = vadd.xlane.f32.xlu1 %v2181_v61 }
 0x7b1   :  { %2221 = vadd.xlane.f32.xlu0 %v2218_v51 }
 0x7b4   :  { %2233 = vadd.xlane.f32.xlu1 %v2230_v6 }
 0x7b5   :  { %2219 = vadd.xlane.f32.xlu0 %v2217_v55 }
 0x7b8   :  { %2231 = vadd.xlane.f32.xlu1 %v2229_v33 }
 0x82e   :  { %v2128_v2 = vpop.xlane.xlu0 %2127 }
 0x82f   :  { %v2130_v26 = vcvt.f32.s32 %v2128_v2 }
 0x831   :  { %v2140_v60 = vpop.xlane.xlu1 %2139  ;;  %v2131_v20 = vshll.u32 %v2130_v26, 16 }
 0x832   :  { %v2174_v5 = vpop.xlane.xlu0 %2173  ;;  %v2142_v15 = vcvt.f32.s32 %v2140_v60 }
 0x833   :  { %v2176_v11 = vcvt.f32.s32 %v2174_v5 }
 0x834   :  { %v2143_v10 = vshll.u32 %v2142_v15, 16 }
 0x835   :  { %v2186_v12 = vpop.xlane.xlu1 %2185  ;;  %v2177_v23 = vshll.u32 %v2176_v11, 16 }
 0x836   :  { %v2126_v56 = vpop.xlane.xlu0 %2125  ;;  %v2188_v3 = vcvt.f32.s32 %v2186_v12 }
 0x837   :  { %v2129_v37 = vcvt.f32.s32 %v2126_v56 }
 0x838   :  { %v2189_v0 = vshll.u32 %v2188_v3, 16 }
 0x839   :  { %v2132_v62 = vadd.s32 %v2131_v20, %v2129_v37  ;;  %v2138_v49 = vpop.xlane.xlu1 %2137 }
 0x83a   :  { %v2172_v22 = vpop.xlane.xlu0 %2171  ;;  %v2141_v44 = vcvt.f32.s32 %v2138_v49 }
 0x83b   :  { %v2145_v38 = vrot.slane %v2132_v62, 4  ;;  %v2175_v47 = vcvt.f32.s32 %v2172_v22 }
 0x83c   :  { %v2144_v17 = vadd.s32 %v2143_v10, %v2141_v44 }
 0x83d   :  { %v2146_v24 = vadd.s32 %v2145_v38, %v2132_v62  ;;  %v2178_v59 = vadd.s32 %v2177_v23, %v2175_v47  ;;  %v2184_v53 = vpop.xlane.xlu1 %2183 }
 0x83e   :  { %v2222_v29 = vpop.xlane.xlu0 %2221  ;;  %v2151_v4 = vrot.slane %v2144_v17, 4  ;;  %v2187_v1 = vcvt.f32.s32 %v2184_v53 }
 0x83f   :  { %v2147_v41 = vrot.slane %v2146_v24, 2  ;;  %v2191_v63 = vrot.slane %v2178_v59, 4  ;;  %v2224_v30 = vcvt.f32.s32 %v2222_v29 }
 0x840   :  { %v2152_v8 = vadd.s32 %v2151_v4, %v2144_v17  ;;  %v2190_v45 = vadd.s32 %v2189_v0, %v2187_v1 }
 0x841   :  { %v2192_v34 = vadd.s32 %v2191_v63, %v2178_v59  ;;  %v2234_v31 = vpop.xlane.xlu1 %2233  ;;  %v2148_v7 = vadd.s32 %v2147_v41, %v2146_v24  ;;  %v2225_v39 = vshll.u32 %v2224_v30, 16 }
 0x842   :  { %v2220_v32 = vpop.xlane.xlu0 %2219  ;;  %v2197_v36 = vrot.slane %v2190_v45, 4  ;;  %v2153_v40 = vrot.slane %v2152_v8, 2  ;;  %v2236_v46 = vcvt.f32.s32 %v2234_v31 }
 0x843   :  { %v2193_v25 = vrot.slane %v2192_v34, 2  ;;  %v2223_v27 = vcvt.f32.s32 %v2220_v32  ;;  %v2149_v6 = vrot.slane %v2148_v7, 1 }
 0x844   :  { %v2198_v51 = vadd.s32 %v2197_v36, %v2190_v45  ;;  %v2154_v33 = vadd.s32 %v2153_v40, %v2152_v8  ;;  %v2237_v2 = vshll.u32 %v2236_v46, 16 }
 0x845   :  { %v2194_v61 = vadd.s32 %v2193_v25, %v2192_v34  ;;  %v2226_v58 = vadd.s32 %v2225_v39, %v2223_v27  ;;  %v2232_v52 = vpop.xlane.xlu1 %2231  ;;  %v2150_v11 = vadd.s32 %v2149_v6, %v2148_v7 }
 0x846   :  { %v2199_v57 = vrot.slane %v2198_v51, 2  ;;  %v2235_v5 = vcvt.f32.s32 %v2232_v52  ;;  %v2155_v37 = vrot.slane %v2154_v33, 1 }
 0x847   :  { %v2195_v55 = vrot.slane %v2194_v61, 1  ;;  %v2239_v60 = vrot.slane %v2226_v58, 4  ;;  %vm2157_vm5 = vcmp.ge.s32.totalorder %v2150_v11, %v4714_v50 }
 0x848   :  { %v2200_v26 = vadd.s32 %v2199_v57, %v2198_v51  ;;  %v2238_v56 = vadd.s32 %v2237_v2, %v2235_v5  ;;  %v2156_v23 = vadd.s32 %v2155_v37, %v2154_v33  ;;  %v2159_v59 = vsel %vm2157_vm5, 1, %v5398_v9 }
 0x849   :  { %v2196_v15 = vadd.s32 %v2195_v55, %v2194_v61  ;;  %v2240_v12 = vadd.s32 %v2239_v60, %v2226_v58 }
 0x84a   :  { %v2201_v20 = vrot.slane %v2200_v26, 1  ;;  %v2245_v10 = vrot.slane %v2238_v56, 4  ;;  %vm2158_vm1 = vcmp.ge.s32.totalorder %v2156_v23, %v4720_v21 }
 0x84b   :  { %v2241_v62 = vrot.slane %v2240_v12, 2  ;;  %vm2203_vm15 = vcmp.ge.s32.totalorder %v2196_v15, %v4714_v50  ;;  %v2160_v1 = vsel %vm2158_vm1, 1, %v5398_v9 }
 0x84c   :  { %v2202_v3 = vadd.s32 %v2201_v20, %v2200_v26  ;;  %v2246_v22 = vadd.s32 %v2245_v10, %v2238_v56  ;;  %v2205_v47 = vsel %vm2203_vm15, 1, %v5398_v9 }
 0x84d   :  { %v2242_v49 = vadd.s32 %v2241_v62, %v2240_v12  ;;  %v2207_v0 = vadd.s32 %v2205_v47, %v2159_v59 }
 0x84e   :  { %v2247_v44 = vrot.slane %v2246_v22, 2  ;;  %vm2204_vm6 = vcmp.ge.s32.totalorder %v2202_v3, %v4720_v21 }
 0x84f   :  { %v2243_v38 = vrot.slane %v2242_v49, 1  ;;  %v2206_v29 = vsel %vm2204_vm6, 1, %v5398_v9 }
 0x850   :  { %v2248_v17 = vadd.s32 %v2247_v44, %v2246_v22  ;;  %v2208_v30 = vadd.s32 %v2206_v29, %v2160_v1 }
 0x851   :  { %v2244_v24 = vadd.s32 %v2243_v38, %v2242_v49 }
 0x852   :  { %v2249_v53 = vrot.slane %v2248_v17, 1 }
 0x853   :  { %vm2251_vm0 = vcmp.ge.s32.totalorder %v2244_v24, %v4714_v50 }
 0x854   :  { %v2253_v41 = vsel %vm2251_vm0, 1, %v5398_v9  ;;  %v2250_v63 = vadd.s32 %v2249_v53, %v2248_v17 }
 0x855   :  { %v2255_v4 = vadd.s32 %v2253_v41, %v2207_v0 }
 0x856   :  { %vm2252_vm9 = vcmp.ge.s32.totalorder %v2250_v63, %v4720_v21 }
 0x857   :  { %v2257_v8 = vmul.u32 65536, %v2255_v4  ;;  %v2254_v34 = vsel %vm2252_vm9, 1, %v5398_v9 }
 0x858   :  { %v2256_v31 = vadd.s32 %v2254_v34, %v2208_v30 }
 0x859   :  { %v4973_v45 = vadd.s32 %v2257_v8, %v4937_v48 }
 0x85a   :  { %v2258_v32 = vmul.u32 65536, %v2256_v31 }
 0x85b   :  { %v2261_v7 = vadd.s32 16384, %v4973_v45  ;;  %v2307_v25 = vadd.s32 32768, %v4973_v45  ;;  %v2355_v6 = vadd.s32 49152, %v4973_v45 }
 0x85c   :  { %v4978_v36 = vadd.s32 %v2258_v32, %v4942_v28 }
 0x85d   :  { %vm2263_vm10 = vcmp.ge.s32.totalorder %v4676_v14, %v2261_v7  ;;  %vm2309_vm4 = vcmp.ge.s32.totalorder %v4676_v14, %v2307_v25  ;;  %vm2357_vm8 = vcmp.ge.s32.totalorder %v4676_v14, %v2355_v6 }
 0x85e   :  { %v2265_v40 = vsel %vm2263_vm10, 1, %v5398_v9  ;;  %v2311_v39 = vsel %vm2309_vm4, 1, %v5398_v9  ;;  %v2262_v48 = vadd.s32 16384, %v4978_v36  ;;  %v2308_v27 = vadd.s32 32768, %v4978_v36 }
 0x85f   :  { %v2268_v46 = vshrl.u32 %v2265_v40, 16  ;;  %v2314_v51 = vshrl.u32 %v2311_v39, 16  ;;  %v2267_v2 = vand.u32 65535, %v2265_v40  ;;  %v2356_v60 = vadd.s32 49152, %v4978_v36 }
 0x860   :  { %vm2264_vm14 = vcmp.ge.s32.totalorder %v4701_v19, %v2262_v48  ;;  %vm2310_vm3 = vcmp.ge.s32.totalorder %v4701_v19, %v2308_v27  ;;  %v2313_v12 = vand.u32 65535, %v2311_v39  ;;  %v2359_v56 = vsel %vm2357_vm8, 1, %v5398_v9 }
 0x861   :  { %v2270_v61 = vcvt.s32.f32 %v2268_v46  ;;  %v2266_v28 = vsel %vm2264_vm14, 1, %v5398_v9  ;;  %v2312_v58 = vsel %vm2310_vm3, 1, %v5398_v9  ;;  %v2316_v57 = vcvt.s32.f32 %v2314_v51 }
 0x862   :  { %v2280_v52 = vshrl.u32 %v2266_v28, 16  ;;  %v2326_v33 = vshrl.u32 %v2312_v58, 16  ;;  %v2269_v26 = vcvt.s32.f32 %v2267_v2  ;;  %v2279_v15 = vand.u32 65535, %v2266_v28 }
 0x863   :  { %2273 = vadd.xlane.f32.xlu0 %v2270_v61  ;;  %vm2358_vm12 = vcmp.ge.s32.totalorder %v4701_v19, %v2356_v60  ;;  %v2315_v11 = vcvt.s32.f32 %v2313_v12  ;;  %v2325_v37 = vand.u32 65535, %v2312_v58  ;;  %v2362_v62 = vshrl.u32 %v2359_v56, 16 }
 0x864   :  { %v2282_v55 = vcvt.s32.f32 %v2280_v52  ;;  %v2328_v5 = vcvt.s32.f32 %v2326_v33  ;;  %v2281_v20 = vcvt.s32.f32 %v2279_v15  ;;  %v2360_v10 = vsel %vm2358_vm12, 1, %v5398_v9 }
 0x865   :  { %v2327_v3 = vcvt.s32.f32 %v2325_v37  ;;  %v2364_v49 = vcvt.s32.f32 %v2362_v62  ;;  %v2374_v22 = vshrl.u32 %v2360_v10, 16  ;;  %v2361_v23 = vand.u32 65535, %v2359_v56 }
 0x866   :  { %2285 = vadd.xlane.f32.xlu1 %v2282_v55  ;;  %v2373_v47 = vand.u32 65535, %v2360_v10 }
 0x867   :  { %2319 = vadd.xlane.f32.xlu0 %v2316_v57  ;;  %v2376_v38 = vcvt.s32.f32 %v2374_v22  ;;  %v2363_v44 = vcvt.s32.f32 %v2361_v23 }
 0x868   :  { %v2375_v24 = vcvt.s32.f32 %v2373_v47 }
 0x86a   :  { %2331 = vadd.xlane.f32.xlu1 %v2328_v5 }
 0x86b   :  { %2271 = vadd.xlane.f32.xlu0 %v2269_v26 }
 0x86e   :  { %2283 = vadd.xlane.f32.xlu1 %v2281_v20 }
 0x86f   :  { %2317 = vadd.xlane.f32.xlu0 %v2315_v11 }
 0x872   :  { %2329 = vadd.xlane.f32.xlu1 %v2327_v3 }
 0x873   :  { %2367 = vadd.xlane.f32.xlu0 %v2364_v49 }
 0x876   :  { %2379 = vadd.xlane.f32.xlu1 %v2376_v38 }
 0x877   :  { %2365 = vadd.xlane.f32.xlu0 %v2363_v44 }
 0x87a   :  { %2377 = vadd.xlane.f32.xlu1 %v2375_v24 }
 0x8f0   :  { %v2274_v17 = vpop.xlane.xlu0 %2273 }
 0x8f1   :  { %v2276_v53 = vcvt.f32.s32 %v2274_v17 }
 0x8f3   :  { %v2286_v59 = vpop.xlane.xlu1 %2285  ;;  %v2277_v63 = vshll.u32 %v2276_v53, 16 }
 0x8f4   :  { %v2320_v0 = vpop.xlane.xlu0 %2319  ;;  %v2288_v29 = vcvt.f32.s32 %v2286_v59 }
 0x8f5   :  { %v2322_v1 = vcvt.f32.s32 %v2320_v0 }
 0x8f6   :  { %v2289_v34 = vshll.u32 %v2288_v29, 16 }
 0x8f7   :  { %v2332_v41 = vpop.xlane.xlu1 %2331  ;;  %v2323_v25 = vshll.u32 %v2322_v1, 16 }
 0x8f8   :  { %v2272_v4 = vpop.xlane.xlu0 %2271  ;;  %v2334_v31 = vcvt.f32.s32 %v2332_v41 }
 0x8f9   :  { %v2275_v30 = vcvt.f32.s32 %v2272_v4 }
 0x8fa   :  { %v2335_v51 = vshll.u32 %v2334_v31, 16 }
 0x8fb   :  { %v2278_v8 = vadd.s32 %v2277_v63, %v2275_v30  ;;  %v2284_v32 = vpop.xlane.xlu1 %2283 }
 0x8fc   :  { %v2318_v7 = vpop.xlane.xlu0 %2317  ;;  %v2287_v39 = vcvt.f32.s32 %v2284_v32 }
 0x8fd   :  { %v2291_v40 = vrot.slane %v2278_v8, 4  ;;  %v2321_v46 = vcvt.f32.s32 %v2318_v7 }
 0x8fe   :  { %v2290_v27 = vadd.s32 %v2289_v34, %v2287_v39 }
 0x8ff   :  { %v2292_v48 = vadd.s32 %v2291_v40, %v2278_v8  ;;  %v2324_v61 = vadd.s32 %v2323_v25, %v2321_v46  ;;  %v2330_v28 = vpop.xlane.xlu1 %2329 }
 0x900   :  { %v2368_v58 = vpop.xlane.xlu0 %2367  ;;  %v2297_v6 = vrot.slane %v2290_v27, 4  ;;  %v2333_v57 = vcvt.f32.s32 %v2330_v28 }
 0x901   :  { %v2293_v52 = vrot.slane %v2292_v48, 2  ;;  %v2337_v55 = vrot.slane %v2324_v61, 4  ;;  %v2370_v33 = vcvt.f32.s32 %v2368_v58 }
 0x902   :  { %v2298_v2 = vadd.s32 %v2297_v6, %v2290_v27  ;;  %v2336_v5 = vadd.s32 %v2335_v51, %v2333_v57 }
 0x903   :  { %v2338_v60 = vadd.s32 %v2337_v55, %v2324_v61  ;;  %v2380_v26 = vpop.xlane.xlu1 %2379  ;;  %v2294_v12 = vadd.s32 %v2293_v52, %v2292_v48  ;;  %v2371_v37 = vshll.u32 %v2370_v33, 16 }
 0x904   :  { %v2366_v15 = vpop.xlane.xlu0 %2365  ;;  %v2343_v20 = vrot.slane %v2336_v5, 4  ;;  %v2299_v11 = vrot.slane %v2298_v2, 2  ;;  %v2382_v62 = vcvt.f32.s32 %v2380_v26 }
 0x905   :  { %v2339_v56 = vrot.slane %v2338_v60, 2  ;;  %v2369_v10 = vcvt.f32.s32 %v2366_v15  ;;  %v2295_v38 = vrot.slane %v2294_v12, 1 }
 0x906   :  { %v2344_v49 = vadd.s32 %v2343_v20, %v2336_v5  ;;  %v2300_v24 = vadd.s32 %v2299_v11, %v2298_v2  ;;  %v2383_v17 = vshll.u32 %v2382_v62, 16 }
 0x907   :  { %v2340_v3 = vadd.s32 %v2339_v56, %v2338_v60  ;;  %v2372_v22 = vadd.s32 %v2371_v37, %v2369_v10  ;;  %v2378_v23 = vpop.xlane.xlu1 %2377  ;;  %v2296_v1 = vadd.s32 %v2295_v38, %v2294_v12 }
 0x908   :  { %v2345_v47 = vrot.slane %v2344_v49, 2  ;;  %v2381_v0 = vcvt.f32.s32 %v2378_v23  ;;  %v2301_v30 = vrot.slane %v2300_v24, 1 }
 0x909   :  { %v2341_v44 = vrot.slane %v2340_v3, 1  ;;  %v2385_v59 = vrot.slane %v2372_v22, 4  ;;  %vm2303_vm13 = vcmp.ge.s32.totalorder %v2296_v1, %v4714_v50 }
 0x90a   :  { %v2346_v53 = vadd.s32 %v2345_v47, %v2344_v49  ;;  %v2384_v4 = vadd.s32 %v2383_v17, %v2381_v0  ;;  %v2302_v25 = vadd.s32 %v2301_v30, %v2300_v24  ;;  %v2305_v61 = vsel %vm2303_vm13, 1, %v5398_v9 }
 0x90b   :  { %v2342_v29 = vadd.s32 %v2341_v44, %v2340_v3  ;;  %v2386_v41 = vadd.s32 %v2385_v59, %v2372_v22 }
 0x90c   :  { %v2347_v63 = vrot.slane %v2346_v53, 1  ;;  %v2391_v34 = vrot.slane %v2384_v4, 4  ;;  %vm2304_vm5 = vcmp.ge.s32.totalorder %v2302_v25, %v4720_v21 }
 0x90d   :  { %v2387_v8 = vrot.slane %v2386_v41, 2  ;;  %vm2349_vm11 = vcmp.ge.s32.totalorder %v2342_v29, %v4714_v50  ;;  %v2306_v57 = vsel %vm2304_vm5, 1, %v5398_v9 }
 0x90e   :  { %v2348_v31 = vadd.s32 %v2347_v63, %v2346_v53  ;;  %v2392_v7 = vadd.s32 %v2391_v34, %v2384_v4  ;;  %v2351_v46 = vsel %vm2349_vm11, 1, %v5398_v9 }
 0x90f   :  { %v2388_v32 = vadd.s32 %v2387_v8, %v2386_v41  ;;  %v2353_v51 = vadd.s32 %v2351_v46, %v2305_v61 }
 0x910   :  { %v2393_v39 = vrot.slane %v2392_v7, 2  ;;  %vm2350_vm15 = vcmp.ge.s32.totalorder %v2348_v31, %v4720_v21 }
 0x911   :  { %v2389_v40 = vrot.slane %v2388_v32, 1  ;;  %v2352_v58 = vsel %vm2350_vm15, 1, %v5398_v9 }
 0x912   :  { %v2394_v27 = vadd.s32 %v2393_v39, %v2392_v7  ;;  %v2354_v33 = vadd.s32 %v2352_v58, %v2306_v57 }
 0x913   :  { %v2390_v48 = vadd.s32 %v2389_v40, %v2388_v32 }
 0x914   :  { %v2395_v28 = vrot.slane %v2394_v27, 1 }
 0x915   :  { %vm2397_vm6 = vcmp.ge.s32.totalorder %v2390_v48, %v4714_v50 }
 0x916   :  { %v2399_v52 = vsel %vm2397_vm6, 1, %v5398_v9  ;;  %v2396_v55 = vadd.s32 %v2395_v28, %v2394_v27 }
 0x917   :  { %v2401_v6 = vadd.s32 %v2399_v52, %v2353_v51 }
 0x918   :  { %vm2398_vm1 = vcmp.ge.s32.totalorder %v2396_v55, %v4720_v21 }
 0x919   :  { %v2403_v2 = vmul.u32 16384, %v2401_v6  ;;  %v2400_v60 = vsel %vm2398_vm1, 1, %v5398_v9 }
 0x91a   :  { %v2402_v26 = vadd.s32 %v2400_v60, %v2354_v33 }
 0x91b   :  { %v5009_v5 = vadd.s32 %v2403_v2, %v4973_v45 }
 0x91c   :  { %v2404_v15 = vmul.u32 16384, %v2402_v26 }
 0x91d   :  { %v2407_v12 = vadd.s32 4096, %v5009_v5  ;;  %v2453_v56 = vadd.s32 8192, %v5009_v5  ;;  %v2501_v38 = vadd.s32 12288, %v5009_v5 }
 0x91e   :  { %v5014_v20 = vadd.s32 %v2404_v15, %v4978_v36 }
 0x91f   :  { %vm2409_vm0 = vcmp.ge.s32.totalorder %v4676_v14, %v2407_v12  ;;  %vm2455_vm9 = vcmp.ge.s32.totalorder %v4676_v14, %v2453_v56  ;;  %vm2503_vm14 = vcmp.ge.s32.totalorder %v4676_v14, %v2501_v38 }
 0x920   :  { %v2411_v11 = vsel %vm2409_vm0, 1, %v5398_v9  ;;  %v2457_v37 = vsel %vm2455_vm9, 1, %v5398_v9  ;;  %v2408_v45 = vadd.s32 4096, %v5014_v20  ;;  %v2454_v10 = vadd.s32 8192, %v5014_v20 }
 0x921   :  { %v2414_v62 = vshrl.u32 %v2411_v11, 16  ;;  %v2460_v49 = vshrl.u32 %v2457_v37, 16  ;;  %v2413_v17 = vand.u32 65535, %v2411_v11  ;;  %v2502_v59 = vadd.s32 12288, %v5014_v20 }
 0x922   :  { %vm2410_vm10 = vcmp.ge.s32.totalorder %v4701_v19, %v2408_v45  ;;  %vm2456_vm4 = vcmp.ge.s32.totalorder %v4701_v19, %v2454_v10  ;;  %v2459_v41 = vand.u32 65535, %v2457_v37  ;;  %v2505_v4 = vsel %vm2503_vm14, 1, %v5398_v9 }
 0x923   :  { %v2416_v3 = vcvt.s32.f32 %v2414_v62  ;;  %v2412_v36 = vsel %vm2410_vm10, 1, %v5398_v9  ;;  %v2458_v22 = vsel %vm2456_vm4, 1, %v5398_v9  ;;  %v2462_v47 = vcvt.s32.f32 %v2460_v49 }
 0x924   :  { %v2426_v23 = vshrl.u32 %v2412_v36, 16  ;;  %v2472_v24 = vshrl.u32 %v2458_v22, 16  ;;  %v2415_v53 = vcvt.s32.f32 %v2413_v17  ;;  %v2425_v29 = vand.u32 65535, %v2412_v36 }
 0x925   :  { %2419 = vadd.xlane.f32.xlu0 %v2416_v3  ;;  %vm2504_vm3 = vcmp.ge.s32.totalorder %v4701_v19, %v2502_v59  ;;  %v2461_v1 = vcvt.s32.f32 %v2459_v41  ;;  %v2471_v30 = vand.u32 65535, %v2458_v22  ;;  %v2508_v8 = vshrl.u32 %v2505_v4, 16 }
 0x926   :  { %v2428_v44 = vcvt.s32.f32 %v2426_v23  ;;  %v2474_v0 = vcvt.s32.f32 %v2472_v24  ;;  %v2427_v63 = vcvt.s32.f32 %v2425_v29  ;;  %v2506_v34 = vsel %vm2504_vm3, 1, %v5398_v9 }
 0x927   :  { %v2473_v31 = vcvt.s32.f32 %v2471_v30  ;;  %v2510_v32 = vcvt.s32.f32 %v2508_v8  ;;  %v2520_v7 = vshrl.u32 %v2506_v34, 16  ;;  %v2507_v25 = vand.u32 65535, %v2505_v4 }
 0x928   :  { %2431 = vadd.xlane.f32.xlu1 %v2428_v44  ;;  %v2519_v46 = vand.u32 65535, %v2506_v34 }
 0x929   :  { %2465 = vadd.xlane.f32.xlu0 %v2462_v47  ;;  %v2522_v40 = vcvt.s32.f32 %v2520_v7  ;;  %v2509_v39 = vcvt.s32.f32 %v2507_v25 }
 0x92a   :  { %v2521_v48 = vcvt.s32.f32 %v2519_v46 }
 0x92c   :  { %2477 = vadd.xlane.f32.xlu1 %v2474_v0 }
 0x92d   :  { %2417 = vadd.xlane.f32.xlu0 %v2415_v53 }
 0x930   :  { %2429 = vadd.xlane.f32.xlu1 %v2427_v63 }
 0x931   :  { %2463 = vadd.xlane.f32.xlu0 %v2461_v1 }
 0x934   :  { %2475 = vadd.xlane.f32.xlu1 %v2473_v31 }
 0x935   :  { %2513 = vadd.xlane.f32.xlu0 %v2510_v32 }
 0x938   :  { %2525 = vadd.xlane.f32.xlu1 %v2522_v40 }
 0x939   :  { %2511 = vadd.xlane.f32.xlu0 %v2509_v39 }
 0x93c   :  { %2523 = vadd.xlane.f32.xlu1 %v2521_v48 }
 0x9b2   :  { %v2420_v27 = vpop.xlane.xlu0 %2419 }
 0x9b3   :  { %v2422_v28 = vcvt.f32.s32 %v2420_v27 }
 0x9b5   :  { %v2432_v61 = vpop.xlane.xlu1 %2431  ;;  %v2423_v55 = vshll.u32 %v2422_v28, 16 }
 0x9b6   :  { %v2466_v51 = vpop.xlane.xlu0 %2465  ;;  %v2434_v58 = vcvt.f32.s32 %v2432_v61 }
 0x9b7   :  { %v2468_v57 = vcvt.f32.s32 %v2466_v51 }
 0x9b8   :  { %v2435_v60 = vshll.u32 %v2434_v58, 16 }
 0x9b9   :  { %v2478_v52 = vpop.xlane.xlu1 %2477  ;;  %v2469_v56 = vshll.u32 %v2468_v57, 16 }
 0x9ba   :  { %v2418_v6 = vpop.xlane.xlu0 %2417  ;;  %v2480_v26 = vcvt.f32.s32 %v2478_v52 }
 0x9bb   :  { %v2421_v33 = vcvt.f32.s32 %v2418_v6 }
 0x9bc   :  { %v2481_v49 = vshll.u32 %v2480_v26, 16 }
 0x9bd   :  { %v2424_v2 = vadd.s32 %v2423_v55, %v2421_v33  ;;  %v2430_v15 = vpop.xlane.xlu1 %2429 }
 0x9be   :  { %v2464_v12 = vpop.xlane.xlu0 %2463  ;;  %v2433_v37 = vcvt.f32.s32 %v2430_v15 }
 0x9bf   :  { %v2437_v11 = vrot.slane %v2424_v2, 4  ;;  %v2467_v62 = vcvt.f32.s32 %v2464_v12 }
 0x9c0   :  { %v2436_v10 = vadd.s32 %v2435_v60, %v2433_v37 }
 0x9c1   :  { %v2438_v45 = vadd.s32 %v2437_v11, %v2424_v2  ;;  %v2470_v3 = vadd.s32 %v2469_v56, %v2467_v62  ;;  %v2476_v36 = vpop.xlane.xlu1 %2475 }
 0x9c2   :  { %v2514_v22 = vpop.xlane.xlu0 %2513  ;;  %v2443_v38 = vrot.slane %v2436_v10, 4  ;;  %v2479_v47 = vcvt.f32.s32 %v2476_v36 }
 0x9c3   :  { %v2439_v23 = vrot.slane %v2438_v45, 2  ;;  %v2483_v44 = vrot.slane %v2470_v3, 4  ;;  %v2516_v24 = vcvt.f32.s32 %v2514_v22 }
 0x9c4   :  { %v2444_v17 = vadd.s32 %v2443_v38, %v2436_v10  ;;  %v2482_v0 = vadd.s32 %v2481_v49, %v2479_v47 }
 0x9c5   :  { %v2484_v59 = vadd.s32 %v2483_v44, %v2470_v3  ;;  %v2526_v53 = vpop.xlane.xlu1 %2525  ;;  %v2440_v41 = vadd.s32 %v2439_v23, %v2438_v45  ;;  %v2517_v30 = vshll.u32 %v2516_v24, 16 }
 0x9c6   :  { %v2512_v29 = vpop.xlane.xlu0 %2511  ;;  %v2489_v63 = vrot.slane %v2482_v0, 4  ;;  %v2445_v1 = vrot.slane %v2444_v17, 2  ;;  %v2528_v8 = vcvt.f32.s32 %v2526_v53 }
 0x9c7   :  { %v2485_v4 = vrot.slane %v2484_v59, 2  ;;  %v2515_v34 = vcvt.f32.s32 %v2512_v29  ;;  %v2441_v40 = vrot.slane %v2440_v41, 1 }
 0x9c8   :  { %v2490_v32 = vadd.s32 %v2489_v63, %v2482_v0  ;;  %v2446_v48 = vadd.s32 %v2445_v1, %v2444_v17  ;;  %v2529_v27 = vshll.u32 %v2528_v8, 16 }
 0x9c9   :  { %v2486_v31 = vadd.s32 %v2485_v4, %v2484_v59  ;;  %v2518_v7 = vadd.s32 %v2517_v30, %v2515_v34  ;;  %v2524_v25 = vpop.xlane.xlu1 %2523  ;;  %v2442_v57 = vadd.s32 %v2441_v40, %v2440_v41 }
 0x9ca   :  { %v2491_v46 = vrot.slane %v2490_v32, 2  ;;  %v2527_v51 = vcvt.f32.s32 %v2524_v25  ;;  %v2447_v33 = vrot.slane %v2446_v48, 1 }
 0x9cb   :  { %v2487_v39 = vrot.slane %v2486_v31, 1  ;;  %v2531_v61 = vrot.slane %v2518_v7, 4  ;;  %vm2449_vm12 = vcmp.ge.s32.totalorder %v2442_v57, %v4714_v50 }
 0x9cc   :  { %v2492_v28 = vadd.s32 %v2491_v46, %v2490_v32  ;;  %v2530_v6 = vadd.s32 %v2529_v27, %v2527_v51  ;;  %v2448_v56 = vadd.s32 %v2447_v33, %v2446_v48  ;;  %v2451_v3 = vsel %vm2449_vm12, 1, %v5398_v9 }
 0x9cd   :  { %v2488_v58 = vadd.s32 %v2487_v39, %v2486_v31  ;;  %v2532_v52 = vadd.s32 %v2531_v61, %v2518_v7 }
 0x9ce   :  { %v2493_v55 = vrot.slane %v2492_v28, 1  ;;  %v2537_v60 = vrot.slane %v2530_v6, 4  ;;  %vm2450_vm13 = vcmp.ge.s32.totalorder %v2448_v56, %v4720_v21 }
 0x9cf   :  { %v2533_v2 = vrot.slane %v2532_v52, 2  ;;  %vm2495_vm8 = vcmp.ge.s32.totalorder %v2488_v58, %v4714_v50  ;;  %v2452_v47 = vsel %vm2450_vm13, 1, %v5398_v9 }
 0x9d0   :  { %v2494_v26 = vadd.s32 %v2493_v55, %v2492_v28  ;;  %v2538_v12 = vadd.s32 %v2537_v60, %v2530_v6  ;;  %v2497_v62 = vsel %vm2495_vm8, 1, %v5398_v9 }
 0x9d1   :  { %v2534_v15 = vadd.s32 %v2533_v2, %v2532_v52  ;;  %v2499_v49 = vadd.s32 %v2497_v62, %v2451_v3 }
 0x9d2   :  { %v2539_v37 = vrot.slane %v2538_v12, 2  ;;  %vm2496_vm11 = vcmp.ge.s32.totalorder %v2494_v26, %v4720_v21 }
 0x9d3   :  { %v2535_v11 = vrot.slane %v2534_v15, 1  ;;  %v2498_v22 = vsel %vm2496_vm11, 1, %v5398_v9 }
 0x9d4   :  { %v2540_v10 = vadd.s32 %v2539_v37, %v2538_v12  ;;  %v2500_v24 = vadd.s32 %v2498_v22, %v2452_v47 }
 0x9d5   :  { %v2536_v45 = vadd.s32 %v2535_v11, %v2534_v15 }
 0x9d6   :  { %v2541_v36 = vrot.slane %v2540_v10, 1 }
 0x9d7   :  { %vm2543_vm15 = vcmp.ge.s32.totalorder %v2536_v45, %v4714_v50 }
 0x9d8   :  { %v2545_v23 = vsel %vm2543_vm15, 1, %v5398_v9  ;;  %v2542_v44 = vadd.s32 %v2541_v36, %v2540_v10 }
 0x9d9   :  { %v2547_v38 = vadd.s32 %v2545_v23, %v2499_v49 }
 0x9da   :  { %vm2544_vm5 = vcmp.ge.s32.totalorder %v2542_v44, %v4720_v21 }
 0x9db   :  { %v2549_v17 = vmul.u32 4096, %v2547_v38  ;;  %v2546_v59 = vsel %vm2544_vm5, 1, %v5398_v9 }
 0x9dc   :  { %v2548_v53 = vadd.s32 %v2546_v59, %v2500_v24 }
 0x9dd   :  { %v5045_v0 = vadd.s32 %v2549_v17, %v5009_v5 }
 0x9de   :  { %v2550_v29 = vmul.u32 4096, %v2548_v53 }
 0x9df   :  { %v2553_v41 = vadd.s32 1024, %v5045_v0  ;;  %v2599_v4 = vadd.s32 2048, %v5045_v0  ;;  %v2647_v40 = vadd.s32 3072, %v5045_v0 }
 0x9e0   :  { %v5050_v63 = vadd.s32 %v2550_v29, %v5014_v20 }
 0x9e1   :  { %vm2555_vm6 = vcmp.ge.s32.totalorder %v4676_v14, %v2553_v41  ;;  %vm2601_vm1 = vcmp.ge.s32.totalorder %v4676_v14, %v2599_v4  ;;  %vm2649_vm10 = vcmp.ge.s32.totalorder %v4676_v14, %v2647_v40 }
 0x9e2   :  { %v2557_v1 = vsel %vm2555_vm6, 1, %v5398_v9  ;;  %v2603_v30 = vsel %vm2601_vm1, 1, %v5398_v9  ;;  %v2554_v5 = vadd.s32 1024, %v5050_v63  ;;  %v2600_v34 = vadd.s32 2048, %v5050_v63 }
 0x9e3   :  { %v2560_v8 = vshrl.u32 %v2557_v1, 16  ;;  %v2606_v32 = vshrl.u32 %v2603_v30, 16  ;;  %v2559_v27 = vand.u32 65535, %v2557_v1  ;;  %v2648_v61 = vadd.s32 3072, %v5050_v63 }
 0x9e4   :  { %vm2556_vm0 = vcmp.ge.s32.totalorder %v4701_v19, %v2554_v5  ;;  %vm2602_vm9 = vcmp.ge.s32.totalorder %v4701_v19, %v2600_v34  ;;  %v2605_v52 = vand.u32 65535, %v2603_v30  ;;  %v2651_v6 = vsel %vm2649_vm10, 1, %v5398_v9 }
 0x9e5   :  { %v2562_v31 = vcvt.s32.f32 %v2560_v8  ;;  %v2558_v20 = vsel %vm2556_vm0, 1, %v5398_v9  ;;  %v2604_v7 = vsel %vm2602_vm9, 1, %v5398_v9  ;;  %v2608_v46 = vcvt.s32.f32 %v2606_v32 }
 0x9e6   :  { %v2572_v25 = vshrl.u32 %v2558_v20, 16  ;;  %v2618_v48 = vshrl.u32 %v2604_v7, 16  ;;  %v2561_v28 = vcvt.s32.f32 %v2559_v27  ;;  %v2571_v58 = vand.u32 65535, %v2558_v20 }
 0x9e7   :  { %2565 = vadd.xlane.f32.xlu0 %v2562_v31  ;;  %vm2650_vm4 = vcmp.ge.s32.totalorder %v4701_v19, %v2648_v61  ;;  %v2607_v57 = vcvt.s32.f32 %v2605_v52  ;;  %v2617_v33 = vand.u32 65535, %v2604_v7  ;;  %v2654_v2 = vshrl.u32 %v2651_v6, 16 }
 0x9e8   :  { %v2574_v39 = vcvt.s32.f32 %v2572_v25  ;;  %v2620_v51 = vcvt.s32.f32 %v2618_v48  ;;  %v2573_v55 = vcvt.s32.f32 %v2571_v58  ;;  %v2652_v60 = vsel %vm2650_vm4, 1, %v5398_v9 }
 0x9e9   :  { %v2619_v26 = vcvt.s32.f32 %v2617_v33  ;;  %v2656_v15 = vcvt.s32.f32 %v2654_v2  ;;  %v2666_v12 = vshrl.u32 %v2652_v60, 16  ;;  %v2653_v56 = vand.u32 65535, %v2651_v6 }
 0x9ea   :  { %2577 = vadd.xlane.f32.xlu1 %v2574_v39  ;;  %v2665_v62 = vand.u32 65535, %v2652_v60 }
 0x9eb   :  { %2611 = vadd.xlane.f32.xlu0 %v2608_v46  ;;  %v2668_v11 = vcvt.s32.f32 %v2666_v12  ;;  %v2655_v37 = vcvt.s32.f32 %v2653_v56 }
 0x9ec   :  { %v2667_v45 = vcvt.s32.f32 %v2665_v62 }
 0x9ee   :  { %2623 = vadd.xlane.f32.xlu1 %v2620_v51 }
 0x9ef   :  { %2563 = vadd.xlane.f32.xlu0 %v2561_v28 }
 0x9f2   :  { %2575 = vadd.xlane.f32.xlu1 %v2573_v55 }
 0x9f3   :  { %2609 = vadd.xlane.f32.xlu0 %v2607_v57 }
 0x9f6   :  { %2621 = vadd.xlane.f32.xlu1 %v2619_v26 }
 0x9f7   :  { %2659 = vadd.xlane.f32.xlu0 %v2656_v15 }
 0x9fa   :  { %2671 = vadd.xlane.f32.xlu1 %v2668_v11 }
 0x9fb   :  { %2657 = vadd.xlane.f32.xlu0 %v2655_v37 }
 0x9fe   :  { %2669 = vadd.xlane.f32.xlu1 %v2667_v45 }
 0xa74   :  { %v2566_v10 = vpop.xlane.xlu0 %2565 }
 0xa75   :  { %v2568_v36 = vcvt.f32.s32 %v2566_v10 }
 0xa77   :  { %v2578_v3 = vpop.xlane.xlu1 %2577  ;;  %v2569_v44 = vshll.u32 %v2568_v36, 16 }
 0xa78   :  { %v2612_v49 = vpop.xlane.xlu0 %2611  ;;  %v2580_v22 = vcvt.f32.s32 %v2578_v3 }
 0xa79   :  { %v2614_v47 = vcvt.f32.s32 %v2612_v49 }
 0xa7a   :  { %v2581_v59 = vshll.u32 %v2580_v22, 16 }
 0xa7b   :  { %v2624_v23 = vpop.xlane.xlu1 %2623  ;;  %v2615_v4 = vshll.u32 %v2614_v47, 16 }
 0xa7c   :  { %v2564_v38 = vpop.xlane.xlu0 %2563  ;;  %v2626_v53 = vcvt.f32.s32 %v2624_v23 }
 0xa7d   :  { %v2567_v24 = vcvt.f32.s32 %v2564_v38 }
 0xa7e   :  { %v2627_v32 = vshll.u32 %v2626_v53, 16 }
 0xa7f   :  { %v2570_v17 = vadd.s32 %v2569_v44, %v2567_v24  ;;  %v2576_v29 = vpop.xlane.xlu1 %2575 }
 0xa80   :  { %v2610_v41 = vpop.xlane.xlu0 %2609  ;;  %v2579_v30 = vcvt.f32.s32 %v2576_v29 }
 0xa81   :  { %v2583_v1 = vrot.slane %v2570_v17, 4  ;;  %v2613_v8 = vcvt.f32.s32 %v2610_v41 }
 0xa82   :  { %v2582_v34 = vadd.s32 %v2581_v59, %v2579_v30 }
 0xa83   :  { %v2584_v5 = vadd.s32 %v2583_v1, %v2570_v17  ;;  %v2616_v31 = vadd.s32 %v2615_v4, %v2613_v8  ;;  %v2622_v20 = vpop.xlane.xlu1 %2621 }
 0xa84   :  { %v2660_v7 = vpop.xlane.xlu0 %2659  ;;  %v2589_v40 = vrot.slane %v2582_v34, 4  ;;  %v2625_v46 = vcvt.f32.s32 %v2622_v20 }
 0xa85   :  { %v2585_v25 = vrot.slane %v2584_v5, 2  ;;  %v2629_v39 = vrot.slane %v2616_v31, 4  ;;  %v2662_v48 = vcvt.f32.s32 %v2660_v7 }
 0xa86   :  { %v2590_v27 = vadd.s32 %v2589_v40, %v2582_v34  ;;  %v2628_v51 = vadd.s32 %v2627_v32, %v2625_v46 }
 0xa87   :  { %v2630_v61 = vadd.s32 %v2629_v39, %v2616_v31  ;;  %v2672_v28 = vpop.xlane.xlu1 %2671  ;;  %v2586_v52 = vadd.s32 %v2585_v25, %v2584_v5  ;;  %v2663_v33 = vshll.u32 %v2662_v48, 16 }
 0xa88   :  { %v2658_v58 = vpop.xlane.xlu0 %2657  ;;  %v2635_v55 = vrot.slane %v2628_v51, 4  ;;  %v2591_v57 = vrot.slane %v2590_v27, 2  ;;  %v2674_v2 = vcvt.f32.s32 %v2672_v28 }
 0xa89   :  { %v2631_v6 = vrot.slane %v2630_v61, 2  ;;  %v2661_v60 = vcvt.f32.s32 %v2658_v58  ;;  %v2587_v11 = vrot.slane %v2586_v52, 1 }
 0xa8a   :  { %v2636_v15 = vadd.s32 %v2635_v55, %v2628_v51  ;;  %v2592_v45 = vadd.s32 %v2591_v57, %v2590_v27  ;;  %v2675_v10 = vshll.u32 %v2674_v2, 16 }
 0xa8b   :  { %v2632_v26 = vadd.s32 %v2631_v6, %v2630_v61  ;;  %v2664_v12 = vadd.s32 %v2663_v33, %v2661_v60  ;;  %v2670_v56 = vpop.xlane.xlu1 %2669  ;;  %v2588_v47 = vadd.s32 %v2587_v11, %v2586_v52 }
 0xa8c   :  { %v2637_v62 = vrot.slane %v2636_v15, 2  ;;  %v2673_v49 = vcvt.f32.s32 %v2670_v56  ;;  %v2593_v24 = vrot.slane %v2592_v45, 1 }
 0xa8d   :  { %v2633_v37 = vrot.slane %v2632_v26, 1  ;;  %v2677_v3 = vrot.slane %v2664_v12, 4  ;;  %vm2595_vm3 = vcmp.ge.s32.totalorder %v2588_v47, %v4714_v50 }
 0xa8e   :  { %v2638_v36 = vadd.s32 %v2637_v62, %v2636_v15  ;;  %v2676_v38 = vadd.s32 %v2675_v10, %v2673_v49  ;;  %v2594_v4 = vadd.s32 %v2593_v24, %v2592_v45  ;;  %v2597_v31 = vsel %vm2595_vm3, 1, %v5398_v9 }
 0xa8f   :  { %v2634_v22 = vadd.s32 %v2633_v37, %v2632_v26  ;;  %v2678_v23 = vadd.s32 %v2677_v3, %v2664_v12 }
 0xa90   :  { %v2639_v44 = vrot.slane %v2638_v36, 1  ;;  %v2683_v59 = vrot.slane %v2676_v38, 4  ;;  %vm2596_vm12 = vcmp.ge.s32.totalorder %v2594_v4, %v4720_v21 }
 0xa91   :  { %v2679_v17 = vrot.slane %v2678_v23, 2  ;;  %vm2641_vm14 = vcmp.ge.s32.totalorder %v2634_v22, %v4714_v50  ;;  %v2598_v46 = vsel %vm2596_vm12, 1, %v5398_v9 }
 0xa92   :  { %v2640_v53 = vadd.s32 %v2639_v44, %v2638_v36  ;;  %v2684_v41 = vadd.s32 %v2683_v59, %v2676_v38  ;;  %v2643_v8 = vsel %vm2641_vm14, 1, %v5398_v9 }
 0xa93   :  { %v2680_v29 = vadd.s32 %v2679_v17, %v2678_v23  ;;  %v2645_v32 = vadd.s32 %v2643_v8, %v2597_v31 }
 0xa94   :  { %v2685_v30 = vrot.slane %v2684_v41, 2  ;;  %vm2642_vm8 = vcmp.ge.s32.totalorder %v2640_v53, %v4720_v21 }
 0xa95   :  { %v2681_v1 = vrot.slane %v2680_v29, 1  ;;  %v2644_v7 = vsel %vm2642_vm8, 1, %v5398_v9 }
 0xa96   :  { %v2686_v34 = vadd.s32 %v2685_v30, %v2684_v41  ;;  %v2646_v48 = vadd.s32 %v2644_v7, %v2598_v46 }
 0xa97   :  { %v2682_v5 = vadd.s32 %v2681_v1, %v2680_v29 }
 0xa98   :  { %v2687_v20 = vrot.slane %v2686_v34, 1 }
 0xa99   :  { %vm2689_vm11 = vcmp.ge.s32.totalorder %v2682_v5, %v4714_v50 }
 0xa9a   :  { %v2691_v25 = vsel %vm2689_vm11, 1, %v5398_v9  ;;  %v2688_v39 = vadd.s32 %v2687_v20, %v2686_v34 }
 0xa9b   :  { %v2693_v40 = vadd.s32 %v2691_v25, %v2645_v32 }
 0xa9c   :  { %vm2690_vm13 = vcmp.ge.s32.totalorder %v2688_v39, %v4720_v21 }
 0xa9d   :  { %v2695_v27 = vmul.u32 1024, %v2693_v40  ;;  %v2692_v61 = vsel %vm2690_vm13, 1, %v5398_v9 }
 0xa9e   :  { %v2694_v28 = vadd.s32 %v2692_v61, %v2646_v48 }
 0xa9f   :  { %v5081_v51 = vadd.s32 %v2695_v27, %v5045_v0 }
 0xaa0   :  { %v2696_v58 = vmul.u32 1024, %v2694_v28 }
 0xaa1   :  { %v2699_v52 = vadd.s32 256, %v5081_v51  ;;  %v2745_v6 = vadd.s32 512, %v5081_v51  ;;  %v2793_v11 = vadd.s32 768, %v5081_v51 }
 0xaa2   :  { %v5086_v55 = vadd.s32 %v2696_v58, %v5050_v63 }
 0xaa3   :  { %vm2701_vm15 = vcmp.ge.s32.totalorder %v4676_v14, %v2699_v52  ;;  %vm2747_vm5 = vcmp.ge.s32.totalorder %v4676_v14, %v2745_v6  ;;  %vm2795_vm0 = vcmp.ge.s32.totalorder %v4676_v14, %v2793_v11 }
 0xaa4   :  { %v2703_v57 = vsel %vm2701_vm15, 1, %v5398_v9  ;;  %v2749_v33 = vsel %vm2747_vm5, 1, %v5398_v9  ;;  %v2700_v0 = vadd.s32 256, %v5086_v55  ;;  %v2746_v60 = vadd.s32 512, %v5086_v55 }
 0xaa5   :  { %v2706_v2 = vshrl.u32 %v2703_v57, 16  ;;  %v2752_v15 = vshrl.u32 %v2749_v33, 16  ;;  %v2705_v10 = vand.u32 65535, %v2703_v57  ;;  %v2794_v3 = vadd.s32 768, %v5086_v55 }
 0xaa6   :  { %vm2702_vm6 = vcmp.ge.s32.totalorder %v4701_v19, %v2700_v0  ;;  %vm2748_vm1 = vcmp.ge.s32.totalorder %v4701_v19, %v2746_v60  ;;  %v2751_v23 = vand.u32 65535, %v2749_v33  ;;  %v2797_v38 = vsel %vm2795_vm0, 1, %v5398_v9 }
 0xaa7   :  { %v2708_v26 = vcvt.s32.f32 %v2706_v2  ;;  %v2704_v63 = vsel %vm2702_vm6, 1, %v5398_v9  ;;  %v2750_v12 = vsel %vm2748_vm1, 1, %v5398_v9  ;;  %v2754_v62 = vcvt.s32.f32 %v2752_v15 }
 0xaa8   :  { %v2718_v56 = vshrl.u32 %v2704_v63, 16  ;;  %v2764_v45 = vshrl.u32 %v2750_v12, 16  ;;  %v2707_v36 = vcvt.s32.f32 %v2705_v10  ;;  %v2717_v22 = vand.u32 65535, %v2704_v63 }
 0xaa9   :  { %2711 = vadd.xlane.f32.xlu0 %v2708_v26  ;;  %vm2796_vm9 = vcmp.ge.s32.totalorder %v4701_v19, %v2794_v3  ;;  %v2753_v47 = vcvt.s32.f32 %v2751_v23  ;;  %v2763_v24 = vand.u32 65535, %v2750_v12  ;;  %v2800_v17 = vshrl.u32 %v2797_v38, 16 }
 0xaaa   :  { %v2720_v37 = vcvt.s32.f32 %v2718_v56  ;;  %v2766_v49 = vcvt.s32.f32 %v2764_v45  ;;  %v2719_v44 = vcvt.s32.f32 %v2717_v22  ;;  %v2798_v59 = vsel %vm2796_vm9, 1, %v5398_v9 }
 0xaab   :  { %v2765_v53 = vcvt.s32.f32 %v2763_v24  ;;  %v2802_v29 = vcvt.s32.f32 %v2800_v17  ;;  %v2812_v41 = vshrl.u32 %v2798_v59, 16  ;;  %v2799_v4 = vand.u32 65535, %v2797_v38 }
 0xaac   :  { %2723 = vadd.xlane.f32.xlu1 %v2720_v37  ;;  %v2811_v8 = vand.u32 65535, %v2798_v59 }
 0xaad   :  { %2757 = vadd.xlane.f32.xlu0 %v2754_v62  ;;  %v2814_v1 = vcvt.s32.f32 %v2812_v41  ;;  %v2801_v30 = vcvt.s32.f32 %v2799_v4 }
 0xaae   :  { %v2813_v5 = vcvt.s32.f32 %v2811_v8 }
 0xab0   :  { %2769 = vadd.xlane.f32.xlu1 %v2766_v49 }
 0xab1   :  { %2709 = vadd.xlane.f32.xlu0 %v2707_v36 }
 0xab4   :  { %2721 = vadd.xlane.f32.xlu1 %v2719_v44 }
 0xab5   :  { %2755 = vadd.xlane.f32.xlu0 %v2753_v47 }
 0xab8   :  { %2767 = vadd.xlane.f32.xlu1 %v2765_v53 }
 0xab9   :  { %2805 = vadd.xlane.f32.xlu0 %v2802_v29 }
 0xabc   :  { %2817 = vadd.xlane.f32.xlu1 %v2814_v1 }
 0xabd   :  { %2803 = vadd.xlane.f32.xlu0 %v2801_v30 }
 0xac0   :  { %2815 = vadd.xlane.f32.xlu1 %v2813_v5 }
 0xb36   :  { %v2712_v34 = vpop.xlane.xlu0 %2711 }
 0xb37   :  { %v2714_v20 = vcvt.f32.s32 %v2712_v34 }
 0xb39   :  { %v2724_v31 = vpop.xlane.xlu1 %2723  ;;  %v2715_v39 = vshll.u32 %v2714_v20, 16 }
 0xb3a   :  { %v2758_v32 = vpop.xlane.xlu0 %2757  ;;  %v2726_v7 = vcvt.f32.s32 %v2724_v31 }
 0xb3b   :  { %v2760_v46 = vcvt.f32.s32 %v2758_v32 }
 0xb3c   :  { %v2727_v61 = vshll.u32 %v2726_v7, 16 }
 0xb3d   :  { %v2770_v25 = vpop.xlane.xlu1 %2769  ;;  %v2761_v6 = vshll.u32 %v2760_v46, 16 }
 0xb3e   :  { %v2710_v40 = vpop.xlane.xlu0 %2709  ;;  %v2772_v28 = vcvt.f32.s32 %v2770_v25 }
 0xb3f   :  { %v2713_v48 = vcvt.f32.s32 %v2710_v40 }
 0xb40   :  { %v2773_v15 = vshll.u32 %v2772_v28, 16 }
 0xb41   :  { %v2716_v27 = vadd.s32 %v2715_v39, %v2713_v48  ;;  %v2722_v58 = vpop.xlane.xlu1 %2721 }
 0xb42   :  { %v2756_v52 = vpop.xlane.xlu0 %2755  ;;  %v2725_v33 = vcvt.f32.s32 %v2722_v58 }
 0xb43   :  { %v2729_v57 = vrot.slane %v2716_v27, 4  ;;  %v2759_v2 = vcvt.f32.s32 %v2756_v52 }
 0xb44   :  { %v2728_v60 = vadd.s32 %v2727_v61, %v2725_v33 }
 0xb45   :  { %v2730_v0 = vadd.s32 %v2729_v57, %v2716_v27  ;;  %v2762_v26 = vadd.s32 %v2761_v6, %v2759_v2  ;;  %v2768_v63 = vpop.xlane.xlu1 %2767 }
 0xb46   :  { %v2806_v12 = vpop.xlane.xlu0 %2805  ;;  %v2735_v11 = vrot.slane %v2728_v60, 4  ;;  %v2771_v62 = vcvt.f32.s32 %v2768_v63 }
 0xb47   :  { %v2731_v56 = vrot.slane %v2730_v0, 2  ;;  %v2775_v37 = vrot.slane %v2762_v26, 4  ;;  %v2808_v45 = vcvt.f32.s32 %v2806_v12 }
 0xb48   :  { %v2736_v10 = vadd.s32 %v2735_v11, %v2728_v60  ;;  %v2774_v49 = vadd.s32 %v2773_v15, %v2771_v62 }
 0xb49   :  { %v2776_v3 = vadd.s32 %v2775_v37, %v2762_v26  ;;  %v2818_v36 = vpop.xlane.xlu1 %2817  ;;  %v2732_v23 = vadd.s32 %v2731_v56, %v2730_v0  ;;  %v2809_v24 = vshll.u32 %v2808_v45, 16 }
 0xb4a   :  { %v2804_v22 = vpop.xlane.xlu0 %2803  ;;  %v2781_v44 = vrot.slane %v2774_v49, 4  ;;  %v2737_v47 = vrot.slane %v2736_v10, 2  ;;  %v2820_v17 = vcvt.f32.s32 %v2818_v36 }
 0xb4b   :  { %v2777_v38 = vrot.slane %v2776_v3, 2  ;;  %v2807_v59 = vcvt.f32.s32 %v2804_v22  ;;  %v2733_v1 = vrot.slane %v2732_v23, 1 }
 0xb4c   :  { %v2782_v29 = vadd.s32 %v2781_v44, %v2774_v49  ;;  %v2738_v5 = vadd.s32 %v2737_v47, %v2736_v10  ;;  %v2821_v34 = vshll.u32 %v2820_v17, 16 }
 0xb4d   :  { %v2778_v53 = vadd.s32 %v2777_v38, %v2776_v3  ;;  %v2810_v41 = vadd.s32 %v2809_v24, %v2807_v59  ;;  %v2816_v4 = vpop.xlane.xlu1 %2815  ;;  %v2734_v46 = vadd.s32 %v2733_v1, %v2732_v23 }
 0xb4e   :  { %v2783_v8 = vrot.slane %v2782_v29, 2  ;;  %v2819_v32 = vcvt.f32.s32 %v2816_v4  ;;  %v2739_v48 = vrot.slane %v2738_v5, 1 }
 0xb4f   :  { %v2779_v30 = vrot.slane %v2778_v53, 1  ;;  %v2823_v31 = vrot.slane %v2810_v41, 4  ;;  %vm2741_vm4 = vcmp.ge.s32.totalorder %v2734_v46, %v4714_v50 }
 0xb50   :  { %v2784_v20 = vadd.s32 %v2783_v8, %v2782_v29  ;;  %v2822_v40 = vadd.s32 %v2821_v34, %v2819_v32  ;;  %v2740_v6 = vadd.s32 %v2739_v48, %v2738_v5  ;;  %v2743_v26 = vsel %vm2741_vm4, 1, %v5398_v9 }
 0xb51   :  { %v2780_v7 = vadd.s32 %v2779_v30, %v2778_v53  ;;  %v2824_v25 = vadd.s32 %v2823_v31, %v2810_v41 }
 0xb52   :  { %v2785_v39 = vrot.slane %v2784_v20, 1  ;;  %v2829_v61 = vrot.slane %v2822_v40, 4  ;;  %vm2742_vm3 = vcmp.ge.s32.totalorder %v2740_v6, %v4720_v21 }
 0xb53   :  { %v2825_v27 = vrot.slane %v2824_v25, 2  ;;  %vm2787_vm10 = vcmp.ge.s32.totalorder %v2780_v7, %v4714_v50  ;;  %v2744_v62 = vsel %vm2742_vm3, 1, %v5398_v9 }
 0xb54   :  { %v2786_v28 = vadd.s32 %v2785_v39, %v2784_v20  ;;  %v2830_v52 = vadd.s32 %v2829_v61, %v2822_v40  ;;  %v2789_v2 = vsel %vm2787_vm10, 1, %v5398_v9 }
 0xb55   :  { %v2826_v58 = vadd.s32 %v2825_v27, %v2824_v25  ;;  %v2791_v15 = vadd.s32 %v2789_v2, %v2743_v26 }
 0xb56   :  { %v2831_v33 = vrot.slane %v2830_v52, 2  ;;  %vm2788_vm14 = vcmp.ge.s32.totalorder %v2786_v28, %v4720_v21 }
 0xb57   :  { %v2827_v57 = vrot.slane %v2826_v58, 1  ;;  %v2790_v12 = vsel %vm2788_vm14, 1, %v5398_v9 }
 0xb58   :  { %v2832_v60 = vadd.s32 %v2831_v33, %v2830_v52  ;;  %v2792_v45 = vadd.s32 %v2790_v12, %v2744_v62 }
 0xb59   :  { %v2828_v0 = vadd.s32 %v2827_v57, %v2826_v58 }
 0xb5a   :  { %v2833_v63 = vrot.slane %v2832_v60, 1 }
 0xb5b   :  { %vm2835_vm8 = vcmp.ge.s32.totalorder %v2828_v0, %v4714_v50 }
 0xb5c   :  { %v2837_v56 = vsel %vm2835_vm8, 1, %v5398_v9  ;;  %v2834_v37 = vadd.s32 %v2833_v63, %v2832_v60 }
 0xb5d   :  { %v2839_v11 = vadd.s32 %v2837_v56, %v2791_v15 }
 0xb5e   :  { %vm2836_vm12 = vcmp.ge.s32.totalorder %v2834_v37, %v4720_v21 }
 0xb5f   :  { %v2841_v10 = vmul.u32 256, %v2839_v11  ;;  %v2838_v3 = vsel %vm2836_vm12, 1, %v5398_v9 }
 0xb60   :  { %v2840_v36 = vadd.s32 %v2838_v3, %v2792_v45 }
 0xb61   :  { %v5117_v49 = vadd.s32 %v2841_v10, %v5081_v51 }
 0xb62   :  { %v2842_v22 = vmul.u32 256, %v2840_v36 }
 0xb63   :  { %v2845_v23 = vadd.s32 64, %v5117_v49  ;;  %v2891_v38 = vadd.s32 128, %v5117_v49  ;;  %v2939_v1 = vadd.s32 192, %v5117_v49 }
 0xb64   :  { %v5122_v44 = vadd.s32 %v2842_v22, %v5086_v55 }
 0xb65   :  { %vm2847_vm11 = vcmp.ge.s32.totalorder %v4676_v14, %v2845_v23  ;;  %vm2893_vm13 = vcmp.ge.s32.totalorder %v4676_v14, %v2891_v38  ;;  %vm2941_vm6 = vcmp.ge.s32.totalorder %v4676_v14, %v2939_v1 }
 0xb66   :  { %v2849_v47 = vsel %vm2847_vm11, 1, %v5398_v9  ;;  %v2895_v24 = vsel %vm2893_vm13, 1, %v5398_v9  ;;  %v2846_v51 = vadd.s32 64, %v5122_v44  ;;  %v2892_v59 = vadd.s32 128, %v5122_v44 }
 0xb67   :  { %v2852_v17 = vshrl.u32 %v2849_v47, 16  ;;  %v2898_v29 = vshrl.u32 %v2895_v24, 16  ;;  %v2851_v34 = vand.u32 65535, %v2849_v47  ;;  %v2940_v31 = vadd.s32 192, %v5122_v44 }
 0xb68   :  { %vm2848_vm15 = vcmp.ge.s32.totalorder %v4701_v19, %v2846_v51  ;;  %vm2894_vm5 = vcmp.ge.s32.totalorder %v4701_v19, %v2892_v59  ;;  %v2897_v25 = vand.u32 65535, %v2895_v24  ;;  %v2943_v40 = vsel %vm2941_vm6, 1, %v5398_v9 }
 0xb69   :  { %v2854_v53 = vcvt.s32.f32 %v2852_v17  ;;  %v2850_v55 = vsel %vm2848_vm15, 1, %v5398_v9  ;;  %v2896_v41 = vsel %vm2894_vm5, 1, %v5398_v9  ;;  %v2900_v8 = vcvt.s32.f32 %v2898_v29 }
 0xb6a   :  { %v2864_v4 = vshrl.u32 %v2850_v55, 16  ;;  %v2910_v5 = vshrl.u32 %v2896_v41, 16  ;;  %v2853_v20 = vcvt.s32.f32 %v2851_v34  ;;  %v2863_v7 = vand.u32 65535, %v2850_v55 }
 0xb6b   :  { %2857 = vadd.xlane.f32.xlu0 %v2854_v53  ;;  %vm2942_vm1 = vcmp.ge.s32.totalorder %v4701_v19, %v2940_v31  ;;  %v2899_v46 = vcvt.s32.f32 %v2897_v25  ;;  %v2909_v48 = vand.u32 65535, %v2896_v41  ;;  %v2946_v27 = vshrl.u32 %v2943_v40, 16 }
 0xb6c   :  { %v2866_v30 = vcvt.s32.f32 %v2864_v4  ;;  %v2912_v32 = vcvt.s32.f32 %v2910_v5  ;;  %v2865_v39 = vcvt.s32.f32 %v2863_v7  ;;  %v2944_v61 = vsel %vm2942_vm1, 1, %v5398_v9 }
 0xb6d   :  { %v2911_v28 = vcvt.s32.f32 %v2909_v48  ;;  %v2948_v58 = vcvt.s32.f32 %v2946_v27  ;;  %v2958_v52 = vshrl.u32 %v2944_v61, 16  ;;  %v2945_v6 = vand.u32 65535, %v2943_v40 }
 0xb6e   :  { %2869 = vadd.xlane.f32.xlu1 %v2866_v30  ;;  %v2957_v2 = vand.u32 65535, %v2944_v61 }
 0xb6f   :  { %2903 = vadd.xlane.f32.xlu0 %v2900_v8  ;;  %v2960_v57 = vcvt.s32.f32 %v2958_v52  ;;  %v2947_v33 = vcvt.s32.f32 %v2945_v6 }
 0xb70   :  { %v2959_v0 = vcvt.s32.f32 %v2957_v2 }
 0xb72   :  { %2915 = vadd.xlane.f32.xlu1 %v2912_v32 }
 0xb73   :  { %2855 = vadd.xlane.f32.xlu0 %v2853_v20 }
 0xb76   :  { %2867 = vadd.xlane.f32.xlu1 %v2865_v39 }
 0xb77   :  { %2901 = vadd.xlane.f32.xlu0 %v2899_v46 }
 0xb7a   :  { %2913 = vadd.xlane.f32.xlu1 %v2911_v28 }
 0xb7b   :  { %2951 = vadd.xlane.f32.xlu0 %v2948_v58 }
 0xb7e   :  { %2963 = vadd.xlane.f32.xlu1 %v2960_v57 }
 0xb7f   :  { %2949 = vadd.xlane.f32.xlu0 %v2947_v33 }
 0xb82   :  { %2961 = vadd.xlane.f32.xlu1 %v2959_v0 }
 0xbf8   :  { %v2858_v60 = vpop.xlane.xlu0 %2857 }
 0xbf9   :  { %v2860_v63 = vcvt.f32.s32 %v2858_v60 }
 0xbfb   :  { %v2870_v26 = vpop.xlane.xlu1 %2869  ;;  %v2861_v37 = vshll.u32 %v2860_v63, 16 }
 0xbfc   :  { %v2904_v15 = vpop.xlane.xlu0 %2903  ;;  %v2872_v12 = vcvt.f32.s32 %v2870_v26 }
 0xbfd   :  { %v2906_v62 = vcvt.f32.s32 %v2904_v15 }
 0xbfe   :  { %v2873_v3 = vshll.u32 %v2872_v12, 16 }
 0xbff   :  { %v2916_v56 = vpop.xlane.xlu1 %2915  ;;  %v2907_v38 = vshll.u32 %v2906_v62, 16 }
 0xc00   :  { %v2856_v11 = vpop.xlane.xlu0 %2855  ;;  %v2918_v36 = vcvt.f32.s32 %v2916_v56 }
 0xc01   :  { %v2859_v45 = vcvt.f32.s32 %v2856_v11 }
 0xc02   :  { %v2919_v29 = vshll.u32 %v2918_v36, 16 }
 0xc03   :  { %v2862_v10 = vadd.s32 %v2861_v37, %v2859_v45  ;;  %v2868_v22 = vpop.xlane.xlu1 %2867 }
 0xc04   :  { %v2902_v23 = vpop.xlane.xlu0 %2901  ;;  %v2871_v24 = vcvt.f32.s32 %v2868_v22 }
 0xc05   :  { %v2875_v47 = vrot.slane %v2862_v10, 4  ;;  %v2905_v17 = vcvt.f32.s32 %v2902_v23 }
 0xc06   :  { %v2874_v59 = vadd.s32 %v2873_v3, %v2871_v24 }
 0xc07   :  { %v2876_v51 = vadd.s32 %v2875_v47, %v2862_v10  ;;  %v2908_v53 = vadd.s32 %v2907_v38, %v2905_v17  ;;  %v2914_v55 = vpop.xlane.xlu1 %2913 }
 0xc08   :  { %v2952_v41 = vpop.xlane.xlu0 %2951  ;;  %v2881_v1 = vrot.slane %v2874_v59, 4  ;;  %v2917_v8 = vcvt.f32.s32 %v2914_v55 }
 0xc09   :  { %v2877_v4 = vrot.slane %v2876_v51, 2  ;;  %v2921_v30 = vrot.slane %v2908_v53, 4  ;;  %v2954_v5 = vcvt.f32.s32 %v2952_v41 }
 0xc0a   :  { %v2882_v34 = vadd.s32 %v2881_v1, %v2874_v59  ;;  %v2920_v32 = vadd.s32 %v2919_v29, %v2917_v8 }
 0xc0b   :  { %v2922_v31 = vadd.s32 %v2921_v30, %v2908_v53  ;;  %v2964_v20 = vpop.xlane.xlu1 %2963  ;;  %v2878_v25 = vadd.s32 %v2877_v4, %v2876_v51  ;;  %v2955_v48 = vshll.u32 %v2954_v5, 16 }
 0xc0c   :  { %v2950_v7 = vpop.xlane.xlu0 %2949  ;;  %v2927_v39 = vrot.slane %v2920_v32, 4  ;;  %v2883_v46 = vrot.slane %v2882_v34, 2  ;;  %v2966_v27 = vcvt.f32.s32 %v2964_v20 }
 0xc0d   :  { %v2923_v40 = vrot.slane %v2922_v31, 2  ;;  %v2953_v61 = vcvt.f32.s32 %v2950_v7  ;;  %v2879_v57 = vrot.slane %v2878_v25, 1 }
 0xc0e   :  { %v2928_v58 = vadd.s32 %v2927_v39, %v2920_v32  ;;  %v2884_v0 = vadd.s32 %v2883_v46, %v2882_v34  ;;  %v2967_v60 = vshll.u32 %v2966_v27, 16 }
 0xc0f   :  { %v2924_v28 = vadd.s32 %v2923_v40, %v2922_v31  ;;  %v2956_v52 = vadd.s32 %v2955_v48, %v2953_v61  ;;  %v2962_v6 = vpop.xlane.xlu1 %2961  ;;  %v2880_v62 = vadd.s32 %v2879_v57, %v2878_v25 }
 0xc10   :  { %v2929_v2 = vrot.slane %v2928_v58, 2  ;;  %v2965_v15 = vcvt.f32.s32 %v2962_v6  ;;  %v2885_v45 = vrot.slane %v2884_v0, 1 }
 0xc11   :  { %v2925_v33 = vrot.slane %v2924_v28, 1  ;;  %v2969_v26 = vrot.slane %v2956_v52, 4  ;;  %vm2887_vm9 = vcmp.ge.s32.totalorder %v2880_v62, %v4714_v50 }
 0xc12   :  { %v2930_v63 = vadd.s32 %v2929_v2, %v2928_v58  ;;  %v2968_v11 = vadd.s32 %v2967_v60, %v2965_v15  ;;  %v2886_v38 = vadd.s32 %v2885_v45, %v2884_v0  ;;  %v2889_v53 = vsel %vm2887_vm9, 1, %v5398_v9 }
 0xc13   :  { %v2926_v12 = vadd.s32 %v2925_v33, %v2924_v28  ;;  %v2970_v56 = vadd.s32 %v2969_v26, %v2956_v52 }
 0xc14   :  { %v2931_v37 = vrot.slane %v2930_v63, 1  ;;  %v2975_v3 = vrot.slane %v2968_v11, 4  ;;  %vm2888_vm4 = vcmp.ge.s32.totalorder %v2886_v38, %v4720_v21 }
 0xc15   :  { %v2971_v10 = vrot.slane %v2970_v56, 2  ;;  %vm2933_vm0 = vcmp.ge.s32.totalorder %v2926_v12, %v4714_v50  ;;  %v2890_v8 = vsel %vm2888_vm4, 1, %v5398_v9 }
 0xc16   :  { %v2932_v36 = vadd.s32 %v2931_v37, %v2930_v63  ;;  %v2976_v23 = vadd.s32 %v2975_v3, %v2968_v11  ;;  %v2935_v17 = vsel %vm2933_vm0, 1, %v5398_v9 }
 0xc17   :  { %v2972_v22 = vadd.s32 %v2971_v10, %v2970_v56  ;;  %v2937_v29 = vadd.s32 %v2935_v17, %v2889_v53 }
 0xc18   :  { %v2977_v24 = vrot.slane %v2976_v23, 2  ;;  %vm2934_vm10 = vcmp.ge.s32.totalorder %v2932_v36, %v4720_v21 }
 0xc19   :  { %v2973_v47 = vrot.slane %v2972_v22, 1  ;;  %v2936_v41 = vsel %vm2934_vm10, 1, %v5398_v9 }
 0xc1a   :  { %v2978_v59 = vadd.s32 %v2977_v24, %v2976_v23  ;;  %v2938_v5 = vadd.s32 %v2936_v41, %v2890_v8 }
 0xc1b   :  { %v2974_v51 = vadd.s32 %v2973_v47, %v2972_v22 }
 0xc1c   :  { %v2979_v55 = vrot.slane %v2978_v59, 1 }
 0xc1d   :  { %vm2981_vm14 = vcmp.ge.s32.totalorder %v2974_v51, %v4714_v50 }
 0xc1e   :  { %v2983_v4 = vsel %vm2981_vm14, 1, %v5398_v9  ;;  %v2980_v30 = vadd.s32 %v2979_v55, %v2978_v59 }
 0xc1f   :  { %v2985_v1 = vadd.s32 %v2983_v4, %v2937_v29 }
 0xc20   :  { %vm2982_vm3 = vcmp.ge.s32.totalorder %v2980_v30, %v4720_v21 }
 0xc21   :  { %v2987_v34 = vmul.u32 64, %v2985_v1  ;;  %v2984_v31 = vsel %vm2982_vm3, 1, %v5398_v9 }
 0xc22   :  { %v2986_v20 = vadd.s32 %v2984_v31, %v2938_v5 }
 0xc23   :  { %v5153_v32 = vadd.s32 %v2987_v34, %v5117_v49 }
 0xc24   :  { %v2988_v7 = vmul.u32 64, %v2986_v20 }
 0xc25   :  { %v2991_v25 = vadd.s32 16, %v5153_v32  ;;  %v3037_v40 = vadd.s32 32, %v5153_v32  ;;  %v3085_v57 = vadd.s32 48, %v5153_v32 }
 0xc26   :  { %v5158_v39 = vadd.s32 %v2988_v7, %v5122_v44 }
 0xc27   :  { %vm2993_vm8 = vcmp.ge.s32.totalorder %v4676_v14, %v2991_v25  ;;  %vm3039_vm12 = vcmp.ge.s32.totalorder %v4676_v14, %v3037_v40  ;;  %vm3087_vm15 = vcmp.ge.s32.totalorder %v4676_v14, %v3085_v57 }
 0xc28   :  { %v2995_v46 = vsel %vm2993_vm8, 1, %v5398_v9  ;;  %v3041_v48 = vsel %vm3039_vm12, 1, %v5398_v9  ;;  %v2992_v49 = vadd.s32 16, %v5158_v39  ;;  %v3038_v61 = vadd.s32 32, %v5158_v39 }
 0xc29   :  { %v2998_v27 = vshrl.u32 %v2995_v46, 16  ;;  %v3044_v58 = vshrl.u32 %v3041_v48, 16  ;;  %v2997_v60 = vand.u32 65535, %v2995_v46  ;;  %v3086_v26 = vadd.s32 48, %v5158_v39 }
 0xc2a   :  { %vm2994_vm11 = vcmp.ge.s32.totalorder %v4701_v19, %v2992_v49  ;;  %vm3040_vm13 = vcmp.ge.s32.totalorder %v4701_v19, %v3038_v61  ;;  %v3043_v56 = vand.u32 65535, %v3041_v48  ;;  %v3089_v11 = vsel %vm3087_vm15, 1, %v5398_v9 }
 0xc2b   :  { %v3000_v28 = vcvt.s32.f32 %v2998_v27  ;;  %v2996_v44 = vsel %vm2994_vm11, 1, %v5398_v9  ;;  %v3042_v52 = vsel %vm3040_vm13, 1, %v5398_v9  ;;  %v3046_v2 = vcvt.s32.f32 %v3044_v58 }
 0xc2c   :  { %v3010_v6 = vshrl.u32 %v2996_v44, 16  ;;  %v3056_v0 = vshrl.u32 %v3042_v52, 16  ;;  %v2999_v63 = vcvt.s32.f32 %v2997_v60  ;;  %v3009_v12 = vand.u32 65535, %v2996_v44 }
 0xc2d   :  { %3003 = vadd.xlane.f32.xlu0 %v3000_v28  ;;  %vm3088_vm5 = vcmp.ge.s32.totalorder %v4701_v19, %v3086_v26  ;;  %v3045_v62 = vcvt.s32.f32 %v3043_v56  ;;  %v3055_v45 = vand.u32 65535, %v3042_v52  ;;  %v3092_v10 = vshrl.u32 %v3089_v11, 16 }
 0xc2e   :  { %v3012_v33 = vcvt.s32.f32 %v3010_v6  ;;  %v3058_v15 = vcvt.s32.f32 %v3056_v0  ;;  %v3011_v37 = vcvt.s32.f32 %v3009_v12  ;;  %v3090_v3 = vsel %vm3088_vm5, 1, %v5398_v9 }
 0xc2f   :  { %v3057_v36 = vcvt.s32.f32 %v3055_v45  ;;  %v3094_v22 = vcvt.s32.f32 %v3092_v10  ;;  %v3104_v23 = vshrl.u32 %v3090_v3, 16  ;;  %v3091_v38 = vand.u32 65535, %v3089_v11 }
 0xc30   :  { %3015 = vadd.xlane.f32.xlu1 %v3012_v33  ;;  %v3103_v17 = vand.u32 65535, %v3090_v3 }
 0xc31   :  { %3049 = vadd.xlane.f32.xlu0 %v3046_v2  ;;  %v3106_v47 = vcvt.s32.f32 %v3104_v23  ;;  %v3093_v24 = vcvt.s32.f32 %v3091_v38 }
 0xc32   :  { %v3105_v51 = vcvt.s32.f32 %v3103_v17 }
 0xc34   :  { %3061 = vadd.xlane.f32.xlu1 %v3058_v15 }
 0xc35   :  { %3001 = vadd.xlane.f32.xlu0 %v2999_v63 }
 0xc38   :  { %3013 = vadd.xlane.f32.xlu1 %v3011_v37 }
 0xc39   :  { %3047 = vadd.xlane.f32.xlu0 %v3045_v62 }
 0xc3c   :  { %3059 = vadd.xlane.f32.xlu1 %v3057_v36 }
 0xc3d   :  { %3097 = vadd.xlane.f32.xlu0 %v3094_v22 }
 0xc40   :  { %3109 = vadd.xlane.f32.xlu1 %v3106_v47 }
 0xc41   :  { %3095 = vadd.xlane.f32.xlu0 %v3093_v24 }
 0xc44   :  { %3107 = vadd.xlane.f32.xlu1 %v3105_v51 }
 0xcba   :  { %v3004_v59 = vpop.xlane.xlu0 %3003 }
 0xcbb   :  { %v3006_v55 = vcvt.f32.s32 %v3004_v59 }
 0xcbd   :  { %v3016_v53 = vpop.xlane.xlu1 %3015  ;;  %v3007_v30 = vshll.u32 %v3006_v55, 16 }
 0xcbe   :  { %v3050_v29 = vpop.xlane.xlu0 %3049  ;;  %v3018_v41 = vcvt.f32.s32 %v3016_v53 }
 0xcbf   :  { %v3052_v8 = vcvt.f32.s32 %v3050_v29 }
 0xcc0   :  { %v3019_v31 = vshll.u32 %v3018_v41, 16 }
 0xcc1   :  { %v3062_v4 = vpop.xlane.xlu1 %3061  ;;  %v3053_v40 = vshll.u32 %v3052_v8, 16 }
 0xcc2   :  { %v3002_v1 = vpop.xlane.xlu0 %3001  ;;  %v3064_v20 = vcvt.f32.s32 %v3062_v4 }
 0xcc3   :  { %v3005_v5 = vcvt.f32.s32 %v3002_v1 }
 0xcc4   :  { %v3065_v58 = vshll.u32 %v3064_v20, 16 }
 0xcc5   :  { %v3008_v34 = vadd.s32 %v3007_v30, %v3005_v5  ;;  %v3014_v7 = vpop.xlane.xlu1 %3013 }
 0xcc6   :  { %v3048_v25 = vpop.xlane.xlu0 %3047  ;;  %v3017_v48 = vcvt.f32.s32 %v3014_v7 }
 0xcc7   :  { %v3021_v46 = vrot.slane %v3008_v34, 4  ;;  %v3051_v27 = vcvt.f32.s32 %v3048_v25 }
 0xcc8   :  { %v3020_v61 = vadd.s32 %v3019_v31, %v3017_v48 }
 0xcc9   :  { %v3022_v49 = vadd.s32 %v3021_v46, %v3008_v34  ;;  %v3054_v28 = vadd.s32 %v3053_v40, %v3051_v27  ;;  %v3060_v44 = vpop.xlane.xlu1 %3059 }
 0xcca   :  { %v3098_v52 = vpop.xlane.xlu0 %3097  ;;  %v3027_v57 = vrot.slane %v3020_v61, 4  ;;  %v3063_v2 = vcvt.f32.s32 %v3060_v44 }
 0xccb   :  { %v3023_v6 = vrot.slane %v3022_v49, 2  ;;  %v3067_v33 = vrot.slane %v3054_v28, 4  ;;  %v3100_v0 = vcvt.f32.s32 %v3098_v52 }
 0xccc   :  { %v3028_v60 = vadd.s32 %v3027_v57, %v3020_v61  ;;  %v3066_v15 = vadd.s32 %v3065_v58, %v3063_v2 }
 0xccd   :  { %v3068_v26 = vadd.s32 %v3067_v33, %v3054_v28  ;;  %v3110_v63 = vpop.xlane.xlu1 %3109  ;;  %v3024_v56 = vadd.s32 %v3023_v6, %v3022_v49  ;;  %v3101_v45 = vshll.u32 %v3100_v0, 16 }
 0xcce   :  { %v3096_v12 = vpop.xlane.xlu0 %3095  ;;  %v3073_v37 = vrot.slane %v3066_v15, 4  ;;  %v3029_v62 = vrot.slane %v3028_v60, 2  ;;  %v3112_v10 = vcvt.f32.s32 %v3110_v63 }
 0xccf   :  { %v3069_v11 = vrot.slane %v3068_v26, 2  ;;  %v3099_v3 = vcvt.f32.s32 %v3096_v12  ;;  %v3025_v47 = vrot.slane %v3024_v56, 1 }
 0xcd0   :  { %v3074_v22 = vadd.s32 %v3073_v37, %v3066_v15  ;;  %v3030_v51 = vadd.s32 %v3029_v62, %v3028_v60  ;;  %v3113_v59 = vshll.u32 %v3112_v10, 16 }
 0xcd1   :  { %v3070_v36 = vadd.s32 %v3069_v11, %v3068_v26  ;;  %v3102_v23 = vadd.s32 %v3101_v45, %v3099_v3  ;;  %v3108_v38 = vpop.xlane.xlu1 %3107  ;;  %v3026_v8 = vadd.s32 %v3025_v47, %v3024_v56 }
 0xcd2   :  { %v3075_v17 = vrot.slane %v3074_v22, 2  ;;  %v3111_v29 = vcvt.f32.s32 %v3108_v38  ;;  %v3031_v5 = vrot.slane %v3030_v51, 1 }
 0xcd3   :  { %v3071_v24 = vrot.slane %v3070_v36, 1  ;;  %v3115_v53 = vrot.slane %v3102_v23, 4  ;;  %vm3033_vm1 = vcmp.ge.s32.totalorder %v3026_v8, %v4714_v50 }
 0xcd4   :  { %v3076_v55 = vadd.s32 %v3075_v17, %v3074_v22  ;;  %v3114_v1 = vadd.s32 %v3113_v59, %v3111_v29  ;;  %v3032_v40 = vadd.s32 %v3031_v5, %v3030_v51  ;;  %v3035_v28 = vsel %vm3033_vm1, 1, %v5398_v9 }
 0xcd5   :  { %v3072_v41 = vadd.s32 %v3071_v24, %v3070_v36  ;;  %v3116_v4 = vadd.s32 %v3115_v53, %v3102_v23 }
 0xcd6   :  { %v3077_v30 = vrot.slane %v3076_v55, 1  ;;  %v3121_v31 = vrot.slane %v3114_v1, 4  ;;  %vm3034_vm9 = vcmp.ge.s32.totalorder %v3032_v40, %v4720_v21 }
 0xcd7   :  { %v3117_v34 = vrot.slane %v3116_v4, 2  ;;  %vm3079_vm6 = vcmp.ge.s32.totalorder %v3072_v41, %v4714_v50  ;;  %v3036_v2 = vsel %vm3034_vm9, 1, %v5398_v9 }
 0xcd8   :  { %v3078_v20 = vadd.s32 %v3077_v30, %v3076_v55  ;;  %v3122_v25 = vadd.s32 %v3121_v31, %v3114_v1  ;;  %v3081_v27 = vsel %vm3079_vm6, 1, %v5398_v9 }
 0xcd9   :  { %v3118_v7 = vadd.s32 %v3117_v34, %v3116_v4  ;;  %v3083_v58 = vadd.s32 %v3081_v27, %v3035_v28 }
 0xcda   :  { %v3123_v48 = vrot.slane %v3122_v25, 2  ;;  %vm3080_vm0 = vcmp.ge.s32.totalorder %v3078_v20, %v4720_v21 }
 0xcdb   :  { %v3119_v46 = vrot.slane %v3118_v7, 1  ;;  %v3082_v52 = vsel %vm3080_vm0, 1, %v5398_v9 }
 0xcdc   :  { %v3124_v61 = vadd.s32 %v3123_v48, %v3122_v25  ;;  %v3084_v0 = vadd.s32 %v3082_v52, %v3036_v2 }
 0xcdd   :  { %v3120_v49 = vadd.s32 %v3119_v46, %v3118_v7 }
 0xcde   :  { %v3125_v44 = vrot.slane %v3124_v61, 1 }
 0xcdf   :  { %vm3127_vm10 = vcmp.ge.s32.totalorder %v3120_v49, %v4714_v50 }
 0xce0   :  { %v3129_v6 = vsel %vm3127_vm10, 1, %v5398_v9  ;;  %v3126_v33 = vadd.s32 %v3125_v44, %v3124_v61 }
 0xce1   :  { %v3131_v57 = vadd.s32 %v3129_v6, %v3083_v58 }
 0xce2   :  { %vm3128_vm4 = vcmp.ge.s32.totalorder %v3126_v33, %v4720_v21 }
 0xce3   :  { %v3133_v60 = vmul.u32 16, %v3131_v57  ;;  %v3130_v26 = vsel %vm3128_vm4, 1, %v5398_v9 }
 0xce4   :  { %v3132_v63 = vadd.s32 %v3130_v26, %v3084_v0 }
 0xce5   :  { %v5189_v15 = vadd.s32 %v3133_v60, %v5153_v32 }
 0xce6   :  { %v3134_v12 = vmul.u32 16, %v3132_v63 }
 0xce7   :  { %v3137_v56 = vadd.s32 4, %v5189_v15  ;;  %v3183_v11 = vadd.s32 8, %v5189_v15  ;;  %v3231_v47 = vadd.s32 12, %v5189_v15 }
 0xce8   :  { %v5194_v37 = vadd.s32 %v3134_v12, %v5158_v39 }
 0xce9   :  { %vm3139_vm14 = vcmp.ge.s32.totalorder %v4676_v14, %v3137_v56  ;;  %vm3185_vm3 = vcmp.ge.s32.totalorder %v4676_v14, %v3183_v11  ;;  %vm3233_vm11 = vcmp.ge.s32.totalorder %v4676_v14, %v3231_v47 }
 0xcea   :  { %v3141_v62 = vsel %vm3139_vm14, 1, %v5398_v9  ;;  %v3187_v45 = vsel %vm3185_vm3, 1, %v5398_v9  ;;  %v3138_v32 = vadd.s32 4, %v5194_v37  ;;  %v3184_v3 = vadd.s32 8, %v5194_v37 }
 0xceb   :  { %v3144_v10 = vshrl.u32 %v3141_v62, 16  ;;  %v3190_v22 = vshrl.u32 %v3187_v45, 16  ;;  %v3143_v59 = vand.u32 65535, %v3141_v62  ;;  %v3232_v53 = vadd.s32 12, %v5194_v37 }
 0xcec   :  { %vm3140_vm8 = vcmp.ge.s32.totalorder %v4701_v19, %v3138_v32  ;;  %vm3186_vm12 = vcmp.ge.s32.totalorder %v4701_v19, %v3184_v3  ;;  %v3189_v4 = vand.u32 65535, %v3187_v45  ;;  %v3235_v1 = vsel %vm3233_vm11, 1, %v5398_v9 }
 0xced   :  { %v3146_v36 = vcvt.s32.f32 %v3144_v10  ;;  %v3142_v39 = vsel %vm3140_vm8, 1, %v5398_v9  ;;  %v3188_v23 = vsel %vm3186_vm12, 1, %v5398_v9  ;;  %v3192_v17 = vcvt.s32.f32 %v3190_v22 }
 0xcee   :  { %v3156_v38 = vshrl.u32 %v3142_v39, 16  ;;  %v3202_v51 = vshrl.u32 %v3188_v23, 16  ;;  %v3145_v55 = vcvt.s32.f32 %v3143_v59  ;;  %v3155_v41 = vand.u32 65535, %v3142_v39 }
 0xcef   :  { %3149 = vadd.xlane.f32.xlu0 %v3146_v36  ;;  %vm3234_vm13 = vcmp.ge.s32.totalorder %v4701_v19, %v3232_v53  ;;  %v3191_v8 = vcvt.s32.f32 %v3189_v4  ;;  %v3201_v5 = vand.u32 65535, %v3188_v23  ;;  %v3238_v34 = vshrl.u32 %v3235_v1, 16 }
 0xcf0   :  { %v3158_v24 = vcvt.s32.f32 %v3156_v38  ;;  %v3204_v29 = vcvt.s32.f32 %v3202_v51  ;;  %v3157_v30 = vcvt.s32.f32 %v3155_v41  ;;  %v3236_v31 = vsel %vm3234_vm13, 1, %v5398_v9 }
 0xcf1   :  { %v3203_v20 = vcvt.s32.f32 %v3201_v5  ;;  %v3240_v7 = vcvt.s32.f32 %v3238_v34  ;;  %v3250_v25 = vshrl.u32 %v3236_v31, 16  ;;  %v3237_v40 = vand.u32 65535, %v3235_v1 }
 0xcf2   :  { %3161 = vadd.xlane.f32.xlu1 %v3158_v24  ;;  %v3249_v27 = vand.u32 65535, %v3236_v31 }
 0xcf3   :  { %3195 = vadd.xlane.f32.xlu0 %v3192_v17  ;;  %v3252_v46 = vcvt.s32.f32 %v3250_v25  ;;  %v3239_v48 = vcvt.s32.f32 %v3237_v40 }
 0xcf4   :  { %v3251_v49 = vcvt.s32.f32 %v3249_v27 }
 0xcf6   :  { %3207 = vadd.xlane.f32.xlu1 %v3204_v29 }
 0xcf7   :  { %3147 = vadd.xlane.f32.xlu0 %v3145_v55 }
 0xcfa   :  { %3159 = vadd.xlane.f32.xlu1 %v3157_v30 }
 0xcfb   :  { %3193 = vadd.xlane.f32.xlu0 %v3191_v8 }
 0xcfe   :  { %3205 = vadd.xlane.f32.xlu1 %v3203_v20 }
 0xcff   :  { %3243 = vadd.xlane.f32.xlu0 %v3240_v7 }
 0xd02   :  { %3255 = vadd.xlane.f32.xlu1 %v3252_v46 }
 0xd03   :  { %3241 = vadd.xlane.f32.xlu0 %v3239_v48 }
 0xd06   :  { %3253 = vadd.xlane.f32.xlu1 %v3251_v49 }
 0xd7c   :  { %v3150_v61 = vpop.xlane.xlu0 %3149 }
 0xd7d   :  { %v3152_v44 = vcvt.f32.s32 %v3150_v61 }
 0xd7f   :  { %v3162_v28 = vpop.xlane.xlu1 %3161  ;;  %v3153_v33 = vshll.u32 %v3152_v44, 16 }
 0xd80   :  { %v3196_v58 = vpop.xlane.xlu0 %3195  ;;  %v3164_v52 = vcvt.f32.s32 %v3162_v28 }
 0xd81   :  { %v3198_v2 = vcvt.f32.s32 %v3196_v58 }
 0xd82   :  { %v3165_v26 = vshll.u32 %v3164_v52, 16 }
 0xd83   :  { %v3208_v6 = vpop.xlane.xlu1 %3207  ;;  %v3199_v11 = vshll.u32 %v3198_v2, 16 }
 0xd84   :  { %v3148_v57 = vpop.xlane.xlu0 %3147  ;;  %v3210_v63 = vcvt.f32.s32 %v3208_v6 }
 0xd85   :  { %v3151_v0 = vcvt.f32.s32 %v3148_v57 }
 0xd86   :  { %v3211_v22 = vshll.u32 %v3210_v63, 16 }
 0xd87   :  { %v3154_v60 = vadd.s32 %v3153_v33, %v3151_v0  ;;  %v3160_v12 = vpop.xlane.xlu1 %3159 }
 0xd88   :  { %v3194_v56 = vpop.xlane.xlu0 %3193  ;;  %v3163_v45 = vcvt.f32.s32 %v3160_v12 }
 0xd89   :  { %v3167_v62 = vrot.slane %v3154_v60, 4  ;;  %v3197_v10 = vcvt.f32.s32 %v3194_v56 }
 0xd8a   :  { %v3166_v3 = vadd.s32 %v3165_v26, %v3163_v45 }
 0xd8b   :  { %v3168_v32 = vadd.s32 %v3167_v62, %v3154_v60  ;;  %v3200_v36 = vadd.s32 %v3199_v11, %v3197_v10  ;;  %v3206_v39 = vpop.xlane.xlu1 %3205 }
 0xd8c   :  { %v3244_v23 = vpop.xlane.xlu0 %3243  ;;  %v3173_v47 = vrot.slane %v3166_v3, 4  ;;  %v3209_v17 = vcvt.f32.s32 %v3206_v39 }
 0xd8d   :  { %v3169_v38 = vrot.slane %v3168_v32, 2  ;;  %v3213_v24 = vrot.slane %v3200_v36, 4  ;;  %v3246_v51 = vcvt.f32.s32 %v3244_v23 }
 0xd8e   :  { %v3174_v59 = vadd.s32 %v3173_v47, %v3166_v3  ;;  %v3212_v29 = vadd.s32 %v3211_v22, %v3209_v17 }
 0xd8f   :  { %v3214_v53 = vadd.s32 %v3213_v24, %v3200_v36  ;;  %v3256_v55 = vpop.xlane.xlu1 %3255  ;;  %v3170_v4 = vadd.s32 %v3169_v38, %v3168_v32  ;;  %v3247_v5 = vshll.u32 %v3246_v51, 16 }
 0xd90   :  { %v3242_v41 = vpop.xlane.xlu0 %3241  ;;  %v3219_v30 = vrot.slane %v3212_v29, 4  ;;  %v3175_v8 = vrot.slane %v3174_v59, 2  ;;  %v3258_v34 = vcvt.f32.s32 %v3256_v55 }
 0xd91   :  { %v3215_v1 = vrot.slane %v3214_v53, 2  ;;  %v3245_v31 = vcvt.f32.s32 %v3242_v41  ;;  %v3171_v46 = vrot.slane %v3170_v4, 1 }
 0xd92   :  { %v3220_v7 = vadd.s32 %v3219_v30, %v3212_v29  ;;  %v3176_v49 = vadd.s32 %v3175_v8, %v3174_v59  ;;  %v3259_v61 = vshll.u32 %v3258_v34, 16 }
 0xd93   :  { %v3216_v20 = vadd.s32 %v3215_v1, %v3214_v53  ;;  %v3248_v25 = vadd.s32 %v3247_v5, %v3245_v31  ;;  %v3254_v40 = vpop.xlane.xlu1 %3253  ;;  %v3172_v2 = vadd.s32 %v3171_v46, %v3170_v4 }
 0xd94   :  { %v3221_v27 = vrot.slane %v3220_v7, 2  ;;  %v3257_v58 = vcvt.f32.s32 %v3254_v40  ;;  %v3177_v0 = vrot.slane %v3176_v49, 1 }
 0xd95   :  { %v3217_v48 = vrot.slane %v3216_v20, 1  ;;  %v3261_v28 = vrot.slane %v3248_v25, 4  ;;  %vm3179_vm5 = vcmp.ge.s32.totalorder %v3172_v2, %v4714_v50 }
 0xd96   :  { %v3222_v44 = vadd.s32 %v3221_v27, %v3220_v7  ;;  %v3260_v57 = vadd.s32 %v3259_v61, %v3257_v58  ;;  %v3178_v11 = vadd.s32 %v3177_v0, %v3176_v49  ;;  %v3181_v36 = vsel %vm3179_vm5, 1, %v5398_v9 }
 0xd97   :  { %v3218_v52 = vadd.s32 %v3217_v48, %v3216_v20  ;;  %v3262_v6 = vadd.s32 %v3261_v28, %v3248_v25 }
 0xd98   :  { %v3223_v33 = vrot.slane %v3222_v44, 1  ;;  %v3267_v26 = vrot.slane %v3260_v57, 4  ;;  %vm3180_vm1 = vcmp.ge.s32.totalorder %v3178_v11, %v4720_v21 }
 0xd99   :  { %v3263_v60 = vrot.slane %v3262_v6, 2  ;;  %vm3225_vm15 = vcmp.ge.s32.totalorder %v3218_v52, %v4714_v50  ;;  %v3182_v17 = vsel %vm3180_vm1, 1, %v5398_v9  ;;  %vm3429_vm1 = vcmp.gt.s32.totalorder %v4714_v50, 0 }
 0xd9a   :  { %v3224_v63 = vadd.s32 %v3223_v33, %v3222_v44  ;;  %v3268_v56 = vadd.s32 %v3267_v26, %v3260_v57  ;;  %v3227_v10 = vsel %vm3225_vm15, 1, %v5398_v9 }
 0xd9b   :  { %v3264_v12 = vadd.s32 %v3263_v60, %v3262_v6  ;;  %v3229_v22 = vadd.s32 %v3227_v10, %v3181_v36 }
 0xd9c   :  { %v3269_v45 = vrot.slane %v3268_v56, 2  ;;  %vm3226_vm6 = vcmp.ge.s32.totalorder %v3224_v63, %v4720_v21 }
 0xd9d   :  { %v3265_v62 = vrot.slane %v3264_v12, 1  ;;  %v3228_v23 = vsel %vm3226_vm6, 1, %v5398_v9 }
 0xd9e   :  { %v3270_v3 = vadd.s32 %v3269_v45, %v3268_v56  ;;  %v3230_v51 = vadd.s32 %v3228_v23, %v3182_v17 }
 0xd9f   :  { %v3266_v32 = vadd.s32 %v3265_v62, %v3264_v12 }
 0xda0   :  { %v3271_v39 = vrot.slane %v3270_v3, 1 }
 0xda1   :  { %vm3273_vm0 = vcmp.ge.s32.totalorder %v3266_v32, %v4714_v50 }
 0xda2   :  { %v3275_v38 = vsel %vm3273_vm0, 1, %v5398_v9  ;;  %v3272_v24 = vadd.s32 %v3271_v39, %v3270_v3 }
 0xda3   :  { %v3277_v47 = vadd.s32 %v3275_v38, %v3229_v22 }
 0xda4   :  { %vm3274_vm9 = vcmp.ge.s32.totalorder %v3272_v24, %v4720_v21 }
 0xda5   :  { %v3279_v59 = vmul.u32 4, %v3277_v47  ;;  %v3276_v53 = vsel %vm3274_vm9, 1, %v5398_v9 }
 0xda6   :  { %v3278_v55 = vadd.s32 %v3276_v53, %v3230_v51 }
 0xda7   :  { %v5225_v29 = vadd.s32 %v3279_v59, %v5189_v15 }
 0xda8   :  { %v3280_v41 = vmul.u32 4, %v3278_v55 }
 0xda9   :  { %v3283_v4 = vadd.s32 1, %v5225_v29  ;;  %v3329_v1 = vadd.s32 2, %v5225_v29  ;;  %v3377_v46 = vadd.s32 3, %v5225_v29 }
 0xdaa   :  { %v5230_v30 = vadd.s32 %v3280_v41, %v5194_v37 }
 0xdab   :  { %vm3285_vm10 = vcmp.ge.s32.totalorder %v4676_v14, %v3283_v4  ;;  %vm3331_vm4 = vcmp.ge.s32.totalorder %v4676_v14, %v3329_v1  ;;  %vm3379_vm8 = vcmp.ge.s32.totalorder %v4676_v14, %v3377_v46 }
 0xdac   :  { %v3287_v8 = vsel %vm3285_vm10, 1, %v5398_v9  ;;  %v3333_v5 = vsel %vm3331_vm4, 1, %v5398_v9  ;;  %v3284_v15 = vadd.s32 1, %v5230_v30  ;;  %v3330_v31 = vadd.s32 2, %v5230_v30 }
 0xdad   :  { %v3290_v34 = vshrl.u32 %v3287_v8, 16  ;;  %v3336_v7 = vshrl.u32 %v3333_v5, 16  ;;  %v3289_v61 = vand.u32 65535, %v3287_v8  ;;  %v3378_v28 = vadd.s32 3, %v5230_v30 }
 0xdae   :  { %vm3286_vm14 = vcmp.ge.s32.totalorder %v4701_v19, %v3284_v15  ;;  %vm3332_vm3 = vcmp.ge.s32.totalorder %v4701_v19, %v3330_v31  ;;  %v3335_v6 = vand.u32 65535, %v3333_v5  ;;  %v3381_v57 = vsel %vm3379_vm8, 1, %v5398_v9 }
 0xdaf   :  { %v3292_v20 = vcvt.s32.f32 %v3290_v34  ;;  %v3288_v37 = vsel %vm3286_vm14, 1, %v5398_v9  ;;  %v3334_v25 = vsel %vm3332_vm3, 1, %v5398_v9  ;;  %v3338_v27 = vcvt.s32.f32 %v3336_v7 }
 0xdb0   :  { %v3302_v40 = vshrl.u32 %v3288_v37, 16  ;;  %v3348_v49 = vshrl.u32 %v3334_v25, 16  ;;  %v3291_v44 = vcvt.s32.f32 %v3289_v61  ;;  %v3301_v52 = vand.u32 65535, %v3288_v37 }
 0xdb1   :  { %3295 = vadd.xlane.f32.xlu0 %v3292_v20  ;;  %vm3380_vm12 = vcmp.ge.s32.totalorder %v4701_v19, %v3378_v28  ;;  %v3337_v2 = vcvt.s32.f32 %v3335_v6  ;;  %v3347_v0 = vand.u32 65535, %v3334_v25  ;;  %v3384_v60 = vshrl.u32 %v3381_v57, 16 }
 0xdb2   :  { %v3304_v48 = vcvt.s32.f32 %v3302_v40  ;;  %v3350_v58 = vcvt.s32.f32 %v3348_v49  ;;  %v3303_v33 = vcvt.s32.f32 %v3301_v52  ;;  %v3382_v26 = vsel %vm3380_vm12, 1, %v5398_v9 }
 0xdb3   :  { %v3349_v63 = vcvt.s32.f32 %v3347_v0  ;;  %v3386_v12 = vcvt.s32.f32 %v3384_v60  ;;  %v3396_v56 = vshrl.u32 %v3382_v26, 16  ;;  %v3383_v11 = vand.u32 65535, %v3381_v57 }
 0xdb4   :  { %3307 = vadd.xlane.f32.xlu1 %v3304_v48  ;;  %v3395_v10 = vand.u32 65535, %v3382_v26  ;;  %vm3430_vm10 = vcmp.gt.s32.totalorder %v4720_v21, 0  ;;  %vm5479_vm4 = vcmp.lt.s32.totalorder %v3832_v43, 128 }
 0xdb5   :  { %3341 = vadd.xlane.f32.xlu0 %v3338_v27  ;;  %v3398_v62 = vcvt.s32.f32 %v3396_v56  ;;  %v3385_v45 = vcvt.s32.f32 %v3383_v11  ;;  %vm3435_vm14 = vmand %vm3429_vm1, %vm5479_vm4 }
 0xdb6   :  { %v3397_v32 = vcvt.s32.f32 %v3395_v10  ;;  %vm5480_vm8 = vmmov %vm5479_vm4 }
 0xdb7   :  { %vm3436_vm12 = vmand %vm3430_vm10, %vm5480_vm8 }
 0xdb8   :  { %3353 = vadd.xlane.f32.xlu1 %v3350_v58 }
 0xdb9   :  { %3293 = vadd.xlane.f32.xlu0 %v3291_v44 }
 0xdbc   :  { %3305 = vadd.xlane.f32.xlu1 %v3303_v33 }
 0xdbd   :  { %3339 = vadd.xlane.f32.xlu0 %v3337_v2 }
 0xdc0   :  { %3351 = vadd.xlane.f32.xlu1 %v3349_v63 }
 0xdc1   :  { %3389 = vadd.xlane.f32.xlu0 %v3386_v12 }
 0xdc4   :  { %3401 = vadd.xlane.f32.xlu1 %v3398_v62 }
 0xdc5   :  { %3387 = vadd.xlane.f32.xlu0 %v3385_v45 }
 0xdc8   :  { %3399 = vadd.xlane.f32.xlu1 %v3397_v32 }
 0xdc9   :  { %1053 = vadd.xlane.f32.xlu0 %v4710_v54 }
 0xe3e   :  { %v3296_v3 = vpop.xlane.xlu0 %3295 }
 0xe3f   :  { %v3298_v39 = vcvt.f32.s32 %v3296_v3 }
 0xe41   :  { %v3308_v36 = vpop.xlane.xlu1 %3307  ;;  %v3299_v24 = vshll.u32 %v3298_v39, 16 }
 0xe42   :  { %v3342_v22 = vpop.xlane.xlu0 %3341  ;;  %v3310_v23 = vcvt.f32.s32 %v3308_v36 }
 0xe43   :  { %v3344_v17 = vcvt.f32.s32 %v3342_v22 }
 0xe44   :  { %v3311_v53 = vshll.u32 %v3310_v23, 16 }
 0xe45   :  { %v3354_v38 = vpop.xlane.xlu1 %3353  ;;  %v3345_v1 = vshll.u32 %v3344_v17, 16 }
 0xe46   :  { %v3294_v47 = vpop.xlane.xlu0 %3293  ;;  %v3356_v55 = vcvt.f32.s32 %v3354_v38 }
 0xe47   :  { %v3297_v51 = vcvt.f32.s32 %v3294_v47 }
 0xe48   :  { %v3357_v20 = vshll.u32 %v3356_v55, 16 }
 0xe49   :  { %v3300_v59 = vadd.s32 %v3299_v24, %v3297_v51  ;;  %v3306_v41 = vpop.xlane.xlu1 %3305 }
 0xe4a   :  { %v3340_v4 = vpop.xlane.xlu0 %3339  ;;  %v3309_v5 = vcvt.f32.s32 %v3306_v41 }
 0xe4b   :  { %v3313_v8 = vrot.slane %v3300_v59, 4  ;;  %v3343_v34 = vcvt.f32.s32 %v3340_v4 }
 0xe4c   :  { %v3312_v15 = vadd.s32 %v3311_v53, %v3309_v5 }
 0xe4d   :  { %v3314_v54 = vadd.s32 %v3313_v8, %v3300_v59  ;;  %v3346_v31 = vadd.s32 %v3345_v1, %v3343_v34  ;;  %v3352_v7 = vpop.xlane.xlu1 %3351 }
 0xe4e   :  { %v3390_v37 = vpop.xlane.xlu0 %3389  ;;  %v3319_v40 = vrot.slane %v3312_v15, 4  ;;  %v3355_v48 = vcvt.f32.s32 %v3352_v7 }
 0xe4f   :  { %v3315_v25 = vrot.slane %v3314_v54, 2  ;;  %v3359_v46 = vrot.slane %v3346_v31, 4  ;;  %v3392_v27 = vcvt.f32.s32 %v3390_v37 }
 0xe50   :  { %v3320_v49 = vadd.s32 %v3319_v40, %v3312_v15  ;;  %v3358_v28 = vadd.s32 %v3357_v20, %v3355_v48 }
 0xe51   :  { %v3360_v61 = vadd.s32 %v3359_v46, %v3346_v31  ;;  %v3402_v58 = vpop.xlane.xlu1 %3401  ;;  %v3316_v52 = vadd.s32 %v3315_v25, %v3314_v54  ;;  %v3393_v2 = vshll.u32 %v3392_v27, 16 }
 0xe52   :  { %v3388_v44 = vpop.xlane.xlu0 %3387  ;;  %v3321_v6 = vrot.slane %v3320_v49, 2  ;;  %v3365_v33 = vrot.slane %v3358_v28, 4  ;;  %v3404_v0 = vcvt.f32.s32 %v3402_v58 }
 0xe53   :  { %v3361_v57 = vrot.slane %v3360_v61, 2  ;;  %v3391_v60 = vcvt.f32.s32 %v3388_v44  ;;  %v3317_v62 = vrot.slane %v3316_v52, 1 }
 0xe54   :  { %v3366_v63 = vadd.s32 %v3365_v33, %v3358_v28  ;;  %v3322_v45 = vadd.s32 %v3321_v6, %v3320_v49  ;;  %v3405_v3 = vshll.u32 %v3404_v0, 16 }
 0xe55   :  { %v3362_v26 = vadd.s32 %v3361_v57, %v3360_v61  ;;  %v3394_v12 = vadd.s32 %v3393_v2, %v3391_v60  ;;  %v3400_v56 = vpop.xlane.xlu1 %3399  ;;  %v3318_v59 = vadd.s32 %v3317_v62, %v3316_v52 }
 0xe56   :  { %v1054_v11 = vpop.xlane.xlu0 %1053  ;;  %v3367_v32 = vrot.slane %v3366_v63, 2  ;;  %v3403_v22 = vcvt.f32.s32 %v3400_v56  ;;  %v3323_v53 = vrot.slane %v3322_v45, 1 }
 0xe57   :  { %v3363_v10 = vrot.slane %v3362_v26, 1  ;;  %v3407_v36 = vrot.slane %v3394_v12, 4  ;;  %v1055_v39 = vrot.slane %v1054_v11, 4  ;;  %vm3325_vm13 = vcmp.ge.s32.totalorder %v3318_v59, %v4714_v50 }
 0xe58   :  { %v3368_v23 = vadd.s32 %v3367_v32, %v3366_v63  ;;  %v3406_v24 = vadd.s32 %v3405_v3, %v3403_v22  ;;  %v3324_v54 = vadd.s32 %v3323_v53, %v3322_v45  ;;  %v3327_v40 = vsel %vm3325_vm13, 1, %v5398_v9 }
 0xe59   :  { %v3364_v38 = vadd.s32 %v3363_v10, %v3362_v26  ;;  %v3408_v47 = vadd.s32 %v3407_v36, %v3394_v12  ;;  %v1056_v17 = vadd.f32 %v1055_v39, %v1054_v11 }
 0xe5a   :  { %v3369_v51 = vrot.slane %v3368_v23, 1  ;;  %v3413_v41 = vrot.slane %v3406_v24, 4  ;;  %vm3326_vm5 = vcmp.ge.s32.totalorder %v3324_v54, %v4720_v21 }
 0xe5b   :  { %v3409_v55 = vrot.slane %v3408_v47, 2  ;;  %v1057_v4 = vrot.slane %v1056_v17, 2  ;;  %vm3371_vm11 = vcmp.ge.s32.totalorder %v3364_v38, %v4714_v50  ;;  %v3328_v44 = vsel %vm3326_vm5, 1, %v5398_v9 }
 0xe5c   :  { %v3370_v1 = vadd.s32 %v3369_v51, %v3368_v23  ;;  %v3414_v5 = vadd.s32 %v3413_v41, %v3406_v24  ;;  %v3373_v20 = vsel %vm3371_vm11, 1, %v5398_v9 }
 0xe5d   :  { %v3410_v8 = vadd.s32 %v3409_v55, %v3408_v47  ;;  %v1058_v34 = vadd.f32 %v1057_v4, %v1056_v17  ;;  %v3375_v48 = vadd.s32 %v3373_v20, %v3327_v40 }
 0xe5e   :  { %v3415_v31 = vrot.slane %v3414_v5, 2  ;;  %vm3372_vm15 = vcmp.ge.s32.totalorder %v3370_v1, %v4720_v21 }
 0xe5f   :  { %v3411_v15 = vrot.slane %v3410_v8, 1  ;;  %v1059_v7 = vrot.slane %v1058_v34, 1  ;;  %v3374_v49 = vsel %vm3372_vm15, 1, %v5398_v9 }
 0xe60   :  { %v3416_v25 = vadd.s32 %v3415_v31, %v3414_v5  ;;  %v3376_v52 = vadd.s32 %v3374_v49, %v3328_v44 }
 0xe61   :  { %v3412_v37 = vadd.s32 %v3411_v15, %v3410_v8  ;;  %v1060_v46 = vadd.f32 %v1059_v7, %v1058_v34 }
 0xe62   :  { %v3417_v27 = vrot.slane %v3416_v25, 1 }
 0xe63   :  { %vm3419_vm6 = vcmp.ge.s32.totalorder %v3412_v37, %v4714_v50  ;;  %3511 = vpush %v1060_v46 }
 0xe64   :  { %v3421_v61 = vsel %vm3419_vm6, 1, %v5398_v9  ;;  %v3418_v28 = vadd.s32 %v3417_v27, %v3416_v25 }
 0xe65   :  { %v3423_v58 = vadd.s32 %v3421_v61, %v3375_v48 }
 0xe66   :  { %vm3420_vm0 = vcmp.ge.s32.totalorder %v3418_v28, %v4720_v21 }
 0xe67   :  { %v3425_v6 = vadd.s32 %v3423_v58, %v5225_v29  ;;  %v3422_v57 = vsel %vm3420_vm0, 1, %v5398_v9 }
 0xe68   :  { %v3424_v33 = vadd.s32 %v3422_v57, %v3376_v52 }
 0xe69   :  { %vm3427_vm9 = vcmp.ge.s32.totalorder %v4676_v14, %v3425_v6 }
 0xe6a   :  { %vm3437_vm3 = vmand %vm3427_vm9, %vm3435_vm14  ;;  %v3426_v2 = vadd.s32 %v3424_v33, %v5230_v30 }
 0xe6b   :  { %vm3439_vm13 = vmor %vm908_vm2, %vm3437_vm3 }
 0xe6c   :  { %vm3428_vm11 = vcmp.ge.s32.totalorder %v4701_v19, %v3426_v2  ;;  %v3441_v9 = vsel %vm3439_vm13, %v4664_v42, 0.0 }
 0xe6d   :  { %vm3438_vm15 = vmand %vm3428_vm11, %vm3436_vm12 }
 0xe6e   :  { %vm3440_vm5 = vmor %vm909_vm7, %vm3438_vm15 }
 0xe6f   :  { %v3442_v14 = vsel %vm3440_vm5, %v4683_v35, 0.0 }
 0xe70   :  { %v3443_v50 = vadd.f32 %v3442_v14, %v3441_v9 }
 0xe72   :  { %3444 = vadd.xlane.f32.xlu1 %v3443_v50 }
 0xe94   :  { %s3512_s1 = spop %3511 }
 0xe95   :  { %3454 = sst [smem:[#allocation7]] %s3512_s1 }
 0xe96   :  { %3645 = shalt.err (!%p3642_p4)
}
 0xe97   :  { %s3680_s25 = smov [#allocation7]   ;;  %s3646_s8 = scalar_lea.hbm %s5319_s5, 16 }
 0xe98   :  { %3468 = dma.smem_to_hbm %s3680_s25, 16, %s5318_s4, [#allocation4]  }
 0xe99   :  { %p3647_p5 = scmp.ne.s32.totalorder %s5319_s5, %s3646_s8  ;;  %p3650_p6 = scmp.lt.u32.totalorder %s3646_s8, %s5319_s5 }
 0xe9b   :  { %p3652_p7 = pnand %p3650_p6, %p3647_p5 }
 0xeff   :  { %v3445_v43 = vpop.xlane.xlu1 %3444 }
 0xf00   :  { %v3446_v13 = vrot.slane %v3445_v43, 4 }
 0xf02   :  { %v3447_v18 = vadd.f32 %v3446_v13, %v3445_v43 }
 0xf04   :  { %v3448_v42 = vrot.slane %v3447_v18, 2 }
 0xf06   :  { %v3449_v35 = vadd.f32 %v3448_v42, %v3447_v18 }
 0xf08   :  { %v3450_v19 = vrot.slane %v3449_v35, 1 }
 0xf0a   :  { %v3451_v21 = vadd.f32 %v3450_v19, %v3449_v35 }
 0xf0c   :  { %3513 = vpush %v3451_v21 }
 0xf0d   :  { %3515 = vpush %v4712_v16 }
 0xf3d   :  { %s3514_s28 = spop %3513 }
 0xf3e   :  { %3456 = sst [smem:[#allocation8]] %s3514_s28  ;;  %s3516_s29 = spop %3515 }
 0xf3f   :  { %3460 = sst [smem:[#allocation10]] %s3516_s29 }
 0xf40   :  { %3655 = shalt.err (!%p3652_p7)
}
 0xf41   :  { %s3681_s11 = smov [#allocation8]   ;;  %s3656_s16 = scalar_lea.hbm %s5320_s6, 16 }
 0xf42   :  { %3476 = dma.smem_to_hbm %s3681_s11, 16, %s5319_s5, [#allocation9]  }
 0xf43   :  { %p3657_p8 = scmp.ne.s32.totalorder %s5320_s6, %s3656_s16  ;;  %p3660_p9 = scmp.lt.u32.totalorder %s3656_s16, %s5320_s6 }
 0xf45   :  { %p3662_p10 = pnand %p3660_p9, %p3657_p8 }
 0xf47   :  { %3665 = shalt.err (!%p3662_p10)
}
 0xf48   :  { %s3682_s20 = smov [#allocation10]  }
 0xf49   :  { %3484 = dma.smem_to_hbm %s3682_s20, 16, %s5320_s6, [#allocation9]  }
 0xf4a   :  { %3670 = dma.done.wait [#allocation4], 16  }
 0xf4b   :  { %3671 = vsyncadd [#allocation4], 4294967280 }
 0xf4c   :  { %3672 = dma.done.wait [#allocation9], 32  }
 0xf4d   :  { %3673 = vsyncadd [#allocation9], 4294967264 }
 0xf4e   :  { %3494 = sfence }
 0xf4f   :  { %3495 = vsyncpa [#allocation3], 1 }
 0xf50   :  { %3496 = vsyncpa [#allocation6], 1 }
 0xf51   :  { %3497 = vsyncpa [#allocation4], 1 }
 0xf52   :  { %3498 = vsyncpa [#allocation9], 1 }

</bundles_post_ra>
